<compile_context>
chip_gen: v5e
topology: v5e:2x2
jax: 0.10.0
libtpu: 0.0.40
codegen_flags: <defaults>
</compile_context>

<pallas_src>
import functools

import jax
import jax.numpy as jnp
from jax.experimental import pallas as pl
from jax.experimental.pallas import tpu as pltpu

NUM_CLASSES = 4   # stand-in for len(le.classes_)
HIDDEN = 64
CONV_CH = 32
FC1_DIM = 32


def _round_up(n, m):
    return (n + m - 1) // m * m


def _device_kind():
    try:
        return jax.devices()[0].device_kind.lower()
    except Exception:
        return ""


def _cnn_lstm_kernel(xt_ref, convw_ref, bnshift_ref,
                     wih_ref, whh_ref, blstm_ref,
                     w1_ref, b1_ref, w2_ref, b2_ref,
                     out_ref, pooled_ref,
                     *, seq_len, hidden, unroll, eup_bf16):
    H = hidden
    Dp = 2 * seq_len                      # conv positions consumed by MaxPool1d(2)
    xt = xt_ref[...]                      # (D+2, TB) f32: time on sublanes, batch on lanes
    tb = xt.shape[1]
    convw = convw_ref[...]                # (3, 32, 1) f32, BN scale pre-folded

    # ---- Conv1d(1->32, k=3, pad=1): channels on sublanes, batch on lanes ----
    # One hoisted sublane->slab broadcast of the zero-padded input; the three
    # taps are then free leading-dim slices (no unaligned sublane slices).
    xb = jnp.broadcast_to(xt[:Dp + 2, None, :], (Dp + 2, CONV_CH, tb))
    conv = xb[0:Dp] * convw[0:1]
    conv = conv + xb[1:Dp + 1] * convw[1:2]
    conv = conv + xb[2:Dp + 2] * convw[2:3]                  # (Dp, 32, TB)

    # ---- BN shift (scale already folded into convw) + ReLU + MaxPool1d(2) ----
    y = jnp.maximum(conv + bnshift_ref[...][None, :, :], 0.0)
    y = y.reshape(seq_len, 2, CONV_CH, tb)                   # leading-dim split: free
    pooled_ref[...] = jnp.maximum(y[:, 0], y[:, 1]).astype(pooled_ref.dtype)

    # ---- LSTM recurrence, transposed: gates (4H, TB), h/c (H, TB) ----
    # Gate rows were permuted to [i, f, o, g] and the i/f/o rows pre-scaled by
    # 0.5 so sigmoid(z) == 0.5*(1 + tanh(z/2)) costs one contiguous affine.
    wih = wih_ref[...]                    # (4H, 32) bf16
    whh = whh_ref[...]                    # (4H, H)  bf16
    blstm = blstm_ref[...]                # (4H, 1)  f32

    def step(t, carry):
        h, c = carry                      # (H, TB) f32
        gates = (jnp.dot(wih, pooled_ref[t], preferred_element_type=jnp.float32)
                 + jnp.dot(whh, h.astype(jnp.bfloat16),
                           preferred_element_type=jnp.float32)
                 + blstm)                 # (4H, TB) f32
        if eup_bf16:                      # v6e/v7x: bf16 EUP path (~2x f32 rate)
            tg = jnp.tanh(gates.astype(jnp.bfloat16)).astype(jnp.float32)
        else:                             # v5e and older: no bf16 EUP -> stay f32
            tg = jnp.tanh(gates)
        sig = 0.5 * (tg[0:3 * H] + 1.0)   # i, f, o in one contiguous sublane slice
        i_g = sig[0:H]
        f_g = sig[H:2 * H]
        o_g = sig[2 * H:3 * H]
        g_g = tg[3 * H:4 * H]
        c = f_g * c + i_g * g_g
        if eup_bf16:
            tc = jnp.tanh(c.astype(jnp.bfloat16)).astype(jnp.float32)
        else:
            tc = jnp.tanh(c)
        h = o_g * tc
        return h, c

    h0 = jnp.zeros((H, tb), jnp.float32)
    c0 = jnp.zeros((H, tb), jnp.float32)
    h, _ = jax.lax.fori_loop(0, seq_len, step, (h0, c0), unroll=unroll)

    # ---- FC head: fc1 -> ReLU -> dropout (identity at inference) -> fc2 ----
    # TODO(synk): Dropout(p=0.5) is identity in eval mode; training-mode masks
    #             (pltpu.prng_random_bits) are not implemented here.
    h1 = jnp.dot(w1_ref[...], h.astype(jnp.bfloat16),
                 preferred_element_type=jnp.float32) + b1_ref[...]
    h1 = jnp.maximum(h1, 0.0)
    out_ref[...] = jnp.dot(w2_ref[...], h1.astype(jnp.bfloat16),
                           preferred_element_type=jnp.float32) + b2_ref[...]


def init_params(key, input_dim):
    ks = jax.random.split(key, 10)
    p = {}
    # Conv1d(1, 32, 3, padding=1): weight (32, 1, 3), bias (32,)
    p["conv_w"] = jax.random.normal(ks[0], (CONV_CH, 1, 3), jnp.float32) * 0.2
    p["conv_b"] = jax.random.normal(ks[1], (CONV_CH,), jnp.float32) * 0.1
    # BatchNorm1d(32) (eval-mode running stats + affine)
    p["bn_gamma"] = 1.0 + jax.random.normal(ks[2], (CONV_CH,), jnp.float32) * 0.05
    p["bn_beta"] = jax.random.normal(ks[3], (CONV_CH,), jnp.float32) * 0.05
    p["bn_mean"] = jax.random.normal(ks[4], (CONV_CH,), jnp.float32) * 0.05
    p["bn_var"] = 1.0 + jax.random.uniform(ks[5], (CONV_CH,), jnp.float32) * 0.1
    # LSTM(32 -> 64): W_ih (4H, 32), W_hh (4H, H), b_ih, b_hh (4H,)
    p["w_ih"] = jax.random.normal(ks[6], (4 * HIDDEN, CONV_CH), jnp.float32) * 0.1
    p["w_hh"] = jax.random.normal(ks[7], (4 * HIDDEN, HIDDEN), jnp.float32) * 0.1
    p["b_ih"] = jnp.zeros((4 * HIDDEN,), jnp.float32)
    p["b_hh"] = jnp.zeros((4 * HIDDEN,), jnp.float32)
    # fc1: Linear(64, 32); fc2: Linear(32, NUM_CLASSES)
    p["fc1_w"] = jax.random.normal(ks[8], (FC1_DIM, HIDDEN), jnp.float32) * 0.1
    p["fc1_b"] = jnp.zeros((FC1_DIM,), jnp.float32)
    p["fc2_w"] = jax.random.normal(ks[9], (NUM_CLASSES, FC1_DIM), jnp.float32) * 0.1
    p["fc2_b"] = jnp.zeros((NUM_CLASSES,), jnp.float32)
    return p


def cnn_lstm_forward(x, p, *, batch_tile=128, eup_bf16=None):
    """x: (B, input_dim) float32 tabular input -> (B, NUM_CLASSES) f32 logits."""
    B, D = x.shape
    seq_len = D // 2          # MaxPool1d(2) floors away an odd trailing conv position
    assert seq_len >= 1
    H = HIDDEN
    Dp = 2 * seq_len
    eps = 1e-5

    # ---- generation-aware knobs ----
    kind = _device_kind()
    is_v7 = ("v7" in kind) or ("tpu7" in kind.replace(" ", ""))
    is_v6 = "v6" in kind
    if eup_bf16 is None:
        eup_bf16 = is_v6 or is_v7          # v5e and older: no bf16 EUP/VPU
    # VMEM we are willing to request (conservative when the generation is
    # unknown or it is a 64-MiB v7x part; v5e/v6e have 128 MiB physical).
    vmem_cap = (100 << 20) if (is_v6 or ("v5" in kind)) else (56 << 20)

    # ---- per-tile VMEM footprint estimate (drives TB and vmem_limit_bytes) ----
    def footprint(tb):
        b = 2 * (D + 2) * tb * 4            # double-buffered input block
        b += (Dp + 2) * CONV_CH * tb * 4    # broadcast input slab
        b += 2 * Dp * CONV_CH * tb * 4      # conv / post-BN-ReLU temporaries
        b += seq_len * CONV_CH * tb * 2     # pooled scratch (bf16)
        b += 16 * 4 * H * tb * 4            # recurrence temporaries (gates, h, c, ...)
        b += 2 * NUM_CLASSES * tb * 4       # double-buffered output block
        b += 1 << 20                        # weights + slack
        return b

    # ---- batch tiling: lane-dense tiles; >=2 grid tiles once B > 128 so a
    #      two-TensorCore part (v7x) never leaves a core idle ----
    if B <= 128:
        TB = _round_up(B, 8)
    else:
        TB = max(128, _round_up(min(batch_tile, pl.cdiv(B, 2)), 128))
        while TB > 128 and int(1.25 * footprint(TB)) > vmem_cap:
            TB -= 128
    Bp = _round_up(B, TB)
    num_tiles = Bp // TB
    vmem_limit = int(min(vmem_cap, max(32 << 20, int(1.25 * footprint(TB)))))

    # ---- glue / weight prep (pure XLA, once per call) ----
    # Batch-pad, zero-pad time for the k=3 halo, go time-major: time on
    # sublanes, batch on lanes -> the kernel never transposes.
    xt = jnp.pad(x.astype(jnp.float32), ((0, Bp - B), (1, 1))).T        # (D+2, Bp)

    # Conv weight with the BatchNorm scale folded in (both linear, nothing
    # nonlinear in between); only the shift stays in-kernel.
    bnscale = p["bn_gamma"] / jnp.sqrt(p["bn_var"] + eps)               # (32,)
    convw = (p["conv_w"][:, 0, :] * bnscale[:, None]).T                 # (3, 32)
    convw = convw.reshape(3, CONV_CH, 1).astype(jnp.float32)
    bnshift = ((p["conv_b"] - p["bn_mean"]) * bnscale + p["bn_beta"])
    bnshift = bnshift.reshape(CONV_CH, 1).astype(jnp.float32)

    # LSTM weights: rows permuted [i, f, g, o] -> [i, f, o, g] and i/f/o rows
    # pre-scaled by 0.5 (sigmoid(z) = 0.5*(1 + tanh(z/2))).  Kept in the
    # PyTorch (4H, in) orientation because the recurrence runs transposed.
    perm = jnp.concatenate([jnp.arange(0, 2 * H), jnp.arange(3 * H, 4 * H),
                            jnp.arange(2 * H, 3 * H)])
    gate_scale = jnp.concatenate([jnp.full((3 * H,), 0.5, jnp.float32),
                                  jnp.ones((H,), jnp.float32)])
    wih = (p["w_ih"][perm, :] * gate_scale[:, None]).astype(jnp.bfloat16)   # (4H, 32)
    whh = (p["w_hh"][perm, :] * gate_scale[:, None]).astype(jnp.bfloat16)   # (4H, H)
    blstm = ((p["b_ih"] + p["b_hh"])[perm] * gate_scale).reshape(4 * H, 1)
    blstm = blstm.astype(jnp.float32)
    w1 = p["fc1_w"].astype(jnp.bfloat16)                                    # (32, 64)
    b1 = p["fc1_b"].reshape(FC1_DIM, 1).astype(jnp.float32)
    w2 = p["fc2_w"].astype(jnp.bfloat16)                                    # (C, 32)
    b2 = p["fc2_b"].reshape(NUM_CLASSES, 1).astype(jnp.float32)

    def resident(arr):   # weights/biases: same block every grid step (VMEM-resident)
        return pl.BlockSpec(arr.shape, lambda i: (0,) * arr.ndim)

    in_specs = [
        pl.BlockSpec((D + 2, TB), lambda i: (0, i)),                    # x^T batch tile
        resident(convw), resident(bnshift),
        resident(wih), resident(whh), resident(blstm),
        resident(w1), resident(b1), resident(w2), resident(b2),
    ]
    out_spec = pl.BlockSpec((NUM_CLASSES, TB), lambda i: (0, i))        # lane-dense logits

    kernel = functools.partial(
        _cnn_lstm_kernel, seq_len=seq_len, hidden=H,
        # Full unroll for short sequences; partial unroll (cross-iteration
        # scheduler visibility) instead of a visible loop for long ones.
        unroll=(True if seq_len <= 16 else 4),
        eup_bf16=bool(eup_bf16))

    # Advisory cost estimate so XLA schedules around the fused call.
    flops = int(2 * Bp * (Dp * 3 * CONV_CH
                          + seq_len * CONV_CH * 4 * H
                          + seq_len * H * 4 * H
                          + H * FC1_DIM + FC1_DIM * NUM_CLASSES))
    transcendentals = int(Bp * seq_len * 5 * H)
    bytes_accessed = int(xt.size * 4 + Bp * NUM_CLASSES * 4
                         + 2 * (wih.size + whh.size + w1.size + w2.size)
                         + 4 * (convw.size + bnshift.size + blstm.size
                                + b1.size + b2.size))

    out = pl.pallas_call(
        kernel,
        out_shape=jax.ShapeDtypeStruct((NUM_CLASSES, Bp), jnp.float32),
        grid=(num_tiles,),
        in_specs=in_specs,
        out_specs=out_spec,
        scratch_shapes=[pltpu.VMEM((seq_len, CONV_CH, TB), jnp.bfloat16)],
        compiler_params=pltpu.CompilerParams(
            # Batch axis is embarrassingly parallel -> megacore / v7x 2-TC split.
            dimension_semantics=("parallel",),
            vmem_limit_bytes=vmem_limit),
        cost_estimate=pl.CostEstimate(flops=flops,
                                      transcendentals=transcendentals,
                                      bytes_accessed=bytes_accessed),
    )(xt, convw, bnshift, wih, whh, blstm, w1, b1, w2, b2)
    return out[:, :B].T


def reference_forward(x, p):
    """Pure-JAX f32 reference mirroring the PyTorch forward (eval mode)."""
    B, D = x.shape
    eps = 1e-5
    xpad = jnp.pad(x, ((0, 0), (1, 1)))
    convw = p["conv_w"][:, 0, :]                                        # (32, 3)
    conv = sum(xpad[:, k:k + D][:, None, :] * convw[None, :, k:k + 1]
               for k in range(3)) + p["conv_b"][None, :, None]          # (B,32,D)
    bn = ((conv - p["bn_mean"][None, :, None])
          / jnp.sqrt(p["bn_var"][None, :, None] + eps)
          * p["bn_gamma"][None, :, None] + p["bn_beta"][None, :, None])
    act = jnp.maximum(bn, 0.0)[:, :, :2 * (D // 2)]
    pooled = jnp.maximum(act[:, :, 0::2], act[:, :, 1::2])              # (B,32,L)
    seq = jnp.transpose(pooled, (0, 2, 1))                              # (B,L,32)

    h = jnp.zeros((B, HIDDEN), jnp.float32)
    c = jnp.zeros((B, HIDDEN), jnp.float32)
    H = HIDDEN
    for t in range(seq.shape[1]):
        gates = seq[:, t, :] @ p["w_ih"].T + h @ p["w_hh"].T + p["b_ih"] + p["b_hh"]
        i_g = jax.nn.sigmoid(gates[:, 0 * H:1 * H])
        f_g = jax.nn.sigmoid(gates[:, 1 * H:2 * H])
        g_g = jnp.tanh(gates[:, 2 * H:3 * H])
        o_g = jax.nn.sigmoid(gates[:, 3 * H:4 * H])
        c = f_g * c + i_g * g_g
        h = o_g * jnp.tanh(c)
    h1 = jnp.maximum(h @ p["fc1_w"].T + p["fc1_b"], 0.0)
    return h1 @ p["fc2_w"].T + p["fc2_b"]


if __name__ == "__main__":
    key = jax.random.PRNGKey(0)
    k_x, k_p, k_x2 = jax.random.split(key, 3)
    B, INPUT_DIM = 2, 16
    x = jax.random.normal(k_x, (B, INPUT_DIM), jnp.float32)
    params = init_params(k_p, INPUT_DIM)
    ref = reference_forward(x, params)

    # Portable f32-EUP path (correct on every TPU generation).
    out = jax.block_until_ready(cnn_lstm_forward(x, params, eup_bf16=False))
    assert out.shape == (B, NUM_CLASSES)
    # bf16 matmul operands vs the f32 reference -> loosened tolerance.
    assert jnp.allclose(out, ref, rtol=2e-2, atol=2e-2), (out, ref)

    # Multi-tile grid path (3 batch tiles of 128, padded batch).
    B2 = 260
    x2 = jax.random.normal(k_x2, (B2, INPUT_DIM), jnp.float32)
    ref2 = reference_forward(x2, params)
    out2 = jax.block_until_ready(
        cnn_lstm_forward(x2, params, batch_tile=128, eup_bf16=False))
    assert out2.shape == (B2, NUM_CLASSES)
    assert jnp.allclose(out2, ref2, rtol=2e-2, atol=2e-2)

    # Generation-specific bf16-EUP path (auto-enabled on v6e / v7x only).
    kind = _device_kind()
    if ("v6" in kind) or ("v7" in kind) or ("tpu7" in kind.replace(" ", "")):
        out3 = jax.block_until_ready(cnn_lstm_forward(x, params))
        assert jnp.allclose(out3, ref, rtol=1e-1, atol=1e-1)

    print("KERNEL_OK")
</pallas_src>

<mosaic_0001>
module attributes {stable_mosaic.version = 11 : i64} {
  func.func @_cnn_lstm_kernel(%arg0: i32, %arg1: memref<18x8xf32, #tpu.memory_space<vmem>>, %arg2: memref<3x32x1xf32, #tpu.memory_space<vmem>>, %arg3: memref<32x1xf32, #tpu.memory_space<vmem>>, %arg4: memref<256x32xbf16, #tpu.memory_space<vmem>>, %arg5: memref<256x64xbf16, #tpu.memory_space<vmem>>, %arg6: memref<256x1xf32, #tpu.memory_space<vmem>>, %arg7: memref<32x64xbf16, #tpu.memory_space<vmem>>, %arg8: memref<32x1xf32, #tpu.memory_space<vmem>>, %arg9: memref<4x32xbf16, #tpu.memory_space<vmem>>, %arg10: memref<4x1xf32, #tpu.memory_space<vmem>>, %arg11: memref<4x8xf32, #tpu.memory_space<vmem>>, %arg12: memref<8x32x8xbf16, #tpu.memory_space<vmem>>) attributes {dimension_semantics = [#tpu.dimension_semantics<parallel>], iteration_bounds = array<i64: 1>, scalar_prefetch = 0 : i64, scratch_operands = 1 : i64, tpu.core_type = #tpu.core_type<tc>, window_params = [{transform_indices = @transform_0, window_bounds = array<i64: 18, 8>}, {pipeline_mode = #tpu.pipeline_mode<synchronous>, transform_indices = @transform_1, window_bounds = array<i64: 3, 32, 1>}, {pipeline_mode = #tpu.pipeline_mode<synchronous>, transform_indices = @transform_2, window_bounds = array<i64: 32, 1>}, {pipeline_mode = #tpu.pipeline_mode<synchronous>, transform_indices = @transform_3, window_bounds = array<i64: 256, 32>}, {pipeline_mode = #tpu.pipeline_mode<synchronous>, transform_indices = @transform_4, window_bounds = array<i64: 256, 64>}, {pipeline_mode = #tpu.pipeline_mode<synchronous>, transform_indices = @transform_5, window_bounds = array<i64: 256, 1>}, {pipeline_mode = #tpu.pipeline_mode<synchronous>, transform_indices = @transform_6, window_bounds = array<i64: 32, 64>}, {pipeline_mode = #tpu.pipeline_mode<synchronous>, transform_indices = @transform_7, window_bounds = array<i64: 32, 1>}, {pipeline_mode = #tpu.pipeline_mode<synchronous>, transform_indices = @transform_8, window_bounds = array<i64: 4, 32>}, {pipeline_mode = #tpu.pipeline_mode<synchronous>, transform_indices = @transform_9, window_bounds = array<i64: 4, 1>}, {transform_indices = @transform_10, window_bounds = array<i64: 4, 8>}]} {
    %c0 = arith.constant 0 : index
    %c0_0 = arith.constant 0 : index
    %0 = vector.load %arg1[%c0, %c0_0] : memref<18x8xf32, #tpu.memory_space<vmem>>, vector<18x8xf32>
    %c0_1 = arith.constant 0 : index
    %c0_2 = arith.constant 0 : index
    %c0_3 = arith.constant 0 : index
    %1 = vector.load %arg2[%c0_1, %c0_2, %c0_3] : memref<3x32x1xf32, #tpu.memory_space<vmem>>, vector<3x32x1xf32>
    %2 = vector.shape_cast %0 : vector<18x8xf32> to vector<18x1x8xf32>
    %3 = vector.shape_cast %2 : vector<18x1x8xf32> to vector<18x1x8xf32>
    %4 = vector.broadcast %3 : vector<18x1x8xf32> to vector<18x32x8xf32>
    %5 = vector.extract_strided_slice %4 {offsets = [0, 0, 0], sizes = [16, 32, 8], strides = [1, 1, 1]} : vector<18x32x8xf32> to vector<16x32x8xf32>
    %6 = vector.extract_strided_slice %1 {offsets = [0, 0, 0], sizes = [1, 32, 1], strides = [1, 1, 1]} : vector<3x32x1xf32> to vector<1x32x1xf32>
    %7 = vector.broadcast %6 : vector<1x32x1xf32> to vector<16x32x8xf32>
    %8 = arith.mulf %5, %7 : vector<16x32x8xf32>
    %9 = vector.extract_strided_slice %4 {offsets = [1, 0, 0], sizes = [16, 32, 8], strides = [1, 1, 1]} : vector<18x32x8xf32> to vector<16x32x8xf32>
    %10 = vector.extract_strided_slice %1 {offsets = [1, 0, 0], sizes = [1, 32, 1], strides = [1, 1, 1]} : vector<3x32x1xf32> to vector<1x32x1xf32>
    %11 = vector.broadcast %10 : vector<1x32x1xf32> to vector<16x32x8xf32>
    %12 = arith.mulf %9, %11 : vector<16x32x8xf32>
    %13 = arith.addf %8, %12 : vector<16x32x8xf32>
    %14 = vector.extract_strided_slice %4 {offsets = [2, 0, 0], sizes = [16, 32, 8], strides = [1, 1, 1]} : vector<18x32x8xf32> to vector<16x32x8xf32>
    %15 = vector.extract_strided_slice %1 {offsets = [2, 0, 0], sizes = [1, 32, 1], strides = [1, 1, 1]} : vector<3x32x1xf32> to vector<1x32x1xf32>
    %16 = vector.broadcast %15 : vector<1x32x1xf32> to vector<16x32x8xf32>
    %17 = arith.mulf %14, %16 : vector<16x32x8xf32>
    %18 = arith.addf %13, %17 : vector<16x32x8xf32>
    %c0_4 = arith.constant 0 : index
    %c0_5 = arith.constant 0 : index
    %19 = vector.load %arg3[%c0_4, %c0_5] : memref<32x1xf32, #tpu.memory_space<vmem>>, vector<32x1xf32>
    %20 = vector.shape_cast %19 : vector<32x1xf32> to vector<1x32x1xf32>
    %21 = vector.broadcast %20 : vector<1x32x1xf32> to vector<16x32x8xf32>
    %22 = arith.addf %18, %21 : vector<16x32x8xf32>
    %cst = arith.constant 0.000000e+00 : f32
    %23 = vector.broadcast %cst : f32 to vector<16x32x8xf32>
    %24 = arith.maximumf %22, %23 : vector<16x32x8xf32>
    %25 = vector.shape_cast %24 : vector<16x32x8xf32> to vector<8x2x32x8xf32>
    %26 = vector.extract_strided_slice %25 {offsets = [0, 0, 0, 0], sizes = [8, 1, 32, 8], strides = [1, 1, 1, 1]} : vector<8x2x32x8xf32> to vector<8x1x32x8xf32>
    %27 = vector.shape_cast %26 : vector<8x1x32x8xf32> to vector<8x32x8xf32>
    %28 = vector.extract_strided_slice %25 {offsets = [0, 1, 0, 0], sizes = [8, 1, 32, 8], strides = [1, 1, 1, 1]} : vector<8x2x32x8xf32> to vector<8x1x32x8xf32>
    %29 = vector.shape_cast %28 : vector<8x1x32x8xf32> to vector<8x32x8xf32>
    %30 = arith.maximumf %27, %29 : vector<8x32x8xf32>
    %31 = arith.truncf %30 : vector<8x32x8xf32> to vector<8x32x8xbf16>
    %c0_6 = arith.constant 0 : index
    %c0_7 = arith.constant 0 : index
    %c0_8 = arith.constant 0 : index
    %32 = vector.load %arg12[%c0_6, %c0_7, %c0_8] : memref<8x32x8xbf16, #tpu.memory_space<vmem>>, vector<8x32x8xbf16>
    tpu.vector_store %arg12[%c0_6, %c0_7, %c0_8], %31 {strides = array<i32>} : memref<8x32x8xbf16, #tpu.memory_space<vmem>>, vector<8x32x8xbf16>,
    %c0_9 = arith.constant 0 : index
    %c0_10 = arith.constant 0 : index
    %33 = vector.load %arg4[%c0_9, %c0_10] : memref<256x32xbf16, #tpu.memory_space<vmem>>, vector<256x32xbf16>
    %c0_11 = arith.constant 0 : index
    %c0_12 = arith.constant 0 : index
    %34 = vector.load %arg5[%c0_11, %c0_12] : memref<256x64xbf16, #tpu.memory_space<vmem>>, vector<256x64xbf16>
    %c0_13 = arith.constant 0 : index
    %c0_14 = arith.constant 0 : index
    %35 = vector.load %arg6[%c0_13, %c0_14] : memref<256x1xf32, #tpu.memory_space<vmem>>, vector<256x1xf32>
    %cst_15 = arith.constant 0.000000e+00 : f32
    %36 = vector.broadcast %cst_15 : f32 to vector<64x8xf32>
    %cst_16 = arith.constant 0.000000e+00 : f32
    %37 = vector.broadcast %cst_16 : f32 to vector<64x8xf32>
    %c0_i32 = arith.constant 0 : i32
    %38 = arith.index_cast %c0_i32 : i32 to index
    %c0_17 = arith.constant 0 : index
    %c0_18 = arith.constant 0 : index
    %39 = vector.load %arg12[%38, %c0_17, %c0_18] : memref<8x32x8xbf16, #tpu.memory_space<vmem>>, vector<1x32x8xbf16>
    %40 = vector.shape_cast %39 : vector<1x32x8xbf16> to vector<32x8xbf16>
    %cst_19 = arith.constant dense<0.000000e+00> : vector<256x8xf32>
    %41 = tpu.matmul %33, %40, %cst_19 {dimension_numbers = #tpu.dot_dimension_numbers<[1], [0], [0], [1], [0, 0, 1, 1], [], []>} : vector<256x32xbf16>, vector<32x8xbf16>, vector<256x8xf32> -> vector<256x8xf32>
    %42 = arith.truncf %36 : vector<64x8xf32> to vector<64x8xbf16>
    %cst_20 = arith.constant dense<0.000000e+00> : vector<256x8xf32>
    %43 = tpu.matmul %34, %42, %cst_20 {dimension_numbers = #tpu.dot_dimension_numbers<[1], [0], [0], [1], [0, 0, 1, 1], [], []>} : vector<256x64xbf16>, vector<64x8xbf16>, vector<256x8xf32> -> vector<256x8xf32>
    %44 = arith.addf %41, %43 : vector<256x8xf32>
    %45 = vector.broadcast %35 : vector<256x1xf32> to vector<256x8xf32>
    %46 = arith.addf %44, %45 : vector<256x8xf32>
    %47 = math.tanh %46 : vector<256x8xf32>
    %48 = vector.extract_strided_slice %47 {offsets = [0, 0], sizes = [192, 8], strides = [1, 1]} : vector<256x8xf32> to vector<192x8xf32>
    %cst_21 = arith.constant 1.000000e+00 : f32
    %49 = vector.broadcast %cst_21 : f32 to vector<192x8xf32>
    %50 = arith.addf %48, %49 : vector<192x8xf32>
    %cst_22 = arith.constant 5.000000e-01 : f32
    %51 = vector.broadcast %cst_22 : f32 to vector<192x8xf32>
    %52 = arith.mulf %51, %50 : vector<192x8xf32>
    %53 = vector.extract_strided_slice %52 {offsets = [0, 0], sizes = [64, 8], strides = [1, 1]} : vector<192x8xf32> to vector<64x8xf32>
    %54 = vector.extract_strided_slice %52 {offsets = [64, 0], sizes = [64, 8], strides = [1, 1]} : vector<192x8xf32> to vector<64x8xf32>
    %55 = vector.extract_strided_slice %52 {offsets = [128, 0], sizes = [64, 8], strides = [1, 1]} : vector<192x8xf32> to vector<64x8xf32>
    %56 = vector.extract_strided_slice %47 {offsets = [192, 0], sizes = [64, 8], strides = [1, 1]} : vector<256x8xf32> to vector<64x8xf32>
    %57 = arith.mulf %54, %37 : vector<64x8xf32>
    %58 = arith.mulf %53, %56 : vector<64x8xf32>
    %59 = arith.addf %57, %58 : vector<64x8xf32>
    %60 = math.tanh %59 : vector<64x8xf32>
    %61 = arith.mulf %55, %60 : vector<64x8xf32>
    %c1_i32 = arith.constant 1 : i32
    %62 = arith.index_cast %c1_i32 : i32 to index
    %c0_23 = arith.constant 0 : index
    %c0_24 = arith.constant 0 : index
    %63 = vector.load %arg12[%62, %c0_23, %c0_24] : memref<8x32x8xbf16, #tpu.memory_space<vmem>>, vector<1x32x8xbf16>
    %64 = vector.shape_cast %63 : vector<1x32x8xbf16> to vector<32x8xbf16>
    %cst_25 = arith.constant dense<0.000000e+00> : vector<256x8xf32>
    %65 = tpu.matmul %33, %64, %cst_25 {dimension_numbers = #tpu.dot_dimension_numbers<[1], [0], [0], [1], [0, 0, 1, 1], [], []>} : vector<256x32xbf16>, vector<32x8xbf16>, vector<256x8xf32> -> vector<256x8xf32>
    %66 = arith.truncf %61 : vector<64x8xf32> to vector<64x8xbf16>
    %cst_26 = arith.constant dense<0.000000e+00> : vector<256x8xf32>
    %67 = tpu.matmul %34, %66, %cst_26 {dimension_numbers = #tpu.dot_dimension_numbers<[1], [0], [0], [1], [0, 0, 1, 1], [], []>} : vector<256x64xbf16>, vector<64x8xbf16>, vector<256x8xf32> -> vector<256x8xf32>
    %68 = arith.addf %65, %67 : vector<256x8xf32>
    %69 = vector.broadcast %35 : vector<256x1xf32> to vector<256x8xf32>
    %70 = arith.addf %68, %69 : vector<256x8xf32>
    %71 = math.tanh %70 : vector<256x8xf32>
    %72 = vector.extract_strided_slice %71 {offsets = [0, 0], sizes = [192, 8], strides = [1, 1]} : vector<256x8xf32> to vector<192x8xf32>
    %cst_27 = arith.constant 1.000000e+00 : f32
    %73 = vector.broadcast %cst_27 : f32 to vector<192x8xf32>
    %74 = arith.addf %72, %73 : vector<192x8xf32>
    %cst_28 = arith.constant 5.000000e-01 : f32
    %75 = vector.broadcast %cst_28 : f32 to vector<192x8xf32>
    %76 = arith.mulf %75, %74 : vector<192x8xf32>
    %77 = vector.extract_strided_slice %76 {offsets = [0, 0], sizes = [64, 8], strides = [1, 1]} : vector<192x8xf32> to vector<64x8xf32>
    %78 = vector.extract_strided_slice %76 {offsets = [64, 0], sizes = [64, 8], strides = [1, 1]} : vector<192x8xf32> to vector<64x8xf32>
    %79 = vector.extract_strided_slice %76 {offsets = [128, 0], sizes = [64, 8], strides = [1, 1]} : vector<192x8xf32> to vector<64x8xf32>
    %80 = vector.extract_strided_slice %71 {offsets = [192, 0], sizes = [64, 8], strides = [1, 1]} : vector<256x8xf32> to vector<64x8xf32>
    %81 = arith.mulf %78, %59 : vector<64x8xf32>
    %82 = arith.mulf %77, %80 : vector<64x8xf32>
    %83 = arith.addf %81, %82 : vector<64x8xf32>
    %84 = math.tanh %83 : vector<64x8xf32>
    %85 = arith.mulf %79, %84 : vector<64x8xf32>
    %c2_i32 = arith.constant 2 : i32
    %86 = arith.index_cast %c2_i32 : i32 to index
    %c0_29 = arith.constant 0 : index
    %c0_30 = arith.constant 0 : index
    %87 = vector.load %arg12[%86, %c0_29, %c0_30] : memref<8x32x8xbf16, #tpu.memory_space<vmem>>, vector<1x32x8xbf16>
    %88 = vector.shape_cast %87 : vector<1x32x8xbf16> to vector<32x8xbf16>
    %cst_31 = arith.constant dense<0.000000e+00> : vector<256x8xf32>
    %89 = tpu.matmul %33, %88, %cst_31 {dimension_numbers = #tpu.dot_dimension_numbers<[1], [0], [0], [1], [0, 0, 1, 1], [], []>} : vector<256x32xbf16>, vector<32x8xbf16>, vector<256x8xf32> -> vector<256x8xf32>
    %90 = arith.truncf %85 : vector<64x8xf32> to vector<64x8xbf16>
    %cst_32 = arith.constant dense<0.000000e+00> : vector<256x8xf32>
    %91 = tpu.matmul %34, %90, %cst_32 {dimension_numbers = #tpu.dot_dimension_numbers<[1], [0], [0], [1], [0, 0, 1, 1], [], []>} : vector<256x64xbf16>, vector<64x8xbf16>, vector<256x8xf32> -> vector<256x8xf32>
    %92 = arith.addf %89, %91 : vector<256x8xf32>
    %93 = vector.broadcast %35 : vector<256x1xf32> to vector<256x8xf32>
    %94 = arith.addf %92, %93 : vector<256x8xf32>
    %95 = math.tanh %94 : vector<256x8xf32>
    %96 = vector.extract_strided_slice %95 {offsets = [0, 0], sizes = [192, 8], strides = [1, 1]} : vector<256x8xf32> to vector<192x8xf32>
    %cst_33 = arith.constant 1.000000e+00 : f32
    %97 = vector.broadcast %cst_33 : f32 to vector<192x8xf32>
    %98 = arith.addf %96, %97 : vector<192x8xf32>
    %cst_34 = arith.constant 5.000000e-01 : f32
    %99 = vector.broadcast %cst_34 : f32 to vector<192x8xf32>
    %100 = arith.mulf %99, %98 : vector<192x8xf32>
    %101 = vector.extract_strided_slice %100 {offsets = [0, 0], sizes = [64, 8], strides = [1, 1]} : vector<192x8xf32> to vector<64x8xf32>
    %102 = vector.extract_strided_slice %100 {offsets = [64, 0], sizes = [64, 8], strides = [1, 1]} : vector<192x8xf32> to vector<64x8xf32>
    %103 = vector.extract_strided_slice %100 {offsets = [128, 0], sizes = [64, 8], strides = [1, 1]} : vector<192x8xf32> to vector<64x8xf32>
    %104 = vector.extract_strided_slice %95 {offsets = [192, 0], sizes = [64, 8], strides = [1, 1]} : vector<256x8xf32> to vector<64x8xf32>
    %105 = arith.mulf %102, %83 : vector<64x8xf32>
    %106 = arith.mulf %101, %104 : vector<64x8xf32>
    %107 = arith.addf %105, %106 : vector<64x8xf32>
    %108 = math.tanh %107 : vector<64x8xf32>
    %109 = arith.mulf %103, %108 : vector<64x8xf32>
    %c3_i32 = arith.constant 3 : i32
    %110 = arith.index_cast %c3_i32 : i32 to index
    %c0_35 = arith.constant 0 : index
    %c0_36 = arith.constant 0 : index
    %111 = vector.load %arg12[%110, %c0_35, %c0_36] : memref<8x32x8xbf16, #tpu.memory_space<vmem>>, vector<1x32x8xbf16>
    %112 = vector.shape_cast %111 : vector<1x32x8xbf16> to vector<32x8xbf16>
    %cst_37 = arith.constant dense<0.000000e+00> : vector<256x8xf32>
    %113 = tpu.matmul %33, %112, %cst_37 {dimension_numbers = #tpu.dot_dimension_numbers<[1], [0], [0], [1], [0, 0, 1, 1], [], []>} : vector<256x32xbf16>, vector<32x8xbf16>, vector<256x8xf32> -> vector<256x8xf32>
    %114 = arith.truncf %109 : vector<64x8xf32> to vector<64x8xbf16>
    %cst_38 = arith.constant dense<0.000000e+00> : vector<256x8xf32>
    %115 = tpu.matmul %34, %114, %cst_38 {dimension_numbers = #tpu.dot_dimension_numbers<[1], [0], [0], [1], [0, 0, 1, 1], [], []>} : vector<256x64xbf16>, vector<64x8xbf16>, vector<256x8xf32> -> vector<256x8xf32>
    %116 = arith.addf %113, %115 : vector<256x8xf32>
    %117 = vector.broadcast %35 : vector<256x1xf32> to vector<256x8xf32>
    %118 = arith.addf %116, %117 : vector<256x8xf32>
    %119 = math.tanh %118 : vector<256x8xf32>
    %120 = vector.extract_strided_slice %119 {offsets = [0, 0], sizes = [192, 8], strides = [1, 1]} : vector<256x8xf32> to vector<192x8xf32>
    %cst_39 = arith.constant 1.000000e+00 : f32
    %121 = vector.broadcast %cst_39 : f32 to vector<192x8xf32>
    %122 = arith.addf %120, %121 : vector<192x8xf32>
    %cst_40 = arith.constant 5.000000e-01 : f32
    %123 = vector.broadcast %cst_40 : f32 to vector<192x8xf32>
    %124 = arith.mulf %123, %122 : vector<192x8xf32>
    %125 = vector.extract_strided_slice %124 {offsets = [0, 0], sizes = [64, 8], strides = [1, 1]} : vector<192x8xf32> to vector<64x8xf32>
    %126 = vector.extract_strided_slice %124 {offsets = [64, 0], sizes = [64, 8], strides = [1, 1]} : vector<192x8xf32> to vector<64x8xf32>
    %127 = vector.extract_strided_slice %124 {offsets = [128, 0], sizes = [64, 8], strides = [1, 1]} : vector<192x8xf32> to vector<64x8xf32>
    %128 = vector.extract_strided_slice %119 {offsets = [192, 0], sizes = [64, 8], strides = [1, 1]} : vector<256x8xf32> to vector<64x8xf32>
    %129 = arith.mulf %126, %107 : vector<64x8xf32>
    %130 = arith.mulf %125, %128 : vector<64x8xf32>
    %131 = arith.addf %129, %130 : vector<64x8xf32>
    %132 = math.tanh %131 : vector<64x8xf32>
    %133 = arith.mulf %127, %132 : vector<64x8xf32>
    %c4_i32 = arith.constant 4 : i32
    %134 = arith.index_cast %c4_i32 : i32 to index
    %c0_41 = arith.constant 0 : index
    %c0_42 = arith.constant 0 : index
    %135 = vector.load %arg12[%134, %c0_41, %c0_42] : memref<8x32x8xbf16, #tpu.memory_space<vmem>>, vector<1x32x8xbf16>
    %136 = vector.shape_cast %135 : vector<1x32x8xbf16> to vector<32x8xbf16>
    %cst_43 = arith.constant dense<0.000000e+00> : vector<256x8xf32>
    %137 = tpu.matmul %33, %136, %cst_43 {dimension_numbers = #tpu.dot_dimension_numbers<[1], [0], [0], [1], [0, 0, 1, 1], [], []>} : vector<256x32xbf16>, vector<32x8xbf16>, vector<256x8xf32> -> vector<256x8xf32>
    %138 = arith.truncf %133 : vector<64x8xf32> to vector<64x8xbf16>
    %cst_44 = arith.constant dense<0.000000e+00> : vector<256x8xf32>
    %139 = tpu.matmul %34, %138, %cst_44 {dimension_numbers = #tpu.dot_dimension_numbers<[1], [0], [0], [1], [0, 0, 1, 1], [], []>} : vector<256x64xbf16>, vector<64x8xbf16>, vector<256x8xf32> -> vector<256x8xf32>
    %140 = arith.addf %137, %139 : vector<256x8xf32>
    %141 = vector.broadcast %35 : vector<256x1xf32> to vector<256x8xf32>
    %142 = arith.addf %140, %141 : vector<256x8xf32>
    %143 = math.tanh %142 : vector<256x8xf32>
    %144 = vector.extract_strided_slice %143 {offsets = [0, 0], sizes = [192, 8], strides = [1, 1]} : vector<256x8xf32> to vector<192x8xf32>
    %cst_45 = arith.constant 1.000000e+00 : f32
    %145 = vector.broadcast %cst_45 : f32 to vector<192x8xf32>
    %146 = arith.addf %144, %145 : vector<192x8xf32>
    %cst_46 = arith.constant 5.000000e-01 : f32
    %147 = vector.broadcast %cst_46 : f32 to vector<192x8xf32>
    %148 = arith.mulf %147, %146 : vector<192x8xf32>
    %149 = vector.extract_strided_slice %148 {offsets = [0, 0], sizes = [64, 8], strides = [1, 1]} : vector<192x8xf32> to vector<64x8xf32>
    %150 = vector.extract_strided_slice %148 {offsets = [64, 0], sizes = [64, 8], strides = [1, 1]} : vector<192x8xf32> to vector<64x8xf32>
    %151 = vector.extract_strided_slice %148 {offsets = [128, 0], sizes = [64, 8], strides = [1, 1]} : vector<192x8xf32> to vector<64x8xf32>
    %152 = vector.extract_strided_slice %143 {offsets = [192, 0], sizes = [64, 8], strides = [1, 1]} : vector<256x8xf32> to vector<64x8xf32>
    %153 = arith.mulf %150, %131 : vector<64x8xf32>
    %154 = arith.mulf %149, %152 : vector<64x8xf32>
    %155 = arith.addf %153, %154 : vector<64x8xf32>
    %156 = math.tanh %155 : vector<64x8xf32>
    %157 = arith.mulf %151, %156 : vector<64x8xf32>
    %c5_i32 = arith.constant 5 : i32
    %158 = arith.index_cast %c5_i32 : i32 to index
    %c0_47 = arith.constant 0 : index
    %c0_48 = arith.constant 0 : index
    %159 = vector.load %arg12[%158, %c0_47, %c0_48] : memref<8x32x8xbf16, #tpu.memory_space<vmem>>, vector<1x32x8xbf16>
    %160 = vector.shape_cast %159 : vector<1x32x8xbf16> to vector<32x8xbf16>
    %cst_49 = arith.constant dense<0.000000e+00> : vector<256x8xf32>
    %161 = tpu.matmul %33, %160, %cst_49 {dimension_numbers = #tpu.dot_dimension_numbers<[1], [0], [0], [1], [0, 0, 1, 1], [], []>} : vector<256x32xbf16>, vector<32x8xbf16>, vector<256x8xf32> -> vector<256x8xf32>
    %162 = arith.truncf %157 : vector<64x8xf32> to vector<64x8xbf16>
    %cst_50 = arith.constant dense<0.000000e+00> : vector<256x8xf32>
    %163 = tpu.matmul %34, %162, %cst_50 {dimension_numbers = #tpu.dot_dimension_numbers<[1], [0], [0], [1], [0, 0, 1, 1], [], []>} : vector<256x64xbf16>, vector<64x8xbf16>, vector<256x8xf32> -> vector<256x8xf32>
    %164 = arith.addf %161, %163 : vector<256x8xf32>
    %165 = vector.broadcast %35 : vector<256x1xf32> to vector<256x8xf32>
    %166 = arith.addf %164, %165 : vector<256x8xf32>
    %167 = math.tanh %166 : vector<256x8xf32>
    %168 = vector.extract_strided_slice %167 {offsets = [0, 0], sizes = [192, 8], strides = [1, 1]} : vector<256x8xf32> to vector<192x8xf32>
    %cst_51 = arith.constant 1.000000e+00 : f32
    %169 = vector.broadcast %cst_51 : f32 to vector<192x8xf32>
    %170 = arith.addf %168, %169 : vector<192x8xf32>
    %cst_52 = arith.constant 5.000000e-01 : f32
    %171 = vector.broadcast %cst_52 : f32 to vector<192x8xf32>
    %172 = arith.mulf %171, %170 : vector<192x8xf32>
    %173 = vector.extract_strided_slice %172 {offsets = [0, 0], sizes = [64, 8], strides = [1, 1]} : vector<192x8xf32> to vector<64x8xf32>
    %174 = vector.extract_strided_slice %172 {offsets = [64, 0], sizes = [64, 8], strides = [1, 1]} : vector<192x8xf32> to vector<64x8xf32>
    %175 = vector.extract_strided_slice %172 {offsets = [128, 0], sizes = [64, 8], strides = [1, 1]} : vector<192x8xf32> to vector<64x8xf32>
    %176 = vector.extract_strided_slice %167 {offsets = [192, 0], sizes = [64, 8], strides = [1, 1]} : vector<256x8xf32> to vector<64x8xf32>
    %177 = arith.mulf %174, %155 : vector<64x8xf32>
    %178 = arith.mulf %173, %176 : vector<64x8xf32>
    %179 = arith.addf %177, %178 : vector<64x8xf32>
    %180 = math.tanh %179 : vector<64x8xf32>
    %181 = arith.mulf %175, %180 : vector<64x8xf32>
    %c6_i32 = arith.constant 6 : i32
    %182 = arith.index_cast %c6_i32 : i32 to index
    %c0_53 = arith.constant 0 : index
    %c0_54 = arith.constant 0 : index
    %183 = vector.load %arg12[%182, %c0_53, %c0_54] : memref<8x32x8xbf16, #tpu.memory_space<vmem>>, vector<1x32x8xbf16>
    %184 = vector.shape_cast %183 : vector<1x32x8xbf16> to vector<32x8xbf16>
    %cst_55 = arith.constant dense<0.000000e+00> : vector<256x8xf32>
    %185 = tpu.matmul %33, %184, %cst_55 {dimension_numbers = #tpu.dot_dimension_numbers<[1], [0], [0], [1], [0, 0, 1, 1], [], []>} : vector<256x32xbf16>, vector<32x8xbf16>, vector<256x8xf32> -> vector<256x8xf32>
    %186 = arith.truncf %181 : vector<64x8xf32> to vector<64x8xbf16>
    %cst_56 = arith.constant dense<0.000000e+00> : vector<256x8xf32>
    %187 = tpu.matmul %34, %186, %cst_56 {dimension_numbers = #tpu.dot_dimension_numbers<[1], [0], [0], [1], [0, 0, 1, 1], [], []>} : vector<256x64xbf16>, vector<64x8xbf16>, vector<256x8xf32> -> vector<256x8xf32>
    %188 = arith.addf %185, %187 : vector<256x8xf32>
    %189 = vector.broadcast %35 : vector<256x1xf32> to vector<256x8xf32>
    %190 = arith.addf %188, %189 : vector<256x8xf32>
    %191 = math.tanh %190 : vector<256x8xf32>
    %192 = vector.extract_strided_slice %191 {offsets = [0, 0], sizes = [192, 8], strides = [1, 1]} : vector<256x8xf32> to vector<192x8xf32>
    %cst_57 = arith.constant 1.000000e+00 : f32
    %193 = vector.broadcast %cst_57 : f32 to vector<192x8xf32>
    %194 = arith.addf %192, %193 : vector<192x8xf32>
    %cst_58 = arith.constant 5.000000e-01 : f32
    %195 = vector.broadcast %cst_58 : f32 to vector<192x8xf32>
    %196 = arith.mulf %195, %194 : vector<192x8xf32>
    %197 = vector.extract_strided_slice %196 {offsets = [0, 0], sizes = [64, 8], strides = [1, 1]} : vector<192x8xf32> to vector<64x8xf32>
    %198 = vector.extract_strided_slice %196 {offsets = [64, 0], sizes = [64, 8], strides = [1, 1]} : vector<192x8xf32> to vector<64x8xf32>
    %199 = vector.extract_strided_slice %196 {offsets = [128, 0], sizes = [64, 8], strides = [1, 1]} : vector<192x8xf32> to vector<64x8xf32>
    %200 = vector.extract_strided_slice %191 {offsets = [192, 0], sizes = [64, 8], strides = [1, 1]} : vector<256x8xf32> to vector<64x8xf32>
    %201 = arith.mulf %198, %179 : vector<64x8xf32>
    %202 = arith.mulf %197, %200 : vector<64x8xf32>
    %203 = arith.addf %201, %202 : vector<64x8xf32>
    %204 = math.tanh %203 : vector<64x8xf32>
    %205 = arith.mulf %199, %204 : vector<64x8xf32>
    %c7_i32 = arith.constant 7 : i32
    %206 = arith.index_cast %c7_i32 : i32 to index
    %c0_59 = arith.constant 0 : index
    %c0_60 = arith.constant 0 : index
    %207 = vector.load %arg12[%206, %c0_59, %c0_60] : memref<8x32x8xbf16, #tpu.memory_space<vmem>>, vector<1x32x8xbf16>
    %208 = vector.shape_cast %207 : vector<1x32x8xbf16> to vector<32x8xbf16>
    %cst_61 = arith.constant dense<0.000000e+00> : vector<256x8xf32>
    %209 = tpu.matmul %33, %208, %cst_61 {dimension_numbers = #tpu.dot_dimension_numbers<[1], [0], [0], [1], [0, 0, 1, 1], [], []>} : vector<256x32xbf16>, vector<32x8xbf16>, vector<256x8xf32> -> vector<256x8xf32>
    %210 = arith.truncf %205 : vector<64x8xf32> to vector<64x8xbf16>
    %cst_62 = arith.constant dense<0.000000e+00> : vector<256x8xf32>
    %211 = tpu.matmul %34, %210, %cst_62 {dimension_numbers = #tpu.dot_dimension_numbers<[1], [0], [0], [1], [0, 0, 1, 1], [], []>} : vector<256x64xbf16>, vector<64x8xbf16>, vector<256x8xf32> -> vector<256x8xf32>
    %212 = arith.addf %209, %211 : vector<256x8xf32>
    %213 = vector.broadcast %35 : vector<256x1xf32> to vector<256x8xf32>
    %214 = arith.addf %212, %213 : vector<256x8xf32>
    %215 = math.tanh %214 : vector<256x8xf32>
    %216 = vector.extract_strided_slice %215 {offsets = [0, 0], sizes = [192, 8], strides = [1, 1]} : vector<256x8xf32> to vector<192x8xf32>
    %cst_63 = arith.constant 1.000000e+00 : f32
    %217 = vector.broadcast %cst_63 : f32 to vector<192x8xf32>
    %218 = arith.addf %216, %217 : vector<192x8xf32>
    %cst_64 = arith.constant 5.000000e-01 : f32
    %219 = vector.broadcast %cst_64 : f32 to vector<192x8xf32>
    %220 = arith.mulf %219, %218 : vector<192x8xf32>
    %221 = vector.extract_strided_slice %220 {offsets = [0, 0], sizes = [64, 8], strides = [1, 1]} : vector<192x8xf32> to vector<64x8xf32>
    %222 = vector.extract_strided_slice %220 {offsets = [64, 0], sizes = [64, 8], strides = [1, 1]} : vector<192x8xf32> to vector<64x8xf32>
    %223 = vector.extract_strided_slice %220 {offsets = [128, 0], sizes = [64, 8], strides = [1, 1]} : vector<192x8xf32> to vector<64x8xf32>
    %224 = vector.extract_strided_slice %215 {offsets = [192, 0], sizes = [64, 8], strides = [1, 1]} : vector<256x8xf32> to vector<64x8xf32>
    %225 = arith.mulf %222, %203 : vector<64x8xf32>
    %226 = arith.mulf %221, %224 : vector<64x8xf32>
    %227 = arith.addf %225, %226 : vector<64x8xf32>
    %228 = math.tanh %227 : vector<64x8xf32>
    %229 = arith.mulf %223, %228 : vector<64x8xf32>
    %c8_i32 = arith.constant 8 : i32
    %c0_65 = arith.constant 0 : index
    %c0_66 = arith.constant 0 : index
    %230 = vector.load %arg7[%c0_65, %c0_66] : memref<32x64xbf16, #tpu.memory_space<vmem>>, vector<32x64xbf16>
    %231 = arith.truncf %229 : vector<64x8xf32> to vector<64x8xbf16>
    %cst_67 = arith.constant dense<0.000000e+00> : vector<32x8xf32>
    %232 = tpu.matmul %230, %231, %cst_67 {dimension_numbers = #tpu.dot_dimension_numbers<[1], [0], [0], [1], [0, 0, 1, 1], [], []>} : vector<32x64xbf16>, vector<64x8xbf16>, vector<32x8xf32> -> vector<32x8xf32>
    %c0_68 = arith.constant 0 : index
    %c0_69 = arith.constant 0 : index
    %233 = vector.load %arg8[%c0_68, %c0_69] : memref<32x1xf32, #tpu.memory_space<vmem>>, vector<32x1xf32>
    %234 = vector.broadcast %233 : vector<32x1xf32> to vector<32x8xf32>
    %235 = arith.addf %232, %234 : vector<32x8xf32>
    %cst_70 = arith.constant 0.000000e+00 : f32
    %236 = vector.broadcast %cst_70 : f32 to vector<32x8xf32>
    %237 = arith.maximumf %235, %236 : vector<32x8xf32>
    %c0_71 = arith.constant 0 : index
    %c0_72 = arith.constant 0 : index
    %238 = vector.load %arg9[%c0_71, %c0_72] : memref<4x32xbf16, #tpu.memory_space<vmem>>, vector<4x32xbf16>
    %239 = arith.truncf %237 : vector<32x8xf32> to vector<32x8xbf16>
    %cst_73 = arith.constant dense<0.000000e+00> : vector<4x8xf32>
    %240 = tpu.matmul %238, %239, %cst_73 {dimension_numbers = #tpu.dot_dimension_numbers<[1], [0], [0], [1], [0, 0, 1, 1], [], []>} : vector<4x32xbf16>, vector<32x8xbf16>, vector<4x8xf32> -> vector<4x8xf32>
    %c0_74 = arith.constant 0 : index
    %c0_75 = arith.constant 0 : index
    %241 = vector.load %arg10[%c0_74, %c0_75] : memref<4x1xf32, #tpu.memory_space<vmem>>, vector<4x1xf32>
    %242 = vector.broadcast %241 : vector<4x1xf32> to vector<4x8xf32>
    %243 = arith.addf %240, %242 : vector<4x8xf32>
    %c0_76 = arith.constant 0 : index
    %c0_77 = arith.constant 0 : index
    %244 = vector.load %arg11[%c0_76, %c0_77] : memref<4x8xf32, #tpu.memory_space<vmem>>, vector<4x8xf32>
    tpu.vector_store %arg11[%c0_76, %c0_77], %243 {strides = array<i32>} : memref<4x8xf32, #tpu.memory_space<vmem>>, vector<4x8xf32>,
    return
  }
  func.func @transform_0(%arg0: i32) -> (i32, i32) {
    %c0_i32 = arith.constant 0 : i32
    %c0_i32_0 = arith.constant 0 : i32
    return %c0_i32, %arg0 : i32, i32
  }
  func.func @transform_1(%arg0: i32) -> (i32, i32, i32) {
    %c0_i32 = arith.constant 0 : i32
    %c0_i32_0 = arith.constant 0 : i32
    %c0_i32_1 = arith.constant 0 : i32
    %c0_i32_2 = arith.constant 0 : i32
    return %c0_i32, %c0_i32_0, %c0_i32_1 : i32, i32, i32
  }
  func.func @transform_2(%arg0: i32) -> (i32, i32) {
    %c0_i32 = arith.constant 0 : i32
    %c0_i32_0 = arith.constant 0 : i32
    %c0_i32_1 = arith.constant 0 : i32
    return %c0_i32, %c0_i32_0 : i32, i32
  }
  func.func @transform_3(%arg0: i32) -> (i32, i32) {
    %c0_i32 = arith.constant 0 : i32
    %c0_i32_0 = arith.constant 0 : i32
    %c0_i32_1 = arith.constant 0 : i32
    return %c0_i32, %c0_i32_0 : i32, i32
  }
  func.func @transform_4(%arg0: i32) -> (i32, i32) {
    %c0_i32 = arith.constant 0 : i32
    %c0_i32_0 = arith.constant 0 : i32
    %c0_i32_1 = arith.constant 0 : i32
    return %c0_i32, %c0_i32_0 : i32, i32
  }
  func.func @transform_5(%arg0: i32) -> (i32, i32) {
    %c0_i32 = arith.constant 0 : i32
    %c0_i32_0 = arith.constant 0 : i32
    %c0_i32_1 = arith.constant 0 : i32
    return %c0_i32, %c0_i32_0 : i32, i32
  }
  func.func @transform_6(%arg0: i32) -> (i32, i32) {
    %c0_i32 = arith.constant 0 : i32
    %c0_i32_0 = arith.constant 0 : i32
    %c0_i32_1 = arith.constant 0 : i32
    return %c0_i32, %c0_i32_0 : i32, i32
  }
  func.func @transform_7(%arg0: i32) -> (i32, i32) {
    %c0_i32 = arith.constant 0 : i32
    %c0_i32_0 = arith.constant 0 : i32
    %c0_i32_1 = arith.constant 0 : i32
    return %c0_i32, %c0_i32_0 : i32, i32
  }
  func.func @transform_8(%arg0: i32) -> (i32, i32) {
    %c0_i32 = arith.constant 0 : i32
    %c0_i32_0 = arith.constant 0 : i32
    %c0_i32_1 = arith.constant 0 : i32
    return %c0_i32, %c0_i32_0 : i32, i32
  }
  func.func @transform_9(%arg0: i32) -> (i32, i32) {
    %c0_i32 = arith.constant 0 : i32
    %c0_i32_0 = arith.constant 0 : i32
    %c0_i32_1 = arith.constant 0 : i32
    return %c0_i32, %c0_i32_0 : i32, i32
  }
  func.func @transform_10(%arg0: i32) -> (i32, i32) {
    %c0_i32 = arith.constant 0 : i32
    %c0_i32_0 = arith.constant 0 : i32
    return %c0_i32, %arg0 : i32, i32
  }
}

</mosaic_0001>

<bundles_post_ra>
// kernel: tpu_custom_call.1
= control target key start
LH: loop header
LB: loop body
LE: loop exit
PB: predicated region body
PF: predicated region fallthrough
CT: control target
= control target key end

     0   :  { %v5443_v3 = vmov 0   ;;  %s8802_s0 = inlined_call_operand.vmem [shape: f32[18,8], index: 0, kind: input, shape index: {}]   ;;  %s8803_s1 = inlined_call_operand.vmem [shape: f32[3,32,1], index: 1, kind: input, shape index: {}]   ;;  %s8804_s2 = inlined_call_operand.vmem [shape: f32[32,1], index: 2, kind: input, shape index: {}]   ;;  %s8805_s3 = inlined_call_operand.vmem [shape: bf16[256,32], index: 3, kind: input, shape index: {}]   ;;  %s8806_s4 = inlined_call_operand.vmem [shape: bf16[256,64], index: 4, kind: input, shape index: {}]   ;;  %s8807_s5 = inlined_call_operand.vmem [shape: f32[256,1], index: 5, kind: input, shape index: {}]   ;;  %s8808_s6 = inlined_call_operand.vmem [shape: bf16[32,64], index: 6, kind: input, shape index: {}]   ;;  %s8809_s7 = inlined_call_operand.vmem [shape: f32[32,1], index: 7, kind: input, shape index: {}]   ;;  %s8810_s8 = inlined_call_operand.vmem [shape: bf16[4,32], index: 8, kind: input, shape index: {}]   ;;  %s8811_s9 = inlined_call_operand.vmem [shape: f32[4,1], index: 9, kind: input, shape index: {}]   ;;  %s8812_s10 = inlined_call_operand.hbm [shape: f32[4,8], index: 10, kind: output, shape index: {}]  }
   0x1   :  { %v50_v0 = vld [vmem:[%s8803_s1 + $0x50] sm:$0xff]  ;;  %4679 = vset.pattern.permute.xlu2 %v5443_v3  ;;  %4678 = vset.pattern.permute.xlu1 %v5443_v3 }
   0x2   :  { %v46_v1 = vld [vmem:[%s8803_s1 + $0x30] sm:$0xff]  ;;  %4677 = vset.pattern.permute.xlu0 %v5443_v3  ;;  %350 = vperm.xlu2 %4679, %v50_v0  }
   0x3   :  { %v42_v2 = vld [vmem:[%s8803_s1 + $0x10] sm:$0xff]  ;;  %200 = vperm.xlu1 %4678, %v46_v1   ;;  %4674 = vmatpush.bf16.msra.mxu3 %v5443_v3 }
   0x4   :  { %114 = vperm.xlu0 %4677, %v42_v2   ;;  %971 = vmatpush.bf16.msra.mxu0 %v5443_v3 }
   0x5   :  { %15 = vsyncpa [#allocation4], 0  ;;  %v51_v4 = vld [vmem:[%s8803_s1 + $0x58] sm:$0xff]  ;;  %v44_v7 = vld [vmem:[%s8803_s1 + $0x20] sm:$0xff]  ;;  %vm915_vm0 = vcmask 523264   ;;  %vm702_vm1 = vcmask 60416  }
   0x6   :  { %v47_v5 = vld [vmem:[%s8803_s1 + $0x38] sm:$0xff]  ;;  %v41_v8 = vld [vmem:[%s8803_s1 + $0x8] sm:$0xff]  ;;  %v40_v9 = vld [vmem:[%s8803_s1] sm:$0xff]  ;;  %vm1145_vm2 = vcmask 261120   ;;  %s5444_s15 = smov [#allocation3]   ;;  %s4156_s18 = sshll.u32 %s8812_s10, 4  ;;  %s4157_s18 = int_to_ptr.hbm [resolvable:$true] %s4156_s18 }
   0x7   :  { %v43_v6 = vld [vmem:[%s8803_s1 + $0x18] sm:$0xff]  ;;  %v49_v10 = vld [vmem:[%s8803_s1 + $0x48] sm:$0xff]  ;;  %v48_v11 = vld [vmem:[%s8803_s1 + $0x40] sm:$0xff]  ;;  %s4154_s16 = sshll.u32 %s5444_s15, 4  ;;  %s4155_s16 = int_to_ptr.vmem [resolvable:$true] %s4154_s16 }
   0x8   :  { %v45_v12 = vld [vmem:[%s8803_s1 + $0x28] sm:$0xff]  ;;  %v486_v13 = vld [vmem:[%s8804_s2] sm:$0xff]  ;;  %v489_v14 = vld [vmem:[%s8804_s2 + $0x18] sm:$0xff] }
   0x9   :  { %v488_v15 = vld [vmem:[%s8804_s2 + $0x10] sm:$0xff]  ;;  %v806_v16 = vld [vmem:[%s8807_s5 + $0x38] sm:$0xff]  ;;  %v487_v18 = vld [vmem:[%s8804_s2 + $0x8] sm:$0xff] }
   0xa   :  { %355 = vperm.xlu2 %4679, %v51_v4   ;;  %v805_v17 = vld [vmem:[%s8807_s5 + $0x30] sm:$0xff]  ;;  %v803_v19 = vld [vmem:[%s8807_s5 + $0x20] sm:$0xff]  ;;  %v814_v20 = vld [vmem:[%s8807_s5 + $0x78] sm:$0xff] }
   0xb   :  { %205 = vperm.xlu1 %4678, %v47_v5   ;;  %v813_v21 = vld [vmem:[%s8807_s5 + $0x70] sm:$0xff]  ;;  %v812_v22 = vld [vmem:[%s8807_s5 + $0x68] sm:$0xff]  ;;  %v811_v23 = vld [vmem:[%s8807_s5 + $0x60] sm:$0xff] }
   0xc   :  { %119 = vperm.xlu0 %4677, %v43_v6   ;;  %v804_v24 = vld [vmem:[%s8807_s5 + $0x28] sm:$0xff]  ;;  %v801_v25 = vld [vmem:[%s8807_s5 + $0x10] sm:$0xff]  ;;  %v830_v26 = vld [vmem:[%s8807_s5 + $0xf8] sm:$0xff] }
   0xd   :  { %v829_v27 = vld [vmem:[%s8807_s5 + $0xf0] sm:$0xff]  ;;  %v810_v28 = vld [vmem:[%s8807_s5 + $0x58] sm:$0xff]  ;;  %v828_v32 = vld [vmem:[%s8807_s5 + $0xe8] sm:$0xff] }
   0xe   :  { %v809_v29 = vld [vmem:[%s8807_s5 + $0x50] sm:$0xff]  ;;  %v802_v30 = vld [vmem:[%s8807_s5 + $0x18] sm:$0xff]  ;;  %v827_v33 = vld [vmem:[%s8807_s5 + $0xe0] sm:$0xff] }
   0xf   :  { %v821_v31 = vld [vmem:[%s8807_s5 + $0xb0] sm:$0xff]  ;;  %v800_v34 = vld [vmem:[%s8807_s5 + $0x8] sm:$0xff]  ;;  %v799_v35 = vld [vmem:[%s8807_s5] sm:$0xff] }
  0x10   :  { %v822_v36 = vld [vmem:[%s8807_s5 + $0xb8] sm:$0xff]  ;;  %v825_v38 = vld [vmem:[%s8807_s5 + $0xd0] sm:$0xff]  ;;  %v808_v39 = vld [vmem:[%s8807_s5 + $0x48] sm:$0xff] }
  0x11   :  { %v807_v40 = vld [vmem:[%s8807_s5 + $0x40] sm:$0xff]  ;;  %v820_v43 = vld [vmem:[%s8807_s5 + $0xa8] sm:$0xff]  ;;  %v826_v46 = vld [vmem:[%s8807_s5 + $0xd8] sm:$0xff] }
  0x12   :  { %190 = vperm.xlu2 %4679, %v44_v7   ;;  %v37_v42 = vld [vmem:[%s8802_s0] sm:$0xff]  ;;  %v5636_v51 = vld [vmem:[%s8802_s0 + $0x8] sm:$0xff]  ;;  %v817_v7 = vld [vmem:[%s8807_s5 + $0x90] sm:$0xff] }
  0x13   :  { %109 = vperm.xlu1 %4678, %v41_v8   ;;  %v819_v44 = vld [vmem:[%s8807_s5 + $0xa0] sm:$0xff]  ;;  %v56_v45 = vrot.slane %v37_v42, 2  ;;  %v57_v47 = vrot.slane %v37_v42, 3  ;;  %v58_v48 = vrot.slane %v37_v42, 4  ;;  %v59_v49 = vrot.slane %v37_v42, 5 }
  0x14   :  { %104 = vperm.xlu0 %4677, %v40_v9   ;;  %v60_v50 = vrot.slane %v37_v42, 6  ;;  %v55_v52 = vrot.slane %v37_v42, 1  ;;  %v61_v53 = vrot.slane %v37_v42, 7  ;;  %v5638_v54 = vperm.slane %v37_v42, 0 }
  0x15   :  { %v5640_v55 = vperm.slane %v56_v45, 0  ;;  %v63_v56 = vrot.slane %v5636_v51, 2  ;;  %v64_v57 = vrot.slane %v5636_v51, 3  ;;  %v5646_v59 = vperm.slane %v57_v47, 0  ;;  %v816_v47 = vld [vmem:[%s8807_s5 + $0x88] sm:$0xff] }
  0x16   :  { %v5648_v60 = vperm.slane %v58_v48, 0  ;;  %v5650_v61 = vperm.slane %v59_v49, 0  ;;  %v5652_v62 = vperm.slane %v60_v50, 0  ;;  %v5654_v63 = vperm.slane %v55_v52, 0 }
  0x17   :  { %v5656_v0 = vperm.slane %v61_v53, 0  ;;  %v62_v2 = vrot.slane %v5636_v51, 1  ;;  %v815_v53 = vld [vmem:[%s8807_s5 + $0x80] sm:$0xff] }
  0x19   :  { %9004 = vst [vmem:[#allocation9_spill] sm:$0xff] %v5656_v0 }
  0x1a   :  { %345 = vperm.xlu2 %4679, %v49_v10   ;;  %v5688_v10 = vperm.slane %v63_v56, 0  ;;  %v818_v56 = vld [vmem:[%s8807_s5 + $0x98] sm:$0xff] }
  0x1b   :  { %340 = vperm.xlu1 %4678, %v48_v11   ;;  %v5690_v11 = vperm.slane %v64_v57, 0 }
  0x1c   :  { %195 = vperm.xlu0 %4677, %v45_v12   ;;  %v824_v12 = vld [vmem:[%s8807_s5 + $0xc8] sm:$0xff] }
  0x22   :  { %492 = vperm.xlu2 %4679, %v486_v13   ;;  %v823_v13 = vld [vmem:[%s8807_s5 + $0xc0] sm:$0xff] }
  0x23   :  { %507 = vperm.xlu1 %4678, %v489_v14  }
  0x24   :  { %502 = vperm.xlu0 %4677, %v488_v15  }
  0x2a   :  { %1320 = vperm.xlu2 %4679, %v806_v16  }
  0x2b   :  { %1315 = vperm.xlu1 %4678, %v805_v17  }
  0x2c   :  { %497 = vperm.xlu0 %4677, %v487_v18  }
  0x32   :  { %1305 = vperm.xlu2 %4679, %v803_v19   ;;  %v5718_v19 = vperm.slane %v62_v2, 0 }
  0x33   :  { %1360 = vperm.xlu1 %4678, %v814_v20  }
  0x34   :  { %1355 = vperm.xlu0 %4677, %v813_v21  }
  0x3a   :  { %1350 = vperm.xlu2 %4679, %v812_v22  }
  0x3b   :  { %1345 = vperm.xlu1 %4678, %v811_v23  }
  0x3c   :  { %1310 = vperm.xlu0 %4677, %v804_v24  }
  0x42   :  { %1295 = vperm.xlu2 %4679, %v801_v25  }
  0x43   :  { %1440 = vperm.xlu1 %4678, %v830_v26  }
  0x44   :  { %1435 = vperm.xlu0 %4677, %v829_v27  }
  0x4a   :  { %1340 = vperm.xlu2 %4679, %v810_v28   ;;  %v5753_v28 = vperm.slane %v5636_v51, 0 }
  0x4b   :  { %1335 = vperm.xlu1 %4678, %v809_v29  }
  0x4c   :  { %1300 = vperm.xlu0 %4677, %v802_v30   ;;  %9005 = vst [vmem:[#allocation10_spill] sm:$0xff] %v5753_v28 }
  0x52   :  { %1395 = vperm.xlu2 %4679, %v821_v31  }
  0x53   :  { %1430 = vperm.xlu1 %4678, %v828_v32  }
  0x54   :  { %1425 = vperm.xlu0 %4677, %v827_v33  }
  0x5a   :  { %1290 = vperm.xlu2 %4679, %v800_v34  }
  0x5b   :  { %1285 = vperm.xlu1 %4678, %v799_v35  }
  0x5c   :  { %1400 = vperm.xlu0 %4677, %v822_v36   ;;  %v5608_v37 = vpop.permute.xlu2 %350 }
  0x5d   :  { %9001 = vst [vmem:[#allocation6_spill] sm:$0xff] %v5608_v37  ;;  %v5660_v1 = vmul.f32 %v5608_v37, %v5640_v55  ;;  %v364_v3 = vmul.f32 %v5608_v37, %v5646_v59  ;;  %v5667_v4 = vmul.f32 %v5608_v37, %v5648_v60  ;;  %v5671_v5 = vmul.f32 %v5608_v37, %v5650_v61 }
  0x5e   :  { %v5675_v6 = vmul.f32 %v5608_v37, %v5652_v62  ;;  %v5686_v9 = vmul.f32 %v5608_v37, %v5656_v0  ;;  %v5722_v20 = vmul.f32 %v5608_v37, %v5688_v10  ;;  %v5726_v21 = vmul.f32 %v5608_v37, %v5690_v11  ;;  %v4062_v37 = vld [vmem:[%s8809_s7 + $0x10] sm:$0xff] }
  0x62   :  { %1415 = vperm.xlu2 %4679, %v825_v38  }
  0x63   :  { %1330 = vperm.xlu1 %4678, %v808_v39  }
  0x64   :  { %1325 = vperm.xlu0 %4677, %v807_v40   ;;  %v5619_v41 = vpop.permute.xlu2 %355 }
  0x65   :  { %9002 = vst [vmem:[#allocation7_spill] sm:$0xff] %v5619_v41  ;;  %v5682_v8 = vmul.f32 %v5619_v41, %v5640_v55  ;;  %v5700_v14 = vmul.f32 %v5619_v41, %v5646_v59  ;;  %v5704_v15 = vmul.f32 %v5619_v41, %v5648_v60  ;;  %v5708_v16 = vmul.f32 %v5619_v41, %v5650_v61 }
  0x66   :  { %v5712_v17 = vmul.f32 %v5619_v41, %v5652_v62  ;;  %v5716_v18 = vmul.f32 %v5619_v41, %v5656_v0  ;;  %v5757_v29 = vmul.f32 %v5619_v41, %v5688_v10  ;;  %v5763_v31 = vmul.f32 %v5619_v41, %v5690_v11 }
  0x6a   :  { %1390 = vperm.xlu2 %4679, %v820_v43  }
  0x6b   :  { %1385 = vperm.xlu1 %4678, %v819_v44  }
  0x6c   :  { %1420 = vperm.xlu0 %4677, %v826_v46   ;;  %v5644_v58 = vpop.permute.xlu2 %190 }
  0x6d   :  { %9003 = vst [vmem:[#allocation8_spill] sm:$0xff] %v5644_v58  ;;  %v5730_v22 = vmul.f32 %v5644_v58, %v5654_v63  ;;  %v5734_v23 = vmul.f32 %v5644_v58, %v5640_v55  ;;  %v5738_v24 = vmul.f32 %v5644_v58, %v5646_v59  ;;  %v5742_v25 = vmul.f32 %v5644_v58, %v5648_v60 }
  0x6e   :  { %v5746_v26 = vmul.f32 %v5644_v58, %v5650_v61  ;;  %v5750_v27 = vmul.f32 %v5644_v58, %v5652_v62  ;;  %v5767_v32 = vmul.f32 %v5644_v58, %v5718_v19 }
  0x70   :  { %9007 = vst [vmem:[#allocation12_spill] sm:$0xff] %v5767_v32 }
  0x72   :  { %1375 = vperm.xlu2 %4679, %v817_v7  }
  0x73   :  { %1410 = vperm.xlu1 %4678, %v824_v12  }
  0x74   :  { %1405 = vperm.xlu0 %4677, %v823_v13   ;;  %v5759_v30 = vpop.permute.xlu2 %345 }
  0x75   :  { %9006 = vst [vmem:[#allocation11_spill] sm:$0xff] %v5759_v30  ;;  %v5771_v35 = vpop.permute.xlu1 %200  ;;  %v5777_v38 = vmul.f32 %v5759_v30, %v5640_v55  ;;  %v5781_v39 = vmul.f32 %v5759_v30, %v5646_v59  ;;  %v5785_v40 = vmul.f32 %v5759_v30, %v5648_v60  ;;  %v5819_v34 = vmul.f32 %v5759_v30, %v5650_v61 }
  0x76   :  { %9008 = vst [vmem:[#allocation13_spill] sm:$0xff] %v5771_v35  ;;  %v5773_v36 = vpop.permute.xlu0 %114  ;;  %v210_v45 = vmul.f32 %v5771_v35, %v5654_v63  ;;  %v214_v46 = vmul.f32 %v5771_v35, %v5640_v55  ;;  %v218_v50 = vmul.f32 %v5771_v35, %v5646_v59  ;;  %v222_v52 = vmul.f32 %v5771_v35, %v5648_v60 }
  0x77   :  { %9009 = vst [vmem:[#allocation14_spill] sm:$0xff] %v5773_v36  ;;  %v124_v43 = vmul.f32 %v5773_v36, %v5638_v54  ;;  %v128_v44 = vmul.f32 %v5773_v36, %v5654_v63  ;;  %v132_v48 = vmul.f32 %v5773_v36, %v5640_v55  ;;  %v136_v49 = vmul.f32 %v5773_v36, %v5646_v59 }
  0x78   :  { %v140_v7 = vmul.f32 %v5773_v36, %v5648_v60  ;;  %v144_v12 = vmul.f32 %v5773_v36, %v5650_v61  ;;  %v226_v33 = vmul.f32 %v5771_v35, %v5650_v61 }
  0x79   :  { %v274_v57 = vadd.f32 %v210_v45, %v124_v43  ;;  %v278_v2 = vadd.f32 %v214_v46, %v128_v44  ;;  %v282_v13 = vadd.f32 %v218_v50, %v132_v48  ;;  %v286_v42 = vadd.f32 %v222_v52, %v136_v49 }
  0x7a   :  { %1370 = vperm.xlu2 %4679, %v816_v47   ;;  %v230_v44 = vmul.f32 %v5771_v35, %v5652_v62  ;;  %v5832_v45 = vmul.f32 %v5759_v30, %v5652_v62  ;;  %v290_v47 = vadd.f32 %v226_v33, %v140_v7  ;;  %v5843_v49 = vmul.f32 %v5759_v30, %v5656_v0 }
  0x7b   :  { %v5824_v41 = vadd.f32 %v5660_v1, %v274_v57  ;;  %v5826_v43 = vadd.f32 %v364_v3, %v278_v2  ;;  %1365 = vperm.xlu1 %4678, %v815_v53   ;;  %v5835_v46 = vadd.f32 %v5667_v4, %v282_v13  ;;  %v5838_v48 = vadd.f32 %v5671_v5, %v286_v42 }
  0x7c   :  { %9010 = vst [vmem:[#allocation15_spill] sm:$0xff] %v5832_v45  ;;  %1380 = vperm.xlu0 %4677, %v818_v56   ;;  %v294_v3 = vadd.f32 %v230_v44, %v144_v12  ;;  %v156_v50 = vmul.f32 %v5773_v36, %v5753_v28  ;;  %v160_v52 = vmul.f32 %v5773_v36, %v5718_v19  ;;  %v4060_v12 = vld [vmem:[%s8809_s7] sm:$0xff] }
  0x7d   :  { %9011 = vst [vmem:[#allocation16_spill] sm:$0xff] %v5838_v48  ;;  %v5849_v53 = vpop.permute.xlu1 %205  ;;  %v5854_v5 = vadd.f32 %v5675_v6, %v290_v47  ;;  %v242_v33 = vmul.f32 %v5771_v35, %v5718_v19  ;;  %v246_v42 = vmul.f32 %v5771_v35, %v5688_v10  ;;  %v5862_v56 = vmul.f32 %v5644_v58, %v5688_v10  ;;  %v4063_v58 = vld [vmem:[%s8809_s7 + $0x18] sm:$0xff] }
  0x7e   :  { %9012 = vst [vmem:[#allocation17_spill] sm:$0xff] %v5843_v49  ;;  %v5851_v4 = vpop.permute.xlu0 %119  ;;  %v211_v6 = vmul.f32 %v5849_v53, %v5654_v63  ;;  %v215_v7 = vmul.f32 %v5849_v53, %v5640_v55  ;;  %v219_v47 = vmul.f32 %v5849_v53, %v5646_v59  ;;  %v223_v1 = vmul.f32 %v5849_v53, %v5648_v60 }
  0x7f   :  { %9013 = vst [vmem:[#allocation18_spill] sm:$0xff] %v5849_v53  ;;  %v125_v57 = vmul.f32 %v5851_v4, %v5638_v54  ;;  %v129_v2 = vmul.f32 %v5851_v4, %v5654_v63  ;;  %v133_v13 = vmul.f32 %v5851_v4, %v5640_v55  ;;  %v137_v44 = vmul.f32 %v5851_v4, %v5646_v59 }
  0x80   :  { %9014 = vst [vmem:[#allocation19_spill] sm:$0xff] %v5851_v4  ;;  %v145_v32 = vmul.f32 %v5851_v4, %v5650_v61  ;;  %v227_v0 = vmul.f32 %v5849_v53, %v5650_v61 }
  0x81   :  { %9015 = vst [vmem:[#allocation20_spill] sm:$0xff] %v5854_v5  ;;  %v275_v35 = vadd.f32 %v211_v6, %v125_v57  ;;  %v279_v36 = vadd.f32 %v215_v7, %v129_v2  ;;  %v283_v49 = vadd.f32 %v219_v47, %v133_v13  ;;  %v287_v45 = vadd.f32 %v223_v1, %v137_v44 }
  0x82   :  { %9016 = vst [vmem:[#allocation21_spill] sm:$0xff] %v5862_v56  ;;  %v141_v56 = vmul.f32 %v5851_v4, %v5648_v60  ;;  %v231_v5 = vmul.f32 %v5849_v53, %v5652_v62  ;;  %4066 = vperm.xlu2 %4679, %v4060_v12   ;;  %v5904_v2 = vadd.f32 %v5686_v9, %v294_v3 }
  0x83   :  { %v5898_v48 = vadd.f32 %v5682_v8, %v275_v35  ;;  %v5901_v57 = vadd.f32 %v5700_v14, %v279_v36  ;;  %v157_v6 = vmul.f32 %v5851_v4, %v5753_v28  ;;  %4081 = vperm.xlu1 %4678, %v4063_v58   ;;  %v5909_v1 = vadd.f32 %v5704_v15, %v283_v49 }
  0x84   :  { %4076 = vperm.xlu0 %4677, %v4062_v37   ;;  %v5912_v7 = vadd.f32 %v5708_v16, %v287_v45  ;;  %v291_v12 = vadd.f32 %v227_v0, %v141_v56  ;;  %v9017_v8 = vrot.slane %v5636_v51, 4  ;;  %v295_v14 = vadd.f32 %v231_v5, %v145_v32 }
  0x85   :  { %v161_v9 = vmul.f32 %v5851_v4, %v5718_v19  ;;  %v243_v36 = vmul.f32 %v5849_v53, %v5718_v19  ;;  %v247_v37 = vmul.f32 %v5849_v53, %v5688_v10  ;;  %v5924_v58 = vpop.permute.xlu1 %109  ;;  %v306_v16 = vadd.f32 %v242_v33, %v156_v50 }
  0x86   :  { %v5916_v35 = vperm.slane %v9017_v8, 0  ;;  %9019 = vst [vmem:[#allocation23_spill] sm:$0xff] %v5924_v58  ;;  %v5926_v15 = vpop.permute.xlu0 %104  ;;  %v5929_v0 = vadd.f32 %v5712_v17, %v291_v12  ;;  %v310_v45 = vadd.f32 %v246_v42, %v160_v52  ;;  %v5933_v32 = vmul.f32 %v5759_v30, %v5688_v10  ;;  %v4061_v42 = vld [vmem:[%s8809_s7 + $0x8] sm:$0xff] }
  0x87   :  { %9020 = vst [vmem:[#allocation24_spill] sm:$0xff] %v5926_v15  ;;  %v122_v3 = vmul.f32 %v5926_v15, %v5638_v54  ;;  %v123_v49 = vmul.f32 %v5924_v58, %v5638_v54  ;;  %v126_v5 = vmul.f32 %v5926_v15, %v5654_v63  ;;  %v127_v56 = vmul.f32 %v5924_v58, %v5654_v63  ;;  %v4126_v54 = vld [vmem:[%s8811_s9] sm:$0xf] }
  0x88   :  { %9018 = vst [vmem:[#allocation22_spill] sm:$0xff] %v5916_v35  ;;  %v130_v17 = vmul.f32 %v5926_v15, %v5640_v55  ;;  %v131_v50 = vmul.f32 %v5924_v58, %v5640_v55  ;;  %v134_v52 = vmul.f32 %v5926_v15, %v5646_v59  ;;  %v135_v33 = vmul.f32 %v5924_v58, %v5646_v59 }
  0x89   :  { %v272_v13 = vadd.f32 %v5730_v22, %v122_v3  ;;  %v276_v44 = vadd.f32 %v5734_v23, %v126_v5  ;;  %v5960_v47 = vadd.f32 %v5716_v18, %v295_v14  ;;  %v138_v12 = vmul.f32 %v5926_v15, %v5648_v60 }
  0x8a   :  { %v280_v8 = vadd.f32 %v5738_v24, %v130_v17  ;;  %v284_v53 = vadd.f32 %v5742_v25, %v134_v52  ;;  %v5968_v4 = vmul.f32 %v5924_v58, %v5648_v60  ;;  %v142_v35 = vmul.f32 %v5926_v15, %v5650_v61 }
  0x8b   :  { %v5974_v22 = vmul.f32 %v5924_v58, %v5650_v61  ;;  %v5977_v18 = vadd.f32 %v5746_v26, %v138_v12  ;;  %v307_v23 = vadd.f32 %v243_v36, %v157_v6  ;;  %v311_v14 = vadd.f32 %v247_v37, %v161_v9  ;;  %4129 = vperm.xlu1 %4678, %v4126_v54  }
  0x8c   :  { %4071 = vperm.xlu0 %4677, %v4061_v42   ;;  %v5980_v24 = vadd.f32 %v5750_v27, %v142_v35  ;;  %v5983_v25 = vadd.f32 %v5722_v20, %v306_v16  ;;  %v5986_v3 = vadd.f32 %v5726_v21, %v310_v45  ;;  %v9021_v5 = vrot.slane %v5636_v51, 5 }
  0x8d   :  { %v5993_v26 = vadd.f32 %v5757_v29, %v307_v23  ;;  %v5996_v6 = vadd.f32 %v5763_v31, %v311_v14  ;;  %v6000_v27 = vmul.f32 %v5926_v15, %v5753_v28  ;;  %v9023_v20 = vrot.slane %v5636_v51, 6  ;;  %v6006_v21 = vpop.permute.xlu1 %340 }
  0x8e   :  { %v5990_v17 = vperm.slane %v9021_v5, 0  ;;  %v6008_v9 = vpop.permute.xlu0 %195  ;;  %v6012_v36 = vmul.f32 %v5924_v58, %v5753_v28  ;;  %v6016_v29 = vmul.f32 %v5926_v15, %v5718_v19  ;;  %v6020_v31 = vmul.f32 %v5924_v58, %v5718_v19 }
  0x8f   :  { %v6004_v35 = vperm.slane %v9023_v20, 0  ;;  %v6024_v37 = vmul.f32 %v5759_v30, %v5690_v11  ;;  %v209_v16 = vmul.f32 %v6008_v9, %v5654_v63  ;;  %v213_v45 = vmul.f32 %v6008_v9, %v5640_v55 }
  0x90   :  { %9022 = vst [vmem:[#allocation25_spill] sm:$0xff] %v5990_v17  ;;  %v358_v52 = vmul.f32 %v6006_v21, %v5640_v55  ;;  %v362_v54 = vmul.f32 %v6006_v21, %v5646_v59  ;;  %v217_v42 = vmul.f32 %v6008_v9, %v5646_v59  ;;  %v221_v12 = vmul.f32 %v6008_v9, %v5648_v60  ;;  %v6042_v55 = vpop.permute.xlu2 %492  ;;  %v4640_v59 = vld [vmem:[%s8806_s4] sm:$0xff] }
  0x91   :  { %9024 = vst [vmem:[#allocation26_spill] sm:$0xff] %v6004_v35  ;;  %v366_v23 = vmul.f32 %v6006_v21, %v5648_v60  ;;  %v370_v63 = vmul.f32 %v6006_v21, %v5650_v61  ;;  %v273_v14 = vadd.f32 %v209_v16, %v123_v49  ;;  %v277_v5 = vadd.f32 %v213_v45, %v127_v56 }
  0x92   :  { %9025 = vst [vmem:[#allocation27_spill] sm:$0xff] %v6024_v37  ;;  %v422_v20 = vadd.f32 %v358_v52, %v272_v13  ;;  %v426_v28 = vadd.f32 %v362_v54, %v276_v44  ;;  %v281_v30 = vadd.f32 %v217_v42, %v131_v50  ;;  %v285_v58 = vadd.f32 %v221_v12, %v135_v33 }
  0x93   :  { %v430_v15 = vadd.f32 %v366_v23, %v280_v8  ;;  %v434_v35 = vadd.f32 %v370_v63, %v284_v53  ;;  %v423_v17 = vadd.f32 %v5777_v38, %v273_v14  ;;  %v9026_v49 = vrot.slane %v5636_v51, 7  ;;  %4229 = vmatmul.msk.bf16.vlgmr.msra.gmra.mxu0 %vm915_vm0, %v4640_v59 }
  0x94   :  { %v510_v60 = vadd.f32 %v6042_v55, %v422_v20  ;;  %v514_v37 = vadd.f32 %v6042_v55, %v426_v28  ;;  %v427_v13 = vadd.f32 %v5781_v39, %v277_v5  ;;  %v431_v50 = vadd.f32 %v5785_v40, %v281_v30 }
  0x95   :  { %v6052_v56 = vperm.slane %v9026_v49, 0  ;;  %v518_v53 = vadd.f32 %v6042_v55, %v430_v15  ;;  %v522_v33 = vadd.f32 %v6042_v55, %v434_v35  ;;  %v435_v38 = vadd.f32 %v5819_v34, %v285_v58  ;;  %v6059_v16 = vpop.permute.xlu1 %507 }
  0x96   :  { %v574_v44 = vmax.f32 %v510_v60, 0.0  ;;  %v578_v8 = vmax.f32 %v514_v37, 0.0  ;;  %v6061_v28 = vpop.permute.xlu0 %502  ;;  %v225_v30 = vmul.f32 %v6008_v9, %v5650_v61  ;;  %v229_v39 = vmul.f32 %v6008_v9, %v5652_v62  ;;  %v9027_v37 = vld [vmem:[#allocation16_spill] sm:$0xff] }
  0x97   :  { %v582_v51 = vmax.f32 %v518_v53, 0.0  ;;  %v586_v45 = vmax.f32 %v522_v33, 0.0  ;;  %v512_v40 = vadd.f32 %v6061_v28, %v5824_v41  ;;  %v513_v34 = vadd.f32 %v6059_v16, %v5898_v48  ;;  %v9028_v60 = vld [vmem:[#allocation20_spill] sm:$0xff] }
  0x98   :  { %v516_v58 = vadd.f32 %v6061_v28, %v5826_v43  ;;  %v517_v15 = vadd.f32 %v6059_v16, %v5901_v57  ;;  %v520_v35 = vadd.f32 %v6061_v28, %v5835_v46  ;;  %v521_v61 = vadd.f32 %v6059_v16, %v5909_v1 }
  0x99   :  { %v524_v52 = vadd.f32 %v6061_v28, %v9027_v37  ;;  %v525_v41 = vadd.f32 %v6059_v16, %v5912_v7  ;;  %v576_v54 = vmax.f32 %v512_v40, 0.0  ;;  %v577_v48 = vmax.f32 %v513_v34, 0.0 }
  0x9a   :  { %v580_v42 = vmax.f32 %v516_v58, 0.0  ;;  %v581_v12 = vmax.f32 %v517_v15, 0.0  ;;  %v584_v43 = vmax.f32 %v520_v35, 0.0  ;;  %v585_v23 = vmax.f32 %v521_v61, 0.0 }
  0x9b   :  { %v588_v63 = vmax.f32 %v524_v52, 0.0  ;;  %v589_v57 = vmax.f32 %v525_v41, 0.0  ;;  %v638_v46 = vmax.f32 %v574_v44, %v578_v8  ;;  %v642_v20 = vmax.f32 %v582_v51, %v586_v45 }
  0x9c   :  { %v640_v14 = vmax.f32 %v576_v54, %v580_v42  ;;  %v641_v5 = vmax.f32 %v577_v48, %v581_v12  ;;  %v528_v49 = vadd.f32 %v6061_v28, %v9028_v60  ;;  %v529_v7 = vadd.f32 %v6059_v16, %v5929_v0 }
  0x9d   :  { %v644_v59 = vmax.f32 %v584_v43, %v588_v63  ;;  %v645_v1 = vmax.f32 %v585_v23, %v589_v57  ;;  %v670_v40 = vpack.c.bf16 %v638_v46, %v638_v46  ;;  %v674_v34 = vpack.c.bf16 %v642_v20, %v642_v20  ;;  %v9029_v63 = vld [vmem:[#allocation9_spill] sm:$0xff]  ;;  %v9030_v46 = vld [vmem:[#allocation15_spill] sm:$0xff] }
  0x9e   :  { %v672_v53 = vpack.c.bf16 %v640_v14, %v640_v14  ;;  %v673_v33 = vpack.c.bf16 %v641_v5, %v641_v5  ;;  %v6088_v58 = vpop.permute.xlu0 %497  ;;  %v532_v44 = vadd.f32 %v6061_v28, %v5904_v2  ;;  %v533_v8 = vadd.f32 %v6059_v16, %v5960_v47 }
  0x9f   :  { %v676_v15 = vpack.c.bf16 %v644_v59, %v644_v59  ;;  %v677_v35 = vpack.c.bf16 %v645_v1, %v645_v1  ;;  %v511_v51 = vadd.f32 %v6088_v58, %v423_v17  ;;  %v515_v0 = vadd.f32 %v6088_v58, %v427_v13  ;;  %703 = vst.msk [vmem:[#allocation2] sm:$0xf] %vm702_vm1, %v670_v40  ;;  %v9031_v59 = vld [vmem:[#allocation17_spill] sm:$0xff] }
  0xa0   :  { %705 = vst.msk [vmem:[#allocation2 + $0x8] sm:$0xf] %vm702_vm1, %v672_v53  ;;  %v519_v45 = vadd.f32 %v6088_v58, %v431_v50  ;;  %v523_v61 = vadd.f32 %v6088_v58, %v435_v38  ;;  %v592_v37 = vmax.f32 %v528_v49, 0.0  ;;  %v593_v52 = vmax.f32 %v529_v7, 0.0 }
  0xa1   :  { %706 = vst.msk [vmem:[#allocation2 + $0xc] sm:$0xf] %vm702_vm1, %v673_v33  ;;  %v596_v41 = vmax.f32 %v532_v44, 0.0  ;;  %v597_v54 = vmax.f32 %v533_v8, 0.0  ;;  %v575_v2 = vmax.f32 %v511_v51, 0.0  ;;  %v579_v47 = vmax.f32 %v515_v0, 0.0 }
  0xa2   :  { %709 = vst.msk [vmem:[#allocation2 + $0x18] sm:$0xf] %vm702_vm1, %v676_v15  ;;  %v583_v48 = vmax.f32 %v519_v45, 0.0  ;;  %v587_v42 = vmax.f32 %v523_v61, 0.0  ;;  %v289_v50 = vadd.f32 %v225_v30, %v5968_v4  ;;  %v293_v38 = vadd.f32 %v229_v39, %v5974_v22  ;;  %v4641_v22 = vld [vmem:[%s8806_s4 + $0x8] sm:$0xff] }
  0xa3   :  { %710 = vst.msk [vmem:[#allocation2 + $0x1c] sm:$0xf] %vm702_vm1, %v677_v35  ;;  %v648_v17 = vmax.f32 %v592_v37, %v596_v41  ;;  %v649_v13 = vmax.f32 %v593_v52, %v597_v54  ;;  %v639_v12 = vmax.f32 %v575_v2, %v579_v47  ;;  %v374_v23 = vmul.f32 %v6006_v21, %v5652_v62  ;;  %v9032_v52 = vld [vmem:[#allocation12_spill] sm:$0xff] }
  0xa4   :  { %v643_v43 = vmax.f32 %v583_v48, %v587_v42  ;;  %v378_v57 = vmul.f32 %v6006_v21, %v9029_v63  ;;  %707 = vst.msk [vmem:[#allocation2 + $0x10] sm:$0xf] %vm702_vm1, %v674_v34  ;;  %v439_v20 = vadd.f32 %v9030_v46, %v289_v50  ;;  %v443_v4 = vadd.f32 %v9031_v59, %v293_v38  ;;  %v9033_v48 = vld [vmem:[#allocation21_spill] sm:$0xff]  ;;  %v9035_v46 = vld [vmem:[#allocation22_spill] sm:$0xff] }
  0xa5   :  { %v680_v14 = vpack.c.bf16 %v648_v17, %v648_v17  ;;  %v681_v5 = vpack.c.bf16 %v649_v13, %v649_v13  ;;  %v671_v30 = vpack.c.bf16 %v639_v12, %v639_v12  ;;  %v438_v1 = vadd.f32 %v374_v23, %v5977_v18  ;;  %4230 = vmatmul.msk.bf16.gmra.mxu0 %vm915_vm0, %v4641_v22 }
  0xa6   :  { %v675_v39 = vpack.c.bf16 %v643_v43, %v643_v43  ;;  %v442_v60 = vadd.f32 %v378_v57, %v5980_v24  ;;  %v527_v49 = vadd.f32 %v6088_v58, %v439_v20  ;;  %v531_v7 = vadd.f32 %v6088_v58, %v443_v4  ;;  %v9036_v20 = vld [vmem:[#allocation14_spill] sm:$0xff] }
  0xa7   :  { %713 = vst.msk [vmem:[#allocation2 + $0x28] sm:$0xf] %vm702_vm1, %v680_v14  ;;  %v544_v53 = vadd.f32 %v6061_v28, %v5983_v25  ;;  %v545_v33 = vadd.f32 %v6059_v16, %v5993_v26  ;;  %v526_v34 = vadd.f32 %v6042_v55, %v438_v1  ;;  %v548_v24 = vadd.f32 %v6061_v28, %v5986_v3  ;;  %v6156_v4 = vld [vmem:[%s8805_s3] sm:$0xff] }
  0xa8   :  { %v4657_v40 = vld [vmem:[#allocation2 + $0x8] sm:$0xff]  ;;  %704 = vst.msk [vmem:[#allocation2 + $0x4] sm:$0xf] %vm702_vm1, %v671_v30  ;;  %v530_v18 = vadd.f32 %v6042_v55, %v442_v60  ;;  %v549_v15 = vadd.f32 %v6059_v16, %v5996_v6  ;;  %v591_v35 = vmax.f32 %v527_v49, 0.0  ;;  %v595_v25 = vmax.f32 %v531_v7, 0.0  ;;  %v9038_v1 = vld [vmem:[#allocation25_spill] sm:$0xff] }
  0xa9   :  { %708 = vst.msk [vmem:[#allocation2 + $0x14] sm:$0xf] %vm702_vm1, %v675_v39  ;;  %v608_v44 = vmax.f32 %v544_v53, 0.0  ;;  %v609_v8 = vmax.f32 %v545_v33, 0.0  ;;  %1200 = vmatpush.bf16.msra.mxu1 %v4657_v40  ;;  %v590_v51 = vmax.f32 %v526_v34, 0.0  ;;  %v612_v45 = vmax.f32 %v548_v24, 0.0 }
  0xaa   :  { %v4659_v26 = vld [vmem:[#allocation2 + $0x18] sm:$0xff]  ;;  %714 = vst.msk [vmem:[#allocation2 + $0x2c] sm:$0xf] %vm702_vm1, %v681_v5  ;;  %v594_v0 = vmax.f32 %v530_v18, 0.0  ;;  %v241_v3 = vmul.f32 %v6008_v9, %v5718_v19  ;;  %v647_v61 = vmax.f32 %v591_v35, %v595_v25  ;;  %v613_v6 = vmax.f32 %v549_v15, 0.0  ;;  %v9037_v30 = vld [vmem:[#allocation19_spill] sm:$0xff] }
  0xab   :  { %v245_v37 = vmul.f32 %v6008_v9, %v5688_v10  ;;  %v304_v41 = vadd.f32 %v9032_v52, %v6000_v27  ;;  %1711 = vmatpush.bf16.msrb.mxu3 %v4659_v26  ;;  %v656_v2 = vmax.f32 %v608_v44, %v612_v45  ;;  %v308_v42 = vadd.f32 %v9033_v48, %v6016_v29  ;;  %v9034_v29 = vld [vmem:[#allocation27_spill] sm:$0xff]  ;;  %v9039_v18 = vld [vmem:[#allocation13_spill] sm:$0xff]  ;;  %v9040_v15 = vld [vmem:[#allocation18_spill] sm:$0xff] }
  0xac   :  { %v646_v54 = vmax.f32 %v590_v51, %v594_v0  ;;  %v305_v47 = vadd.f32 %v241_v3, %v6012_v36  ;;  %v679_v17 = vpack.c.bf16 %v647_v61, %v647_v61  ;;  %v657_v13 = vmax.f32 %v609_v8, %v613_v6  ;;  %v9041_v8 = vld [vmem:[#allocation26_spill] sm:$0xff]  ;;  %v4642_v52 = vld [vmem:[%s8806_s4 + $0x10] sm:$0xff] }
  0xad   :  { %v309_v50 = vadd.f32 %v245_v37, %v6020_v31  ;;  %v390_v38 = vmul.f32 %v6006_v21, %v5688_v10  ;;  %v688_v43 = vpack.c.bf16 %v656_v2, %v656_v2  ;;  %v394_v27 = vmul.f32 %v6006_v21, %v5690_v11  ;;  %v9042_v61 = vld [vmem:[#allocation6_spill] sm:$0xff]  ;;  %v9043_v2 = vld [vmem:[#allocation7_spill] sm:$0xff] }
  0xae   :  { %v678_v12 = vpack.c.bf16 %v646_v54, %v646_v54  ;;  %v455_v23 = vadd.f32 %v5933_v32, %v305_v47  ;;  %712 = vst.msk [vmem:[#allocation2 + $0x24] sm:$0xf] %vm702_vm1, %v679_v17  ;;  %v689_v36 = vpack.c.bf16 %v657_v13, %v657_v13  ;;  %v172_v31 = vmul.f32 %v9036_v20, %v9035_v46 }
  0xaf   :  { %v4656_v57 = vld [vmem:[#allocation2] sm:$0xff]  ;;  %v454_v14 = vadd.f32 %v390_v38, %v304_v41  ;;  %v459_v5 = vadd.f32 %v9034_v29, %v309_v50  ;;  %v458_v22 = vadd.f32 %v394_v27, %v308_v42  ;;  %v173_v39 = vmul.f32 %v9037_v30, %v9035_v46  ;;  %721 = vst.msk [vmem:[#allocation2 + $0x48] sm:$0xf] %vm702_vm1, %v688_v43  ;;  %v9044_v43 = vld [vmem:[#allocation24_spill] sm:$0xff] }
  0xb0   :  { %v4658_v59 = vld [vmem:[#allocation2 + $0x10] sm:$0xff]  ;;  %711 = vst.msk [vmem:[#allocation2 + $0x20] sm:$0xf] %vm702_vm1, %v678_v12  ;;  %v543_v32 = vadd.f32 %v6088_v58, %v455_v23  ;;  %v176_v60 = vmul.f32 %v9036_v20, %v9038_v1  ;;  %1201 = vmatpush.bf16.msra.mxu1 %v4656_v57  ;;  %v177_v33 = vmul.f32 %v9037_v30, %v9038_v1 }
  0xb1   :  { %v4661_v49 = vld [vmem:[#allocation2 + $0x28] sm:$0xff]  ;;  %v542_v7 = vadd.f32 %v6042_v55, %v454_v14  ;;  %v547_v53 = vadd.f32 %v6088_v58, %v459_v5  ;;  %1712 = vmatpush.bf16.msrb.mxu3 %v4658_v59  ;;  %722 = vst.msk [vmem:[#allocation2 + $0x4c] sm:$0xf] %vm702_vm1, %v689_v36  ;;  %v546_v40 = vadd.f32 %v6042_v55, %v458_v22 }
  0xb2   :  { %v607_v34 = vmax.f32 %v543_v32, 0.0  ;;  %v258_v24 = vmul.f32 %v9039_v18, %v9038_v1  ;;  %v259_v35 = vmul.f32 %v9040_v15, %v9038_v1  ;;  %v262_v26 = vmul.f32 %v9039_v18, %v9041_v8  ;;  %v9045_v23 = vld [vmem:[#allocation23_spill] sm:$0xff] }
  0xb3   :  { %v606_v25 = vmax.f32 %v542_v7, 0.0  ;;  %v611_v44 = vmax.f32 %v547_v53, 0.0  ;;  %v263_v51 = vmul.f32 %v9040_v15, %v9041_v8  ;;  %4317 = vmatmul.msk.bf16.vlgmr.msra.gmra.mxu1 %vm1145_vm2, %v6156_v4  ;;  %v610_v0 = vmax.f32 %v546_v40, 0.0  ;;  %v9046_v7 = vld [vmem:[#allocation8_spill] sm:$0xff] }
  0xb4   :  { %2062 = vmatpush.bf16.msrb.mxu1 %v4661_v49  ;;  %v322_v45 = vadd.f32 %v258_v24, %v172_v31  ;;  %v323_v3 = vadd.f32 %v259_v35, %v173_v39  ;;  %v408_v6 = vmul.f32 %v9042_v61, %v9041_v8  ;;  %v326_v41 = vadd.f32 %v262_v26, %v176_v60 }
  0xb5   :  { %v655_v37 = vmax.f32 %v607_v34, %v611_v44  ;;  %v327_v54 = vadd.f32 %v263_v51, %v177_v33  ;;  %v409_v47 = vmul.f32 %v9043_v2, %v9041_v8  ;;  %v654_v48 = vmax.f32 %v606_v25, %v610_v0  ;;  %4231 = vmatmul.msk.bf16.gmra.mxu0 %vm915_vm0, %v4642_v52 }
  0xb6   :  { %v412_v42 = vmul.f32 %v9042_v61, %v6052_v56  ;;  %v413_v17 = vmul.f32 %v9043_v2, %v6052_v56  ;;  %v472_v13 = vadd.f32 %v408_v6, %v322_v45  ;;  %v170_v27 = vmul.f32 %v9044_v43, %v9035_v46 }
  0xb7   :  { %v4660_v50 = vld [vmem:[#allocation2 + $0x20] sm:$0xff]  ;;  %v687_v38 = vpack.c.bf16 %v655_v37, %v655_v37  ;;  %v473_v12 = vadd.f32 %v409_v47, %v323_v3  ;;  %v171_v57 = vmul.f32 %v9045_v23, %v9035_v46  ;;  %v686_v36 = vpack.c.bf16 %v654_v48, %v654_v48  ;;  %v9047_v3 = vld [vmem:[#allocation11_spill] sm:$0xff] }
  0xb8   :  { %v476_v14 = vadd.f32 %v412_v42, %v326_v41  ;;  %v477_v29 = vadd.f32 %v413_v17, %v327_v54  ;;  %v560_v5 = vadd.f32 %v6061_v28, %v472_v13  ;;  %2063 = vmatpush.bf16.msrb.mxu1 %v4660_v50  ;;  %v4665_v31 = vld [vmem:[#allocation2 + $0x48] sm:$0xff]  ;;  %v174_v22 = vmul.f32 %v9044_v43, %v9038_v1 }
  0xb9   :  { %720 = vst.msk [vmem:[#allocation2 + $0x44] sm:$0xf] %vm702_vm1, %v687_v38  ;;  %v561_v59 = vadd.f32 %v6059_v16, %v473_v12  ;;  %v175_v32 = vmul.f32 %v9045_v23, %v9038_v1  ;;  %v256_v53 = vmul.f32 %v9046_v7, %v9038_v1  ;;  %v257_v40 = vmul.f32 %v6008_v9, %v9038_v1  ;;  %v6230_v13 = vld [vmem:[%s8805_s3 + $0x8] sm:$0xff] }
  0xba   :  { %719 = vst.msk [vmem:[#allocation2 + $0x40] sm:$0xf] %vm702_vm1, %v686_v36  ;;  %v564_v39 = vadd.f32 %v6061_v28, %v476_v14  ;;  %v565_v60 = vadd.f32 %v6059_v16, %v477_v29  ;;  %v624_v49 = vmax.f32 %v560_v5, 0.0  ;;  %v260_v34 = vmul.f32 %v9046_v7, %v9041_v8 }
  0xbb   :  { %v625_v33 = vmax.f32 %v561_v59, 0.0  ;;  %v261_v24 = vmul.f32 %v6008_v9, %v9041_v8  ;;  %v320_v44 = vadd.f32 %v256_v53, %v170_v27  ;;  %v406_v26 = vmul.f32 %v6006_v21, %v9041_v8 }
  0xbc   :  { %2764 = vmatpush.bf16.msra.mxu1 %v4665_v31  ;;  %v628_v35 = vmax.f32 %v564_v39, 0.0  ;;  %v629_v25 = vmax.f32 %v565_v60, 0.0  ;;  %v321_v51 = vadd.f32 %v257_v40, %v171_v57  ;;  %v324_v0 = vadd.f32 %v260_v34, %v174_v22 }
  0xbd   :  { %v325_v45 = vadd.f32 %v261_v24, %v175_v32  ;;  %v407_v6 = vmul.f32 %v9047_v3, %v9041_v8  ;;  %v410_v41 = vmul.f32 %v6006_v21, %v6052_v56  ;;  %v411_v54 = vmul.f32 %v9047_v3, %v6052_v56 }
  0xbe   :  { %v664_v37 = vmax.f32 %v624_v49, %v628_v35  ;;  %v665_v52 = vmax.f32 %v625_v33, %v629_v25  ;;  %v470_v47 = vadd.f32 %v406_v26, %v320_v44  ;;  %v148_v42 = vmul.f32 %v9036_v20, %v5652_v62  ;;  %v9048_v49 = vld [vmem:[#allocation10_spill] sm:$0xff]  ;;  %v4643_v25 = vld [vmem:[%s8806_s4 + $0x18] sm:$0xff] }
  0xbf   :  { %v471_v48 = vadd.f32 %v407_v6, %v321_v51  ;;  %v149_v17 = vmul.f32 %v9037_v30, %v5652_v62  ;;  %v474_v12 = vadd.f32 %v410_v41, %v324_v0  ;;  %v475_v27 = vadd.f32 %v411_v54, %v325_v45 }
  0xc0   :  { %v696_v50 = vpack.c.bf16 %v664_v37, %v664_v37  ;;  %v697_v38 = vpack.c.bf16 %v665_v52, %v665_v52  ;;  %v558_v36 = vadd.f32 %v6042_v55, %v470_v47  ;;  %v152_v29 = vmul.f32 %v9036_v20, %v9029_v63 }
  0xc1   :  { %v4664_v57 = vld [vmem:[#allocation2 + $0x40] sm:$0xff]  ;;  %v559_v14 = vadd.f32 %v6088_v58, %v471_v48  ;;  %v153_v5 = vmul.f32 %v9037_v30, %v9029_v63  ;;  %v562_v31 = vadd.f32 %v6042_v55, %v474_v12  ;;  %v563_v59 = vadd.f32 %v6088_v58, %v475_v27 }
  0xc2   :  { %729 = vst.msk [vmem:[#allocation2 + $0x68] sm:$0xf] %vm702_vm1, %v696_v50  ;;  %v234_v22 = vmul.f32 %v9039_v18, %v9029_v63  ;;  %v235_v32 = vmul.f32 %v9040_v15, %v9029_v63  ;;  %2765 = vmatpush.bf16.msra.mxu1 %v4664_v57  ;;  %v622_v39 = vmax.f32 %v558_v36, 0.0  ;;  %v238_v53 = vmul.f32 %v9039_v18, %v9048_v49 }
  0xc3   :  { %730 = vst.msk [vmem:[#allocation2 + $0x6c] sm:$0xf] %vm702_vm1, %v697_v38  ;;  %v623_v60 = vmax.f32 %v559_v14, 0.0  ;;  %v239_v33 = vmul.f32 %v9040_v15, %v9048_v49  ;;  %4318 = vmatmul.msk.bf16.gmra.mxu1 %vm1145_vm2, %v6230_v13  ;;  %v626_v40 = vmax.f32 %v562_v31, 0.0  ;;  %v627_v34 = vmax.f32 %v563_v59, 0.0 }
  0xc4   :  { %v298_v24 = vadd.f32 %v234_v22, %v148_v42  ;;  %v299_v35 = vadd.f32 %v235_v32, %v149_v17  ;;  %v302_v44 = vadd.f32 %v238_v53, %v152_v29  ;;  %v384_v51 = vmul.f32 %v9042_v61, %v9048_v49 }
  0xc5   :  { %v303_v26 = vadd.f32 %v239_v33, %v153_v5  ;;  %v385_v0 = vmul.f32 %v9043_v2, %v9048_v49  ;;  %v662_v45 = vmax.f32 %v622_v39, %v626_v40  ;;  %v663_v6 = vmax.f32 %v623_v60, %v627_v34  ;;  %4232 = vmatmul.msk.bf16.gmra.mxu0 %vm915_vm0, %v4643_v25 }
  0xc6   :  { %v388_v37 = vmul.f32 %v9042_v61, %v5718_v19  ;;  %v389_v52 = vmul.f32 %v9043_v2, %v5718_v19  ;;  %v448_v41 = vadd.f32 %v384_v51, %v298_v24  ;;  %v146_v47 = vmul.f32 %v9044_v43, %v5652_v62 }
  0xc7   :  { %v449_v54 = vadd.f32 %v385_v0, %v299_v35  ;;  %v147_v48 = vmul.f32 %v9045_v23, %v5652_v62  ;;  %v694_v42 = vpack.c.bf16 %v662_v45, %v662_v45  ;;  %v695_v17 = vpack.c.bf16 %v663_v6, %v663_v6 }
  0xc8   :  { %v452_v50 = vadd.f32 %v388_v37, %v302_v44  ;;  %v453_v38 = vadd.f32 %v389_v52, %v303_v26  ;;  %v536_v12 = vadd.f32 %v6061_v28, %v448_v41  ;;  %v150_v57 = vmul.f32 %v9044_v43, %v9029_v63 }
  0xc9   :  { %v537_v27 = vadd.f32 %v6059_v16, %v449_v54  ;;  %v151_v36 = vmul.f32 %v9045_v23, %v9029_v63  ;;  %727 = vst.msk [vmem:[#allocation2 + $0x60] sm:$0xf] %vm702_vm1, %v694_v42  ;;  %v232_v29 = vmul.f32 %v9046_v7, %v9029_v63  ;;  %v233_v5 = vmul.f32 %v6008_v9, %v9029_v63 }
  0xca   :  { %v540_v62 = vadd.f32 %v6061_v28, %v452_v50  ;;  %v541_v14 = vadd.f32 %v6059_v16, %v453_v38  ;;  %728 = vst.msk [vmem:[#allocation2 + $0x64] sm:$0xf] %vm702_vm1, %v695_v17  ;;  %v600_v31 = vmax.f32 %v536_v12, 0.0  ;;  %v236_v22 = vmul.f32 %v9046_v7, %v9048_v49 }
  0xcb   :  { %v601_v59 = vmax.f32 %v537_v27, 0.0  ;;  %v237_v32 = vmul.f32 %v6008_v9, %v9048_v49  ;;  %v296_v53 = vadd.f32 %v232_v29, %v146_v47  ;;  %v297_v33 = vadd.f32 %v233_v5, %v147_v48 }
  0xcc   :  { %v604_v39 = vmax.f32 %v540_v62, 0.0  ;;  %v605_v60 = vmax.f32 %v541_v14, 0.0  ;;  %v300_v40 = vadd.f32 %v236_v22, %v150_v57  ;;  %v382_v24 = vmul.f32 %v6006_v21, %v9048_v49 }
  0xcd   :  { %v301_v34 = vadd.f32 %v237_v32, %v151_v36  ;;  %v383_v63 = vmul.f32 %v9047_v3, %v9048_v49  ;;  %v386_v44 = vmul.f32 %v6006_v21, %v5718_v19  ;;  %v387_v26 = vmul.f32 %v9047_v3, %v5718_v19  ;;  %v6301_v49 = vld [vmem:[%s8805_s3 + $0x10] sm:$0xff] }
  0xce   :  { %v652_v35 = vmax.f32 %v600_v31, %v604_v39  ;;  %v653_v25 = vmax.f32 %v601_v59, %v605_v60  ;;  %v446_v51 = vadd.f32 %v382_v24, %v296_v53  ;;  %v164_v45 = vmul.f32 %v9036_v20, %v5688_v10  ;;  %v4644_v59 = vld [vmem:[%s8806_s4 + $0x20] sm:$0xff] }
  0xcf   :  { %v447_v0 = vadd.f32 %v383_v63, %v297_v33  ;;  %v165_v6 = vmul.f32 %v9037_v30, %v5688_v10  ;;  %v450_v41 = vadd.f32 %v386_v44, %v300_v40  ;;  %v451_v54 = vadd.f32 %v387_v26, %v301_v34 }
  0xd0   :  { %v684_v37 = vpack.c.bf16 %v652_v35, %v652_v35  ;;  %v685_v52 = vpack.c.bf16 %v653_v25, %v653_v25  ;;  %v534_v47 = vadd.f32 %v6042_v55, %v446_v51  ;;  %v168_v48 = vmul.f32 %v9036_v20, %v5690_v11 }
  0xd1   :  { %v535_v19 = vadd.f32 %v6088_v58, %v447_v0  ;;  %v169_v42 = vmul.f32 %v9037_v30, %v5690_v11  ;;  %v538_v17 = vadd.f32 %v6042_v55, %v450_v41  ;;  %v539_v50 = vadd.f32 %v6088_v58, %v451_v54 }
  0xd2   :  { %717 = vst.msk [vmem:[#allocation2 + $0x38] sm:$0xf] %vm702_vm1, %v684_v37  ;;  %v250_v38 = vmul.f32 %v9039_v18, %v5690_v11  ;;  %v251_v12 = vmul.f32 %v9040_v15, %v5690_v11  ;;  %v598_v27 = vmax.f32 %v534_v47, 0.0  ;;  %v254_v36 = vmul.f32 %v9039_v18, %v9035_v46 }
  0xd3   :  { %718 = vst.msk [vmem:[#allocation2 + $0x3c] sm:$0xf] %vm702_vm1, %v685_v52  ;;  %v599_v57 = vmax.f32 %v535_v19, 0.0  ;;  %v255_v62 = vmul.f32 %v9040_v15, %v9035_v46  ;;  %4319 = vmatmul.msk.bf16.gmra.mxu1 %vm1145_vm2, %v6301_v49  ;;  %v602_v14 = vmax.f32 %v538_v17, 0.0  ;;  %v603_v29 = vmax.f32 %v539_v50, 0.0 }
  0xd4   :  { %v314_v5 = vadd.f32 %v250_v38, %v164_v45  ;;  %v315_v31 = vadd.f32 %v251_v12, %v165_v6  ;;  %v318_v22 = vadd.f32 %v254_v36, %v168_v48  ;;  %v400_v39 = vmul.f32 %v9042_v61, %v9035_v46 }
  0xd5   :  { %v319_v32 = vadd.f32 %v255_v62, %v169_v42  ;;  %v401_v60 = vmul.f32 %v9043_v2, %v9035_v46  ;;  %v650_v53 = vmax.f32 %v598_v27, %v602_v14  ;;  %v651_v33 = vmax.f32 %v599_v57, %v603_v29  ;;  %4233 = vmatmul.msk.bf16.gmra.mxu0 %vm915_vm0, %v4644_v59  ;;  %v39_v57 = vld [vmem:[%s8802_s0 + $0x10] sm:$0x3] }
  0xd6   :  { %v404_v40 = vmul.f32 %v9042_v61, %v9038_v1  ;;  %v405_v34 = vmul.f32 %v9043_v2, %v9038_v1  ;;  %v464_v24 = vadd.f32 %v400_v39, %v314_v5  ;;  %v162_v35 = vmul.f32 %v9044_v43, %v5688_v10 }
  0xd7   :  { %v465_v63 = vadd.f32 %v401_v60, %v315_v31  ;;  %v163_v25 = vmul.f32 %v9045_v23, %v5688_v10  ;;  %v682_v44 = vpack.c.bf16 %v650_v53, %v650_v53  ;;  %v683_v26 = vpack.c.bf16 %v651_v33, %v651_v33  ;;  %v6373_v53 = vld [vmem:[%s8805_s3 + $0x18] sm:$0xff] }
  0xd8   :  { %v468_v51 = vadd.f32 %v404_v40, %v318_v22  ;;  %v469_v0 = vadd.f32 %v405_v34, %v319_v32  ;;  %v552_v45 = vadd.f32 %v6061_v28, %v464_v24  ;;  %v166_v37 = vmul.f32 %v9044_v43, %v5690_v11 }
  0xd9   :  { %v553_v6 = vadd.f32 %v6059_v16, %v465_v63  ;;  %v167_v52 = vmul.f32 %v9045_v23, %v5690_v11  ;;  %715 = vst.msk [vmem:[#allocation2 + $0x30] sm:$0xf] %vm702_vm1, %v682_v44  ;;  %v248_v54 = vmul.f32 %v9046_v7, %v5690_v11  ;;  %v249_v47 = vmul.f32 %v6008_v9, %v5690_v11 }
  0xda   :  { %v556_v10 = vadd.f32 %v6061_v28, %v468_v51  ;;  %v557_v41 = vadd.f32 %v6059_v16, %v469_v0  ;;  %716 = vst.msk [vmem:[#allocation2 + $0x34] sm:$0xf] %vm702_vm1, %v683_v26  ;;  %v616_v19 = vmax.f32 %v552_v45, 0.0  ;;  %v252_v42 = vmul.f32 %v9046_v7, %v9035_v46 }
  0xdb   :  { %v617_v48 = vmax.f32 %v553_v6, 0.0  ;;  %v253_v17 = vmul.f32 %v6008_v9, %v9035_v46  ;;  %v312_v12 = vadd.f32 %v248_v54, %v162_v35  ;;  %v313_v27 = vadd.f32 %v249_v47, %v163_v25 }
  0xdc   :  { %v620_v50 = vmax.f32 %v556_v10, 0.0  ;;  %v621_v38 = vmax.f32 %v557_v41, 0.0  ;;  %v316_v36 = vadd.f32 %v252_v42, %v166_v37  ;;  %v398_v62 = vmul.f32 %v6006_v21, %v9035_v46  ;;  %v6398_v41 = vld [vmem:[%s8806_s4 + $0x28] sm:$0xff] }
  0xdd   :  { %v317_v11 = vadd.f32 %v253_v17, %v167_v52  ;;  %v399_v14 = vmul.f32 %v9047_v3, %v9035_v46  ;;  %v402_v31 = vmul.f32 %v6006_v21, %v9038_v1  ;;  %v403_v59 = vmul.f32 %v9047_v3, %v9038_v1  ;;  %9049 = vst [vmem:[#allocation16_spill] sm:$0xff] %v6398_v41 }
  0xde   :  { %v660_v29 = vmax.f32 %v616_v19, %v620_v50  ;;  %v661_v5 = vmax.f32 %v617_v48, %v621_v38  ;;  %v462_v22 = vadd.f32 %v398_v62, %v312_v12  ;;  %v69_v39 = vrot.slane %v39_v57, 1 }
  0xdf   :  { %v463_v32 = vadd.f32 %v399_v14, %v313_v27  ;;  %v180_v60 = vmul.f32 %v9036_v20, %v9041_v8  ;;  %v466_v40 = vadd.f32 %v402_v31, %v316_v36  ;;  %v467_v34 = vadd.f32 %v403_v59, %v317_v11 }
  0xe0   :  { %v692_v46 = vpack.c.bf16 %v660_v29, %v660_v29  ;;  %v693_v33 = vpack.c.bf16 %v661_v5, %v661_v5  ;;  %v550_v24 = vadd.f32 %v6042_v55, %v462_v22  ;;  %v181_v1 = vmul.f32 %v9037_v30, %v9041_v8 }
  0xe1   :  { %v551_v63 = vadd.f32 %v6088_v58, %v463_v32  ;;  %v184_v35 = vmul.f32 %v9036_v20, %v6052_v56  ;;  %v554_v25 = vadd.f32 %v6042_v55, %v466_v40  ;;  %v555_v44 = vadd.f32 %v6088_v58, %v467_v34 }
  0xe2   :  { %725 = vst.msk [vmem:[#allocation2 + $0x58] sm:$0xf] %vm702_vm1, %v692_v46  ;;  %v185_v26 = vmul.f32 %v9037_v30, %v6052_v56  ;;  %v186_v51 = vperm.slane %v39_v57, 0  ;;  %v614_v0 = vmax.f32 %v550_v24, 0.0  ;;  %v266_v6 = vmul.f32 %v9039_v18, %v6052_v56 }
  0xe3   :  { %726 = vst.msk [vmem:[#allocation2 + $0x5c] sm:$0xf] %vm702_vm1, %v693_v33  ;;  %v615_v45 = vmax.f32 %v551_v63, 0.0  ;;  %v267_v20 = vmul.f32 %v9040_v15, %v6052_v56  ;;  %4320 = vmatmul.msk.bf16.gmra.mxu1 %vm1145_vm2, %v6373_v53  ;;  %v618_v37 = vmax.f32 %v554_v25, 0.0  ;;  %v619_v52 = vmax.f32 %v555_v44, 0.0 }
  0xe4   :  { %v270_v10 = vmul.f32 %v9039_v18, %v186_v51  ;;  %v271_v30 = vmul.f32 %v9040_v15, %v186_v51  ;;  %v330_v54 = vadd.f32 %v266_v6, %v180_v60  ;;  %v336_v19 = vperm.slane %v69_v39, 0 }
  0xe5   :  { %v331_v47 = vadd.f32 %v267_v20, %v181_v1  ;;  %v416_v48 = vmul.f32 %v9042_v61, %v186_v51  ;;  %v658_v42 = vmax.f32 %v614_v0, %v618_v37  ;;  %v659_v17 = vmax.f32 %v615_v45, %v619_v52  ;;  %4234 = vmatmul.msk.bf16.gmra.mxu0 %vm915_vm0, %v6398_v41 }
  0xe6   :  { %v334_v50 = vadd.f32 %v270_v10, %v184_v35  ;;  %v335_v38 = vadd.f32 %v271_v30, %v185_v26  ;;  %v417_v12 = vmul.f32 %v9043_v2, %v186_v51  ;;  %v420_v18 = vmul.f32 %v9042_v61, %v336_v19 }
  0xe7   :  { %v421_v15 = vmul.f32 %v9043_v2, %v336_v19  ;;  %v480_v27 = vadd.f32 %v416_v48, %v330_v54  ;;  %v690_v57 = vpack.c.bf16 %v658_v42, %v658_v42  ;;  %v691_v36 = vpack.c.bf16 %v659_v17, %v659_v17  ;;  %v6446_v54 = vld [vmem:[%s8806_s4 + $0x30] sm:$0xff]  ;;  %v6455_v42 = vld [vmem:[%s8805_s3 + $0x28] sm:$0xff]  ;;  %v6462_v17 = vld [vmem:[%s8806_s4 + $0x38] sm:$0xff] }
  0xe8   :  { %v178_v11 = vmul.f32 %v9044_v43, %v9041_v8  ;;  %v179_v62 = vmul.f32 %v9045_v23, %v9041_v8  ;;  %v481_v14 = vadd.f32 %v417_v12, %v331_v47  ;;  %v484_v29 = vadd.f32 %v420_v18, %v334_v50  ;;  %9050 = vst [vmem:[#allocation20_spill] sm:$0xff] %v6446_v54  ;;  %v6469_v50 = vld [vmem:[%s8805_s3 + $0x30] sm:$0xff]  ;;  %v6476_v12 = vld [vmem:[%s8806_s4 + $0x40] sm:$0xff] }
  0xe9   :  { %v485_v5 = vadd.f32 %v421_v15, %v335_v38  ;;  %v568_v31 = vadd.f32 %v6061_v28, %v480_v27  ;;  %723 = vst.msk [vmem:[#allocation2 + $0x50] sm:$0xf] %vm702_vm1, %v690_v57  ;;  %v182_v61 = vmul.f32 %v9044_v43, %v6052_v56  ;;  %v183_v2 = vmul.f32 %v9045_v23, %v6052_v56  ;;  %v6481_v15 = vld [vmem:[%s8805_s3 + $0x38] sm:$0xff]  ;;  %v6490_v57 = vld [vmem:[%s8806_s4 + $0x48] sm:$0xff] }
  0xea   :  { %v264_v59 = vmul.f32 %v9046_v7, %v6052_v56  ;;  %v265_v8 = vmul.f32 %v6008_v9, %v6052_v56  ;;  %724 = vst.msk [vmem:[#allocation2 + $0x54] sm:$0xf] %vm702_vm1, %v691_v36  ;;  %v569_v22 = vadd.f32 %v6059_v16, %v481_v14  ;;  %v572_v32 = vadd.f32 %v6061_v28, %v484_v29 }
  0xeb   :  { %v573_v39 = vadd.f32 %v6059_v16, %v485_v5  ;;  %v632_v60 = vmax.f32 %v568_v31, 0.0  ;;  %v268_v43 = vmul.f32 %v9046_v7, %v186_v51  ;;  %v269_v46 = vmul.f32 %v6008_v9, %v186_v51  ;;  %v6433_v9 = vld [vmem:[%s8805_s3 + $0x20] sm:$0xff]  ;;  %9051 = vst [vmem:[#allocation9_spill] sm:$0xff] %v6462_v17 }
  0xec   :  { %v328_v23 = vadd.f32 %v264_v59, %v178_v11  ;;  %v329_v33 = vadd.f32 %v265_v8, %v179_v62  ;;  %v633_v40 = vmax.f32 %v569_v22, 0.0  ;;  %v636_v34 = vmax.f32 %v572_v32, 0.0  ;;  %9052 = vst [vmem:[#allocation15_spill] sm:$0xff] %v6476_v12  ;;  %v6495_v11 = vld [vmem:[%s8805_s3 + $0x40] sm:$0xff]  ;;  %v6513_v59 = vld [vmem:[%s8805_s3 + $0x48] sm:$0xff] }
  0xed   :  { %v637_v24 = vmax.f32 %v573_v39, 0.0  ;;  %v414_v56 = vmul.f32 %v6006_v21, %v186_v51  ;;  %v332_v63 = vadd.f32 %v268_v43, %v182_v61  ;;  %v333_v1 = vadd.f32 %v269_v46, %v183_v2  ;;  %9053 = vst [vmem:[#allocation17_spill] sm:$0xff] %v6490_v57  ;;  %v6508_v61 = vld [vmem:[%s8806_s4 + $0x50] sm:$0xff]  ;;  %v6526_v43 = vld [vmem:[%s8806_s4 + $0x58] sm:$0xff] }
  0xee   :  { %v415_v35 = vmul.f32 %v9047_v3, %v186_v51  ;;  %v418_v28 = vmul.f32 %v6006_v21, %v336_v19  ;;  %v668_v25 = vmax.f32 %v632_v60, %v636_v34  ;;  %v419_v44 = vmul.f32 %v9047_v3, %v336_v19  ;;  %9054 = vst [vmem:[#allocation12_spill] sm:$0xff] %v6508_v61 }
  0xef   :  { %v669_v16 = vmax.f32 %v633_v40, %v637_v24  ;;  %v478_v7 = vadd.f32 %v414_v56, %v328_v23  ;;  %9055 = vst [vmem:[#allocation21_spill] sm:$0xff] %v6513_v59  ;;  %v6533_v23 = vld [vmem:[%s8805_s3 + $0x50] sm:$0xff] }
  0xf0   :  { %v479_v26 = vadd.f32 %v415_v35, %v329_v33  ;;  %v482_v0 = vadd.f32 %v418_v28, %v332_v63  ;;  %v700_v45 = vpack.c.bf16 %v668_v25, %v668_v25  ;;  %v483_v20 = vadd.f32 %v419_v44, %v333_v1  ;;  %9056 = vst [vmem:[#allocation27_spill] sm:$0xff] %v6526_v43  ;;  %v6546_v63 = vld [vmem:[%s8805_s3 + $0x58] sm:$0xff]  ;;  %v6551_v35 = vld [vmem:[%s8806_s4 + $0x60] sm:$0xff] }
  0xf1   :  { %v701_v6 = vpack.c.bf16 %v669_v16, %v669_v16  ;;  %v566_v37 = vadd.f32 %v6042_v55, %v478_v7  ;;  %9057 = vst [vmem:[#allocation22_spill] sm:$0xff] %v6533_v23  ;;  %v6566_v7 = vld [vmem:[%s8805_s3 + $0x60] sm:$0xff] }
  0xf2   :  { %v567_v51 = vadd.f32 %v6088_v58, %v479_v26  ;;  %v570_v21 = vadd.f32 %v6042_v55, %v482_v0  ;;  %733 = vst.msk [vmem:[#allocation2 + $0x78] sm:$0xf] %vm702_vm1, %v700_v45  ;;  %v571_v3 = vadd.f32 %v6088_v58, %v483_v20  ;;  %v6571_v0 = vld [vmem:[%s8806_s4 + $0x68] sm:$0xff] }
  0xf3   :  { %v630_v52 = vmax.f32 %v566_v37, 0.0  ;;  %4321 = vmatmul.msk.bf16.gmra.mxu1 %vm1145_vm2, %v6433_v9  ;;  %734 = vst.msk [vmem:[#allocation2 + $0x7c] sm:$0xf] %vm702_vm1, %v701_v6 }
  0xf4   :  { %v631_v10 = vmax.f32 %v567_v51, 0.0  ;;  %v634_v30 = vmax.f32 %v570_v21, 0.0  ;;  %v635_v47 = vmax.f32 %v571_v3, 0.0  ;;  %9058 = vst [vmem:[#allocation14_spill] sm:$0xff] %v6546_v63  ;;  %v6586_v51 = vld [vmem:[%s8805_s3 + $0x68] sm:$0xff]  ;;  %v6591_v3 = vld [vmem:[%s8806_s4 + $0x70] sm:$0xff] }
  0xf5   :  { %4235 = vmatmul.msk.bf16.gmra.mxu0 %vm915_vm0, %v6446_v54  ;;  %9059 = vst [vmem:[#allocation19_spill] sm:$0xff] %v6551_v35 }
  0xf6   :  { %v666_v19 = vmax.f32 %v630_v52, %v634_v30  ;;  %v667_v55 = vmax.f32 %v631_v10, %v635_v47  ;;  %9060 = vst [vmem:[#allocation25_spill] sm:$0xff] %v6566_v7  ;;  %v6596_v52 = vld [vmem:[%s8806_s4 + $0x78] sm:$0xff] }
  0xf7   :  { %9061 = vst [vmem:[#allocation13_spill] sm:$0xff] %v6571_v0  ;;  %4244 = vmatmul.msk.bf16.vlgmr.msra.gmra.mxu3 %vm915_vm0, %v6596_v52 }
  0xf8   :  { %v698_v48 = vpack.c.bf16 %v666_v19, %v666_v19  ;;  %v699_v58 = vpack.c.bf16 %v667_v55, %v667_v55  ;;  %9062 = vst [vmem:[#allocation18_spill] sm:$0xff] %v6586_v51  ;;  %v6613_v55 = vld [vmem:[%s8805_s3 + $0x70] sm:$0xff] }
  0xf9   :  { %9063 = vst [vmem:[#allocation26_spill] sm:$0xff] %v6591_v3 }
  0xfa   :  { %731 = vst.msk [vmem:[#allocation2 + $0x70] sm:$0xf] %vm702_vm1, %v698_v48 }
  0xfb   :  { %732 = vst.msk [vmem:[#allocation2 + $0x74] sm:$0xf] %vm702_vm1, %v699_v58 }
  0xfc   :  { %9064 = vst [vmem:[#allocation6_spill] sm:$0xff] %v6596_v52 }
  0xfd   :  { %9065 = vst [vmem:[#allocation7_spill] sm:$0xff] %v6613_v55 }
 0x103   :  { %4322 = vmatmul.msk.bf16.gmra.mxu1 %vm1145_vm2, %v6455_v42 }
 0x105   :  { %4236 = vmatmul.msk.bf16.gmra.mxu0 %vm915_vm0, %v6462_v17 }
 0x107   :  { %4357 = vmatmul.msk.bf16.vlgmr.msrb.gmra.mxu3 %vm1145_vm2, %v6156_v4 }
 0x110   :  { %v973_v38 = vpop.f32.mrf.mxu0 }
 0x113   :  { %4323 = vmatmul.msk.bf16.gmra.mxu1 %vm1145_vm2, %v6469_v50 }
 0x115   :  { %4237 = vmatmul.msk.bf16.gmra.mxu0 %vm915_vm0, %v6476_v12 }
 0x117   :  { %4358 = vmatmul.msk.bf16.gmra.mxu3 %vm1145_vm2, %v6230_v13 }
 0x118   :  { %v975_v18 = vpop.f32.mrf.mxu0 }
 0x122   :  { %v978_v27 = vpop.f32.mrf.mxu0 }
 0x123   :  { %4324 = vmatmul.msk.bf16.gmra.mxu1 %vm1145_vm2, %v6481_v15 }
 0x125   :  { %4238 = vmatmul.msk.bf16.gmra.mxu0 %vm915_vm0, %v6490_v57 }
 0x127   :  { %4359 = vmatmul.msk.bf16.gmra.mxu3 %vm1145_vm2, %v6301_v49 }
 0x12a   :  { %v980_v36 = vpop.f32.mrf.mxu0 }
 0x130   :  { %v1203_v62 = vpop.f32.mrf.mxu1 }
 0x131   :  { %v6499_v14 = vadd.f32 %v1203_v62, %v973_v38 }
 0x132   :  { %v983_v29 = vpop.f32.mrf.mxu0 }
 0x133   :  { %4325 = vmatmul.msk.bf16.gmra.mxu1 %vm1145_vm2, %v6495_v11 }
 0x135   :  { %4239 = vmatmul.msk.bf16.gmra.mxu0 %vm915_vm0, %v6508_v61 }
 0x137   :  { %4360 = vmatmul.msk.bf16.gmra.mxu3 %vm1145_vm2, %v6373_v53 }
 0x138   :  { %v1205_v5 = vpop.f32.mrf.mxu1 }
 0x139   :  { %v6503_v31 = vadd.f32 %v1205_v5, %v975_v18  ;;  %v6632_v5 = vpop.permute.xlu0 %1355 }
 0x13a   :  { %v985_v2 = vpop.f32.mrf.mxu0 }
 0x140   :  { %v1208_v8 = vpop.f32.mrf.mxu1 }
 0x141   :  { %v6517_v22 = vadd.f32 %v1208_v8, %v978_v27 }
 0x142   :  { %v988_v32 = vpop.f32.mrf.mxu0 }
 0x143   :  { %4326 = vmatmul.msk.bf16.gmra.mxu1 %vm1145_vm2, %v6513_v59 }
 0x145   :  { %4240 = vmatmul.msk.bf16.gmra.mxu0 %vm915_vm0, %v6526_v43 }
 0x147   :  { %4361 = vmatmul.msk.bf16.gmra.mxu3 %vm1145_vm2, %v6433_v9 }
 0x148   :  { %v1210_v39 = vpop.f32.mrf.mxu1 }
 0x149   :  { %v6521_v60 = vadd.f32 %v1210_v39, %v980_v36  ;;  %v6628_v36 = vld [vmem:[%s8805_s3 + $0x78] sm:$0xff]  ;;  %v6644_v39 = vpop.permute.xlu0 %1310 }
 0x14a   :  { %v6528_v46 = vpop.f32.mrf.mxu0  ;;  %9066 = vst [vmem:[#allocation24_spill] sm:$0xff] %v6628_v36 }
 0x150   :  { %v1213_v33 = vpop.f32.mrf.mxu1 }
 0x151   :  { %v6537_v40 = vadd.f32 %v1213_v33, %v983_v29 }
 0x152   :  { %v993_v34 = vpop.f32.mrf.mxu0 }
 0x153   :  { %4327 = vmatmul.msk.bf16.gmra.mxu1 %vm1145_vm2, %v6533_v23 }
 0x155   :  { %4241 = vmatmul.msk.bf16.gmra.mxu0 %vm915_vm0, %v6551_v35 }
 0x157   :  { %4362 = vmatmul.msk.bf16.gmra.mxu3 %vm1145_vm2, %v6455_v42 }
 0x158   :  { %v1215_v24 = vpop.f32.mrf.mxu1 }
 0x159   :  { %v6541_v56 = vadd.f32 %v1215_v24, %v985_v2 }
 0x15a   :  { %v6553_v28 = vpop.f32.mrf.mxu0 }
 0x160   :  { %v1218_v1 = vpop.f32.mrf.mxu1 }
 0x161   :  { %v6555_v25 = vadd.f32 %v1218_v1, %v988_v32  ;;  %v6642_v32 = vpop.permute.xlu1 %1315  ;;  %v4669_v1 = vld [vmem:[#allocation2 + $0x68] sm:$0xff] }
 0x162   :  { %v998_v44 = vpop.f32.mrf.mxu0 }
 0x163   :  { %4328 = vmatmul.msk.bf16.gmra.mxu1 %vm1145_vm2, %v6546_v63 }
 0x165   :  { %4242 = vmatmul.msk.bf16.gmra.mxu0 %vm915_vm0, %v6571_v0 }
 0x167   :  { %4363 = vmatmul.msk.bf16.gmra.mxu3 %vm1145_vm2, %v6469_v50 }
 0x168   :  { %v6561_v16 = vpop.f32.mrf.mxu1 }
 0x16a   :  { %v6573_v45 = vpop.f32.mrf.mxu0 }
 0x170   :  { %v1223_v26 = vpop.f32.mrf.mxu1 }
 0x171   :  { %v6575_v6 = vadd.f32 %v1223_v26, %v993_v34  ;;  %v6654_v26 = vpop.permute.xlu1 %1360 }
 0x172   :  { %v1003_v37 = vpop.f32.mrf.mxu0  ;;  %9067 = vst [vmem:[#allocation23_spill] sm:$0xff] %v6654_v26 }
 0x173   :  { %4329 = vmatmul.msk.bf16.gmra.mxu1 %vm1145_vm2, %v6566_v7 }
 0x175   :  { %4243 = vmatmul.msk.bf16.gmra.mxu0 %vm915_vm0, %v6591_v3 }
 0x177   :  { %4364 = vmatmul.msk.bf16.gmra.mxu3 %vm1145_vm2, %v6481_v15 }
 0x178   :  { %v6581_v20 = vpop.f32.mrf.mxu1 }
 0x17a   :  { %v6598_v10 = vpop.f32.mrf.mxu0 }
 0x180   :  { %v1228_v21 = vpop.f32.mrf.mxu1 }
 0x181   :  { %v6600_v30 = vadd.f32 %v1228_v21, %v998_v44  ;;  %v6650_v44 = vpop.permute.xlu2 %1320  ;;  %v6658_v21 = vpop.permute.xlu0 %1435 }
 0x182   :  { %v1008_v19 = vpop.f32.mrf.mxu0  ;;  %9068 = vst [vmem:[#allocation8_spill] sm:$0xff] %v6658_v21 }
 0x183   :  { %4330 = vmatmul.msk.bf16.gmra.mxu1 %vm1145_vm2, %v6586_v51 }
 0x187   :  { %4365 = vmatmul.msk.bf16.gmra.mxu3 %vm1145_vm2, %v6495_v11 }
 0x188   :  { %v6608_v47 = vpop.f32.mrf.mxu1 }
 0x189   :  { %v6666_v52 = vpop.permute.xlu0 %1300 }
 0x18a   :  { %v6621_v38 = vpop.f32.mrf.mxu0 }
 0x190   :  { %v1233_v48 = vpop.f32.mrf.mxu1 }
 0x191   :  { %v6615_v58 = vadd.f32 %v1233_v48, %v1003_v37  ;;  %v6682_v43 = vpop.permute.xlu0 %1425 }
 0x192   :  { %v1013_v27 = vpop.f32.mrf.mxu0 }
 0x193   :  { %4331 = vmatmul.msk.bf16.gmra.mxu1 %vm1145_vm2, %v6613_v55 }
 0x198   :  { %v6623_v18 = vpop.f32.mrf.mxu1 }
 0x199   :  { %v6696_v55 = vpop.permute.xlu0 %1400 }
 0x19a   :  { %v6638_v2 = vpop.f32.mrf.mxu0  ;;  %9073 = vst [vmem:[#allocation30_spill] sm:$0xff] %v6696_v55 }
 0x1a0   :  { %v1238_v62 = vpop.f32.mrf.mxu1 }
 0x1a1   :  { %v6630_v29 = vadd.f32 %v1238_v62, %v1008_v19  ;;  %v4668_v19 = vld [vmem:[#allocation2 + $0x60] sm:$0xff] }
 0x1a2   :  { %v1018_v33 = vpop.f32.mrf.mxu0 }
 0x1a3   :  { %4332 = vmatmul.msk.bf16.gmra.mxu1 %vm1145_vm2, %v6628_v36 }
 0x1a8   :  { %v6640_v8 = vpop.f32.mrf.mxu1 }
 0x1aa   :  { %v6656_v37 = vpop.f32.mrf.mxu0 }
 0x1b0   :  { %v1243_v34 = vpop.f32.mrf.mxu1 }
 0x1b1   :  { %v6646_v24 = vadd.f32 %v1243_v34, %v1013_v27  ;;  %v6662_v27 = vpop.permute.xlu2 %1305  ;;  %v6664_v34 = vpop.permute.xlu1 %1345 }
 0x1b2   :  { %v1023_v62 = vpop.f32.mrf.mxu0 }
 0x1b3   :  { %4397 = vmatmul.msk.bf16.vlgmr.msrb.gmra.mxu1 %vm1145_vm2, %v6156_v4 }
 0x1b4   :  { %3466 = vmatpush.bf16.msrb.mxu1 %v4669_v1 }
 0x1b8   :  { %3467 = vmatpush.bf16.msrb.mxu1 %v4668_v19  ;;  %v6660_v48 = vpop.f32.mrf.mxu1 }
 0x1b9   :  { %v6676_v19 = vpop.permute.xlu2 %1350  ;;  %v6680_v35 = vpop.permute.xlu1 %1440 }
 0x1ba   :  { %v6674_v1 = vpop.f32.mrf.mxu0  ;;  %9069 = vst [vmem:[#allocation11_spill] sm:$0xff] %v6680_v35 }
 0x1c0   :  { %v1248_v3 = vpop.f32.mrf.mxu1 }
 0x1c1   :  { %v6668_v4 = vadd.f32 %v1248_v3, %v1018_v33  ;;  %v6686_v3 = vpop.permute.xlu2 %1295 }
 0x1c2   :  { %v6684_v61 = vpop.f32.mrf.mxu0  ;;  %v1445_v59 = vadd.f32 %v6686_v3, %v6517_v22 }
 0x1c3   :  { %4398 = vmatmul.msk.bf16.gmra.mxu1 %vm1145_vm2, %v6230_v13  ;;  %9070 = vst [vmem:[#allocation10_spill] sm:$0xff] %v6684_v61  ;;  %v6692_v13 = vpop.permute.xlu1 %1335 }
 0x1c4   :  { %9072 = vst [vmem:[#allocation29_spill] sm:$0xff] %v6692_v13 }
 0x1c8   :  { %v6678_v0 = vpop.f32.mrf.mxu1 }
 0x1c9   :  { %v6702_v12 = vpop.permute.xlu2 %1340 }
 0x1ca   :  { %v6700_v51 = vpop.f32.mrf.mxu0 }
 0x1cb   :  { %9074 = vst [vmem:[#allocation31_spill] sm:$0xff] %v6700_v51  ;;  %v6704_v7 = vpop.permute.xlu1 %1430 }
 0x1cc   :  { %9075 = vst [vmem:[#allocation32_spill] sm:$0xff] %v6704_v7 }
 0x1d0   :  { %v1253_v36 = vpop.f32.mrf.mxu1 }
 0x1d1   :  { %v6688_v33 = vadd.f32 %v1253_v36, %v1023_v62  ;;  %v6706_v36 = vpop.permute.xlu0 %1325  ;;  %v6714_v17 = vpop.permute.xlu2 %1395 }
 0x1d2   :  { %9076 = vst [vmem:[#allocation33_spill] sm:$0xff] %v6706_v36  ;;  %v1451_v41 = vadd.f32 %v6706_v36, %v6575_v6 }
 0x1d3   :  { %9071 = vst [vmem:[#allocation28_spill] sm:$0xff] %v6688_v33  ;;  %4399 = vmatmul.msk.bf16.gmra.mxu1 %vm1145_vm2, %v6301_v49  ;;  %v1033_v49 = vpop.f32.mrf.mxu0  ;;  %v6716_v54 = vpop.permute.xlu1 %1285 }
 0x1d4   :  { %9078 = vst [vmem:[#allocation35_spill] sm:$0xff] %v6714_v17  ;;  %v1443_v55 = vadd.f32 %v6716_v54, %v6499_v14  ;;  %4680 = vtanh.f32 %v1451_v41 }
 0x1d5   :  { %9079 = vst [vmem:[#allocation36_spill] sm:$0xff] %v6716_v54  ;;  %v1453_v54 = vadd.f32 %v6692_v13, %v6600_v30 }
 0x1d6   :  { %4682 = vtanh.f32 %v1443_v55 }
 0x1d8   :  { %v6698_v57 = vpop.f32.mrf.mxu1 }
 0x1d9   :  { %v6720_v63 = vpop.permute.xlu0 %1420 }
 0x1da   :  { %v4681_v17 = vpop.eup %4680 }
 0x1db   :  { %v6726_v35 = vpop.f32.mrf.mxu0  ;;  %v1515_v41 = vadd.f32 1.0, %v4681_v17  ;;  %v6737_v55 = vpop.permute.xlu1 %1330 }
 0x1dc   :  { %v4683_v6 = vpop.eup %4682  ;;  %9083 = vst [vmem:[#allocation40_spill] sm:$0xff] %v6737_v55 }
 0x1dd   :  { %v1507_v14 = vadd.f32 1.0, %v4683_v6 }
 0x1e0   :  { %v6708_v62 = vpop.f32.mrf.mxu1 }
 0x1e1   :  { %9077 = vst [vmem:[#allocation34_spill] sm:$0xff] %v6708_v62  ;;  %v6730_v61 = vpop.permute.xlu0 %1405 }
 0x1e2   :  { %9082 = vst [vmem:[#allocation39_spill] sm:$0xff] %v6730_v61 }
 0x1e3   :  { %4400 = vmatmul.msk.bf16.gmra.mxu1 %vm1145_vm2, %v6373_v53  ;;  %v6728_v53 = vpop.permute.xlu2 %1290  ;;  %v6747_v30 = vpop.permute.xlu1 %1385 }
 0x1e4   :  { %9081 = vst [vmem:[#allocation38_spill] sm:$0xff] %v6728_v53 }
 0x1e5   :  { %9084 = vst [vmem:[#allocation41_spill] sm:$0xff] %v6747_v30 }
 0x1e8   :  { %v6722_v23 = vpop.f32.mrf.mxu1 }
 0x1e9   :  { %9080 = vst [vmem:[#allocation37_spill] sm:$0xff] %v6722_v23  ;;  %v1038_v23 = vpop.f32.mrf.mxu0 }
 0x1eb   :  { %v6741_v21 = vpop.permute.xlu2 %1415 }
 0x1f0   :  { %v1263_v51 = vpop.f32.mrf.mxu1 }
 0x1f1   :  { %v1264_v62 = vadd.f32 %v1263_v51, %v1033_v49  ;;  %v1539_v51 = vmul.f32 0.5, %v1515_v41  ;;  %v1040_v41 = vpop.f32.mrf.mxu0 }
 0x1f3   :  { %v1467_v36 = vadd.f32 %v6730_v61, %v1264_v62  ;;  %4401 = vmatmul.msk.bf16.gmra.mxu1 %vm1145_vm2, %v6433_v9  ;;  %v1531_v62 = vmul.f32 0.5, %v1507_v14  ;;  %v1555_v9 = vmul.f32 0.0, %v1539_v51  ;;  %v6751_v33 = vpop.permute.xlu2 %1390  ;;  %v1447_v14 = vadd.f32 %v6662_v27, %v6537_v40 }
 0x1f4   :  { %9085 = vst [vmem:[#allocation42_spill] sm:$0xff] %v6751_v33  ;;  %v1231_v40 = vadd.f32 %v6608_v47, %v6573_v45  ;;  %v1221_v45 = vadd.f32 %v6561_v16, %v6528_v46 }
 0x1f5   :  { %4684 = vtanh.f32 %v1467_v36 }
 0x1f6   :  { %4686 = vtanh.f32 %v1453_v54  ;;  %v1454_v47 = vadd.f32 %v6702_v12, %v1231_v40  ;;  %v1450_v16 = vadd.f32 %v6650_v44, %v1221_v45 }
 0x1f7   :  { %4688 = vtanh.f32 %v1445_v59 }
 0x1f8   :  { %v1265_v49 = vpop.f32.mrf.mxu1 }
 0x1fb   :  { %v4685_v61 = vpop.eup %4684 }
 0x1fc   :  { %v1563_v17 = vmul.f32 %v4685_v61, %v1531_v62  ;;  %v4687_v26 = vpop.eup %4686  ;;  %v1444_v61 = vadd.f32 %v6728_v53, %v6503_v31  ;;  %v1446_v31 = vadd.f32 %v6666_v52, %v6521_v60 }
 0x1fd   :  { %v4689_v13 = vpop.eup %4688  ;;  %v1517_v54 = vadd.f32 1.0, %v4687_v26  ;;  %v1236_v26 = vadd.f32 %v6623_v18, %v6598_v10  ;;  %v1266_v18 = vadd.f32 %v1265_v49, %v6726_v35 }
 0x1fe   :  { %v6745_v36 = vadd.f32 %v1563_v17, %v1555_v9  ;;  %v1509_v59 = vadd.f32 1.0, %v4689_v13  ;;  %v6768_v13 = vpop.permute.xlu1 %1410 }
 0x1ff   :  { %v1541_v51 = vmul.f32 0.5, %v1517_v54  ;;  %v1456_v10 = vadd.f32 %v6676_v19, %v1236_v26  ;;  %v1468_v49 = vadd.f32 %v6768_v13, %v1266_v18  ;;  %v1251_v18 = vadd.f32 %v6678_v0, %v6656_v37  ;;  %v6816_v0 = vpop.permute.xlu0 %1380 }
 0x200   :  { %v1268_v6 = vpop.f32.mrf.mxu1  ;;  %v1533_v9 = vmul.f32 0.5, %v1509_v59 }
 0x201   :  { %v1269_v7 = vadd.f32 %v1268_v6, %v1038_v23  ;;  %v1455_v23 = vadd.f32 %v6664_v34, %v6615_v58  ;;  %v1557_v58 = vmul.f32 0.0, %v1541_v51  ;;  %v1043_v6 = vpop.f32.mrf.mxu0 }
 0x203   :  { %v1469_v22 = vadd.f32 %v6741_v21, %v1269_v7  ;;  %4402 = vmatmul.msk.bf16.gmra.mxu1 %vm1145_vm2, %v6455_v42  ;;  %v1226_v7 = vadd.f32 %v6581_v20, %v6553_v28  ;;  %v1448_v20 = vadd.f32 %v6644_v39, %v6541_v56  ;;  %v1449_v56 = vadd.f32 %v6642_v32, %v6555_v25 }
 0x205   :  { %4690 = vtanh.f32 %v1469_v22  ;;  %v6772_v22 = vpop.permute.xlu2 %1375  ;;  %v1452_v28 = vadd.f32 %v6737_v55, %v1226_v7 }
 0x206   :  { %4692 = vtanh.f32 %v1444_v61  ;;  %9086 = vst [vmem:[#allocation43_spill] sm:$0xff] %v6772_v22 }
 0x207   :  { %4694 = vtanh.f32 %v1455_v23 }
 0x208   :  { %v1270_v62 = vpop.f32.mrf.mxu1  ;;  %4696 = vtanh.f32 %v1447_v14 }
 0x209   :  { %4698 = vtanh.f32 %v1446_v31  ;;  %v1271_v7 = vadd.f32 %v1270_v62, %v1040_v41  ;;  %v1457_v62 = vadd.f32 %v6632_v5, %v6630_v29  ;;  %v1045_v26 = vpop.f32.mrf.mxu0 }
 0x20a   :  { %4700 = vtanh.f32 %v1452_v28  ;;  %v1256_v28 = vadd.f32 %v6698_v57, %v6674_v1  ;;  %v9089_v57 = vld [vmem:[#allocation28_spill] sm:$0xff] }
 0x20b   :  { %v4691_v42 = vpop.eup %4690  ;;  %4702 = vtanh.f32 %v1448_v20  ;;  %v1470_v31 = vadd.f32 %v6720_v63, %v1271_v7  ;;  %v1463_v1 = vadd.f32 %v6747_v30, %v9089_v57  ;;  %9091 = vst [vmem:[#allocation28_spill] sm:$0xff] %v6816_v0 }
 0x20c   :  { %v1565_v17 = vmul.f32 %v4691_v42, %v1533_v9  ;;  %v4693_v54 = vpop.eup %4692  ;;  %4704 = vtanh.f32 %v1456_v10  ;;  %v1246_v9 = vadd.f32 %v6660_v48, %v6638_v2  ;;  %v6797_v42 = vpop.permute.xlu1 %1365 }
 0x20d   :  { %v4695_v61 = vpop.eup %4694  ;;  %v1508_v51 = vadd.f32 1.0, %v4693_v54  ;;  %4706 = vtanh.f32 %v1454_v47  ;;  %9087 = vst [vmem:[#allocation44_spill] sm:$0xff] %v6797_v42  ;;  %v1459_v2 = vadd.f32 %v6797_v42, %v6646_v24  ;;  %v1241_v24 = vadd.f32 %v6640_v8, %v6621_v38 }
 0x20e   :  { %v6777_v60 = vadd.f32 %v1565_v17, %v1557_v58  ;;  %v4697_v14 = vpop.eup %4696  ;;  %v1519_v35 = vadd.f32 1.0, %v4695_v61 }
 0x20f   :  { %v4699_v25 = vpop.eup %4698  ;;  %v1511_v41 = vadd.f32 1.0, %v4697_v14  ;;  %v1532_v40 = vmul.f32 0.5, %v1508_v51  ;;  %v9090_v51 = vld [vmem:[#allocation32_spill] sm:$0xff] }
 0x210   :  { %v1273_v59 = vpop.f32.mrf.mxu1  ;;  %v4701_v58 = vpop.eup %4700  ;;  %v1543_v17 = vmul.f32 0.5, %v1519_v35  ;;  %v1464_v35 = vadd.f32 %v6751_v33, %v1256_v28 }
 0x211   :  { %v1274_v23 = vadd.f32 %v1273_v59, %v1043_v6  ;;  %v4703_v48 = vpop.eup %4702  ;;  %v1510_v6 = vadd.f32 1.0, %v4699_v25  ;;  %v1535_v10 = vmul.f32 0.5, %v1511_v41  ;;  %v1516_v47 = vadd.f32 1.0, %v4701_v58  ;;  %v9092_v25 = vld [vmem:[#allocation23_spill] sm:$0xff] }
 0x212   :  { %v4705_v54 = vpop.eup %4704  ;;  %v1461_v59 = vadd.f32 %v6772_v22, %v6668_v4  ;;  %v1559_v14 = vmul.f32 0.0, %v1543_v17  ;;  %v1458_v41 = vadd.f32 %v9092_v25, %v1241_v24  ;;  %v7029_v25 = vld [vmem:[%s8805_s3 + $0x20] sm:$0xff] }
 0x213   :  { %v1471_v46 = vadd.f32 %v6682_v43, %v1274_v23  ;;  %4403 = vmatmul.msk.bf16.gmra.mxu1 %vm1145_vm2, %v6469_v50  ;;  %v6800_v50 = vpop.permute.xlu2 %1370  ;;  %v4707_v45 = vpop.eup %4706  ;;  %v1520_v37 = vadd.f32 1.0, %v4705_v54  ;;  %v1534_v28 = vmul.f32 0.5, %v1510_v6 }
 0x214   :  { %9088 = vst [vmem:[#allocation45_spill] sm:$0xff] %v6800_v50  ;;  %v1460_v29 = vadd.f32 %v6800_v50, %v1246_v9  ;;  %v1518_v4 = vadd.f32 1.0, %v4707_v45  ;;  %v1540_v9 = vmul.f32 0.5, %v1516_v47  ;;  %v9093_v47 = vld [vmem:[#allocation21_spill] sm:$0xff] }
 0x215   :  { %4708 = vtanh.f32 %v1471_v46  ;;  %v1462_v46 = vadd.f32 %v6816_v0, %v1251_v18  ;;  %v1544_v17 = vmul.f32 0.5, %v1520_v37  ;;  %4366 = vmatmul.msk.bf16.gmra.mxu3 %vm1145_vm2, %v9093_v47  ;;  %v9138_v50 = vld [vmem:[#allocation33_spill] sm:$0xff] }
 0x216   :  { %4710 = vtanh.f32 %v1449_v56 }
 0x217   :  { %4712 = vtanh.f32 %v1468_v49  ;;  %v1512_v49 = vadd.f32 1.0, %v4703_v48  ;;  %v1560_v6 = vmul.f32 0.0, %v1544_v17  ;;  %v9100_v17 = vld [vmem:[#allocation31_spill] sm:$0xff] }
 0x218   :  { %4714 = vtanh.f32 %v1450_v16  ;;  %v1275_v20 = vpop.f32.mrf.mxu1 }
 0x219   :  { %4716 = vtanh.f32 %v1457_v62  ;;  %v1276_v61 = vadd.f32 %v1275_v20, %v1045_v26  ;;  %v1542_v20 = vmul.f32 0.5, %v1518_v4  ;;  %v1536_v18 = vmul.f32 0.5, %v1512_v49 }
 0x21a   :  { %4718 = vtanh.f32 %v1470_v31  ;;  %v1048_v31 = vpop.f32.mrf.mxu3 }
 0x21b   :  { %v4709_v23 = vpop.eup %4708  ;;  %4720 = vtanh.f32 %v1459_v2  ;;  %v1472_v56 = vadd.f32 %v9090_v51, %v1276_v61  ;;  %v1556_v61 = vmul.f32 0.0, %v1540_v9  ;;  %v9098_v9 = vld [vmem:[#allocation34_spill] sm:$0xff] }
 0x21c   :  { %v4711_v7 = vpop.eup %4710  ;;  %4722 = vtanh.f32 %v1460_v29  ;;  %v1567_v38 = vmul.f32 %v4709_v23, %v1535_v10  ;;  %v9094_v23 = vld [vmem:[#allocation8_spill] sm:$0xff] }
 0x21d   :  { %v4713_v8 = vpop.eup %4712  ;;  %4724 = vtanh.f32 %v1472_v56  ;;  %v1513_v37 = vadd.f32 1.0, %v4711_v7 }
 0x21e   :  { %v6820_v16 = vpop.eup %4714  ;;  %4726 = vtanh.f32 %v1461_v59  ;;  %v6823_v62 = vadd.f32 %v1567_v38, %v1559_v14  ;;  %v1564_v2 = vmul.f32 %v4713_v8, %v1532_v40 }
 0x21f   :  { %v4717_v26 = vpop.eup %4716  ;;  %4728 = vtanh.f32 %v1463_v1 }
 0x220   :  { %v4719_v58 = vpop.eup %4718  ;;  %4730 = vtanh.f32 %v1464_v35  ;;  %v1278_v48 = vpop.f32.mrf.mxu1  ;;  %v1521_v45 = vadd.f32 1.0, %v4717_v26  ;;  %v6832_v1 = vadd.f32 %v1564_v2, %v1556_v61  ;;  %v1558_v35 = vmul.f32 0.0, %v1542_v20  ;;  %v9101_v2 = vld [vmem:[#allocation37_spill] sm:$0xff] }
 0x221   :  { %v4721_v29 = vpop.eup %4720  ;;  %4732 = vtanh.f32 %v1462_v46  ;;  %v1279_v54 = vadd.f32 %v1278_v48, %v1048_v31  ;;  %v1566_v59 = vmul.f32 %v4719_v58, %v1534_v28  ;;  %v1261_v48 = vadd.f32 %v9101_v2, %v9100_v17 }
 0x222   :  { %v4723_v10 = vpop.eup %4722  ;;  %4734 = vtanh.f32 %v1458_v41  ;;  %9095 = vst [vmem:[#allocation21_spill] sm:$0xff] %v6832_v1  ;;  %v1545_v8 = vmul.f32 0.5, %v1521_v45  ;;  %v1523_v49 = vadd.f32 1.0, %v4721_v29  ;;  %v1050_v28 = vpop.f32.mrf.mxu3  ;;  %v1537_v45 = vmul.f32 0.5, %v1513_v37 }
 0x223   :  { %v4725_v24 = vpop.eup %4724  ;;  %v1473_v14 = vadd.f32 %v9094_v23, %v1279_v54  ;;  %4736 = vtanh.f32 %v6745_v36  ;;  %4404 = vmatmul.msk.bf16.gmra.mxu1 %vm1145_vm2, %v6481_v15  ;;  %v9097_v15 = vld [vmem:[#allocation10_spill] sm:$0xff]  ;;  %v6839_v31 = vadd.f32 %v1566_v59, %v1558_v35  ;;  %v1524_v26 = vadd.f32 1.0, %v4723_v10  ;;  %v9103_v35 = vld [vmem:[#allocation11_spill] sm:$0xff] }
 0x224   :  { %v4727_v40 = vpop.eup %4726  ;;  %v1568_v57 = vmul.f32 %v4725_v24, %v1536_v18  ;;  %4738 = vtanh.f32 %v6823_v62  ;;  %v1259_v41 = vadd.f32 %v9098_v9, %v9097_v15  ;;  %v1561_v24 = vmul.f32 0.0, %v1545_v8 }
 0x225   :  { %v4729_v56 = vpop.eup %4728  ;;  %4740 = vtanh.f32 %v1473_v14  ;;  %9099 = vst [vmem:[#allocation10_spill] sm:$0xff] %v6839_v31  ;;  %v1525_v59 = vadd.f32 1.0, %v4727_v40  ;;  %v1548_v9 = vmul.f32 0.5, %v1524_v26 }
 0x226   :  { %v4731_v38 = vpop.eup %4730  ;;  %v6834_v4 = vadd.f32 %v1568_v57, %v1560_v6  ;;  %4742 = vtanh.f32 %v6832_v1  ;;  %v1527_v7 = vadd.f32 1.0, %v4729_v56  ;;  %v1547_v6 = vmul.f32 0.5, %v1523_v49  ;;  %v9102_v57 = vld [vmem:[#allocation35_spill] sm:$0xff] }
 0x227   :  { %v4733_v46 = vpop.eup %4732  ;;  %4744 = vtanh.f32 %v6777_v60  ;;  %v1528_v18 = vadd.f32 1.0, %v4731_v38  ;;  %v1465_v56 = vadd.f32 %v9102_v57, %v1259_v41  ;;  %v1549_v49 = vmul.f32 0.5, %v1525_v59 }
 0x228   :  { %9096 = vst [vmem:[#allocation46_spill] sm:$0xff] %v6834_v4  ;;  %v4735_v58 = vpop.eup %4734  ;;  %v1280_v29 = vpop.f32.mrf.mxu1  ;;  %4746 = vtanh.f32 %v6834_v4  ;;  %v1526_v14 = vadd.f32 1.0, %v4733_v46  ;;  %v1551_v1 = vmul.f32 0.5, %v1527_v7  ;;  %v9104_v4 = vld [vmem:[#allocation30_spill] sm:$0xff]  ;;  %v1514_v46 = vadd.f32 1.0, %v6820_v16 }
 0x229   :  { %v4737_v20 = vpop.eup %4736  ;;  %v1281_v54 = vadd.f32 %v1280_v29, %v1050_v28  ;;  %4748 = vtanh.f32 %v6839_v31  ;;  %v1522_v2 = vadd.f32 1.0, %v4735_v58  ;;  %v1466_v28 = vadd.f32 %v9104_v4, %v1261_v48 }
 0x22a   :  { %v4739_v61 = vpop.eup %4738  ;;  %v1552_v31 = vmul.f32 0.5, %v1528_v18  ;;  %v1587_v37 = vmul.f32 %v4737_v20, %v1547_v6  ;;  %v1550_v41 = vmul.f32 0.5, %v1526_v14  ;;  %v1538_v18 = vmul.f32 0.5, %v1514_v46  ;;  %v9106_v6 = vld [vmem:[#allocation22_spill] sm:$0xff] }
 0x22b   :  { %v4741_v10 = vpop.eup %4740  ;;  %v1474_v15 = vadd.f32 %v9103_v35, %v1281_v54  ;;  %v1591_v26 = vmul.f32 %v4739_v61, %v1551_v1  ;;  %v1546_v35 = vmul.f32 0.5, %v1522_v2  ;;  %4367 = vmatmul.msk.bf16.gmra.mxu3 %vm1145_vm2, %v9106_v6  ;;  %v6876_v46 = vld [vmem:[%s8806_s4 + $0x8] sm:$0xff] }
 0x22c   :  { %v4743_v17 = vpop.eup %4742  ;;  %v1569_v38 = vmul.f32 %v4741_v10, %v1537_v45  ;;  %9110 = vst [vmem:[#allocation22_spill] sm:$0xff] %v6876_v46 }
 0x22d   :  { %v4745_v29 = vpop.eup %4744  ;;  %4750 = vtanh.f32 %v1474_v15  ;;  %v1588_v8 = vmul.f32 %v4743_v17, %v1548_v9 }
 0x22e   :  { %v4747_v40 = vpop.eup %4746  ;;  %v6850_v23 = vadd.f32 %v1569_v38, %v1561_v24  ;;  %4752 = vtanh.f32 %v1465_v56  ;;  %v1589_v48 = vmul.f32 %v4745_v29, %v1549_v49  ;;  %v1562_v24 = vmul.f32 0.0, %v1546_v35  ;;  %v4663_v35 = vld [vmem:[#allocation2 + $0x38] sm:$0xff]  ;;  %v6885_v49 = vld [vmem:[%s8806_s4 + $0x10] sm:$0xff] }
 0x22f   :  { %v4749_v54 = vpop.eup %4748  ;;  %v1592_v58 = vmul.f32 %v4747_v40, %v1552_v31  ;;  %v1600_v7 = vpack.c.bf16 %v1588_v8, %v1587_v37  ;;  %4754 = vtanh.f32 %v1466_v28  ;;  %v6867_v37 = vld [vmem:[%s8806_s4] sm:$0xff]  ;;  %v4662_v8 = vld [vmem:[#allocation2 + $0x30] sm:$0xff]  ;;  %v4667_v40 = vld [vmem:[#allocation2 + $0x58] sm:$0xff] }
 0x230   :  { %9105 = vst [vmem:[#allocation34_spill] sm:$0xff] %v6850_v23  ;;  %v1590_v45 = vmul.f32 %v4749_v54, %v1550_v41  ;;  %4756 = vtanh.f32 %v6850_v23  ;;  %v6892_v41 = vld [vmem:[%s8806_s4 + $0x18] sm:$0xff]  ;;  %v6899_v54 = vld [vmem:[%s8806_s4 + $0x20] sm:$0xff] }
 0x231   :  { %v1602_v10 = vpack.c.bf16 %v1592_v58, %v1591_v26  ;;  %9109 = vst [vmem:[#allocation37_spill] sm:$0xff] %v6867_v37  ;;  %v9114_v26 = vld [vmem:[#allocation16_spill] sm:$0xff] }
 0x232   :  { %v1601_v20 = vpack.c.bf16 %v1590_v45, %v1589_v48  ;;  %9112 = vst [vmem:[#allocation47_spill] sm:$0xff] %v6892_v41  ;;  %v9115_v58 = vld [vmem:[#allocation20_spill] sm:$0xff]  ;;  %v9116_v48 = vld [vmem:[#allocation9_spill] sm:$0xff] }
 0x233   :  { %v4751_v16 = vpop.eup %4750  ;;  %4405 = vmatmul.msk.bf16.gmra.mxu1 %vm1145_vm2, %v6495_v11  ;;  %v9108_v11 = vld [vmem:[#allocation14_spill] sm:$0xff]  ;;  %9113 = vst [vmem:[#allocation48_spill] sm:$0xff] %v6899_v54 }
 0x234   :  { %v1570_v59 = vmul.f32 %v4751_v16, %v1538_v18  ;;  %v4753_v14 = vpop.eup %4752  ;;  %9111 = vst [vmem:[#allocation14_spill] sm:$0xff] %v6885_v49  ;;  %v9119_v16 = vld [vmem:[#allocation18_spill] sm:$0xff] }
 0x235   :  { %v4755_v1 = vpop.eup %4754  ;;  %v1529_v61 = vadd.f32 1.0, %v4753_v14 }
 0x236   :  { %v6856_v31 = vadd.f32 %v1570_v59, %v1562_v24  ;;  %v1530_v56 = vadd.f32 1.0, %v4755_v1  ;;  %v4757_v15 = vpop.eup %4756 }
 0x237   :  { %v1553_v9 = vmul.f32 0.5, %v1529_v61 }
 0x238   :  { %9107 = vst [vmem:[#allocation31_spill] sm:$0xff] %v6856_v31  ;;  %4758 = vtanh.f32 %v6856_v31  ;;  %v1554_v17 = vmul.f32 0.5, %v1530_v56  ;;  %v9120_v56 = vld [vmem:[#allocation17_spill] sm:$0xff] }
 0x239   :  { %v1593_v28 = vmul.f32 %v4757_v15, %v1553_v9  ;;  %v9121_v9 = vld [vmem:[#allocation7_spill] sm:$0xff] }
 0x23b   :  { %4368 = vmatmul.msk.bf16.gmra.mxu3 %vm1145_vm2, %v9108_v11 }
 0x23e   :  { %v4759_v2 = vpop.eup %4758 }
 0x23f   :  { %v1594_v38 = vmul.f32 %v4759_v2, %v1554_v17 }
 0x241   :  { %v1603_v29 = vpack.c.bf16 %v1594_v38, %v1593_v28 }
 0x243   :  { %1608 = vmatpush.bf16.msra.mxu2 %v1603_v29  ;;  %4406 = vmatmul.msk.bf16.gmra.mxu1 %vm1145_vm2, %v9093_v47  ;;  %v4666_v47 = vld [vmem:[#allocation2 + $0x50] sm:$0xff] }
 0x247   :  { %1609 = vmatpush.bf16.msra.mxu2 %v1602_v10  ;;  %v9117_v10 = vld [vmem:[#allocation25_spill] sm:$0xff] }
 0x24b   :  { %1610 = vmatpush.bf16.msra.mxu2 %v1601_v20  ;;  %v9118_v20 = vld [vmem:[#allocation15_spill] sm:$0xff] }
 0x24f   :  { %1611 = vmatpush.bf16.msra.mxu2 %v1600_v7  ;;  %v1714_v7 = vpop.f32.mrf.mxu3 }
 0x252   :  { %4333 = vmatmul.msk.bf16.vlgmr.msra.gmra.mxu2 %vm915_vm0, %v6867_v37 }
 0x253   :  { %2413 = vmatpush.bf16.msrb.mxu2 %v4663_v35  ;;  %4407 = vmatmul.msk.bf16.gmra.mxu1 %vm1145_vm2, %v9106_v6 }
 0x257   :  { %2414 = vmatpush.bf16.msrb.mxu2 %v4662_v8  ;;  %v1716_v45 = vpop.f32.mrf.mxu3  ;;  %4369 = vmatmul.msk.bf16.gmra.mxu3 %vm1145_vm2, %v9117_v10  ;;  %v9123_v8 = vld [vmem:[#allocation24_spill] sm:$0xff] }
 0x25b   :  { %3115 = vmatpush.bf16.msra.mxu2 %v4667_v40 }
 0x25f   :  { %3116 = vmatpush.bf16.msra.mxu2 %v4666_v47  ;;  %v1719_v18 = vpop.f32.mrf.mxu3 }
 0x262   :  { %4334 = vmatmul.msk.bf16.gmra.mxu2 %vm915_vm0, %v6876_v46  ;;  %v6987_v46 = vld [vmem:[%s8805_s3 + $0x8] sm:$0xff] }
 0x263   :  { %4408 = vmatmul.msk.bf16.gmra.mxu1 %vm1145_vm2, %v9108_v11  ;;  %v9122_v11 = vld [vmem:[#allocation12_spill] sm:$0xff]  ;;  %9133 = vst [vmem:[#allocation15_spill] sm:$0xff] %v6987_v46 }
 0x267   :  { %v1721_v6 = vpop.f32.mrf.mxu3  ;;  %4370 = vmatmul.msk.bf16.gmra.mxu3 %vm1145_vm2, %v9119_v16 }
 0x26f   :  { %v1724_v14 = vpop.f32.mrf.mxu3 }
 0x272   :  { %4335 = vmatmul.msk.bf16.gmra.mxu2 %vm915_vm0, %v6885_v49 }
 0x277   :  { %v1726_v15 = vpop.f32.mrf.mxu3  ;;  %4371 = vmatmul.msk.bf16.gmra.mxu3 %vm1145_vm2, %v9121_v9 }
 0x27f   :  { %v1729_v28 = vpop.f32.mrf.mxu3 }
 0x282   :  { %4336 = vmatmul.msk.bf16.gmra.mxu2 %vm915_vm0, %v6892_v41 }
 0x287   :  { %v1731_v35 = vpop.f32.mrf.mxu3  ;;  %4372 = vmatmul.msk.bf16.gmra.mxu3 %vm1145_vm2, %v9123_v8 }
 0x292   :  { %4337 = vmatmul.msk.bf16.gmra.mxu2 %vm915_vm0, %v6899_v54 }
 0x2a2   :  { %4338 = vmatmul.msk.bf16.gmra.mxu2 %vm915_vm0, %v9114_v26  ;;  %v1734_v26 = vpop.f32.mrf.mxu3 }
 0x2aa   :  { %v6937_v10 = vpop.f32.mrf.mxu3 }
 0x2b2   :  { %4339 = vmatmul.msk.bf16.gmra.mxu2 %vm915_vm0, %v9115_v58 }
 0x2c2   :  { %4340 = vmatmul.msk.bf16.gmra.mxu2 %vm915_vm0, %v9116_v48  ;;  %v9124_v48 = vld [vmem:[#allocation27_spill] sm:$0xff] }
 0x2c3   :  { %9141 = vst [vmem:[#allocation27_spill] sm:$0xff] %v7029_v25 }
 0x2d2   :  { %4341 = vmatmul.msk.bf16.gmra.mxu2 %vm915_vm0, %v9118_v20 }
 0x2d5   :  { %v1613_v24 = vpop.f32.mrf.mxu2 }
 0x2d6   :  { %v6915_v59 = vadd.f32 %v1714_v7, %v1613_v24  ;;  %v9125_v24 = vld [vmem:[#allocation19_spill] sm:$0xff] }
 0x2dd   :  { %v1615_v1 = vpop.f32.mrf.mxu2 }
 0x2de   :  { %v6917_v61 = vadd.f32 %v1716_v45, %v1615_v1 }
 0x2e2   :  { %4342 = vmatmul.msk.bf16.gmra.mxu2 %vm915_vm0, %v9120_v56 }
 0x2e5   :  { %v1618_v17 = vpop.f32.mrf.mxu2 }
 0x2e6   :  { %v6923_v2 = vadd.f32 %v1719_v18, %v1618_v17  ;;  %v9126_v17 = vld [vmem:[#allocation13_spill] sm:$0xff] }
 0x2ed   :  { %v1620_v38 = vpop.f32.mrf.mxu2 }
 0x2ee   :  { %v6925_v29 = vadd.f32 %v1721_v6, %v1620_v38  ;;  %v1739_v6 = vpop.f32.mrf.mxu3 }
 0x2f2   :  { %4343 = vmatmul.msk.bf16.gmra.mxu2 %vm915_vm0, %v9122_v11 }
 0x2f5   :  { %v1623_v40 = vpop.f32.mrf.mxu2 }
 0x2f6   :  { %v6931_v47 = vadd.f32 %v1724_v14, %v1623_v40  ;;  %v6945_v1 = vpop.f32.mrf.mxu3  ;;  %v9127_v40 = vld [vmem:[#allocation26_spill] sm:$0xff] }
 0x2fd   :  { %v1625_v58 = vpop.f32.mrf.mxu2 }
 0x2fe   :  { %v6933_v7 = vadd.f32 %v1726_v15, %v1625_v58  ;;  %v1744_v9 = vpop.f32.mrf.mxu3 }
 0x302   :  { %4344 = vmatmul.msk.bf16.gmra.mxu2 %vm915_vm0, %v9124_v48 }
 0x305   :  { %v1628_v45 = vpop.f32.mrf.mxu2 }
 0x306   :  { %v6939_v18 = vadd.f32 %v1729_v28, %v1628_v45  ;;  %v6951_v28 = vpop.f32.mrf.mxu3 }
 0x30d   :  { %v1630_v20 = vpop.f32.mrf.mxu2 }
 0x30e   :  { %v6941_v16 = vadd.f32 %v1731_v35, %v1630_v20  ;;  %v1749_v35 = vpop.f32.mrf.mxu3 }
 0x312   :  { %4345 = vmatmul.msk.bf16.gmra.mxu2 %vm915_vm0, %v9125_v24  ;;  %v9128_v24 = vld [vmem:[#allocation6_spill] sm:$0xff] }
 0x315   :  { %v1633_v14 = vpop.f32.mrf.mxu2 }
 0x316   :  { %v1735_v56 = vadd.f32 %v1734_v26, %v1633_v14  ;;  %v6957_v48 = vpop.f32.mrf.mxu3 }
 0x31d   :  { %v6947_v15 = vpop.f32.mrf.mxu2 }
 0x31e   :  { %v1754_v20 = vpop.f32.mrf.mxu3 }
 0x322   :  { %4346 = vmatmul.msk.bf16.gmra.mxu2 %vm915_vm0, %v9126_v17 }
 0x325   :  { %v1638_v38 = vpop.f32.mrf.mxu2 }
 0x326   :  { %v1740_v11 = vadd.f32 %v1739_v6, %v1638_v38  ;;  %v6965_v17 = vpop.f32.mrf.mxu3 }
 0x327   :  { %9129 = vst [vmem:[#allocation16_spill] sm:$0xff] %v6965_v17  ;;  %v1796_v17 = vadd.f32 %v6923_v2, %v6686_v3 }
 0x32d   :  { %v6953_v8 = vpop.f32.mrf.mxu2 }
 0x32e   :  { %v1759_v54 = vpop.f32.mrf.mxu3 }
 0x332   :  { %4347 = vmatmul.msk.bf16.gmra.mxu2 %vm915_vm0, %v9127_v40  ;;  %v4671_v40 = vld [vmem:[#allocation2 + $0x78] sm:$0xff] }
 0x335   :  { %v1643_v58 = vpop.f32.mrf.mxu2 }
 0x336   :  { %v6959_v26 = vadd.f32 %v1744_v9, %v1643_v58  ;;  %v6974_v9 = vld [vmem:[%s8805_s3] sm:$0xff]  ;;  %v6978_v41 = vpop.f32.mrf.mxu3 }
 0x337   :  { %9130 = vst [vmem:[#allocation20_spill] sm:$0xff] %v6974_v9 }
 0x33d   :  { %v6961_v45 = vpop.f32.mrf.mxu2 }
 0x342   :  { %4348 = vmatmul.msk.bf16.gmra.mxu2 %vm915_vm0, %v9128_v24  ;;  %v4670_v24 = vld [vmem:[#allocation2 + $0x70] sm:$0xff] }
 0x345   :  { %v1648_v14 = vpop.f32.mrf.mxu2 }
 0x346   :  { %v6967_v6 = vadd.f32 %v1749_v35, %v1648_v14  ;;  %v1764_v14 = vpop.f32.mrf.mxu3 }
 0x34d   :  { %v6969_v38 = vpop.f32.mrf.mxu2 }
 0x34e   :  { %v6993_v37 = vpop.f32.mrf.mxu3 }
 0x352   :  { %4437 = vmatmul.msk.bf16.vlgmr.msrb.gmra.mxu2 %vm1145_vm2, %v6974_v9 }
 0x353   :  { %3817 = vmatpush.bf16.msrb.mxu2 %v4671_v40 }
 0x355   :  { %v1653_v58 = vpop.f32.mrf.mxu2 }
 0x356   :  { %v6980_v49 = vadd.f32 %v1754_v20, %v1653_v58  ;;  %v7000_v20 = vld [vmem:[%s8805_s3 + $0x10] sm:$0xff]  ;;  %v1769_v58 = vpop.f32.mrf.mxu3 }
 0x357   :  { %3818 = vmatpush.bf16.msrb.mxu2 %v4670_v24  ;;  %9134 = vst [vmem:[#allocation18_spill] sm:$0xff] %v7000_v20 }
 0x358   :  { %9131 = vst [vmem:[#allocation9_spill] sm:$0xff] %v6980_v49  ;;  %v1802_v49 = vadd.f32 %v1735_v56, %v9138_v50 }
 0x35a   :  { %4760 = vtanh.f32 %v1802_v49 }
 0x35d   :  { %v6982_v35 = vpop.f32.mrf.mxu2 }
 0x35e   :  { %9132 = vst [vmem:[#allocation25_spill] sm:$0xff] %v6982_v35 }
 0x362   :  { %4438 = vmatmul.msk.bf16.gmra.mxu2 %vm1145_vm2, %v6987_v46 }
 0x365   :  { %v1658_v9 = vpop.f32.mrf.mxu2 }
 0x366   :  { %v6991_v40 = vadd.f32 %v1759_v54, %v1658_v9  ;;  %v7008_v54 = vpop.f32.mrf.mxu3  ;;  %v7013_v9 = vld [vmem:[%s8805_s3 + $0x18] sm:$0xff] }
 0x367   :  { %9135 = vst [vmem:[#allocation17_spill] sm:$0xff] %v7008_v54 }
 0x368   :  { %9136 = vst [vmem:[#allocation7_spill] sm:$0xff] %v7013_v9 }
 0x36d   :  { %v6995_v31 = vpop.f32.mrf.mxu2 }
 0x372   :  { %4439 = vmatmul.msk.bf16.gmra.mxu2 %vm1145_vm2, %v7000_v20  ;;  %v1774_v20 = vpop.f32.mrf.mxu3 }
 0x375   :  { %v1663_v24 = vpop.f32.mrf.mxu2 }
 0x376   :  { %v7004_v4 = vadd.f32 %v1764_v14, %v1663_v24  ;;  %v9140_v24 = vld [vmem:[#allocation36_spill] sm:$0xff] }
 0x377   :  { %v1794_v42 = vadd.f32 %v6915_v59, %v9140_v24  ;;  %v9143_v24 = vld [vmem:[#allocation29_spill] sm:$0xff] }
 0x379   :  { %4762 = vtanh.f32 %v1794_v42  ;;  %v1804_v42 = vadd.f32 %v1740_v11, %v9143_v24 }
 0x37a   :  { %v7024_v54 = vpop.f32.mrf.mxu3 }
 0x37d   :  { %v7006_v46 = vpop.f32.mrf.mxu2 }
 0x382   :  { %4440 = vmatmul.msk.bf16.gmra.mxu2 %vm1145_vm2, %v7013_v9  ;;  %v9142_v9 = vld [vmem:[#allocation39_spill] sm:$0xff]  ;;  %v1779_v59 = vpop.f32.mrf.mxu3 }
 0x385   :  { %v1668_v57 = vpop.f32.mrf.mxu2 }
 0x386   :  { %v7017_v23 = vadd.f32 %v1769_v58, %v1668_v57  ;;  %v4761_v58 = vpop.eup %4760 }
 0x387   :  { %v4763_v50 = vpop.eup %4762 }
 0x388   :  { %9137 = vst [vmem:[#allocation12_spill] sm:$0xff] %v7017_v23  ;;  %v1858_v49 = vadd.f32 1.0, %v4763_v50  ;;  %v7043_v50 = vld [vmem:[%s8805_s3 + $0x28] sm:$0xff] }
 0x38a   :  { %v1882_v35 = vmul.f32 0.5, %v1858_v49 }
 0x38d   :  { %v7020_v14 = vpop.f32.mrf.mxu2 }
 0x38e   :  { %9139 = vst [vmem:[#allocation24_spill] sm:$0xff] %v7020_v14  ;;  %v1866_v14 = vadd.f32 1.0, %v4761_v58 }
 0x390   :  { %v1890_v0 = vmul.f32 0.5, %v1866_v14  ;;  %v1781_v14 = vpop.f32.mrf.mxu3 }
 0x392   :  { %4441 = vmatmul.msk.bf16.gmra.mxu2 %vm1145_vm2, %v7029_v25 }
 0x395   :  { %v1673_v57 = vpop.f32.mrf.mxu2 }
 0x396   :  { %v1775_v56 = vadd.f32 %v1774_v20, %v1673_v57  ;;  %v1906_v20 = vmul.f32 %v1890_v0, %v6745_v36 }
 0x398   :  { %v1818_v23 = vadd.f32 %v1775_v56, %v9142_v9 }
 0x39a   :  { %4764 = vtanh.f32 %v1818_v23 }
 0x39b   :  { %4766 = vtanh.f32 %v1804_v42  ;;  %v1798_v42 = vadd.f32 %v6931_v47, %v6662_v27  ;;  %v7066_v47 = vld [vmem:[%s8805_s3 + $0x30] sm:$0xff] }
 0x39c   :  { %4768 = vtanh.f32 %v1796_v17 }
 0x39d   :  { %v7035_v33 = vpop.f32.mrf.mxu2 }
 0x3a0   :  { %v4765_v25 = vpop.eup %4764 }
 0x3a1   :  { %v1914_v57 = vmul.f32 %v4765_v25, %v1882_v35  ;;  %v4767_v2 = vpop.eup %4766  ;;  %v1806_v25 = vadd.f32 %v6959_v26, %v6664_v34  ;;  %v1742_v26 = vadd.f32 %v6945_v1, %v6953_v8  ;;  %v1737_v1 = vadd.f32 %v6937_v10, %v6947_v15 }
 0x3a2   :  { %4442 = vmatmul.msk.bf16.gmra.mxu2 %vm1145_vm2, %v7043_v50  ;;  %v4769_v56 = vpop.eup %4768  ;;  %v1868_v36 = vadd.f32 1.0, %v4767_v2  ;;  %v1795_v2 = vadd.f32 %v6917_v61, %v6728_v53  ;;  %v1801_v10 = vadd.f32 %v6941_v16, %v6650_v44  ;;  %v1812_v16 = vadd.f32 %v6991_v40, %v6772_v22  ;;  %v9202_v22 = vld [vmem:[#allocation36_spill] sm:$0xff] }
 0x3a3   :  { %v7047_v23 = vadd.f32 %v1914_v57, %v1906_v20  ;;  %v1860_v0 = vadd.f32 1.0, %v4769_v56  ;;  %v1747_v57 = vadd.f32 %v6951_v28, %v6961_v45  ;;  %v1805_v8 = vadd.f32 %v1742_v26, %v6702_v12 }
 0x3a4   :  { %v1892_v17 = vmul.f32 0.5, %v1868_v36 }
 0x3a5   :  { %v1678_v11 = vpop.f32.mrf.mxu2  ;;  %v1884_v20 = vmul.f32 0.5, %v1860_v0  ;;  %v1807_v61 = vadd.f32 %v1747_v57, %v6676_v19  ;;  %v1800_v0 = vadd.f32 %v6939_v18, %v6642_v32  ;;  %v1808_v57 = vadd.f32 %v6967_v6, %v6632_v5 }
 0x3a6   :  { %v1780_v58 = vadd.f32 %v1779_v59, %v1678_v11  ;;  %v1784_v59 = vpop.f32.mrf.mxu3  ;;  %v1767_v6 = vadd.f32 %v6993_v37, %v7006_v46  ;;  %v1814_v37 = vadd.f32 %v7004_v4, %v6747_v30 }
 0x3a8   :  { %v1820_v49 = vadd.f32 %v1780_v58, %v6741_v21  ;;  %v1908_v58 = vmul.f32 %v1892_v17, %v6777_v60  ;;  %v1799_v60 = vadd.f32 %v6933_v7, %v6644_v39 }
 0x3aa   :  { %4770 = vtanh.f32 %v1820_v49  ;;  %v1797_v49 = vadd.f32 %v6925_v29, %v6666_v52 }
 0x3ab   :  { %4772 = vtanh.f32 %v1806_v25 }
 0x3ac   :  { %4774 = vtanh.f32 %v1798_v42  ;;  %v1803_v42 = vadd.f32 %v1737_v1, %v6737_v55 }
 0x3ad   :  { %v1680_v35 = vpop.f32.mrf.mxu2  ;;  %4776 = vtanh.f32 %v1795_v2 }
 0x3ae   :  { %4778 = vtanh.f32 %v1797_v49  ;;  %v1782_v25 = vadd.f32 %v1781_v14, %v1680_v35  ;;  %v1786_v15 = vpop.f32.mrf.mxu3  ;;  %v1777_v14 = vadd.f32 %v7024_v54, %v7035_v33  ;;  %v1762_v49 = vadd.f32 %v6978_v41, %v6995_v31  ;;  %v9144_v31 = vld [vmem:[#allocation25_spill] sm:$0xff]  ;;  %v9145_v41 = vld [vmem:[#allocation16_spill] sm:$0xff] }
 0x3af   :  { %4780 = vtanh.f32 %v1807_v61 }
 0x3b0   :  { %v4771_v11 = vpop.eup %4770  ;;  %4782 = vtanh.f32 %v1799_v60  ;;  %v1821_v35 = vadd.f32 %v1782_v25, %v6720_v63  ;;  %v1752_v60 = vadd.f32 %v6957_v48, %v6969_v38  ;;  %v1819_v1 = vadd.f32 %v1777_v14, %v6768_v13 }
 0x3b1   :  { %v1916_v56 = vmul.f32 %v4771_v11, %v1884_v20  ;;  %v4773_v29 = vpop.eup %4772  ;;  %4784 = vtanh.f32 %v1805_v8 }
 0x3b2   :  { %4443 = vmatmul.msk.bf16.gmra.mxu2 %vm1145_vm2, %v7066_v47  ;;  %v4775_v17 = vpop.eup %4774  ;;  %v1870_v7 = vadd.f32 1.0, %v4773_v29 }
 0x3b3   :  { %v7071_v28 = vadd.f32 %v1916_v56, %v1908_v58  ;;  %v1862_v18 = vadd.f32 1.0, %v4775_v17 }
 0x3b4   :  { %v1894_v2 = vmul.f32 0.5, %v1870_v7  ;;  %v9147_v7 = vld [vmem:[#allocation28_spill] sm:$0xff] }
 0x3b5   :  { %v1683_v45 = vpop.f32.mrf.mxu2  ;;  %v1886_v61 = vmul.f32 0.5, %v1862_v18 }
 0x3b6   :  { %v1785_v36 = vadd.f32 %v1784_v59, %v1683_v45  ;;  %v4777_v59 = vpop.eup %4776  ;;  %v1910_v40 = vmul.f32 %v1894_v2, %v6823_v62  ;;  %v7109_v62 = vld [vmem:[%s8805_s3 + $0x38] sm:$0xff]  ;;  %v1789_v14 = vpop.f32.mrf.mxu3 }
 0x3b7   :  { %v4779_v11 = vpop.eup %4778  ;;  %v9150_v2 = vld [vmem:[#allocation44_spill] sm:$0xff] }
 0x3b8   :  { %v1822_v20 = vadd.f32 %v1785_v36, %v6682_v43  ;;  %v4781_v58 = vpop.eup %4780  ;;  %v1757_v36 = vadd.f32 %v9145_v41, %v9144_v31  ;;  %v1861_v17 = vadd.f32 1.0, %v4779_v11  ;;  %v1859_v11 = vadd.f32 1.0, %v4777_v59  ;;  %v9153_v41 = vld [vmem:[#allocation8_spill] sm:$0xff] }
 0x3b9   :  { %v4783_v56 = vpop.eup %4782  ;;  %v1871_v8 = vadd.f32 1.0, %v4781_v58  ;;  %v9151_v58 = vld [vmem:[#allocation9_spill] sm:$0xff] }
 0x3ba   :  { %4786 = vtanh.f32 %v1822_v20  ;;  %v4785_v54 = vpop.eup %4784  ;;  %v1813_v20 = vadd.f32 %v1762_v49, %v9147_v7 }
 0x3bb   :  { %4788 = vtanh.f32 %v1800_v0  ;;  %v9146_v0 = vld [vmem:[#allocation42_spill] sm:$0xff]  ;;  %v1895_v49 = vmul.f32 0.5, %v1871_v8 }
 0x3bc   :  { %4790 = vtanh.f32 %v1803_v42  ;;  %v1815_v25 = vadd.f32 %v1767_v6, %v9146_v0  ;;  %v1869_v42 = vadd.f32 1.0, %v4785_v54  ;;  %v9154_v8 = vld [vmem:[#allocation46_spill] sm:$0xff] }
 0x3bd   :  { %4792 = vtanh.f32 %v1801_v10  ;;  %v1685_v26 = vpop.f32.mrf.mxu2  ;;  %v1863_v10 = vadd.f32 1.0, %v4783_v56  ;;  %v1885_v56 = vmul.f32 0.5, %v1861_v17  ;;  %v1883_v17 = vmul.f32 0.5, %v1859_v11  ;;  %v9158_v11 = vld [vmem:[#allocation24_spill] sm:$0xff] }
 0x3be   :  { %4794 = vtanh.f32 %v1808_v57  ;;  %v1787_v33 = vadd.f32 %v1786_v15, %v1685_v26  ;;  %v9148_v15 = vld [vmem:[#allocation23_spill] sm:$0xff] }
 0x3bf   :  { %4796 = vtanh.f32 %v1821_v35  ;;  %v1809_v57 = vadd.f32 %v1752_v60, %v9148_v15 }
 0x3c0   :  { %v4787_v29 = vpop.eup %4786  ;;  %v1823_v46 = vadd.f32 %v1787_v33, %v9090_v51  ;;  %4798 = vtanh.f32 %v1812_v16  ;;  %v1810_v16 = vadd.f32 %v9151_v58, %v9150_v2  ;;  %v9152_v33 = vld [vmem:[#allocation45_spill] sm:$0xff]  ;;  %v1911_v58 = vmul.f32 %v1895_v49, %v9154_v8 }
 0x3c1   :  { %v4789_v45 = vpop.eup %4788  ;;  %v1918_v48 = vmul.f32 %v4787_v29, %v1886_v61  ;;  %v1811_v54 = vadd.f32 %v1757_v36, %v9152_v33  ;;  %v1893_v29 = vmul.f32 0.5, %v1869_v42  ;;  %v9155_v42 = vld [vmem:[#allocation10_spill] sm:$0xff]  ;;  %v9157_v49 = vld [vmem:[#allocation21_spill] sm:$0xff] }
 0x3c2   :  { %v4791_v38 = vpop.eup %4790  ;;  %4800 = vtanh.f32 %v1823_v46  ;;  %4444 = vmatmul.msk.bf16.gmra.mxu2 %vm1145_vm2, %v7109_v62 }
 0x3c3   :  { %v4793_v4 = vpop.eup %4792  ;;  %4802 = vtanh.f32 %v1819_v1  ;;  %v7114_v18 = vadd.f32 %v1918_v48, %v1910_v40  ;;  %v1867_v26 = vadd.f32 1.0, %v4791_v38  ;;  %v1887_v40 = vmul.f32 0.5, %v1863_v10 }
 0x3c4   :  { %v4795_v35 = vpop.eup %4794  ;;  %4804 = vtanh.f32 %v1814_v37  ;;  %v1864_v10 = vadd.f32 1.0, %v4789_v45 }
 0x3c5   :  { %9149 = vst [vmem:[#allocation19_spill] sm:$0xff] %v7114_v18  ;;  %v4797_v6 = vpop.eup %4796  ;;  %4806 = vtanh.f32 %v1815_v25  ;;  %v1688_v61 = vpop.f32.mrf.mxu2  ;;  %v1872_v59 = vadd.f32 1.0, %v4795_v35  ;;  %v1891_v38 = vmul.f32 0.5, %v1867_v26 }
 0x3c6   :  { %4808 = vtanh.f32 %v1813_v20  ;;  %v1790_v60 = vadd.f32 %v1789_v14, %v1688_v61  ;;  %v4799_v1 = vpop.eup %4798  ;;  %v1917_v31 = vmul.f32 %v4797_v6, %v1885_v56  ;;  %v1909_v20 = vmul.f32 %v1893_v29, %v9155_v42  ;;  %v9159_v56 = vld [vmem:[#allocation17_spill] sm:$0xff] }
 0x3c7   :  { %4810 = vtanh.f32 %v1809_v57  ;;  %v1772_v29 = vadd.f32 %v9159_v56, %v9158_v11  ;;  %v9163_v56 = vld [vmem:[#allocation11_spill] sm:$0xff] }
 0x3c8   :  { %v4801_v46 = vpop.eup %4800  ;;  %4812 = vtanh.f32 %v1810_v16  ;;  %v1824_v37 = vadd.f32 %v1790_v60, %v9153_v41  ;;  %v1896_v16 = vmul.f32 0.5, %v1872_v59  ;;  %v7125_v61 = vadd.f32 %v1917_v31, %v1909_v20  ;;  %v1791_v60 = vpop.f32.mrf.mxu3  ;;  %v9161_v20 = vld [vmem:[#allocation35_spill] sm:$0xff] }
 0x3c9   :  { %v4803_v48 = vpop.eup %4802  ;;  %4814 = vtanh.f32 %v1811_v54  ;;  %v1919_v36 = vmul.f32 %v4801_v46, %v1887_v40  ;;  %v1907_v54 = vmul.f32 %v1891_v38, %v9157_v49  ;;  %v1888_v31 = vmul.f32 0.5, %v1864_v10  ;;  %v9160_v38 = vld [vmem:[#allocation34_spill] sm:$0xff]  ;;  %v9162_v49 = vld [vmem:[#allocation12_spill] sm:$0xff] }
 0x3ca   :  { %v4805_v25 = vpop.eup %4804  ;;  %4816 = vtanh.f32 %v1824_v37  ;;  %v1915_v6 = vmul.f32 %v4803_v48, %v1883_v17  ;;  %v1865_v48 = vadd.f32 1.0, %v4793_v4  ;;  %v1912_v42 = vmul.f32 %v1896_v16, %v9160_v38  ;;  %v7144_v16 = vld [vmem:[%s8805_s3 + $0x40] sm:$0xff] }
 0x3cb   :  { %v4807_v14 = vpop.eup %4806  ;;  %v7122_v57 = vadd.f32 %v1919_v36, %v1911_v58  ;;  %4818 = vtanh.f32 %v7114_v18  ;;  %v1878_v46 = vadd.f32 1.0, %v4805_v25  ;;  %v1876_v58 = vadd.f32 1.0, %v4799_v1  ;;  %9165 = vst [vmem:[#allocation26_spill] sm:$0xff] %v7144_v16 }
 0x3cc   :  { %v4809_v35 = vpop.eup %4808  ;;  %4820 = vtanh.f32 %v7071_v28  ;;  %v1879_v8 = vadd.f32 1.0, %v4807_v14  ;;  %v1816_v11 = vadd.f32 %v9162_v49, %v9161_v20  ;;  %v9164_v14 = vld [vmem:[#allocation30_spill] sm:$0xff] }
 0x3cd   :  { %9156 = vst [vmem:[#allocation13_spill] sm:$0xff] %v7122_v57  ;;  %v4811_v26 = vpop.eup %4810  ;;  %v1690_v40 = vpop.f32.mrf.mxu2  ;;  %4822 = vtanh.f32 %v7122_v57  ;;  %v1877_v36 = vadd.f32 1.0, %v4809_v35  ;;  %v7137_v57 = vadd.f32 %v1915_v6, %v1907_v54  ;;  %v1902_v10 = vmul.f32 0.5, %v1878_v46 }
 0x3ce   :  { %v4813_v45 = vpop.eup %4812  ;;  %v1792_v37 = vadd.f32 %v1791_v60, %v1690_v40  ;;  %4824 = vtanh.f32 %v7125_v61  ;;  %v1873_v60 = vadd.f32 1.0, %v4811_v26  ;;  %v1817_v40 = vadd.f32 %v1772_v29, %v9164_v14 }
 0x3cf   :  { %v4815_v59 = vpop.eup %4814  ;;  %4826 = vtanh.f32 %v7047_v23  ;;  %v1874_v1 = vadd.f32 1.0, %v4813_v45  ;;  %v1903_v35 = vmul.f32 0.5, %v1879_v8  ;;  %v1900_v26 = vmul.f32 0.5, %v1876_v58 }
 0x3d0   :  { %v4817_v17 = vpop.eup %4816  ;;  %v1825_v41 = vadd.f32 %v1792_v37, %v9163_v56  ;;  %v1901_v29 = vmul.f32 0.5, %v1877_v36  ;;  %v1875_v46 = vadd.f32 1.0, %v4815_v59  ;;  %v1897_v8 = vmul.f32 0.5, %v1873_v60  ;;  %v9167_v36 = vld [vmem:[#allocation31_spill] sm:$0xff] }
 0x3d1   :  { %v4819_v25 = vpop.eup %4818  ;;  %v1920_v33 = vmul.f32 %v4817_v17, %v1888_v31  ;;  %v1889_v14 = vmul.f32 0.5, %v1865_v48  ;;  %v1898_v58 = vmul.f32 0.5, %v1874_v1 }
 0x3d2   :  { %v4821_v4 = vpop.eup %4820  ;;  %4828 = vtanh.f32 %v1825_v41  ;;  %4445 = vmatmul.msk.bf16.gmra.mxu2 %vm1145_vm2, %v7144_v16  ;;  %v1942_v45 = vmul.f32 %v4819_v25, %v1902_v10  ;;  %v1913_v2 = vmul.f32 %v1897_v8, %v9167_v36  ;;  %v7197_v8 = vld [vmem:[%s8806_s4 + $0x30] sm:$0xff] }
 0x3d3   :  { %v4823_v6 = vpop.eup %4822  ;;  %v7148_v54 = vadd.f32 %v1920_v33, %v1912_v42  ;;  %4830 = vtanh.f32 %v7137_v57  ;;  %v1940_v31 = vmul.f32 %v4821_v4, %v1900_v26  ;;  %v1899_v33 = vmul.f32 0.5, %v1875_v46  ;;  %v9170_v26 = vld [vmem:[#allocation37_spill] sm:$0xff]  ;;  %v7190_v46 = vld [vmem:[%s8806_s4 + $0x28] sm:$0xff]  ;;  %9176 = vst [vmem:[#allocation16_spill] sm:$0xff] %v7197_v8 }
 0x3d4   :  { %v4825_v37 = vpop.eup %4824  ;;  %4832 = vtanh.f32 %v1816_v11  ;;  %v1943_v41 = vmul.f32 %v4823_v6, %v1903_v35  ;;  %9175 = vst [vmem:[#allocation25_spill] sm:$0xff] %v7190_v46 }
 0x3d5   :  { %9166 = vst [vmem:[#allocation6_spill] sm:$0xff] %v7148_v54  ;;  %4834 = vtanh.f32 %v1817_v40  ;;  %v1941_v17 = vmul.f32 %v4825_v37, %v1901_v29  ;;  %v4827_v49 = vpop.eup %4826  ;;  %v7175_v29 = vld [vmem:[%s8805_s3 + $0x58] sm:$0xff]  ;;  %v9172_v37 = vld [vmem:[#allocation14_spill] sm:$0xff] }
 0x3d6   :  { %v1953_v38 = vpack.c.bf16 %v1943_v41, %v1942_v45  ;;  %v1938_v11 = vmul.f32 %v4827_v49, %v1898_v58  ;;  %4836 = vtanh.f32 %v7148_v54  ;;  %v9173_v45 = vld [vmem:[#allocation47_spill] sm:$0xff]  ;;  %v9174_v41 = vld [vmem:[#allocation48_spill] sm:$0xff] }
 0x3d7   :  { %v1952_v56 = vpack.c.bf16 %v1941_v17, %v1940_v31  ;;  %v2065_v31 = vpop.f32.mrf.mxu1  ;;  %v7211_v49 = vld [vmem:[%s8806_s4 + $0x38] sm:$0xff] }
 0x3d8   :  { %v4829_v20 = vpop.eup %4828  ;;  %9178 = vst [vmem:[#allocation46_spill] sm:$0xff] %v7211_v49 }
 0x3d9   :  { %v4831_v42 = vpop.eup %4830  ;;  %v1921_v15 = vmul.f32 %v4829_v20, %v1889_v14  ;;  %v7159_v20 = vld [vmem:[%s8805_s3 + $0x48] sm:$0xff] }
 0x3da   :  { %v4833_v7 = vpop.eup %4832  ;;  %v1939_v25 = vmul.f32 %v4831_v42, %v1899_v33  ;;  %9169 = vst [vmem:[#allocation29_spill] sm:$0xff] %v7159_v20  ;;  %v7218_v42 = vld [vmem:[%s8805_s3 + $0x68] sm:$0xff] }
 0x3db   :  { %v4835_v10 = vpop.eup %4834  ;;  %v7152_v59 = vadd.f32 %v1921_v15, %v1913_v2  ;;  %v1880_v48 = vadd.f32 1.0, %v4833_v7  ;;  %v7166_v7 = vld [vmem:[%s8805_s3 + $0x50] sm:$0xff]  ;;  %9179 = vst [vmem:[#allocation10_spill] sm:$0xff] %v7218_v42 }
 0x3dc   :  { %v1951_v60 = vpack.c.bf16 %v1939_v25, %v1938_v11  ;;  %v1881_v40 = vadd.f32 1.0, %v4835_v10  ;;  %v4837_v4 = vpop.eup %4836  ;;  %v7227_v25 = vld [vmem:[%s8806_s4 + $0x40] sm:$0xff] }
 0x3dd   :  { %9168 = vst [vmem:[#allocation39_spill] sm:$0xff] %v7152_v59  ;;  %4838 = vtanh.f32 %v7152_v59  ;;  %v1904_v1 = vmul.f32 0.5, %v1880_v48 }
 0x3de   :  { %v1905_v35 = vmul.f32 0.5, %v1881_v40  ;;  %9180 = vst [vmem:[#allocation21_spill] sm:$0xff] %v7227_v25 }
 0x3df   :  { %v1944_v2 = vmul.f32 %v4837_v4, %v1904_v1  ;;  %v2067_v17 = vpop.f32.mrf.mxu1  ;;  %v7236_v4 = vld [vmem:[%s8805_s3 + $0x70] sm:$0xff] }
 0x3e0   :  { %9181 = vst [vmem:[#allocation24_spill] sm:$0xff] %v7236_v4 }
 0x3e2   :  { %4446 = vmatmul.msk.bf16.gmra.mxu2 %vm1145_vm2, %v7159_v20 }
 0x3e3   :  { %v4839_v15 = vpop.eup %4838 }
 0x3e4   :  { %v1945_v14 = vmul.f32 %v4839_v15, %v1905_v35  ;;  %v7245_v15 = vld [vmem:[%s8806_s4 + $0x48] sm:$0xff] }
 0x3e5   :  { %9182 = vst [vmem:[#allocation17_spill] sm:$0xff] %v7245_v15 }
 0x3e6   :  { %v1954_v6 = vpack.c.bf16 %v1945_v14, %v1944_v2 }
 0x3e7   :  { %v2070_v58 = vpop.f32.mrf.mxu1 }
 0x3e8   :  { %1959 = vmatpush.bf16.msrb.mxu0 %v1954_v6 }
 0x3ec   :  { %1960 = vmatpush.bf16.msrb.mxu0 %v1953_v38  ;;  %v7204_v38 = vld [vmem:[%s8805_s3 + $0x60] sm:$0xff] }
 0x3ed   :  { %9177 = vst [vmem:[#allocation9_spill] sm:$0xff] %v7204_v38  ;;  %4409 = vmatmul.msk.bf16.gmra.mxu1 %vm1145_vm2, %v7204_v38 }
 0x3ef   :  { %v2072_v33 = vpop.f32.mrf.mxu1 }
 0x3f0   :  { %1961 = vmatpush.bf16.msrb.mxu0 %v1952_v56  ;;  %v9171_v56 = vld [vmem:[#allocation22_spill] sm:$0xff] }
 0x3f2   :  { %4447 = vmatmul.msk.bf16.gmra.mxu2 %vm1145_vm2, %v7166_v7 }
 0x3f4   :  { %1962 = vmatpush.bf16.msrb.mxu0 %v1951_v60 }
 0x3f7   :  { %4373 = vmatmul.msk.bf16.vlgmr.msrb.gmra.mxu0 %vm915_vm0, %v9170_v26  ;;  %v2075_v10 = vpop.f32.mrf.mxu1 }
 0x3fd   :  { %4410 = vmatmul.msk.bf16.gmra.mxu1 %vm1145_vm2, %v7218_v42 }
 0x3ff   :  { %v2077_v40 = vpop.f32.mrf.mxu1 }
 0x402   :  { %4448 = vmatmul.msk.bf16.gmra.mxu2 %vm1145_vm2, %v7175_v29 }
 0x407   :  { %4374 = vmatmul.msk.bf16.gmra.mxu0 %vm915_vm0, %v9171_v56  ;;  %v2080_v2 = vpop.f32.mrf.mxu1  ;;  %v7254_v56 = vld [vmem:[%s8805_s3 + $0x78] sm:$0xff] }
 0x408   :  { %9183 = vst [vmem:[#allocation34_spill] sm:$0xff] %v7254_v56 }
 0x40d   :  { %4411 = vmatmul.msk.bf16.gmra.mxu1 %vm1145_vm2, %v7236_v4 }
 0x40f   :  { %v2082_v26 = vpop.f32.mrf.mxu1 }
 0x417   :  { %4375 = vmatmul.msk.bf16.gmra.mxu0 %vm915_vm0, %v9172_v37 }
 0x41d   :  { %4412 = vmatmul.msk.bf16.gmra.mxu1 %vm1145_vm2, %v7254_v56 }
 0x427   :  { %4376 = vmatmul.msk.bf16.gmra.mxu0 %vm915_vm0, %v9173_v45 }
 0x437   :  { %4377 = vmatmul.msk.bf16.gmra.mxu0 %vm915_vm0, %v9174_v41  ;;  %v7263_v41 = vld [vmem:[%s8806_s4 + $0x50] sm:$0xff] }
 0x438   :  { %9184 = vst [vmem:[#allocation12_spill] sm:$0xff] %v7263_v41 }
 0x447   :  { %4378 = vmatmul.msk.bf16.gmra.mxu0 %vm915_vm0, %v7190_v46 }
 0x457   :  { %4379 = vmatmul.msk.bf16.gmra.mxu0 %vm915_vm0, %v7197_v8  ;;  %v9194_v8 = vld [vmem:[#allocation27_spill] sm:$0xff] }
 0x467   :  { %4380 = vmatmul.msk.bf16.gmra.mxu0 %vm915_vm0, %v7211_v49 }
 0x474   :  { %v1964_v36 = vpop.f32.mrf.mxu0 }
 0x475   :  { %v7222_v11 = vadd.f32 %v2065_v31, %v1964_v36  ;;  %v2085_v31 = vpop.f32.mrf.mxu1 }
 0x477   :  { %4381 = vmatmul.msk.bf16.gmra.mxu0 %vm915_vm0, %v7227_v25  ;;  %v9191_v25 = vld [vmem:[#allocation7_spill] sm:$0xff] }
 0x47c   :  { %v1966_v60 = vpop.f32.mrf.mxu0 }
 0x47d   :  { %v7231_v48 = vadd.f32 %v2067_v17, %v1966_v60  ;;  %v7269_v36 = vpop.f32.mrf.mxu1  ;;  %v9185_v60 = vld [vmem:[#allocation20_spill] sm:$0xff] }
 0x47e   :  { %4477 = vmatmul.msk.bf16.vlgmr.msra.gmra.mxu1 %vm1145_vm2, %v9185_v60 }
 0x484   :  { %v1969_v1 = vpop.f32.mrf.mxu0 }
 0x485   :  { %v7240_v35 = vadd.f32 %v2070_v58, %v1969_v1  ;;  %v7278_v1 = vld [vmem:[%s8806_s4 + $0x58] sm:$0xff] }
 0x486   :  { %9186 = vst [vmem:[#allocation31_spill] sm:$0xff] %v7278_v1 }
 0x487   :  { %4382 = vmatmul.msk.bf16.gmra.mxu0 %vm915_vm0, %v7245_v15 }
 0x48c   :  { %v1971_v14 = vpop.f32.mrf.mxu0 }
 0x48d   :  { %v7249_v6 = vadd.f32 %v2072_v33, %v1971_v14 }
 0x494   :  { %v1974_v37 = vpop.f32.mrf.mxu0 }
 0x495   :  { %v7258_v45 = vadd.f32 %v2075_v10, %v1974_v37  ;;  %v2090_v37 = vpop.f32.mrf.mxu1 }
 0x497   :  { %4383 = vmatmul.msk.bf16.gmra.mxu0 %vm915_vm0, %v7263_v41  ;;  %v9187_v41 = vld [vmem:[#allocation15_spill] sm:$0xff] }
 0x49c   :  { %v1976_v17 = vpop.f32.mrf.mxu0 }
 0x49d   :  { %v7267_v58 = vadd.f32 %v2077_v40, %v1976_v17  ;;  %v7284_v56 = vpop.f32.mrf.mxu1  ;;  %4478 = vmatmul.msk.bf16.gmra.mxu1 %vm1145_vm2, %v9187_v41  ;;  %v7304_v41 = vld [vmem:[%s8806_s4 + $0x68] sm:$0xff] }
 0x49e   :  { %9190 = vst [vmem:[#allocation22_spill] sm:$0xff] %v7304_v41 }
 0x4a4   :  { %v1979_v33 = vpop.f32.mrf.mxu0 }
 0x4a5   :  { %v7273_v10 = vadd.f32 %v2080_v2, %v1979_v33  ;;  %v7291_v33 = vld [vmem:[%s8806_s4 + $0x60] sm:$0xff] }
 0x4a6   :  { %9188 = vst [vmem:[#allocation37_spill] sm:$0xff] %v7291_v33 }
 0x4a7   :  { %4384 = vmatmul.msk.bf16.gmra.mxu0 %vm915_vm0, %v7278_v1  ;;  %v2095_v1 = vpop.f32.mrf.mxu1 }
 0x4ac   :  { %v1981_v14 = vpop.f32.mrf.mxu0 }
 0x4ad   :  { %v7282_v40 = vadd.f32 %v2082_v26, %v1981_v14  ;;  %v9189_v14 = vld [vmem:[#allocation18_spill] sm:$0xff] }
 0x4af   :  { %v7295_v26 = vpop.f32.mrf.mxu1  ;;  %4479 = vmatmul.msk.bf16.gmra.mxu1 %vm1145_vm2, %v9189_v14 }
 0x4b4   :  { %v1984_v17 = vpop.f32.mrf.mxu0 }
 0x4b5   :  { %v2086_v2 = vadd.f32 %v2085_v31, %v1984_v17 }
 0x4b7   :  { %4385 = vmatmul.msk.bf16.gmra.mxu0 %vm915_vm0, %v7291_v33  ;;  %v2100_v17 = vpop.f32.mrf.mxu1 }
 0x4bc   :  { %v1986_v60 = vpop.f32.mrf.mxu0 }
 0x4bf   :  { %v7310_v42 = vpop.f32.mrf.mxu1  ;;  %4480 = vmatmul.msk.bf16.gmra.mxu1 %vm1145_vm2, %v9191_v25 }
 0x4c4   :  { %v1989_v4 = vpop.f32.mrf.mxu0 }
 0x4c5   :  { %v7299_v15 = vadd.f32 %v2090_v37, %v1989_v4  ;;  %v7319_v4 = vld [vmem:[%s8806_s4 + $0x70] sm:$0xff] }
 0x4c6   :  { %9192 = vst [vmem:[#allocation14_spill] sm:$0xff] %v7319_v4 }
 0x4c7   :  { %4386 = vmatmul.msk.bf16.gmra.mxu0 %vm915_vm0, %v7304_v41  ;;  %v2105_v41 = vpop.f32.mrf.mxu1 }
 0x4cc   :  { %v7308_v31 = vpop.f32.mrf.mxu0 }
 0x4cf   :  { %v7325_v49 = vpop.f32.mrf.mxu1  ;;  %4481 = vmatmul.msk.bf16.gmra.mxu1 %vm1145_vm2, %v9194_v8 }
 0x4d0   :  { %9193 = vst [vmem:[#allocation47_spill] sm:$0xff] %v7325_v49 }
 0x4d4   :  { %v1994_v33 = vpop.f32.mrf.mxu0 }
 0x4d5   :  { %v7314_v14 = vadd.f32 %v2095_v1, %v1994_v33  ;;  %v7334_v1 = vld [vmem:[%s8806_s4 + $0x78] sm:$0xff] }
 0x4d6   :  { %9195 = vst [vmem:[#allocation48_spill] sm:$0xff] %v7334_v1 }
 0x4d7   :  { %4387 = vmatmul.msk.bf16.gmra.mxu0 %vm915_vm0, %v7319_v4  ;;  %v2110_v4 = vpop.f32.mrf.mxu1 }
 0x4dc   :  { %v7323_v37 = vpop.f32.mrf.mxu0 }
 0x4df   :  { %v7340_v59 = vpop.f32.mrf.mxu1  ;;  %4482 = vmatmul.msk.bf16.gmra.mxu1 %vm1145_vm2, %v7043_v50 }
 0x4e4   :  { %v1999_v38 = vpop.f32.mrf.mxu0 }
 0x4e5   :  { %v7329_v25 = vadd.f32 %v2100_v17, %v1999_v38 }
 0x4e7   :  { %4388 = vmatmul.msk.bf16.gmra.mxu0 %vm915_vm0, %v7334_v1  ;;  %v2115_v17 = vpop.f32.mrf.mxu1 }
 0x4ec   :  { %v7338_v33 = vpop.f32.mrf.mxu0 }
 0x4ef   :  { %v7348_v0 = vpop.f32.mrf.mxu1  ;;  %4483 = vmatmul.msk.bf16.gmra.mxu1 %vm1145_vm2, %v7066_v47 }
 0x4f4   :  { %v2004_v46 = vpop.f32.mrf.mxu0 }
 0x4f5   :  { %v7344_v8 = vadd.f32 %v2105_v41, %v2004_v46 }
 0x4f7   :  { %9196 = vst [vmem:[#allocation20_spill] sm:$0xff] %v7344_v8  ;;  %v2120_v51 = vpop.f32.mrf.mxu1 }
 0x4fc   :  { %v7346_v38 = vpop.f32.mrf.mxu0 }
 0x4fd   :  { %9197 = vst [vmem:[#allocation15_spill] sm:$0xff] %v7346_v38 }
 0x4ff   :  { %v7356_v18 = vpop.f32.mrf.mxu1  ;;  %4484 = vmatmul.msk.bf16.gmra.mxu1 %vm1145_vm2, %v7109_v62  ;;  %v2145_v62 = vadd.f32 %v7222_v11, %v9202_v22 }
 0x500   :  { %9199 = vst [vmem:[#allocation7_spill] sm:$0xff] %v7356_v18 }
 0x504   :  { %v2009_v54 = vpop.f32.mrf.mxu0 }
 0x505   :  { %v7352_v1 = vadd.f32 %v2110_v4, %v2009_v54  ;;  %v9201_v54 = vld [vmem:[#allocation33_spill] sm:$0xff] }
 0x506   :  { %v2153_v4 = vadd.f32 %v2086_v2, %v9201_v54 }
 0x507   :  { %9198 = vst [vmem:[#allocation18_spill] sm:$0xff] %v7352_v1  ;;  %v2125_v41 = vpop.f32.mrf.mxu1 }
 0x508   :  { %4840 = vtanh.f32 %v2153_v4 }
 0x509   :  { %4842 = vtanh.f32 %v2145_v62 }
 0x50c   :  { %v7354_v49 = vpop.f32.mrf.mxu0 }
 0x50e   :  { %v4841_v2 = vpop.eup %4840 }
 0x50f   :  { %v2127_v38 = vpop.f32.mrf.mxu1  ;;  %4485 = vmatmul.msk.bf16.gmra.mxu1 %vm1145_vm2, %v7144_v16  ;;  %v4843_v54 = vpop.eup %4842  ;;  %v2217_v4 = vadd.f32 1.0, %v4841_v2 }
 0x511   :  { %v2241_v62 = vmul.f32 0.5, %v2217_v4  ;;  %v2148_v4 = vadd.f32 %v7249_v6, %v6666_v52 }
 0x514   :  { %v2014_v30 = vpop.f32.mrf.mxu0 }
 0x515   :  { %v7360_v50 = vadd.f32 %v2115_v17, %v2014_v30  ;;  %v2088_v30 = vadd.f32 %v7269_v36, %v1986_v60  ;;  %v2209_v36 = vadd.f32 1.0, %v4843_v54  ;;  %v2155_v60 = vadd.f32 %v7299_v15, %v9143_v24 }
 0x516   :  { %v2257_v15 = vmul.f32 %v2241_v62, %v7047_v23 }
 0x517   :  { %9200 = vst [vmem:[#allocation27_spill] sm:$0xff] %v7360_v50  ;;  %v2130_v18 = vpop.f32.mrf.mxu1  ;;  %v2154_v17 = vadd.f32 %v2088_v30, %v6737_v55  ;;  %v2146_v50 = vadd.f32 %v7231_v48, %v6728_v53  ;;  %v2147_v48 = vadd.f32 %v7240_v35, %v6686_v3 }
 0x519   :  { %4844 = vtanh.f32 %v2154_v17  ;;  %v2233_v17 = vmul.f32 0.5, %v2209_v36 }
 0x51a   :  { %4846 = vtanh.f32 %v2146_v50  ;;  %v2093_v50 = vadd.f32 %v7284_v56, %v7308_v31 }
 0x51c   :  { %v7362_v46 = vpop.f32.mrf.mxu0 }
 0x524   :  { %v2019_v8 = vpop.f32.mrf.mxu0 }
 0x525   :  { %v7366_v47 = vadd.f32 %v2120_v51, %v2019_v8  ;;  %v2132_v51 = vpop.f32.mrf.mxu1  ;;  %4486 = vmatmul.msk.bf16.gmra.mxu1 %vm1145_vm2, %v7159_v20  ;;  %v4845_v20 = vpop.eup %4844 }
 0x526   :  { %v2218_v2 = vadd.f32 1.0, %v4845_v20 }
 0x528   :  { %v2242_v36 = vmul.f32 0.5, %v2218_v2 }
 0x52a   :  { %v2258_v62 = vmul.f32 %v2242_v36, %v7137_v57  ;;  %v2098_v36 = vadd.f32 %v7295_v26, %v7323_v37 }
 0x52c   :  { %v7369_v1 = vpop.f32.mrf.mxu0 }
 0x52d   :  { %v7384_v53 = vpop.f32.mrf.mxu1 }
 0x534   :  { %v2024_v16 = vpop.f32.mrf.mxu0 }
 0x535   :  { %v2126_v8 = vadd.f32 %v2125_v41, %v2024_v16  ;;  %v4847_v41 = vpop.eup %4846 }
 0x537   :  { %v2169_v11 = vadd.f32 %v2126_v8, %v9142_v9  ;;  %v2210_v8 = vadd.f32 1.0, %v4847_v41 }
 0x539   :  { %4848 = vtanh.f32 %v2169_v11 }
 0x53a   :  { %4850 = vtanh.f32 %v2155_v60 }
 0x53b   :  { %4852 = vtanh.f32 %v2147_v48 }
 0x53c   :  { %v2026_v30 = vpop.f32.mrf.mxu0 }
 0x53d   :  { %v2128_v16 = vadd.f32 %v2127_v38, %v2026_v30  ;;  %v2156_v38 = vadd.f32 %v2093_v50, %v6702_v12  ;;  %v7395_v30 = vpop.f32.mrf.mxu1  ;;  %4487 = vmatmul.msk.bf16.gmra.mxu1 %vm1145_vm2, %v7166_v7 }
 0x53f   :  { %v4849_v55 = vpop.eup %4848  ;;  %v2170_v54 = vadd.f32 %v2128_v16, %v6768_v13 }
 0x540   :  { %v2265_v35 = vmul.f32 %v4849_v55, %v2233_v17  ;;  %v4851_v56 = vpop.eup %4850  ;;  %v2234_v55 = vmul.f32 0.5, %v2210_v8  ;;  %v2157_v17 = vadd.f32 %v7314_v14, %v6664_v34 }
 0x541   :  { %4854 = vtanh.f32 %v2170_v54  ;;  %v4853_v20 = vpop.eup %4852  ;;  %v2219_v16 = vadd.f32 1.0, %v4851_v56 }
 0x542   :  { %v7390_v11 = vadd.f32 %v2265_v35, %v2257_v15  ;;  %4856 = vtanh.f32 %v2156_v38  ;;  %v2211_v41 = vadd.f32 1.0, %v4853_v20 }
 0x543   :  { %4858 = vtanh.f32 %v2148_v4  ;;  %v2243_v54 = vmul.f32 0.5, %v2219_v16 }
 0x544   :  { %v2029_v60 = vpop.f32.mrf.mxu0  ;;  %v2235_v57 = vmul.f32 0.5, %v2211_v41 }
 0x545   :  { %v2131_v23 = vadd.f32 %v2130_v18, %v2029_v60  ;;  %v2149_v18 = vadd.f32 %v7258_v45, %v6662_v27  ;;  %v7407_v2 = vpop.f32.mrf.mxu1  ;;  %v2259_v60 = vmul.f32 %v2243_v54, %v7071_v28  ;;  %v2159_v54 = vadd.f32 %v7329_v25, %v6632_v5 }
 0x546   :  { %v2113_v25 = vadd.f32 %v7340_v59, %v7354_v49 }
 0x547   :  { %v4855_v31 = vpop.eup %4854  ;;  %v2171_v48 = vadd.f32 %v2131_v23, %v6741_v21 }
 0x548   :  { %v2266_v6 = vmul.f32 %v4855_v31, %v2234_v55  ;;  %v4857_v35 = vpop.eup %4856  ;;  %v2150_v31 = vadd.f32 %v7267_v58, %v6644_v39 }
 0x549   :  { %4860 = vtanh.f32 %v2171_v48  ;;  %v4859_v38 = vpop.eup %4858  ;;  %v2220_v56 = vadd.f32 1.0, %v4857_v35  ;;  %v2151_v35 = vadd.f32 %v7273_v10, %v6642_v32  ;;  %v2103_v10 = vadd.f32 %v7310_v42, %v7338_v33  ;;  %v9212_v42 = vld [vmem:[#allocation28_spill] sm:$0xff] }
 0x54a   :  { %v7403_v50 = vadd.f32 %v2266_v6, %v2258_v62  ;;  %4862 = vtanh.f32 %v2157_v17  ;;  %v2212_v23 = vadd.f32 1.0, %v4859_v38  ;;  %v2164_v33 = vadd.f32 %v2113_v25, %v9212_v42 }
 0x54b   :  { %4864 = vtanh.f32 %v2149_v18  ;;  %v2244_v48 = vmul.f32 0.5, %v2220_v56  ;;  %v9203_v56 = vld [vmem:[#allocation43_spill] sm:$0xff] }
 0x54c   :  { %v2031_v15 = vpop.f32.mrf.mxu0  ;;  %v2236_v16 = vmul.f32 0.5, %v2212_v23 }
 0x54d   :  { %v2133_v8 = vadd.f32 %v2132_v51, %v2031_v15  ;;  %v2158_v51 = vadd.f32 %v2098_v36, %v6676_v19  ;;  %v7418_v26 = vpop.f32.mrf.mxu1  ;;  %4488 = vmatmul.msk.bf16.gmra.mxu1 %vm1145_vm2, %v7175_v29  ;;  %v2260_v18 = vmul.f32 %v2244_v48, %v7125_v61  ;;  %v9208_v48 = vld [vmem:[#allocation32_spill] sm:$0xff] }
 0x54f   :  { %v4861_v4 = vpop.eup %4860  ;;  %v2172_v14 = vadd.f32 %v2133_v8, %v6720_v63  ;;  %v2152_v8 = vadd.f32 %v7282_v40, %v6650_v44  ;;  %v9204_v40 = vld [vmem:[#allocation18_spill] sm:$0xff] }
 0x550   :  { %v2267_v45 = vmul.f32 %v4861_v4, %v2235_v57  ;;  %v4863_v55 = vpop.eup %4862  ;;  %v2118_v57 = vadd.f32 %v7348_v0, %v7362_v46  ;;  %v9205_v0 = vld [vmem:[#allocation19_spill] sm:$0xff] }
 0x551   :  { %4866 = vtanh.f32 %v2172_v14  ;;  %v4865_v37 = vpop.eup %4864  ;;  %v2221_v41 = vadd.f32 1.0, %v4863_v55  ;;  %v9207_v55 = vld [vmem:[#allocation27_spill] sm:$0xff] }
 0x552   :  { %v7413_v20 = vadd.f32 %v2267_v45, %v2259_v60  ;;  %4868 = vtanh.f32 %v2158_v51  ;;  %v2213_v15 = vadd.f32 1.0, %v4865_v37  ;;  %v2163_v45 = vadd.f32 %v9204_v40, %v9203_v56  ;;  %v9206_v51 = vld [vmem:[#allocation41_spill] sm:$0xff]  ;;  %v9211_v37 = vld [vmem:[#allocation42_spill] sm:$0xff] }
 0x553   :  { %4870 = vtanh.f32 %v2150_v31  ;;  %v2245_v38 = vmul.f32 0.5, %v2221_v41  ;;  %v2165_v31 = vadd.f32 %v9207_v55, %v9206_v51 }
 0x554   :  { %v2034_v62 = vpop.f32.mrf.mxu0  ;;  %v2237_v60 = vmul.f32 0.5, %v2213_v15  ;;  %v9215_v15 = vld [vmem:[#allocation44_spill] sm:$0xff] }
 0x555   :  { %v2136_v28 = vadd.f32 %v7384_v53, %v2034_v62  ;;  %v2261_v46 = vmul.f32 %v2245_v38, %v9205_v0  ;;  %v9210_v62 = vld [vmem:[#allocation47_spill] sm:$0xff] }
 0x557   :  { %v4867_v6 = vpop.eup %4866  ;;  %v2173_v17 = vadd.f32 %v2136_v28, %v6682_v43 }
 0x558   :  { %v2268_v58 = vmul.f32 %v4867_v6, %v2236_v16  ;;  %v4869_v61 = vpop.eup %4868  ;;  %v2166_v16 = vadd.f32 %v2118_v57, %v9211_v37  ;;  %v9263_v37 = vld [vmem:[#allocation26_spill] sm:$0xff] }
 0x559   :  { %4872 = vtanh.f32 %v2173_v17  ;;  %v4871_v14 = vpop.eup %4870  ;;  %v2222_v49 = vadd.f32 1.0, %v4869_v61  ;;  %v9213_v17 = vld [vmem:[#allocation23_spill] sm:$0xff]  ;;  %v9217_v61 = vld [vmem:[#allocation45_spill] sm:$0xff] }
 0x55a   :  { %v7429_v53 = vadd.f32 %v2268_v58, %v2260_v18  ;;  %4874 = vtanh.f32 %v2159_v54  ;;  %v2214_v41 = vadd.f32 1.0, %v4871_v14  ;;  %v2160_v18 = vadd.f32 %v2103_v10, %v9213_v17 }
 0x55b   :  { %4876 = vtanh.f32 %v2151_v35  ;;  %v9216_v35 = vld [vmem:[#allocation20_spill] sm:$0xff] }
 0x55c   :  { %v2036_v4 = vpop.f32.mrf.mxu0  ;;  %4878 = vtanh.f32 %v2152_v8  ;;  %v2161_v8 = vadd.f32 %v9216_v35, %v9215_v15  ;;  %v2238_v14 = vmul.f32 0.5, %v2214_v41 }
 0x55d   :  { %v2138_v36 = vadd.f32 %v7395_v30, %v2036_v4  ;;  %v9209_v30 = vld [vmem:[#allocation15_spill] sm:$0xff]  ;;  %v2246_v4 = vmul.f32 0.5, %v2222_v49 }
 0x55e   :  { %v2108_v28 = vadd.f32 %v9210_v62, %v9209_v30 }
 0x55f   :  { %v4873_v23 = vpop.eup %4872  ;;  %v2174_v59 = vadd.f32 %v2138_v36, %v9208_v48 }
 0x560   :  { %v2269_v6 = vmul.f32 %v4873_v23, %v2237_v60  ;;  %v4875_v54 = vpop.eup %4874  ;;  %v2162_v36 = vadd.f32 %v2108_v28, %v9217_v61 }
 0x561   :  { %4880 = vtanh.f32 %v2174_v59  ;;  %v4877_v38 = vpop.eup %4876  ;;  %v2223_v10 = vadd.f32 1.0, %v4875_v54 }
 0x562   :  { %4882 = vtanh.f32 %v2163_v45  ;;  %v7451_v58 = vadd.f32 %v2269_v6, %v2261_v46  ;;  %v4879_v60 = vpop.eup %4878  ;;  %v9218_v45 = vld [vmem:[#allocation8_spill] sm:$0xff]  ;;  %v9219_v46 = vld [vmem:[#allocation13_spill] sm:$0xff]  ;;  %v2215_v30 = vadd.f32 1.0, %v4877_v38  ;;  %v9221_v6 = vld [vmem:[#allocation7_spill] sm:$0xff] }
 0x563   :  { %4884 = vtanh.f32 %v2165_v31  ;;  %v2262_v55 = vmul.f32 %v2246_v4, %v9219_v46  ;;  %v2247_v62 = vmul.f32 0.5, %v2223_v10  ;;  %v9224_v46 = vld [vmem:[#allocation11_spill] sm:$0xff] }
 0x564   :  { %9214 = vst [vmem:[#allocation43_spill] sm:$0xff] %v7451_v58  ;;  %4886 = vtanh.f32 %v2166_v16  ;;  %v2039_v57 = vpop.f32.mrf.mxu0  ;;  %v2239_v4 = vmul.f32 0.5, %v2215_v30 }
 0x565   :  { %4888 = vtanh.f32 %v2164_v33  ;;  %v2141_v25 = vadd.f32 %v7407_v2, %v2039_v57  ;;  %v2123_v33 = vadd.f32 %v9221_v6, %v7369_v1 }
 0x566   :  { %4890 = vtanh.f32 %v2160_v18 }
 0x567   :  { %v4881_v40 = vpop.eup %4880  ;;  %4892 = vtanh.f32 %v2161_v8  ;;  %v2175_v23 = vadd.f32 %v2141_v25, %v9218_v45 }
 0x568   :  { %v4883_v0 = vpop.eup %4882  ;;  %4894 = vtanh.f32 %v2162_v36  ;;  %v2270_v31 = vmul.f32 %v4881_v40, %v2238_v14  ;;  %v9222_v36 = vld [vmem:[#allocation6_spill] sm:$0xff] }
 0x569   :  { %v4885_v59 = vpop.eup %4884  ;;  %4896 = vtanh.f32 %v2175_v23  ;;  %v2263_v57 = vmul.f32 %v2247_v62, %v9222_v36  ;;  %v2227_v25 = vadd.f32 1.0, %v4883_v0  ;;  %v9223_v23 = vld [vmem:[#allocation35_spill] sm:$0xff] }
 0x56a   :  { %v4887_v49 = vpop.eup %4886  ;;  %v7459_v28 = vadd.f32 %v2270_v31, %v2262_v55  ;;  %4898 = vtanh.f32 %v7451_v58  ;;  %v2229_v54 = vadd.f32 1.0, %v4885_v59  ;;  %v2167_v1 = vadd.f32 %v7366_v47, %v9223_v23  ;;  %v9267_v58 = vld [vmem:[#allocation38_spill] sm:$0xff] }
 0x56b   :  { %v4889_v2 = vpop.eup %4888  ;;  %4900 = vtanh.f32 %v7413_v20  ;;  %v2230_v35 = vadd.f32 1.0, %v4887_v49  ;;  %v2251_v36 = vmul.f32 0.5, %v2227_v25 }
 0x56c   :  { %9220 = vst [vmem:[#allocation18_spill] sm:$0xff] %v7459_v28  ;;  %v4891_v16 = vpop.eup %4890  ;;  %v2041_v41 = vpop.f32.mrf.mxu0  ;;  %4902 = vtanh.f32 %v7459_v28  ;;  %v2228_v14 = vadd.f32 1.0, %v4889_v2  ;;  %v2253_v0 = vmul.f32 0.5, %v2229_v54 }
 0x56d   :  { %v4893_v18 = vpop.eup %4892  ;;  %v2143_v8 = vadd.f32 %v7418_v26, %v2041_v41  ;;  %4904 = vtanh.f32 %v7429_v53  ;;  %v2224_v40 = vadd.f32 1.0, %v4891_v16  ;;  %v9225_v26 = vld [vmem:[#allocation30_spill] sm:$0xff]  ;;  %v2254_v2 = vmul.f32 0.5, %v2230_v35 }
 0x56e   :  { %v4895_v38 = vpop.eup %4894  ;;  %4906 = vtanh.f32 %v7390_v11  ;;  %v2225_v59 = vadd.f32 1.0, %v4893_v18  ;;  %v2168_v49 = vadd.f32 %v2123_v33, %v9225_v26  ;;  %v2216_v41 = vadd.f32 1.0, %v4879_v60 }
 0x56f   :  { %v4897_v10 = vpop.eup %4896  ;;  %v2176_v55 = vadd.f32 %v2143_v8, %v9224_v46  ;;  %4908 = vtanh.f32 %v7403_v50  ;;  %v2226_v62 = vadd.f32 1.0, %v4895_v38  ;;  %v2252_v47 = vmul.f32 0.5, %v2228_v14 }
 0x570   :  { %v4899_v31 = vpop.eup %4898  ;;  %v2271_v6 = vmul.f32 %v4897_v10, %v2239_v4  ;;  %v2248_v28 = vmul.f32 0.5, %v2224_v40  ;;  %v2249_v26 = vmul.f32 0.5, %v2225_v59 }
 0x571   :  { %v4901_v30 = vpop.eup %4900  ;;  %4910 = vtanh.f32 %v2176_v55  ;;  %v2293_v46 = vmul.f32 %v4899_v31, %v2253_v0  ;;  %v2250_v38 = vmul.f32 0.5, %v2226_v62  ;;  %v2240_v55 = vmul.f32 0.5, %v2216_v41 }
 0x572   :  { %v4903_v16 = vpop.eup %4902  ;;  %v7475_v23 = vadd.f32 %v2271_v6, %v2263_v57  ;;  %4912 = vtanh.f32 %v2167_v1  ;;  %v2291_v33 = vmul.f32 %v4901_v30, %v2251_v36  ;;  %v9227_v57 = vld [vmem:[#allocation39_spill] sm:$0xff]  ;;  %v7506_v36 = vld [vmem:[%s8806_s4 + $0x18] sm:$0xff] }
 0x573   :  { %v4905_v8 = vpop.eup %4904  ;;  %v2294_v18 = vmul.f32 %v4903_v16, %v2254_v2  ;;  %4914 = vtanh.f32 %v2168_v49  ;;  %v2264_v6 = vmul.f32 %v2248_v28, %v9227_v57  ;;  %v7492_v28 = vld [vmem:[%s8806_s4 + $0x8] sm:$0xff]  ;;  %9232 = vst [vmem:[#allocation13_spill] sm:$0xff] %v7506_v36 }
 0x574   :  { %9226 = vst [vmem:[#allocation19_spill] sm:$0xff] %v7475_v23  ;;  %v2292_v4 = vmul.f32 %v4905_v8, %v2252_v47  ;;  %v4907_v10 = vpop.eup %4906  ;;  %4916 = vtanh.f32 %v7475_v23  ;;  %v7513_v47 = vld [vmem:[%s8806_s4 + $0x20] sm:$0xff] }
 0x575   :  { %v2304_v54 = vpack.c.bf16 %v2294_v18, %v2293_v46  ;;  %v4909_v35 = vpop.eup %4908  ;;  %v2289_v25 = vmul.f32 %v4907_v10, %v2249_v26  ;;  %9230 = vst [vmem:[#allocation47_spill] sm:$0xff] %v7492_v28  ;;  %v9234_v8 = vld [vmem:[#allocation25_spill] sm:$0xff]  ;;  %v9235_v18 = vld [vmem:[#allocation16_spill] sm:$0xff] }
 0x576   :  { %v2303_v45 = vpack.c.bf16 %v2292_v4, %v2291_v33  ;;  %v2290_v14 = vmul.f32 %v4909_v35, %v2250_v38  ;;  %9233 = vst [vmem:[#allocation7_spill] sm:$0xff] %v7513_v47  ;;  %v2416_v33 = vpop.f32.mrf.mxu2  ;;  %v9236_v4 = vld [vmem:[#allocation46_spill] sm:$0xff]  ;;  %v9237_v38 = vld [vmem:[#allocation9_spill] sm:$0xff] }
 0x577   :  { %v4911_v60 = vpop.eup %4910  ;;  %v9238_v35 = vld [vmem:[#allocation21_spill] sm:$0xff] }
 0x578   :  { %v2272_v61 = vmul.f32 %v4911_v60, %v2240_v55  ;;  %v4913_v1 = vpop.eup %4912  ;;  %v2302_v31 = vpack.c.bf16 %v2290_v14, %v2289_v25  ;;  %v9239_v60 = vld [vmem:[#allocation10_spill] sm:$0xff] }
 0x579   :  { %v4915_v0 = vpop.eup %4914  ;;  %v2231_v59 = vadd.f32 1.0, %v4913_v1 }
 0x57a   :  { %v7479_v40 = vadd.f32 %v2272_v61, %v2264_v6  ;;  %v2232_v46 = vadd.f32 1.0, %v4915_v0  ;;  %v4917_v49 = vpop.eup %4916  ;;  %v7485_v61 = vld [vmem:[%s8806_s4] sm:$0xff] }
 0x57b   :  { %v2255_v30 = vmul.f32 0.5, %v2231_v59  ;;  %9229 = vst [vmem:[#allocation15_spill] sm:$0xff] %v7485_v61  ;;  %v9241_v59 = vld [vmem:[#allocation24_spill] sm:$0xff] }
 0x57c   :  { %9228 = vst [vmem:[#allocation27_spill] sm:$0xff] %v7479_v40  ;;  %4918 = vtanh.f32 %v7479_v40  ;;  %v2256_v62 = vmul.f32 0.5, %v2232_v46  ;;  %v7638_v40 = vld [vmem:[%s8805_s3 + $0x30] sm:$0xff] }
 0x57d   :  { %v2295_v26 = vmul.f32 %v4917_v49, %v2255_v30  ;;  %9258 = vst [vmem:[#allocation24_spill] sm:$0xff] %v7638_v40 }
 0x57e   :  { %v2418_v10 = vpop.f32.mrf.mxu2  ;;  %4449 = vmatmul.msk.bf16.gmra.mxu2 %vm1145_vm2, %v9237_v38  ;;  %v9244_v38 = vld [vmem:[#allocation31_spill] sm:$0xff] }
 0x582   :  { %v4919_v2 = vpop.eup %4918 }
 0x583   :  { %v2296_v16 = vmul.f32 %v4919_v2, %v2256_v62 }
 0x585   :  { %v2305_v41 = vpack.c.bf16 %v2296_v16, %v2295_v26  ;;  %v9242_v26 = vld [vmem:[#allocation12_spill] sm:$0xff] }
 0x587   :  { %2310 = vmatpush.bf16.msra.mxu3 %v2305_v41  ;;  %v9243_v41 = vld [vmem:[#allocation34_spill] sm:$0xff] }
 0x58b   :  { %2311 = vmatpush.bf16.msra.mxu3 %v2304_v54  ;;  %v2421_v54 = vpop.f32.mrf.mxu2 }
 0x58f   :  { %2312 = vmatpush.bf16.msra.mxu3 %v2303_v45  ;;  %v7499_v45 = vld [vmem:[%s8806_s4 + $0x10] sm:$0xff] }
 0x590   :  { %9231 = vst [vmem:[#allocation20_spill] sm:$0xff] %v7499_v45 }
 0x593   :  { %2313 = vmatpush.bf16.msra.mxu3 %v2302_v31  ;;  %v2423_v55 = vpop.f32.mrf.mxu2  ;;  %4450 = vmatmul.msk.bf16.gmra.mxu2 %vm1145_vm2, %v9239_v60  ;;  %v9240_v31 = vld [vmem:[#allocation17_spill] sm:$0xff] }
 0x596   :  { %4413 = vmatmul.msk.bf16.vlgmr.msra.gmra.mxu3 %vm915_vm0, %v7485_v61 }
 0x59b   :  { %v2426_v57 = vpop.f32.mrf.mxu2 }
 0x5a3   :  { %v2428_v0 = vpop.f32.mrf.mxu2  ;;  %4451 = vmatmul.msk.bf16.gmra.mxu2 %vm1145_vm2, %v9241_v59 }
 0x5a6   :  { %4414 = vmatmul.msk.bf16.gmra.mxu3 %vm915_vm0, %v7492_v28 }
 0x5ab   :  { %v2431_v30 = vpop.f32.mrf.mxu2 }
 0x5b3   :  { %v2433_v16 = vpop.f32.mrf.mxu2  ;;  %4452 = vmatmul.msk.bf16.gmra.mxu2 %vm1145_vm2, %v9243_v41  ;;  %v9248_v41 = vld [vmem:[#allocation22_spill] sm:$0xff] }
 0x5b6   :  { %4415 = vmatmul.msk.bf16.gmra.mxu3 %vm915_vm0, %v7499_v45 }
 0x5c6   :  { %4416 = vmatmul.msk.bf16.gmra.mxu3 %vm915_vm0, %v7506_v36 }
 0x5d6   :  { %4417 = vmatmul.msk.bf16.gmra.mxu3 %vm915_vm0, %v7513_v47  ;;  %v7612_v47 = vld [vmem:[%s8805_s3 + $0x20] sm:$0xff] }
 0x5d7   :  { %9254 = vst [vmem:[#allocation9_spill] sm:$0xff] %v7612_v47 }
 0x5e6   :  { %4418 = vmatmul.msk.bf16.gmra.mxu3 %vm915_vm0, %v9234_v8 }
 0x5f6   :  { %4419 = vmatmul.msk.bf16.gmra.mxu3 %vm915_vm0, %v9235_v18 }
 0x606   :  { %4420 = vmatmul.msk.bf16.gmra.mxu3 %vm915_vm0, %v9236_v4 }
 0x616   :  { %4421 = vmatmul.msk.bf16.gmra.mxu3 %vm915_vm0, %v9238_v35 }
 0x619   :  { %v2315_v25 = vpop.f32.mrf.mxu3 }
 0x61a   :  { %v7529_v14 = vadd.f32 %v2416_v33, %v2315_v25  ;;  %v2436_v33 = vpop.f32.mrf.mxu2 }
 0x621   :  { %v2317_v6 = vpop.f32.mrf.mxu3 }
 0x622   :  { %v7531_v1 = vadd.f32 %v2418_v10, %v2317_v6  ;;  %v7551_v35 = vpop.f32.mrf.mxu2 }
 0x626   :  { %4422 = vmatmul.msk.bf16.gmra.mxu3 %vm915_vm0, %v9240_v31  ;;  %v9246_v31 = vld [vmem:[#allocation37_spill] sm:$0xff] }
 0x629   :  { %v2320_v46 = vpop.f32.mrf.mxu3 }
 0x62a   :  { %v7537_v49 = vadd.f32 %v2421_v54, %v2320_v46  ;;  %v7571_v46 = vld [vmem:[%s8805_s3 + $0x8] sm:$0xff] }
 0x62b   :  { %9247 = vst [vmem:[#allocation39_spill] sm:$0xff] %v7571_v46 }
 0x631   :  { %v2322_v62 = vpop.f32.mrf.mxu3 }
 0x632   :  { %v7539_v2 = vadd.f32 %v2423_v55, %v2322_v62  ;;  %v7556_v55 = vld [vmem:[%s8805_s3] sm:$0xff] }
 0x633   :  { %9245 = vst [vmem:[#allocation6_spill] sm:$0xff] %v7556_v55  ;;  %4517 = vmatmul.msk.bf16.vlgmr.msra.gmra.mxu2 %vm1145_vm2, %v7556_v55 }
 0x636   :  { %4423 = vmatmul.msk.bf16.gmra.mxu3 %vm915_vm0, %v9242_v26 }
 0x639   :  { %v2325_v8 = vpop.f32.mrf.mxu3 }
 0x63a   :  { %v7545_v18 = vadd.f32 %v2426_v57, %v2325_v8  ;;  %v2441_v57 = vpop.f32.mrf.mxu2 }
 0x641   :  { %v2327_v4 = vpop.f32.mrf.mxu3 }
 0x642   :  { %v7547_v10 = vadd.f32 %v2428_v0, %v2327_v4  ;;  %v7566_v59 = vpop.f32.mrf.mxu2  ;;  %v7582_v4 = vld [vmem:[%s8805_s3 + $0x10] sm:$0xff] }
 0x643   :  { %4518 = vmatmul.msk.bf16.gmra.mxu2 %vm1145_vm2, %v7571_v46  ;;  %9249 = vst [vmem:[#allocation25_spill] sm:$0xff] %v7582_v4  ;;  %v9252_v46 = vld [vmem:[#allocation48_spill] sm:$0xff] }
 0x646   :  { %4424 = vmatmul.msk.bf16.gmra.mxu3 %vm915_vm0, %v9244_v38 }
 0x649   :  { %v2330_v54 = vpop.f32.mrf.mxu3 }
 0x64a   :  { %v7560_v60 = vadd.f32 %v2431_v30, %v2330_v54  ;;  %v2446_v26 = vpop.f32.mrf.mxu2 }
 0x651   :  { %v2332_v25 = vpop.f32.mrf.mxu3 }
 0x652   :  { %v7562_v6 = vadd.f32 %v2433_v16, %v2332_v25  ;;  %v7577_v8 = vpop.f32.mrf.mxu2  ;;  %v9250_v25 = vld [vmem:[#allocation14_spill] sm:$0xff] }
 0x653   :  { %4519 = vmatmul.msk.bf16.gmra.mxu2 %vm1145_vm2, %v7582_v4 }
 0x656   :  { %4425 = vmatmul.msk.bf16.gmra.mxu3 %vm915_vm0, %v9246_v31 }
 0x659   :  { %v2335_v0 = vpop.f32.mrf.mxu3 }
 0x65a   :  { %v2437_v30 = vadd.f32 %v2436_v33, %v2335_v0  ;;  %v2451_v33 = vpop.f32.mrf.mxu2 }
 0x661   :  { %v2337_v62 = vpop.f32.mrf.mxu3 }
 0x662   :  { %v7592_v0 = vpop.f32.mrf.mxu2 }
 0x666   :  { %4426 = vmatmul.msk.bf16.gmra.mxu3 %vm915_vm0, %v9248_v41  ;;  %v7597_v41 = vld [vmem:[%s8805_s3 + $0x18] sm:$0xff] }
 0x667   :  { %9251 = vst [vmem:[#allocation16_spill] sm:$0xff] %v7597_v41  ;;  %4520 = vmatmul.msk.bf16.gmra.mxu2 %vm1145_vm2, %v7597_v41 }
 0x669   :  { %v2340_v16 = vpop.f32.mrf.mxu3 }
 0x66a   :  { %v7586_v38 = vadd.f32 %v2441_v57, %v2340_v16  ;;  %v2456_v16 = vpop.f32.mrf.mxu2 }
 0x671   :  { %v7588_v54 = vpop.f32.mrf.mxu3 }
 0x672   :  { %v7607_v55 = vpop.f32.mrf.mxu2 }
 0x673   :  { %9253 = vst [vmem:[#allocation46_spill] sm:$0xff] %v7607_v55 }
 0x676   :  { %4427 = vmatmul.msk.bf16.gmra.mxu3 %vm915_vm0, %v9250_v25 }
 0x677   :  { %4521 = vmatmul.msk.bf16.gmra.mxu2 %vm1145_vm2, %v7612_v47 }
 0x679   :  { %v2345_v31 = vpop.f32.mrf.mxu3 }
 0x67a   :  { %v7601_v4 = vadd.f32 %v2446_v26, %v2345_v31  ;;  %v2461_v31 = vpop.f32.mrf.mxu2 }
 0x681   :  { %v7603_v57 = vpop.f32.mrf.mxu3 }
 0x682   :  { %v7620_v45 = vpop.f32.mrf.mxu2 }
 0x686   :  { %4428 = vmatmul.msk.bf16.gmra.mxu3 %vm915_vm0, %v9252_v46  ;;  %v7625_v46 = vld [vmem:[%s8805_s3 + $0x28] sm:$0xff] }
 0x687   :  { %9255 = vst [vmem:[#allocation21_spill] sm:$0xff] %v7625_v46  ;;  %4522 = vmatmul.msk.bf16.gmra.mxu2 %vm1145_vm2, %v7625_v46 }
 0x689   :  { %v2350_v25 = vpop.f32.mrf.mxu3 }
 0x68a   :  { %v7616_v41 = vadd.f32 %v2451_v33, %v2350_v25  ;;  %v2466_v33 = vpop.f32.mrf.mxu2 }
 0x691   :  { %v7618_v26 = vpop.f32.mrf.mxu3 }
 0x692   :  { %v7633_v47 = vpop.f32.mrf.mxu2 }
 0x697   :  { %4523 = vmatmul.msk.bf16.gmra.mxu2 %vm1145_vm2, %v7638_v40 }
 0x699   :  { %v2355_v36 = vpop.f32.mrf.mxu3 }
 0x69a   :  { %v7629_v28 = vadd.f32 %v2456_v16, %v2355_v36  ;;  %v2471_v36 = vpop.f32.mrf.mxu2 }
 0x69c   :  { %9256 = vst [vmem:[#allocation10_spill] sm:$0xff] %v7629_v28  ;;  %v7651_v28 = vld [vmem:[%s8805_s3 + $0x38] sm:$0xff] }
 0x69d   :  { %9261 = vst [vmem:[#allocation31_spill] sm:$0xff] %v7651_v28 }
 0x6a1   :  { %v7631_v61 = vpop.f32.mrf.mxu3 }
 0x6a2   :  { %9257 = vst [vmem:[#allocation17_spill] sm:$0xff] %v7631_v61  ;;  %v7646_v46 = vpop.f32.mrf.mxu2 }
 0x6a3   :  { %9260 = vst [vmem:[#allocation34_spill] sm:$0xff] %v7646_v46  ;;  %v9265_v46 = vld [vmem:[#allocation33_spill] sm:$0xff] }
 0x6a4   :  { %v2504_v61 = vadd.f32 %v2437_v30, %v9265_v46 }
 0x6a6   :  { %4920 = vtanh.f32 %v2504_v61 }
 0x6a7   :  { %4524 = vmatmul.msk.bf16.gmra.mxu2 %vm1145_vm2, %v7651_v28  ;;  %v2496_v28 = vadd.f32 %v7529_v14, %v9202_v22 }
 0x6a9   :  { %v2360_v25 = vpop.f32.mrf.mxu3  ;;  %4922 = vtanh.f32 %v2496_v28 }
 0x6aa   :  { %v7642_v23 = vadd.f32 %v2461_v31, %v2360_v25  ;;  %v2476_v31 = vpop.f32.mrf.mxu2 }
 0x6ac   :  { %9259 = vst [vmem:[#allocation12_spill] sm:$0xff] %v7642_v23  ;;  %v2497_v23 = vadd.f32 %v7531_v1, %v9267_v58  ;;  %v4921_v30 = vpop.eup %4920  ;;  %v2498_v1 = vadd.f32 %v7537_v49, %v6686_v3 }
 0x6ad   :  { %v2568_v61 = vadd.f32 1.0, %v4921_v30 }
 0x6b1   :  { %v7644_v15 = vpop.f32.mrf.mxu3 }
 0x6b2   :  { %v2478_v40 = vpop.f32.mrf.mxu2 }
 0x6b7   :  { %4525 = vmatmul.msk.bf16.gmra.mxu2 %vm1145_vm2, %v9263_v37 }
 0x6b9   :  { %v2365_v16 = vpop.f32.mrf.mxu3 }
 0x6ba   :  { %v7655_v17 = vadd.f32 %v2466_v33, %v2365_v16  ;;  %v2481_v51 = vpop.f32.mrf.mxu2  ;;  %v2439_v33 = vadd.f32 %v7551_v35, %v2337_v62  ;;  %v9266_v16 = vld [vmem:[#allocation40_spill] sm:$0xff]  ;;  %v2506_v35 = vadd.f32 %v7586_v38, %v9143_v24  ;;  %v2592_v62 = vmul.f32 0.5, %v2568_v61 }
 0x6bb   :  { %v2499_v61 = vadd.f32 %v7539_v2, %v6666_v52 }
 0x6bc   :  { %9262 = vst [vmem:[#allocation37_spill] sm:$0xff] %v7655_v17  ;;  %v2505_v17 = vadd.f32 %v2439_v33, %v9266_v16  ;;  %v2608_v38 = vmul.f32 %v2592_v62, %v7390_v11 }
 0x6be   :  { %4924 = vtanh.f32 %v2505_v17 }
 0x6bf   :  { %4926 = vtanh.f32 %v2497_v23  ;;  %v2444_v23 = vadd.f32 %v7566_v59, %v7588_v54 }
 0x6c1   :  { %v7657_v42 = vpop.f32.mrf.mxu3 }
 0x6c9   :  { %v2370_v25 = vpop.f32.mrf.mxu3 }
 0x6ca   :  { %v7661_v55 = vadd.f32 %v2471_v36, %v2370_v25  ;;  %v2483_v36 = vpop.f32.mrf.mxu2  ;;  %v9268_v25 = vld [vmem:[#allocation29_spill] sm:$0xff] }
 0x6cb   :  { %4526 = vmatmul.msk.bf16.gmra.mxu2 %vm1145_vm2, %v9268_v25 }
 0x6cc   :  { %9264 = vst [vmem:[#allocation22_spill] sm:$0xff] %v7661_v55  ;;  %v4923_v55 = vpop.eup %4922 }
 0x6cd   :  { %v2560_v28 = vadd.f32 1.0, %v4923_v55  ;;  %v4925_v25 = vpop.eup %4924 }
 0x6cf   :  { %v2584_v17 = vmul.f32 0.5, %v2560_v28 }
 0x6d1   :  { %v7664_v48 = vpop.f32.mrf.mxu3 }
 0x6d2   :  { %v7679_v58 = vpop.f32.mrf.mxu2 }
 0x6d9   :  { %v2375_v37 = vpop.f32.mrf.mxu3 }
 0x6da   :  { %v2477_v46 = vadd.f32 %v2476_v31, %v2375_v37  ;;  %v4927_v37 = vpop.eup %4926 }
 0x6db   :  { %v2561_v30 = vadd.f32 1.0, %v4927_v37 }
 0x6dc   :  { %v2520_v14 = vadd.f32 %v2477_v46, %v9142_v9  ;;  %v2569_v46 = vadd.f32 1.0, %v4925_v25 }
 0x6de   :  { %4928 = vtanh.f32 %v2520_v14  ;;  %v2593_v28 = vmul.f32 0.5, %v2569_v46 }
 0x6df   :  { %4930 = vtanh.f32 %v2506_v35 }
 0x6e0   :  { %4932 = vtanh.f32 %v2498_v1  ;;  %v2609_v25 = vmul.f32 %v2593_v28, %v7403_v50 }
 0x6e1   :  { %v2377_v33 = vpop.f32.mrf.mxu3 }
 0x6e2   :  { %v2479_v31 = vadd.f32 %v2478_v40, %v2377_v33  ;;  %v2507_v40 = vadd.f32 %v2444_v23, %v6702_v12  ;;  %v7690_v33 = vpop.f32.mrf.mxu2  ;;  %4527 = vmatmul.msk.bf16.gmra.mxu2 %vm1145_vm2, %v7166_v7  ;;  %v2500_v7 = vadd.f32 %v7545_v18, %v6662_v27 }
 0x6e4   :  { %v4929_v16 = vpop.eup %4928  ;;  %v2521_v55 = vadd.f32 %v2479_v31, %v6768_v13 }
 0x6e5   :  { %v2616_v49 = vmul.f32 %v4929_v16, %v2584_v17  ;;  %v4931_v59 = vpop.eup %4930  ;;  %v2585_v16 = vmul.f32 0.5, %v2561_v30  ;;  %v2508_v17 = vadd.f32 %v7601_v4, %v6664_v34 }
 0x6e6   :  { %4934 = vtanh.f32 %v2521_v55  ;;  %v4933_v54 = vpop.eup %4932  ;;  %v2570_v31 = vadd.f32 1.0, %v4931_v59 }
 0x6e7   :  { %v7685_v14 = vadd.f32 %v2616_v49, %v2608_v38  ;;  %4936 = vtanh.f32 %v2507_v40  ;;  %v2562_v37 = vadd.f32 1.0, %v4933_v54 }
 0x6e8   :  { %4938 = vtanh.f32 %v2499_v61  ;;  %v2449_v61 = vadd.f32 %v7577_v8, %v7603_v57 }
 0x6e9   :  { %v2380_v35 = vpop.f32.mrf.mxu3  ;;  %v2586_v50 = vmul.f32 0.5, %v2562_v37 }
 0x6ea   :  { %v2482_v11 = vadd.f32 %v2481_v51, %v2380_v35  ;;  %v2594_v51 = vmul.f32 0.5, %v2570_v31  ;;  %v7702_v38 = vpop.f32.mrf.mxu2 }
 0x6ec   :  { %v4935_v1 = vpop.eup %4934  ;;  %v2522_v62 = vadd.f32 %v2482_v11, %v6741_v21  ;;  %v2610_v28 = vmul.f32 %v2594_v51, %v7413_v20 }
 0x6ed   :  { %v2617_v2 = vmul.f32 %v4935_v1, %v2585_v16  ;;  %v4937_v46 = vpop.eup %4936  ;;  %v2501_v16 = vadd.f32 %v7547_v10, %v6644_v39 }
 0x6ee   :  { %4940 = vtanh.f32 %v2522_v62  ;;  %v4939_v30 = vpop.eup %4938  ;;  %v2571_v35 = vadd.f32 1.0, %v4937_v46 }
 0x6ef   :  { %v7698_v23 = vadd.f32 %v2617_v2, %v2609_v25  ;;  %4942 = vtanh.f32 %v2508_v17  ;;  %v2563_v59 = vadd.f32 1.0, %v4939_v30 }
 0x6f0   :  { %4944 = vtanh.f32 %v2500_v7  ;;  %v2595_v1 = vmul.f32 0.5, %v2571_v35  ;;  %v2510_v7 = vadd.f32 %v7616_v41, %v6632_v5  ;;  %v2464_v41 = vadd.f32 %v7620_v45, %v7644_v15  ;;  %v9271_v35 = vld [vmem:[#allocation41_spill] sm:$0xff] }
 0x6f1   :  { %v2382_v55 = vpop.f32.mrf.mxu3  ;;  %v2587_v25 = vmul.f32 0.5, %v2563_v59 }
 0x6f2   :  { %v2484_v49 = vadd.f32 %v2483_v36, %v2382_v55  ;;  %v2509_v36 = vadd.f32 %v2449_v61, %v6676_v19  ;;  %v7713_v8 = vpop.f32.mrf.mxu2  ;;  %4528 = vmatmul.msk.bf16.gmra.mxu2 %vm1145_vm2, %v7175_v29  ;;  %v2611_v17 = vmul.f32 %v2595_v1, %v7429_v53  ;;  %v2502_v29 = vadd.f32 %v7560_v60, %v6642_v32  ;;  %v9276_v1 = vld [vmem:[#allocation42_spill] sm:$0xff] }
 0x6f3   :  { %v2503_v55 = vadd.f32 %v7562_v6, %v6650_v44  ;;  %v2454_v60 = vadd.f32 %v7592_v0, %v7618_v26  ;;  %v9269_v6 = vld [vmem:[#allocation12_spill] sm:$0xff] }
 0x6f4   :  { %v4941_v40 = vpop.eup %4940  ;;  %v2523_v4 = vadd.f32 %v2484_v49, %v6720_v63  ;;  %v2469_v49 = vadd.f32 %v7633_v47, %v7657_v42  ;;  %v9270_v42 = vld [vmem:[#allocation43_spill] sm:$0xff]  ;;  %v9277_v0 = vld [vmem:[#allocation28_spill] sm:$0xff] }
 0x6f5   :  { %v2618_v18 = vmul.f32 %v4941_v40, %v2586_v50  ;;  %v4943_v54 = vpop.eup %4942  ;;  %v2515_v26 = vadd.f32 %v2464_v41, %v9277_v0 }
 0x6f6   :  { %4946 = vtanh.f32 %v2523_v4  ;;  %v4945_v57 = vpop.eup %4944  ;;  %v2572_v2 = vadd.f32 1.0, %v4943_v54  ;;  %v2514_v4 = vadd.f32 %v9269_v6, %v9203_v56  ;;  %v9275_v54 = vld [vmem:[#allocation46_spill] sm:$0xff] }
 0x6f7   :  { %v7708_v11 = vadd.f32 %v2618_v18, %v2610_v28  ;;  %4948 = vtanh.f32 %v2509_v36  ;;  %v2564_v51 = vadd.f32 1.0, %v4945_v57  ;;  %v9272_v18 = vld [vmem:[#allocation37_spill] sm:$0xff]  ;;  %v9273_v36 = vld [vmem:[#allocation32_spill] sm:$0xff] }
 0x6f8   :  { %4950 = vtanh.f32 %v2501_v16  ;;  %v2596_v46 = vmul.f32 0.5, %v2572_v2  ;;  %v2516_v59 = vadd.f32 %v9272_v18, %v9271_v35 }
 0x6f9   :  { %v2385_v62 = vpop.f32.mrf.mxu3  ;;  %v2588_v61 = vmul.f32 0.5, %v2564_v51 }
 0x6fa   :  { %v2487_v20 = vadd.f32 %v7679_v58, %v2385_v62  ;;  %v2612_v47 = vmul.f32 %v2596_v46, %v9270_v42  ;;  %v2517_v62 = vadd.f32 %v2469_v49, %v9276_v1 }
 0x6fc   :  { %v4947_v31 = vpop.eup %4946  ;;  %v2524_v37 = vadd.f32 %v2487_v20, %v6682_v43 }
 0x6fd   :  { %v2619_v10 = vmul.f32 %v4947_v31, %v2587_v25  ;;  %v4949_v53 = vpop.eup %4948  ;;  %v9278_v25 = vld [vmem:[#allocation23_spill] sm:$0xff] }
 0x6fe   :  { %4952 = vtanh.f32 %v2524_v37  ;;  %v4951_v40 = vpop.eup %4950  ;;  %v2573_v45 = vadd.f32 1.0, %v4949_v53  ;;  %v2511_v31 = vadd.f32 %v2454_v60, %v9278_v25 }
 0x6ff   :  { %v7724_v58 = vadd.f32 %v2619_v10, %v2611_v17  ;;  %4954 = vtanh.f32 %v2510_v7  ;;  %v2565_v57 = vadd.f32 1.0, %v4951_v40  ;;  %v9279_v17 = vld [vmem:[#allocation44_spill] sm:$0xff]  ;;  %v9280_v10 = vld [vmem:[#allocation10_spill] sm:$0xff] }
 0x700   :  { %4956 = vtanh.f32 %v2502_v29  ;;  %v2512_v7 = vadd.f32 %v9280_v10, %v9279_v17  ;;  %v2597_v29 = vmul.f32 0.5, %v2573_v45 }
 0x701   :  { %v2387_v30 = vpop.f32.mrf.mxu3  ;;  %4958 = vtanh.f32 %v2503_v55  ;;  %v9281_v55 = vld [vmem:[#allocation45_spill] sm:$0xff]  ;;  %v2589_v41 = vmul.f32 0.5, %v2565_v57 }
 0x702   :  { %v2489_v50 = vadd.f32 %v7690_v33, %v2387_v30  ;;  %v9274_v33 = vld [vmem:[#allocation17_spill] sm:$0xff] }
 0x703   :  { %v2459_v16 = vadd.f32 %v9275_v54, %v9274_v33  ;;  %v9285_v54 = vld [vmem:[#allocation34_spill] sm:$0xff] }
 0x704   :  { %v4953_v28 = vpop.eup %4952  ;;  %v2525_v15 = vadd.f32 %v2489_v50, %v9273_v36 }
 0x705   :  { %v2620_v20 = vmul.f32 %v4953_v28, %v2588_v61  ;;  %v4955_v37 = vpop.eup %4954  ;;  %v2513_v46 = vadd.f32 %v2459_v16, %v9281_v55  ;;  %v9282_v61 = vld [vmem:[#allocation8_spill] sm:$0xff]  ;;  %v2474_v16 = vadd.f32 %v9285_v54, %v7664_v48  ;;  %v9288_v48 = vld [vmem:[#allocation22_spill] sm:$0xff] }
 0x706   :  { %4960 = vtanh.f32 %v2525_v15  ;;  %v4957_v51 = vpop.eup %4956  ;;  %v2574_v50 = vadd.f32 1.0, %v4955_v37 }
 0x707   :  { %4962 = vtanh.f32 %v2514_v4  ;;  %v7746_v2 = vadd.f32 %v2620_v20, %v2612_v47  ;;  %v4959_v30 = vpop.eup %4958  ;;  %v9283_v4 = vld [vmem:[#allocation18_spill] sm:$0xff] }
 0x708   :  { %4964 = vtanh.f32 %v2516_v59  ;;  %v2613_v28 = vmul.f32 %v2597_v29, %v9283_v4  ;;  %v2566_v59 = vadd.f32 1.0, %v4957_v51  ;;  %v2598_v15 = vmul.f32 0.5, %v2574_v50 }
 0x709   :  { %4966 = vtanh.f32 %v2517_v62  ;;  %v2390_v49 = vpop.f32.mrf.mxu3 }
 0x70a   :  { %4968 = vtanh.f32 %v2515_v26  ;;  %v2492_v53 = vadd.f32 %v7702_v38, %v2390_v49  ;;  %v2590_v10 = vmul.f32 0.5, %v2566_v59 }
 0x70b   :  { %4970 = vtanh.f32 %v2511_v31 }
 0x70c   :  { %v4961_v40 = vpop.eup %4960  ;;  %4972 = vtanh.f32 %v2512_v7  ;;  %v2526_v60 = vadd.f32 %v2492_v53, %v9282_v61  ;;  %v9286_v7 = vld [vmem:[#allocation19_spill] sm:$0xff] }
 0x70d   :  { %v4963_v6 = vpop.eup %4962  ;;  %4974 = vtanh.f32 %v2513_v46  ;;  %v2621_v42 = vmul.f32 %v4961_v40, %v2589_v41  ;;  %v2614_v51 = vmul.f32 %v2598_v15, %v9286_v7  ;;  %v9287_v41 = vld [vmem:[#allocation35_spill] sm:$0xff] }
 0x70e   :  { %v4965_v47 = vpop.eup %4964  ;;  %4976 = vtanh.f32 %v2526_v60  ;;  %v2578_v29 = vadd.f32 1.0, %v4963_v6  ;;  %v2518_v50 = vadd.f32 %v9288_v48, %v9287_v41  ;;  %v9289_v40 = vld [vmem:[#allocation11_spill] sm:$0xff] }
 0x70f   :  { %v4967_v18 = vpop.eup %4966  ;;  %v7754_v45 = vadd.f32 %v2621_v42, %v2613_v28  ;;  %4978 = vtanh.f32 %v7746_v2  ;;  %v2580_v26 = vadd.f32 1.0, %v4965_v47 }
 0x710   :  { %v4969_v38 = vpop.eup %4968  ;;  %4980 = vtanh.f32 %v7708_v11  ;;  %v2581_v57 = vadd.f32 1.0, %v4967_v18  ;;  %v2602_v54 = vmul.f32 0.5, %v2578_v29 }
 0x711   :  { %9284 = vst [vmem:[#allocation14_spill] sm:$0xff] %v7754_v45  ;;  %v4971_v33 = vpop.eup %4970  ;;  %v2392_v62 = vpop.f32.mrf.mxu3  ;;  %4982 = vtanh.f32 %v7754_v45  ;;  %v2579_v46 = vadd.f32 1.0, %v4969_v38  ;;  %v2604_v6 = vmul.f32 0.5, %v2580_v26 }
 0x712   :  { %v4973_v20 = vpop.eup %4972  ;;  %v2494_v31 = vadd.f32 %v7713_v8, %v2392_v62  ;;  %4984 = vtanh.f32 %v7724_v58  ;;  %v2575_v53 = vadd.f32 1.0, %v4971_v33  ;;  %v9290_v8 = vld [vmem:[#allocation30_spill] sm:$0xff]  ;;  %v2605_v15 = vmul.f32 0.5, %v2581_v57 }
 0x713   :  { %v4975_v37 = vpop.eup %4974  ;;  %4986 = vtanh.f32 %v7685_v14  ;;  %v2576_v28 = vadd.f32 1.0, %v4973_v20  ;;  %v2519_v42 = vadd.f32 %v2474_v16, %v9290_v8  ;;  %v2567_v33 = vadd.f32 1.0, %v4959_v30 }
 0x714   :  { %v4977_v49 = vpop.eup %4976  ;;  %v2527_v60 = vadd.f32 %v2494_v31, %v9289_v40  ;;  %4988 = vtanh.f32 %v7698_v23  ;;  %v2577_v59 = vadd.f32 1.0, %v4975_v37  ;;  %v2603_v62 = vmul.f32 0.5, %v2579_v46 }
 0x715   :  { %v4979_v4 = vpop.eup %4978  ;;  %v2622_v47 = vmul.f32 %v4977_v49, %v2590_v10  ;;  %v2599_v40 = vmul.f32 0.5, %v2575_v53  ;;  %v2600_v8 = vmul.f32 0.5, %v2576_v28 }
 0x716   :  { %v4981_v18 = vpop.eup %4980  ;;  %4990 = vtanh.f32 %v2527_v60  ;;  %v2644_v48 = vmul.f32 %v4979_v4, %v2604_v6  ;;  %v2601_v37 = vmul.f32 0.5, %v2577_v59  ;;  %v2591_v60 = vmul.f32 0.5, %v2567_v33 }
 0x717   :  { %v4983_v38 = vpop.eup %4982  ;;  %v7770_v7 = vadd.f32 %v2622_v47, %v2614_v51  ;;  %4992 = vtanh.f32 %v2518_v50  ;;  %v2642_v16 = vmul.f32 %v4981_v18, %v2602_v54  ;;  %v9292_v51 = vld [vmem:[#allocation27_spill] sm:$0xff] }
 0x718   :  { %v4985_v31 = vpop.eup %4984  ;;  %v2645_v20 = vmul.f32 %v4983_v38, %v2605_v15  ;;  %4994 = vtanh.f32 %v2519_v42  ;;  %v2615_v47 = vmul.f32 %v2599_v40, %v9292_v51  ;;  %v9294_v40 = vld [vmem:[#allocation15_spill] sm:$0xff] }
 0x719   :  { %9291 = vst [vmem:[#allocation48_spill] sm:$0xff] %v7770_v7  ;;  %v2643_v10 = vmul.f32 %v4985_v31, %v2603_v62  ;;  %v4987_v49 = vpop.eup %4986  ;;  %4996 = vtanh.f32 %v7770_v7  ;;  %v9296_v62 = vld [vmem:[#allocation20_spill] sm:$0xff]  ;;  %v9297_v31 = vld [vmem:[#allocation13_spill] sm:$0xff] }
 0x71a   :  { %v2655_v26 = vpack.c.bf16 %v2645_v20, %v2644_v48  ;;  %v4989_v57 = vpop.eup %4988  ;;  %v2640_v29 = vmul.f32 %v4987_v49, %v2600_v8  ;;  %v9298_v48 = vld [vmem:[#allocation7_spill] sm:$0xff]  ;;  %v7804_v49 = vld [vmem:[%s8805_s3 + $0x60] sm:$0xff]  ;;  %v9323_v7 = vld [vmem:[#allocation24_spill] sm:$0xff] }
 0x71b   :  { %v2654_v41 = vpack.c.bf16 %v2643_v10, %v2642_v16  ;;  %v2641_v46 = vmul.f32 %v4989_v57, %v2601_v37  ;;  %v7797_v20 = vld [vmem:[%s8806_s4 + $0x30] sm:$0xff]  ;;  %v2767_v16 = vpop.f32.mrf.mxu1  ;;  %9301 = vst [vmem:[#allocation43_spill] sm:$0xff] %v7804_v49  ;;  %v7811_v37 = vld [vmem:[%s8806_s4 + $0x38] sm:$0xff] }
 0x71c   :  { %v4991_v30 = vpop.eup %4990  ;;  %9300 = vst [vmem:[#allocation12_spill] sm:$0xff] %v7797_v20 }
 0x71d   :  { %v2623_v45 = vmul.f32 %v4991_v30, %v2591_v60  ;;  %v4993_v50 = vpop.eup %4992  ;;  %v2653_v4 = vpack.c.bf16 %v2641_v46, %v2640_v29  ;;  %9302 = vst [vmem:[#allocation37_spill] sm:$0xff] %v7811_v37  ;;  %v7818_v60 = vld [vmem:[%s8805_s3 + $0x68] sm:$0xff]  ;;  %v7827_v46 = vld [vmem:[%s8806_s4 + $0x40] sm:$0xff] }
 0x71e   :  { %v4995_v6 = vpop.eup %4994  ;;  %v2582_v28 = vadd.f32 1.0, %v4993_v50  ;;  %9303 = vst [vmem:[#allocation17_spill] sm:$0xff] %v7818_v60 }
 0x71f   :  { %v7774_v53 = vadd.f32 %v2623_v45, %v2615_v47  ;;  %v2583_v42 = vadd.f32 1.0, %v4995_v6  ;;  %v4997_v18 = vpop.eup %4996  ;;  %v9295_v45 = vld [vmem:[#allocation47_spill] sm:$0xff]  ;;  %9304 = vst [vmem:[#allocation46_spill] sm:$0xff] %v7827_v46 }
 0x720   :  { %v2606_v59 = vmul.f32 0.5, %v2582_v28  ;;  %v7836_v6 = vld [vmem:[%s8805_s3 + $0x70] sm:$0xff] }
 0x721   :  { %9293 = vst [vmem:[#allocation26_spill] sm:$0xff] %v7774_v53  ;;  %4998 = vtanh.f32 %v7774_v53  ;;  %v2607_v15 = vmul.f32 0.5, %v2583_v42 }
 0x722   :  { %v2646_v8 = vmul.f32 %v4997_v18, %v2606_v59  ;;  %9305 = vst [vmem:[#allocation10_spill] sm:$0xff] %v7836_v6  ;;  %v7845_v18 = vld [vmem:[%s8806_s4 + $0x48] sm:$0xff] }
 0x723   :  { %v2769_v10 = vpop.f32.mrf.mxu1  ;;  %4489 = vmatmul.msk.bf16.gmra.mxu1 %vm1145_vm2, %v7804_v49  ;;  %9306 = vst [vmem:[#allocation18_spill] sm:$0xff] %v7845_v18 }
 0x727   :  { %v4999_v38 = vpop.eup %4998 }
 0x728   :  { %v2647_v33 = vmul.f32 %v4999_v38, %v2607_v15 }
 0x72a   :  { %v2656_v54 = vpack.c.bf16 %v2647_v33, %v2646_v8  ;;  %v7854_v33 = vld [vmem:[%s8805_s3 + $0x78] sm:$0xff] }
 0x72b   :  { %9307 = vst [vmem:[#allocation34_spill] sm:$0xff] %v7854_v33 }
 0x72c   :  { %2661 = vmatpush.bf16.msra.mxu0 %v2656_v54 }
 0x730   :  { %2662 = vmatpush.bf16.msra.mxu0 %v2655_v26  ;;  %v2772_v26 = vpop.f32.mrf.mxu1 }
 0x734   :  { %2663 = vmatpush.bf16.msra.mxu0 %v2654_v41  ;;  %v7790_v41 = vld [vmem:[%s8806_s4 + $0x28] sm:$0xff] }
 0x735   :  { %9299 = vst [vmem:[#allocation29_spill] sm:$0xff] %v7790_v41 }
 0x738   :  { %2664 = vmatpush.bf16.msra.mxu0 %v2653_v4  ;;  %v2774_v57 = vpop.f32.mrf.mxu1  ;;  %4490 = vmatmul.msk.bf16.gmra.mxu1 %vm1145_vm2, %v7818_v60 }
 0x73b   :  { %4453 = vmatmul.msk.bf16.vlgmr.msra.gmra.mxu0 %vm915_vm0, %v9294_v40 }
 0x740   :  { %v2777_v51 = vpop.f32.mrf.mxu1 }
 0x748   :  { %v2779_v4 = vpop.f32.mrf.mxu1  ;;  %4491 = vmatmul.msk.bf16.gmra.mxu1 %vm1145_vm2, %v7836_v6  ;;  %v9315_v6 = vld [vmem:[#allocation16_spill] sm:$0xff] }
 0x74b   :  { %4454 = vmatmul.msk.bf16.gmra.mxu0 %vm915_vm0, %v9295_v45  ;;  %v7863_v45 = vld [vmem:[%s8806_s4 + $0x50] sm:$0xff] }
 0x74c   :  { %9308 = vst [vmem:[#allocation19_spill] sm:$0xff] %v7863_v45 }
 0x750   :  { %v2782_v59 = vpop.f32.mrf.mxu1 }
 0x758   :  { %v2784_v8 = vpop.f32.mrf.mxu1  ;;  %4492 = vmatmul.msk.bf16.gmra.mxu1 %vm1145_vm2, %v7854_v33 }
 0x75b   :  { %4455 = vmatmul.msk.bf16.gmra.mxu0 %vm915_vm0, %v9296_v62 }
 0x760   :  { %v2787_v62 = vpop.f32.mrf.mxu1 }
 0x76b   :  { %4456 = vmatmul.msk.bf16.gmra.mxu0 %vm915_vm0, %v9297_v31 }
 0x77b   :  { %4457 = vmatmul.msk.bf16.gmra.mxu0 %vm915_vm0, %v9298_v48 }
 0x78b   :  { %4458 = vmatmul.msk.bf16.gmra.mxu0 %vm915_vm0, %v7790_v41 }
 0x79b   :  { %4459 = vmatmul.msk.bf16.gmra.mxu0 %vm915_vm0, %v7797_v20  ;;  %v9320_v20 = vld [vmem:[#allocation21_spill] sm:$0xff] }
 0x7ab   :  { %4460 = vmatmul.msk.bf16.gmra.mxu0 %vm915_vm0, %v7811_v37 }
 0x7b8   :  { %v2666_v30 = vpop.f32.mrf.mxu0 }
 0x7b9   :  { %v7822_v29 = vadd.f32 %v2767_v16, %v2666_v30  ;;  %v7878_v30 = vld [vmem:[%s8806_s4 + $0x58] sm:$0xff] }
 0x7ba   :  { %9310 = vst [vmem:[#allocation22_spill] sm:$0xff] %v7878_v30 }
 0x7bb   :  { %4461 = vmatmul.msk.bf16.gmra.mxu0 %vm915_vm0, %v7827_v46  ;;  %v9318_v46 = vld [vmem:[#allocation9_spill] sm:$0xff] }
 0x7c0   :  { %v2668_v47 = vpop.f32.mrf.mxu0 }
 0x7c1   :  { %v7831_v50 = vadd.f32 %v2769_v10, %v2668_v47  ;;  %v7869_v10 = vpop.f32.mrf.mxu1 }
 0x7c8   :  { %v2671_v28 = vpop.f32.mrf.mxu0 }
 0x7c9   :  { %v7840_v42 = vadd.f32 %v2772_v26, %v2671_v28  ;;  %v9309_v26 = vld [vmem:[#allocation6_spill] sm:$0xff]  ;;  %v2792_v47 = vpop.f32.mrf.mxu1 }
 0x7ca   :  { %4557 = vmatmul.msk.bf16.vlgmr.msrb.gmra.mxu1 %vm1145_vm2, %v9309_v26 }
 0x7cb   :  { %4462 = vmatmul.msk.bf16.gmra.mxu0 %vm915_vm0, %v7845_v18 }
 0x7d0   :  { %v2673_v15 = vpop.f32.mrf.mxu0 }
 0x7d1   :  { %v7849_v38 = vadd.f32 %v2774_v57, %v2673_v15  ;;  %v7884_v15 = vpop.f32.mrf.mxu1 }
 0x7d8   :  { %v2676_v54 = vpop.f32.mrf.mxu0 }
 0x7d9   :  { %v7858_v40 = vadd.f32 %v2777_v51, %v2676_v54  ;;  %v9311_v54 = vld [vmem:[#allocation39_spill] sm:$0xff]  ;;  %v2797_v26 = vpop.f32.mrf.mxu1 }
 0x7da   :  { %4558 = vmatmul.msk.bf16.gmra.mxu1 %vm1145_vm2, %v9311_v54 }
 0x7db   :  { %4463 = vmatmul.msk.bf16.gmra.mxu0 %vm915_vm0, %v7863_v45 }
 0x7e0   :  { %v2678_v31 = vpop.f32.mrf.mxu0 }
 0x7e1   :  { %v7867_v48 = vadd.f32 %v2779_v4, %v2678_v31  ;;  %v7891_v31 = vld [vmem:[%s8806_s4 + $0x60] sm:$0xff] }
 0x7e2   :  { %9312 = vst [vmem:[#allocation27_spill] sm:$0xff] %v7891_v31 }
 0x7e8   :  { %v2681_v16 = vpop.f32.mrf.mxu0 }
 0x7e9   :  { %v7873_v57 = vadd.f32 %v2782_v59, %v2681_v16 }
 0x7eb   :  { %4464 = vmatmul.msk.bf16.gmra.mxu0 %vm915_vm0, %v7878_v30 }
 0x7f0   :  { %v2683_v51 = vpop.f32.mrf.mxu0 }
 0x7f1   :  { %v7882_v4 = vadd.f32 %v2784_v8, %v2683_v51  ;;  %v7895_v8 = vpop.f32.mrf.mxu1  ;;  %v9313_v51 = vld [vmem:[#allocation25_spill] sm:$0xff] }
 0x7f2   :  { %4559 = vmatmul.msk.bf16.gmra.mxu1 %vm1145_vm2, %v9313_v51 }
 0x7f8   :  { %v2686_v28 = vpop.f32.mrf.mxu0 }
 0x7f9   :  { %v2788_v59 = vadd.f32 %v2787_v62, %v2686_v28  ;;  %v7904_v62 = vld [vmem:[%s8806_s4 + $0x68] sm:$0xff]  ;;  %v2802_v54 = vpop.f32.mrf.mxu1 }
 0x7fa   :  { %9314 = vst [vmem:[#allocation15_spill] sm:$0xff] %v7904_v62 }
 0x7fb   :  { %4465 = vmatmul.msk.bf16.gmra.mxu0 %vm915_vm0, %v7891_v31 }
 0x800   :  { %v2688_v16 = vpop.f32.mrf.mxu0 }
 0x801   :  { %v7910_v45 = vpop.f32.mrf.mxu1 }
 0x802   :  { %4560 = vmatmul.msk.bf16.gmra.mxu1 %vm1145_vm2, %v9315_v6 }
 0x808   :  { %v2691_v30 = vpop.f32.mrf.mxu0 }
 0x809   :  { %v7899_v33 = vadd.f32 %v2792_v47, %v2691_v30  ;;  %v7919_v30 = vld [vmem:[%s8806_s4 + $0x70] sm:$0xff] }
 0x80a   :  { %9316 = vst [vmem:[#allocation47_spill] sm:$0xff] %v7919_v30 }
 0x80b   :  { %4466 = vmatmul.msk.bf16.gmra.mxu0 %vm915_vm0, %v7904_v62  ;;  %v2807_v62 = vpop.f32.mrf.mxu1 }
 0x810   :  { %v7908_v28 = vpop.f32.mrf.mxu0 }
 0x813   :  { %v7925_v60 = vpop.f32.mrf.mxu1  ;;  %4561 = vmatmul.msk.bf16.gmra.mxu1 %vm1145_vm2, %v9318_v46 }
 0x814   :  { %9317 = vst [vmem:[#allocation20_spill] sm:$0xff] %v7925_v60  ;;  %v2790_v60 = vadd.f32 %v7869_v10, %v2688_v16  ;;  %v2857_v16 = vadd.f32 %v7899_v33, %v9143_v24 }
 0x818   :  { %v2696_v31 = vpop.f32.mrf.mxu0 }
 0x819   :  { %v7914_v51 = vadd.f32 %v2797_v26, %v2696_v31  ;;  %v7934_v31 = vld [vmem:[%s8806_s4 + $0x78] sm:$0xff] }
 0x81a   :  { %9319 = vst [vmem:[#allocation13_spill] sm:$0xff] %v7934_v31 }
 0x81b   :  { %4467 = vmatmul.msk.bf16.gmra.mxu0 %vm915_vm0, %v7919_v30  ;;  %v2812_v30 = vpop.f32.mrf.mxu1 }
 0x820   :  { %v7923_v47 = vpop.f32.mrf.mxu0 }
 0x823   :  { %v7940_v37 = vpop.f32.mrf.mxu1  ;;  %4562 = vmatmul.msk.bf16.gmra.mxu1 %vm1145_vm2, %v9320_v20  ;;  %v9325_v20 = vld [vmem:[#allocation31_spill] sm:$0xff] }
 0x828   :  { %v2701_v18 = vpop.f32.mrf.mxu0 }
 0x829   :  { %v7929_v6 = vadd.f32 %v2802_v54, %v2701_v18 }
 0x82b   :  { %4468 = vmatmul.msk.bf16.gmra.mxu0 %vm915_vm0, %v7934_v31  ;;  %v2817_v54 = vpop.f32.mrf.mxu1 }
 0x830   :  { %v7938_v26 = vpop.f32.mrf.mxu0 }
 0x833   :  { %v7948_v53 = vpop.f32.mrf.mxu1  ;;  %4563 = vmatmul.msk.bf16.gmra.mxu1 %vm1145_vm2, %v9323_v7  ;;  %v7967_v7 = vld [vmem:[%s8805_s3 + $0x40] sm:$0xff] }
 0x834   :  { %9327 = vst [vmem:[#allocation16_spill] sm:$0xff] %v7967_v7 }
 0x838   :  { %v2706_v49 = vpop.f32.mrf.mxu0 }
 0x839   :  { %v7944_v46 = vadd.f32 %v2807_v62, %v2706_v49 }
 0x83b   :  { %9321 = vst [vmem:[#allocation7_spill] sm:$0xff] %v7944_v46  ;;  %v2822_v55 = vpop.f32.mrf.mxu1 }
 0x840   :  { %v7946_v18 = vpop.f32.mrf.mxu0 }
 0x841   :  { %9322 = vst [vmem:[#allocation6_spill] sm:$0xff] %v7946_v18  ;;  %v9329_v18 = vld [vmem:[#allocation40_spill] sm:$0xff] }
 0x842   :  { %v2856_v36 = vadd.f32 %v2790_v60, %v9329_v18 }
 0x843   :  { %v7956_v25 = vpop.f32.mrf.mxu1  ;;  %4564 = vmatmul.msk.bf16.gmra.mxu1 %vm1145_vm2, %v9325_v20 }
 0x844   :  { %9324 = vst [vmem:[#allocation39_spill] sm:$0xff] %v7956_v25 }
 0x848   :  { %v2711_v41 = vpop.f32.mrf.mxu0 }
 0x849   :  { %v7952_v31 = vadd.f32 %v2812_v30, %v2711_v41  ;;  %v9328_v30 = vld [vmem:[#allocation33_spill] sm:$0xff] }
 0x84a   :  { %v2855_v25 = vadd.f32 %v2788_v59, %v9328_v30 }
 0x84b   :  { %v2827_v46 = vpop.f32.mrf.mxu1 }
 0x84c   :  { %5000 = vtanh.f32 %v2855_v25 }
 0x850   :  { %v7954_v61 = vpop.f32.mrf.mxu0 }
 0x853   :  { %v2829_v1 = vpop.f32.mrf.mxu1  ;;  %4565 = vmatmul.msk.bf16.gmra.mxu1 %vm1145_vm2, %v7967_v7 }
 0x858   :  { %v2716_v17 = vpop.f32.mrf.mxu0 }
 0x859   :  { %v7960_v49 = vadd.f32 %v2817_v54, %v2716_v17  ;;  %v2847_v54 = vadd.f32 %v7822_v29, %v9202_v22  ;;  %v5001_v29 = vpop.eup %5000 }
 0x85a   :  { %v2919_v60 = vadd.f32 1.0, %v5001_v29 }
 0x85b   :  { %9326 = vst [vmem:[#allocation25_spill] sm:$0xff] %v7960_v49  ;;  %v2832_v17 = vpop.f32.mrf.mxu1  ;;  %5002 = vtanh.f32 %v2847_v54  ;;  %v9330_v49 = vld [vmem:[#allocation38_spill] sm:$0xff]  ;;  %v2849_v54 = vadd.f32 %v7840_v42, %v6686_v3 }
 0x85c   :  { %v2848_v35 = vadd.f32 %v7831_v50, %v9330_v49  ;;  %5004 = vtanh.f32 %v2856_v36  ;;  %v2943_v49 = vmul.f32 0.5, %v2919_v60 }
 0x85e   :  { %5006 = vtanh.f32 %v2848_v35  ;;  %v2795_v35 = vadd.f32 %v7884_v15, %v7908_v28  ;;  %v2959_v33 = vmul.f32 %v2943_v49, %v7685_v14  ;;  %v8010_v15 = vld [vmem:[%s8805_s3 + $0x50] sm:$0xff] }
 0x860   :  { %v7962_v62 = vpop.f32.mrf.mxu0 }
 0x861   :  { %v5003_v59 = vpop.eup %5002 }
 0x862   :  { %v2911_v50 = vadd.f32 1.0, %v5003_v59 }
 0x864   :  { %v2935_v36 = vmul.f32 0.5, %v2911_v50 }
 0x868   :  { %v2721_v0 = vpop.f32.mrf.mxu0 }
 0x869   :  { %v7971_v41 = vadd.f32 %v2822_v55, %v2721_v0  ;;  %v2834_v0 = vpop.f32.mrf.mxu1  ;;  %v7985_v55 = vld [vmem:[%s8805_s3 + $0x48] sm:$0xff] }
 0x86a   :  { %9331 = vst [vmem:[#allocation9_spill] sm:$0xff] %v7985_v55  ;;  %4566 = vmatmul.msk.bf16.gmra.mxu1 %vm1145_vm2, %v7985_v55  ;;  %v5005_v55 = vpop.eup %5004 }
 0x870   :  { %v7974_v20 = vpop.f32.mrf.mxu0 }
 0x871   :  { %v7994_v22 = vpop.f32.mrf.mxu1 }
 0x878   :  { %v2726_v7 = vpop.f32.mrf.mxu0 }
 0x879   :  { %v2828_v25 = vadd.f32 %v2827_v46, %v2726_v7  ;;  %v5007_v7 = vpop.eup %5006 }
 0x87a   :  { %v2912_v59 = vadd.f32 1.0, %v5007_v7 }
 0x87b   :  { %v2871_v10 = vadd.f32 %v2828_v25, %v9142_v9  ;;  %v2920_v25 = vadd.f32 1.0, %v5005_v55 }
 0x87d   :  { %5008 = vtanh.f32 %v2871_v10  ;;  %v2944_v60 = vmul.f32 0.5, %v2920_v25 }
 0x87e   :  { %5010 = vtanh.f32 %v2857_v16  ;;  %v8005_v16 = vpop.f32.mrf.mxu1  ;;  %4567 = vmatmul.msk.bf16.gmra.mxu1 %vm1145_vm2, %v8010_v15 }
 0x87f   :  { %5012 = vtanh.f32 %v2849_v54  ;;  %v2960_v54 = vmul.f32 %v2944_v60, %v7698_v23 }
 0x880   :  { %v2728_v18 = vpop.f32.mrf.mxu0 }
 0x881   :  { %v2830_v46 = vadd.f32 %v2829_v1, %v2728_v18  ;;  %v2858_v1 = vadd.f32 %v2795_v35, %v6702_v12  ;;  %v2850_v18 = vadd.f32 %v7849_v38, %v6666_v52  ;;  %v2859_v35 = vadd.f32 %v7914_v51, %v6664_v34 }
 0x883   :  { %v5009_v30 = vpop.eup %5008  ;;  %v2872_v29 = vadd.f32 %v2830_v46, %v6768_v13 }
 0x884   :  { %v2967_v42 = vmul.f32 %v5009_v30, %v2935_v36  ;;  %v5011_v14 = vpop.eup %5010  ;;  %v2936_v30 = vmul.f32 0.5, %v2912_v59 }
 0x885   :  { %5014 = vtanh.f32 %v2872_v29  ;;  %v5013_v49 = vpop.eup %5012  ;;  %v2921_v46 = vadd.f32 1.0, %v5011_v14 }
 0x886   :  { %v8000_v10 = vadd.f32 %v2967_v42, %v2959_v33  ;;  %5016 = vtanh.f32 %v2858_v1  ;;  %v2913_v36 = vadd.f32 1.0, %v5013_v49  ;;  %v8022_v42 = vpop.f32.mrf.mxu1 }
 0x887   :  { %5018 = vtanh.f32 %v2850_v18  ;;  %v2945_v33 = vmul.f32 0.5, %v2921_v46 }
 0x888   :  { %v2731_v50 = vpop.f32.mrf.mxu0  ;;  %v2937_v23 = vmul.f32 0.5, %v2913_v36 }
 0x889   :  { %v2833_v28 = vadd.f32 %v2832_v17, %v2731_v50  ;;  %v2851_v17 = vadd.f32 %v7858_v40, %v6662_v27  ;;  %v2800_v50 = vadd.f32 %v7895_v8, %v7923_v47  ;;  %v2961_v14 = vmul.f32 %v2945_v33, %v7708_v11  ;;  %v8038_v11 = vld [vmem:[%s8805_s3 + $0x58] sm:$0xff] }
 0x88b   :  { %v5015_v55 = vpop.eup %5014  ;;  %v2873_v38 = vadd.f32 %v2833_v28, %v6741_v21 }
 0x88c   :  { %v2968_v7 = vmul.f32 %v5015_v55, %v2936_v30  ;;  %v5017_v59 = vpop.eup %5016 }
 0x88d   :  { %5020 = vtanh.f32 %v2873_v38  ;;  %v5019_v18 = vpop.eup %5018  ;;  %v2922_v28 = vadd.f32 1.0, %v5017_v59  ;;  %v2852_v38 = vadd.f32 %v7867_v48, %v6644_v39  ;;  %v2861_v59 = vadd.f32 %v7929_v6, %v6632_v5 }
 0x88e   :  { %v8018_v29 = vadd.f32 %v2968_v7, %v2960_v54  ;;  %5022 = vtanh.f32 %v2859_v35  ;;  %v2914_v49 = vadd.f32 1.0, %v5019_v18  ;;  %v8033_v8 = vpop.f32.mrf.mxu1  ;;  %4568 = vmatmul.msk.bf16.gmra.mxu1 %vm1145_vm2, %v8038_v11  ;;  %v2853_v18 = vadd.f32 %v7873_v57, %v6642_v32 }
 0x88f   :  { %5024 = vtanh.f32 %v2851_v17  ;;  %v2946_v54 = vmul.f32 0.5, %v2922_v28  ;;  %v2815_v6 = vadd.f32 %v7940_v37, %v7954_v61  ;;  %v2805_v57 = vadd.f32 %v7910_v45, %v7938_v26  ;;  %v9338_v45 = vld [vmem:[#allocation28_spill] sm:$0xff] }
 0x890   :  { %v2733_v25 = vpop.f32.mrf.mxu0  ;;  %v2938_v36 = vmul.f32 0.5, %v2914_v49 }
 0x891   :  { %v2835_v1 = vadd.f32 %v2834_v0, %v2733_v25  ;;  %v2860_v0 = vadd.f32 %v2800_v50, %v6676_v19  ;;  %v2962_v33 = vmul.f32 %v2946_v54, %v7724_v58  ;;  %v2820_v50 = vadd.f32 %v7948_v53, %v7962_v62  ;;  %v9332_v62 = vld [vmem:[#allocation41_spill] sm:$0xff]  ;;  %v9336_v54 = vld [vmem:[#allocation20_spill] sm:$0xff] }
 0x892   :  { %v2866_v26 = vadd.f32 %v2815_v6, %v9338_v45 }
 0x893   :  { %v5021_v60 = vpop.eup %5020  ;;  %v2874_v51 = vadd.f32 %v2835_v1, %v6720_v63 }
 0x894   :  { %v2969_v40 = vmul.f32 %v5021_v60, %v2937_v23  ;;  %v5023_v55 = vpop.eup %5022  ;;  %v2854_v23 = vadd.f32 %v7882_v4, %v6650_v44  ;;  %v2865_v4 = vadd.f32 %v7952_v31, %v9203_v56 }
 0x895   :  { %5026 = vtanh.f32 %v2874_v51  ;;  %v5025_v7 = vpop.eup %5024  ;;  %v2923_v17 = vadd.f32 1.0, %v5023_v55 }
 0x896   :  { %v8028_v30 = vadd.f32 %v2969_v40, %v2961_v14  ;;  %5028 = vtanh.f32 %v2860_v0  ;;  %v2915_v1 = vadd.f32 1.0, %v5025_v7  ;;  %v9333_v0 = vld [vmem:[#allocation25_spill] sm:$0xff] }
 0x897   :  { %5030 = vtanh.f32 %v2852_v38  ;;  %v2947_v60 = vmul.f32 0.5, %v2923_v17  ;;  %v2867_v55 = vadd.f32 %v9333_v0, %v9332_v62  ;;  %v9334_v38 = vld [vmem:[#allocation32_spill] sm:$0xff] }
 0x898   :  { %v2736_v46 = vpop.f32.mrf.mxu0  ;;  %v2939_v40 = vmul.f32 0.5, %v2915_v1  ;;  %v9384_v62 = vld [vmem:[#allocation36_spill] sm:$0xff] }
 0x899   :  { %v2838_v47 = vadd.f32 %v7994_v22, %v2736_v46  ;;  %v2963_v53 = vmul.f32 %v2947_v60, %v7746_v2 }
 0x89b   :  { %v5027_v35 = vpop.eup %5026  ;;  %v2875_v48 = vadd.f32 %v2838_v47, %v6682_v43  ;;  %v9337_v47 = vld [vmem:[#allocation42_spill] sm:$0xff] }
 0x89c   :  { %v2970_v25 = vmul.f32 %v5027_v35, %v2938_v36  ;;  %v5029_v58 = vpop.eup %5028  ;;  %v2868_v7 = vadd.f32 %v2820_v50, %v9337_v47  ;;  %v9339_v35 = vld [vmem:[#allocation23_spill] sm:$0xff] }
 0x89d   :  { %5032 = vtanh.f32 %v2875_v48  ;;  %v5031_v28 = vpop.eup %5030  ;;  %v2924_v37 = vadd.f32 1.0, %v5029_v58  ;;  %v2862_v17 = vadd.f32 %v2805_v57, %v9339_v35 }
 0x89e   :  { %v8049_v22 = vadd.f32 %v2970_v25, %v2962_v33  ;;  %5034 = vtanh.f32 %v2861_v59  ;;  %v2916_v31 = vadd.f32 1.0, %v5031_v28  ;;  %v9341_v33 = vld [vmem:[#allocation44_spill] sm:$0xff]  ;;  %v9342_v25 = vld [vmem:[#allocation7_spill] sm:$0xff] }
 0x89f   :  { %5036 = vtanh.f32 %v2853_v18  ;;  %v2863_v59 = vadd.f32 %v9342_v25, %v9341_v33  ;;  %v2948_v18 = vmul.f32 0.5, %v2924_v37 }
 0x8a0   :  { %v2738_v51 = vpop.f32.mrf.mxu0  ;;  %5038 = vtanh.f32 %v2854_v23  ;;  %v9343_v23 = vld [vmem:[#allocation45_spill] sm:$0xff]  ;;  %v2940_v6 = vmul.f32 0.5, %v2916_v31 }
 0x8a1   :  { %v2840_v14 = vadd.f32 %v8005_v16, %v2738_v51  ;;  %v9335_v16 = vld [vmem:[#allocation6_spill] sm:$0xff] }
 0x8a2   :  { %v2810_v46 = vadd.f32 %v9336_v54, %v9335_v16 }
 0x8a3   :  { %v5033_v49 = vpop.eup %5032  ;;  %v2876_v61 = vadd.f32 %v2840_v14, %v9334_v38 }
 0x8a4   :  { %v2971_v36 = vmul.f32 %v5033_v49, %v2939_v40  ;;  %v5035_v48 = vpop.eup %5034  ;;  %v2864_v60 = vadd.f32 %v2810_v46, %v9343_v23  ;;  %v9344_v40 = vld [vmem:[#allocation8_spill] sm:$0xff]  ;;  %v9345_v49 = vld [vmem:[#allocation14_spill] sm:$0xff] }
 0x8a5   :  { %5040 = vtanh.f32 %v2876_v61  ;;  %v5037_v1 = vpop.eup %5036  ;;  %v2925_v14 = vadd.f32 1.0, %v5035_v48 }
 0x8a6   :  { %5042 = vtanh.f32 %v2865_v4  ;;  %v8071_v2 = vadd.f32 %v2971_v36, %v2963_v53  ;;  %v5039_v51 = vpop.eup %5038  ;;  %v2964_v53 = vmul.f32 %v2948_v18, %v9345_v49  ;;  %v2917_v37 = vadd.f32 1.0, %v5037_v1  ;;  %v9348_v18 = vld [vmem:[#allocation48_spill] sm:$0xff] }
 0x8a7   :  { %5044 = vtanh.f32 %v2867_v55  ;;  %v2949_v16 = vmul.f32 0.5, %v2925_v14 }
 0x8a8   :  { %9340 = vst [vmem:[#allocation21_spill] sm:$0xff] %v8071_v2  ;;  %5046 = vtanh.f32 %v2868_v7  ;;  %v2741_v50 = vpop.f32.mrf.mxu0  ;;  %v9347_v7 = vld [vmem:[#allocation39_spill] sm:$0xff]  ;;  %v2941_v1 = vmul.f32 0.5, %v2917_v37 }
 0x8a9   :  { %5048 = vtanh.f32 %v2866_v26  ;;  %v2843_v58 = vadd.f32 %v8022_v42, %v2741_v50  ;;  %v2825_v36 = vadd.f32 %v9347_v7, %v7974_v20  ;;  %v2918_v7 = vadd.f32 1.0, %v5039_v51 }
 0x8aa   :  { %5050 = vtanh.f32 %v2862_v17 }
 0x8ab   :  { %v5041_v28 = vpop.eup %5040  ;;  %5052 = vtanh.f32 %v2863_v59  ;;  %v2877_v57 = vadd.f32 %v2843_v58, %v9344_v40 }
 0x8ac   :  { %v5043_v4 = vpop.eup %5042  ;;  %5054 = vtanh.f32 %v2864_v60  ;;  %v2972_v0 = vmul.f32 %v5041_v28, %v2940_v6  ;;  %v2965_v60 = vmul.f32 %v2949_v16, %v9348_v18  ;;  %v9349_v28 = vld [vmem:[#allocation35_spill] sm:$0xff] }
 0x8ad   :  { %v5045_v55 = vpop.eup %5044  ;;  %5056 = vtanh.f32 %v2877_v57  ;;  %v2929_v50 = vadd.f32 1.0, %v5043_v4  ;;  %v2869_v20 = vadd.f32 %v7971_v41, %v9349_v28  ;;  %v9350_v57 = vld [vmem:[#allocation11_spill] sm:$0xff] }
 0x8ae   :  { %v5047_v61 = vpop.eup %5046  ;;  %v8079_v54 = vadd.f32 %v2972_v0, %v2964_v53  ;;  %5058 = vtanh.f32 %v8071_v2  ;;  %v2931_v17 = vadd.f32 1.0, %v5045_v55  ;;  %v9386_v2 = vld [vmem:[#allocation38_spill] sm:$0xff] }
 0x8af   :  { %v5049_v42 = vpop.eup %5048  ;;  %5060 = vtanh.f32 %v8028_v30  ;;  %v2932_v48 = vadd.f32 1.0, %v5047_v61 }
 0x8b0   :  { %9346 = vst [vmem:[#allocation24_spill] sm:$0xff] %v8079_v54  ;;  %v5051_v46 = vpop.eup %5050  ;;  %v2743_v26 = vpop.f32.mrf.mxu0  ;;  %5062 = vtanh.f32 %v8079_v54  ;;  %v2930_v58 = vadd.f32 1.0, %v5049_v42  ;;  %v2955_v4 = vmul.f32 0.5, %v2931_v17 }
 0x8b1   :  { %v5053_v31 = vpop.eup %5052  ;;  %v2845_v25 = vadd.f32 %v8033_v8, %v2743_v26  ;;  %5064 = vtanh.f32 %v8049_v22  ;;  %v2926_v14 = vadd.f32 1.0, %v5051_v46  ;;  %v9351_v8 = vld [vmem:[#allocation30_spill] sm:$0xff]  ;;  %v2956_v42 = vmul.f32 0.5, %v2932_v48 }
 0x8b2   :  { %v5055_v59 = vpop.eup %5054  ;;  %5066 = vtanh.f32 %v8000_v10  ;;  %v2927_v0 = vadd.f32 1.0, %v5053_v31  ;;  %v2870_v55 = vadd.f32 %v2825_v36, %v9351_v8  ;;  %v2953_v26 = vmul.f32 0.5, %v2929_v50 }
 0x8b3   :  { %v5057_v6 = vpop.eup %5056  ;;  %v2878_v49 = vadd.f32 %v2845_v25, %v9350_v57  ;;  %5068 = vtanh.f32 %v8018_v29  ;;  %v2928_v16 = vadd.f32 1.0, %v5055_v59  ;;  %v2954_v41 = vmul.f32 0.5, %v2930_v58 }
 0x8b4   :  { %v5059_v53 = vpop.eup %5058  ;;  %v2973_v61 = vmul.f32 %v5057_v6, %v2941_v1  ;;  %v2950_v28 = vmul.f32 0.5, %v2926_v14  ;;  %v2951_v8 = vmul.f32 0.5, %v2927_v0 }
 0x8b5   :  { %v5061_v37 = vpop.eup %5060  ;;  %5070 = vtanh.f32 %v2878_v49  ;;  %v2995_v57 = vmul.f32 %v5059_v53, %v2955_v4  ;;  %v2952_v59 = vmul.f32 0.5, %v2928_v16  ;;  %v2942_v49 = vmul.f32 0.5, %v2918_v7 }
 0x8b6   :  { %v5063_v46 = vpop.eup %5062  ;;  %v8095_v18 = vadd.f32 %v2973_v61, %v2965_v60  ;;  %5072 = vtanh.f32 %v2869_v20  ;;  %v2993_v36 = vmul.f32 %v5061_v37, %v2953_v26  ;;  %v9353_v60 = vld [vmem:[#allocation26_spill] sm:$0xff]  ;;  %v8126_v26 = vld [vmem:[%s8806_s4 + $0x18] sm:$0xff] }
 0x8b7   :  { %v5065_v25 = vpop.eup %5064  ;;  %v2996_v31 = vmul.f32 %v5063_v46, %v2956_v42  ;;  %5074 = vtanh.f32 %v2870_v55  ;;  %v2966_v61 = vmul.f32 %v2950_v28, %v9353_v60  ;;  %v8112_v28 = vld [vmem:[%s8806_s4 + $0x8] sm:$0xff]  ;;  %9358 = vst [vmem:[#allocation14_spill] sm:$0xff] %v8126_v26 }
 0x8b8   :  { %9352 = vst [vmem:[#allocation31_spill] sm:$0xff] %v8095_v18  ;;  %v2994_v1 = vmul.f32 %v5065_v25, %v2954_v41  ;;  %v5067_v6 = vpop.eup %5066  ;;  %5076 = vtanh.f32 %v8095_v18  ;;  %v8133_v41 = vld [vmem:[%s8806_s4 + $0x20] sm:$0xff] }
 0x8b9   :  { %v3006_v17 = vpack.c.bf16 %v2996_v31, %v2995_v57  ;;  %v5069_v48 = vpop.eup %5068  ;;  %v2991_v50 = vmul.f32 %v5067_v6, %v2951_v8  ;;  %9356 = vst [vmem:[#allocation20_spill] sm:$0xff] %v8112_v28  ;;  %v9360_v25 = vld [vmem:[#allocation29_spill] sm:$0xff]  ;;  %v9361_v31 = vld [vmem:[#allocation12_spill] sm:$0xff] }
 0x8ba   :  { %v3005_v54 = vpack.c.bf16 %v2994_v1, %v2993_v36  ;;  %v2992_v58 = vmul.f32 %v5069_v48, %v2952_v59  ;;  %9359 = vst [vmem:[#allocation39_spill] sm:$0xff] %v8133_v41  ;;  %v3118_v36 = vpop.f32.mrf.mxu2  ;;  %v9362_v1 = vld [vmem:[#allocation37_spill] sm:$0xff]  ;;  %v9363_v59 = vld [vmem:[#allocation43_spill] sm:$0xff]  ;;  %v9364_v48 = vld [vmem:[#allocation46_spill] sm:$0xff] }
 0x8bb   :  { %v5071_v51 = vpop.eup %5070 }
 0x8bc   :  { %v2974_v40 = vmul.f32 %v5071_v51, %v2942_v49  ;;  %v5073_v20 = vpop.eup %5072  ;;  %v3004_v53 = vpack.c.bf16 %v2992_v58, %v2991_v50  ;;  %v9365_v51 = vld [vmem:[#allocation17_spill] sm:$0xff] }
 0x8bd   :  { %v5075_v4 = vpop.eup %5074  ;;  %v2933_v0 = vadd.f32 1.0, %v5073_v20 }
 0x8be   :  { %v8099_v14 = vadd.f32 %v2974_v40, %v2966_v61  ;;  %v2934_v57 = vadd.f32 1.0, %v5075_v4  ;;  %v5077_v55 = vpop.eup %5076  ;;  %v8105_v40 = vld [vmem:[%s8806_s4] sm:$0xff] }
 0x8bf   :  { %v2957_v37 = vmul.f32 0.5, %v2933_v0  ;;  %9355 = vst [vmem:[#allocation6_spill] sm:$0xff] %v8105_v40  ;;  %v9367_v0 = vld [vmem:[#allocation10_spill] sm:$0xff] }
 0x8c0   :  { %9354 = vst [vmem:[#allocation25_spill] sm:$0xff] %v8099_v14  ;;  %5078 = vtanh.f32 %v8099_v14  ;;  %v2958_v16 = vmul.f32 0.5, %v2934_v57 }
 0x8c1   :  { %v2997_v8 = vmul.f32 %v5077_v55, %v2957_v37 }
 0x8c2   :  { %v3120_v6 = vpop.f32.mrf.mxu2  ;;  %4529 = vmatmul.msk.bf16.gmra.mxu2 %vm1145_vm2, %v9363_v59  ;;  %v9370_v59 = vld [vmem:[#allocation22_spill] sm:$0xff] }
 0x8c6   :  { %v5079_v42 = vpop.eup %5078 }
 0x8c7   :  { %v2998_v46 = vmul.f32 %v5079_v42, %v2958_v16 }
 0x8c9   :  { %v3007_v7 = vpack.c.bf16 %v2998_v46, %v2997_v8  ;;  %v9368_v8 = vld [vmem:[#allocation19_spill] sm:$0xff] }
 0x8cb   :  { %3012 = vmatpush.bf16.msrb.mxu3 %v3007_v7  ;;  %v9369_v7 = vld [vmem:[#allocation34_spill] sm:$0xff] }
 0x8cf   :  { %3013 = vmatpush.bf16.msrb.mxu3 %v3006_v17  ;;  %v3123_v17 = vpop.f32.mrf.mxu2 }
 0x8d3   :  { %3014 = vmatpush.bf16.msrb.mxu3 %v3005_v54  ;;  %v8119_v54 = vld [vmem:[%s8806_s4 + $0x10] sm:$0xff] }
 0x8d4   :  { %9357 = vst [vmem:[#allocation7_spill] sm:$0xff] %v8119_v54 }
 0x8d7   :  { %3015 = vmatpush.bf16.msrb.mxu3 %v3004_v53  ;;  %v3125_v49 = vpop.f32.mrf.mxu2  ;;  %4530 = vmatmul.msk.bf16.gmra.mxu2 %vm1145_vm2, %v9365_v51  ;;  %v9366_v53 = vld [vmem:[#allocation18_spill] sm:$0xff] }
 0x8da   :  { %4493 = vmatmul.msk.bf16.vlgmr.msrb.gmra.mxu3 %vm915_vm0, %v8105_v40 }
 0x8df   :  { %v3128_v60 = vpop.f32.mrf.mxu2 }
 0x8e7   :  { %v3130_v4 = vpop.f32.mrf.mxu2  ;;  %4531 = vmatmul.msk.bf16.gmra.mxu2 %vm1145_vm2, %v9367_v0 }
 0x8ea   :  { %4494 = vmatmul.msk.bf16.gmra.mxu3 %vm915_vm0, %v8112_v28 }
 0x8ef   :  { %v3133_v37 = vpop.f32.mrf.mxu2 }
 0x8f7   :  { %v3135_v46 = vpop.f32.mrf.mxu2  ;;  %4532 = vmatmul.msk.bf16.gmra.mxu2 %vm1145_vm2, %v9369_v7  ;;  %v9372_v7 = vld [vmem:[#allocation15_spill] sm:$0xff] }
 0x8fa   :  { %4495 = vmatmul.msk.bf16.gmra.mxu3 %vm915_vm0, %v8119_v54 }
 0x90a   :  { %4496 = vmatmul.msk.bf16.gmra.mxu3 %vm915_vm0, %v8126_v26 }
 0x91a   :  { %4497 = vmatmul.msk.bf16.gmra.mxu3 %vm915_vm0, %v8133_v41 }
 0x92a   :  { %4498 = vmatmul.msk.bf16.gmra.mxu3 %vm915_vm0, %v9360_v25 }
 0x93a   :  { %4499 = vmatmul.msk.bf16.gmra.mxu3 %vm915_vm0, %v9361_v31 }
 0x94a   :  { %4500 = vmatmul.msk.bf16.gmra.mxu3 %vm915_vm0, %v9362_v1 }
 0x95a   :  { %4501 = vmatmul.msk.bf16.gmra.mxu3 %vm915_vm0, %v9364_v48 }
 0x95d   :  { %v3017_v50 = vpop.f32.mrf.mxu3 }
 0x95e   :  { %v8149_v58 = vadd.f32 %v3118_v36, %v3017_v50  ;;  %v3138_v36 = vpop.f32.mrf.mxu2 }
 0x965   :  { %v3019_v61 = vpop.f32.mrf.mxu3 }
 0x966   :  { %v8151_v20 = vadd.f32 %v3120_v6, %v3019_v61  ;;  %v8171_v48 = vpop.f32.mrf.mxu2 }
 0x96a   :  { %4502 = vmatmul.msk.bf16.gmra.mxu3 %vm915_vm0, %v9366_v53  ;;  %v9371_v53 = vld [vmem:[#allocation27_spill] sm:$0xff] }
 0x96d   :  { %v3022_v57 = vpop.f32.mrf.mxu3 }
 0x96e   :  { %v8157_v55 = vadd.f32 %v3123_v17, %v3022_v57  ;;  %v5390_v57 = vld [vmem:[%s8805_s3 + $0x8] sm:$0xff] }
 0x975   :  { %v3024_v16 = vpop.f32.mrf.mxu3 }
 0x976   :  { %v8159_v42 = vadd.f32 %v3125_v49, %v3024_v16  ;;  %v5389_v49 = vld [vmem:[%s8805_s3] sm:$0xff] }
 0x977   :  { %4597 = vmatmul.msk.bf16.vlgmr.msrb.gmra.mxu2 %vm1145_vm2, %v5389_v49 }
 0x97a   :  { %4503 = vmatmul.msk.bf16.gmra.mxu3 %vm915_vm0, %v9368_v8 }
 0x97d   :  { %v3027_v25 = vpop.f32.mrf.mxu3 }
 0x97e   :  { %v8165_v31 = vadd.f32 %v3128_v60, %v3027_v25  ;;  %v3143_v60 = vpop.f32.mrf.mxu2 }
 0x985   :  { %v3029_v1 = vpop.f32.mrf.mxu3 }
 0x986   :  { %v8167_v6 = vadd.f32 %v3130_v4, %v3029_v1  ;;  %v8183_v0 = vpop.f32.mrf.mxu2  ;;  %v5391_v1 = vld [vmem:[%s8805_s3 + $0x10] sm:$0xff] }
 0x987   :  { %4598 = vmatmul.msk.bf16.gmra.mxu2 %vm1145_vm2, %v5390_v57 }
 0x98a   :  { %4504 = vmatmul.msk.bf16.gmra.mxu3 %vm915_vm0, %v9370_v59 }
 0x98d   :  { %v3032_v17 = vpop.f32.mrf.mxu3 }
 0x98e   :  { %v8177_v51 = vadd.f32 %v3133_v37, %v3032_v17  ;;  %v3148_v37 = vpop.f32.mrf.mxu2 }
 0x995   :  { %v3034_v50 = vpop.f32.mrf.mxu3 }
 0x996   :  { %v8179_v61 = vadd.f32 %v3135_v46, %v3034_v50  ;;  %v8191_v25 = vpop.f32.mrf.mxu2 }
 0x997   :  { %4599 = vmatmul.msk.bf16.gmra.mxu2 %vm1145_vm2, %v5391_v1 }
 0x99a   :  { %4505 = vmatmul.msk.bf16.gmra.mxu3 %vm915_vm0, %v9371_v53 }
 0x99d   :  { %v3037_v4 = vpop.f32.mrf.mxu3 }
 0x99e   :  { %v3139_v16 = vadd.f32 %v3138_v36, %v3037_v4  ;;  %v3153_v49 = vpop.f32.mrf.mxu2  ;;  %v9373_v36 = vld [vmem:[#allocation47_spill] sm:$0xff]  ;;  %v5392_v4 = vld [vmem:[%s8805_s3 + $0x18] sm:$0xff] }
 0x9a5   :  { %v3039_v8 = vpop.f32.mrf.mxu3 }
 0x9a6   :  { %v8203_v53 = vpop.f32.mrf.mxu2 }
 0x9a7   :  { %4600 = vmatmul.msk.bf16.gmra.mxu2 %vm1145_vm2, %v5392_v4 }
 0x9aa   :  { %4506 = vmatmul.msk.bf16.gmra.mxu3 %vm915_vm0, %v9372_v7 }
 0x9ad   :  { %v3042_v46 = vpop.f32.mrf.mxu3 }
 0x9ae   :  { %v8197_v59 = vadd.f32 %v3143_v60, %v3042_v46  ;;  %v3158_v60 = vpop.f32.mrf.mxu2  ;;  %v9374_v46 = vld [vmem:[#allocation13_spill] sm:$0xff] }
 0x9b5   :  { %v8199_v17 = vpop.f32.mrf.mxu3 }
 0x9b6   :  { %v8215_v41 = vpop.f32.mrf.mxu2 }
 0x9b7   :  { %9375 = vst [vmem:[#allocation48_spill] sm:$0xff] %v8215_v41  ;;  %v9383_v41 = vld [vmem:[#allocation33_spill] sm:$0xff] }
 0x9ba   :  { %4507 = vmatmul.msk.bf16.gmra.mxu3 %vm915_vm0, %v9373_v36  ;;  %v5393_v36 = vld [vmem:[%s8805_s3 + $0x20] sm:$0xff] }
 0x9bb   :  { %4601 = vmatmul.msk.bf16.gmra.mxu2 %vm1145_vm2, %v5393_v36 }
 0x9bd   :  { %v3047_v50 = vpop.f32.mrf.mxu3 }
 0x9be   :  { %v8209_v57 = vadd.f32 %v3148_v37, %v3047_v50  ;;  %v3163_v37 = vpop.f32.mrf.mxu2 }
 0x9c5   :  { %v8211_v7 = vpop.f32.mrf.mxu3 }
 0x9c6   :  { %v8225_v54 = vpop.f32.mrf.mxu2 }
 0x9ca   :  { %4508 = vmatmul.msk.bf16.gmra.mxu3 %vm915_vm0, %v9374_v46  ;;  %v5394_v46 = vld [vmem:[%s8805_s3 + $0x28] sm:$0xff] }
 0x9cb   :  { %4602 = vmatmul.msk.bf16.gmra.mxu2 %vm1145_vm2, %v5394_v46 }
 0x9cd   :  { %v3052_v1 = vpop.f32.mrf.mxu3 }
 0x9ce   :  { %v8221_v26 = vadd.f32 %v3153_v49, %v3052_v1  ;;  %v3168_v14 = vpop.f32.mrf.mxu2  ;;  %v5395_v1 = vld [vmem:[%s8805_s3 + $0x30] sm:$0xff] }
 0x9d5   :  { %v8223_v4 = vpop.f32.mrf.mxu3 }
 0x9d6   :  { %v8235_v49 = vpop.f32.mrf.mxu2 }
 0x9db   :  { %4603 = vmatmul.msk.bf16.gmra.mxu2 %vm1145_vm2, %v5395_v1 }
 0x9dd   :  { %v3057_v50 = vpop.f32.mrf.mxu3 }
 0x9de   :  { %v8231_v28 = vadd.f32 %v3158_v60, %v3057_v50  ;;  %v3173_v33 = vpop.f32.mrf.mxu2  ;;  %v5396_v50 = vld [vmem:[%s8805_s3 + $0x38] sm:$0xff] }
 0x9e0   :  { %9376 = vst [vmem:[#allocation26_spill] sm:$0xff] %v8231_v28 }
 0x9e5   :  { %v8233_v40 = vpop.f32.mrf.mxu3 }
 0x9e6   :  { %9377 = vst [vmem:[#allocation29_spill] sm:$0xff] %v8233_v40  ;;  %v8245_v60 = vpop.f32.mrf.mxu2 }
 0x9e7   :  { %9379 = vst [vmem:[#allocation37_spill] sm:$0xff] %v8245_v60  ;;  %v3206_v60 = vadd.f32 %v3139_v16, %v9383_v41 }
 0x9e9   :  { %5080 = vtanh.f32 %v3206_v60 }
 0x9eb   :  { %4604 = vmatmul.msk.bf16.gmra.mxu2 %vm1145_vm2, %v5396_v50  ;;  %v3198_v50 = vadd.f32 %v8149_v58, %v9384_v62 }
 0x9ed   :  { %v3062_v36 = vpop.f32.mrf.mxu3  ;;  %5082 = vtanh.f32 %v3198_v50 }
 0x9ee   :  { %v8241_v18 = vadd.f32 %v3163_v37, %v3062_v36  ;;  %v3178_v45 = vpop.f32.mrf.mxu2  ;;  %v9381_v36 = vld [vmem:[#allocation16_spill] sm:$0xff] }
 0x9ef   :  { %v5081_v16 = vpop.eup %5080 }
 0x9f0   :  { %9378 = vst [vmem:[#allocation12_spill] sm:$0xff] %v8241_v18  ;;  %v3199_v18 = vadd.f32 %v8151_v20, %v9386_v2  ;;  %v3270_v60 = vadd.f32 1.0, %v5081_v16  ;;  %v3200_v20 = vadd.f32 %v8157_v55, %v6686_v3 }
 0x9f2   :  { %v3294_v50 = vmul.f32 0.5, %v3270_v60  ;;  %v3201_v60 = vadd.f32 %v8159_v42, %v6666_v52 }
 0x9f5   :  { %v8243_v23 = vpop.f32.mrf.mxu3 }
 0x9f6   :  { %v3180_v37 = vpop.f32.mrf.mxu2 }
 0x9fb   :  { %4605 = vmatmul.msk.bf16.gmra.mxu2 %vm1145_vm2, %v9381_v36 }
 0x9fd   :  { %v3067_v46 = vpop.f32.mrf.mxu3 }
 0x9fe   :  { %v8251_v28 = vadd.f32 %v3168_v14, %v3067_v46  ;;  %v3183_v38 = vpop.f32.mrf.mxu2  ;;  %v3141_v14 = vadd.f32 %v8171_v48, %v3039_v8  ;;  %v9385_v46 = vld [vmem:[#allocation40_spill] sm:$0xff]  ;;  %v3208_v8 = vadd.f32 %v8197_v59, %v9143_v24 }
 0xa00   :  { %9380 = vst [vmem:[#allocation43_spill] sm:$0xff] %v8251_v28  ;;  %v3207_v28 = vadd.f32 %v3141_v14, %v9385_v46 }
 0xa02   :  { %5084 = vtanh.f32 %v3207_v28 }
 0xa03   :  { %5086 = vtanh.f32 %v3199_v18  ;;  %v3146_v18 = vadd.f32 %v8183_v0, %v8199_v17 }
 0xa05   :  { %v8253_v35 = vpop.f32.mrf.mxu3 }
 0xa0d   :  { %v3072_v1 = vpop.f32.mrf.mxu3 }
 0xa0e   :  { %v8257_v47 = vadd.f32 %v3173_v33, %v3072_v1  ;;  %v3185_v33 = vpop.f32.mrf.mxu2  ;;  %v9387_v1 = vld [vmem:[#allocation9_spill] sm:$0xff] }
 0xa0f   :  { %4606 = vmatmul.msk.bf16.gmra.mxu2 %vm1145_vm2, %v9387_v1 }
 0xa10   :  { %9382 = vst [vmem:[#allocation46_spill] sm:$0xff] %v8257_v47  ;;  %v5083_v47 = vpop.eup %5082 }
 0xa11   :  { %v3262_v48 = vadd.f32 1.0, %v5083_v47  ;;  %v5085_v1 = vpop.eup %5084 }
 0xa12   :  { %v3271_v59 = vadd.f32 1.0, %v5085_v1 }
 0xa13   :  { %v3286_v28 = vmul.f32 0.5, %v3262_v48 }
 0xa14   :  { %v3295_v48 = vmul.f32 0.5, %v3271_v59 }
 0xa15   :  { %v8260_v40 = vpop.f32.mrf.mxu3 }
 0xa16   :  { %v8275_v46 = vpop.f32.mrf.mxu2  ;;  %v3311_v1 = vmul.f32 %v3295_v48, %v8018_v29 }
 0xa1d   :  { %v3077_v36 = vpop.f32.mrf.mxu3 }
 0xa1e   :  { %v3179_v41 = vadd.f32 %v3178_v45, %v3077_v36  ;;  %v5087_v36 = vpop.eup %5086 }
 0xa1f   :  { %v3263_v16 = vadd.f32 1.0, %v5087_v36 }
 0xa20   :  { %v3222_v58 = vadd.f32 %v3179_v41, %v9142_v9  ;;  %v3310_v41 = vmul.f32 %v3294_v50, %v8000_v10 }
 0xa22   :  { %5088 = vtanh.f32 %v3222_v58 }
 0xa23   :  { %5090 = vtanh.f32 %v3208_v8 }
 0xa24   :  { %5092 = vtanh.f32 %v3200_v20 }
 0xa25   :  { %v3079_v14 = vpop.f32.mrf.mxu3 }
 0xa26   :  { %v3181_v45 = vadd.f32 %v3180_v37, %v3079_v14  ;;  %v3209_v37 = vadd.f32 %v3146_v18, %v6702_v12  ;;  %v8286_v14 = vpop.f32.mrf.mxu2  ;;  %4607 = vmatmul.msk.bf16.gmra.mxu2 %vm1145_vm2, %v8010_v15  ;;  %v3202_v15 = vadd.f32 %v8165_v31, %v6662_v27 }
 0xa28   :  { %v5089_v2 = vpop.eup %5088  ;;  %v3223_v47 = vadd.f32 %v3181_v45, %v6768_v13 }
 0xa29   :  { %v3318_v55 = vmul.f32 %v5089_v2, %v3286_v28  ;;  %v5091_v0 = vpop.eup %5090  ;;  %v3287_v2 = vmul.f32 0.5, %v3263_v16  ;;  %v3210_v28 = vadd.f32 %v8209_v57, %v6664_v34 }
 0xa2a   :  { %5094 = vtanh.f32 %v3223_v47  ;;  %v5093_v17 = vpop.eup %5092  ;;  %v3272_v45 = vadd.f32 1.0, %v5091_v0 }
 0xa2b   :  { %v8281_v58 = vadd.f32 %v3318_v55, %v3310_v41  ;;  %5096 = vtanh.f32 %v3209_v37  ;;  %v3264_v36 = vadd.f32 1.0, %v5093_v17 }
 0xa2c   :  { %5098 = vtanh.f32 %v3201_v60  ;;  %v3151_v60 = vadd.f32 %v8191_v25, %v8211_v7 }
 0xa2d   :  { %v3082_v8 = vpop.f32.mrf.mxu3  ;;  %v3288_v29 = vmul.f32 0.5, %v3264_v36 }
 0xa2e   :  { %v3184_v10 = vadd.f32 %v3183_v38, %v3082_v8  ;;  %v3296_v38 = vmul.f32 0.5, %v3272_v45  ;;  %v8298_v41 = vpop.f32.mrf.mxu2 }
 0xa30   :  { %v5095_v20 = vpop.eup %5094  ;;  %v3224_v50 = vadd.f32 %v3184_v10, %v6741_v21  ;;  %v3312_v48 = vmul.f32 %v3296_v38, %v8028_v30 }
 0xa31   :  { %v3319_v42 = vmul.f32 %v5095_v20, %v3287_v2  ;;  %v5097_v59 = vpop.eup %5096  ;;  %v3203_v2 = vadd.f32 %v8167_v6, %v6644_v39 }
 0xa32   :  { %5100 = vtanh.f32 %v3224_v50  ;;  %v5099_v16 = vpop.eup %5098  ;;  %v3273_v8 = vadd.f32 1.0, %v5097_v59 }
 0xa33   :  { %v8294_v18 = vadd.f32 %v3319_v42, %v3311_v1  ;;  %5102 = vtanh.f32 %v3210_v28  ;;  %v3265_v0 = vadd.f32 1.0, %v5099_v16 }
 0xa34   :  { %5104 = vtanh.f32 %v3202_v15  ;;  %v3297_v20 = vmul.f32 0.5, %v3273_v8  ;;  %v3212_v15 = vadd.f32 %v8221_v26, %v6632_v5  ;;  %v3166_v26 = vadd.f32 %v8225_v54, %v8243_v23  ;;  %v9391_v8 = vld [vmem:[#allocation41_spill] sm:$0xff] }
 0xa35   :  { %9388 = vst [vmem:[#allocation17_spill] sm:$0xff] %v8294_v18  ;;  %v3084_v47 = vpop.f32.mrf.mxu3  ;;  %v3289_v1 = vmul.f32 0.5, %v3265_v0 }
 0xa36   :  { %v3186_v55 = vadd.f32 %v3185_v33, %v3084_v47  ;;  %v3211_v33 = vadd.f32 %v3151_v60, %v6676_v19  ;;  %v8309_v25 = vpop.f32.mrf.mxu2  ;;  %4608 = vmatmul.msk.bf16.gmra.mxu2 %vm1145_vm2, %v8038_v11  ;;  %v3313_v28 = vmul.f32 %v3297_v20, %v8049_v22  ;;  %v3204_v11 = vadd.f32 %v8177_v51, %v6642_v32  ;;  %v9396_v20 = vld [vmem:[#allocation42_spill] sm:$0xff] }
 0xa37   :  { %v3205_v47 = vadd.f32 %v8179_v61, %v6650_v44  ;;  %v3156_v51 = vadd.f32 %v8203_v53, %v8223_v4  ;;  %v9389_v61 = vld [vmem:[#allocation12_spill] sm:$0xff] }
 0xa38   :  { %v5101_v37 = vpop.eup %5100  ;;  %v3225_v57 = vadd.f32 %v3186_v55, %v6720_v63  ;;  %v3171_v55 = vadd.f32 %v8235_v49, %v8253_v35  ;;  %v9390_v35 = vld [vmem:[#allocation21_spill] sm:$0xff]  ;;  %v9397_v53 = vld [vmem:[#allocation28_spill] sm:$0xff] }
 0xa39   :  { %v3320_v31 = vmul.f32 %v5101_v37, %v3288_v29  ;;  %v5103_v17 = vpop.eup %5102  ;;  %v3217_v4 = vadd.f32 %v3166_v26, %v9397_v53 }
 0xa3a   :  { %5106 = vtanh.f32 %v3225_v57  ;;  %v5105_v7 = vpop.eup %5104  ;;  %v3274_v42 = vadd.f32 1.0, %v5103_v17  ;;  %v3216_v57 = vadd.f32 %v9389_v61, %v9203_v56  ;;  %v9395_v17 = vld [vmem:[#allocation48_spill] sm:$0xff] }
 0xa3b   :  { %v8304_v10 = vadd.f32 %v3320_v31, %v3312_v48  ;;  %5108 = vtanh.f32 %v3211_v33  ;;  %v3266_v38 = vadd.f32 1.0, %v5105_v7  ;;  %v9392_v31 = vld [vmem:[#allocation43_spill] sm:$0xff]  ;;  %v9393_v33 = vld [vmem:[#allocation32_spill] sm:$0xff] }
 0xa3c   :  { %5110 = vtanh.f32 %v3203_v2  ;;  %v3298_v59 = vmul.f32 0.5, %v3274_v42  ;;  %v3218_v0 = vadd.f32 %v9392_v31, %v9391_v8 }
 0xa3d   :  { %v3087_v50 = vpop.f32.mrf.mxu3  ;;  %v3290_v60 = vmul.f32 0.5, %v3266_v38 }
 0xa3e   :  { %v3189_v30 = vadd.f32 %v8275_v46, %v3087_v50  ;;  %v3314_v49 = vmul.f32 %v3298_v59, %v9390_v35  ;;  %v3219_v50 = vadd.f32 %v3171_v55, %v9396_v20 }
 0xa40   :  { %v5107_v45 = vpop.eup %5106  ;;  %v3226_v36 = vadd.f32 %v3189_v30, %v6682_v43 }
 0xa41   :  { %v3321_v6 = vmul.f32 %v5107_v45, %v3289_v1  ;;  %v5109_v22 = vpop.eup %5108  ;;  %v9398_v1 = vld [vmem:[#allocation23_spill] sm:$0xff] }
 0xa42   :  { %5112 = vtanh.f32 %v3226_v36  ;;  %v5111_v37 = vpop.eup %5110  ;;  %v3275_v54 = vadd.f32 1.0, %v5109_v22  ;;  %v3213_v45 = vadd.f32 %v3156_v51, %v9398_v1 }
 0xa43   :  { %v8320_v46 = vadd.f32 %v3321_v6, %v3313_v28  ;;  %5114 = vtanh.f32 %v3212_v15  ;;  %v3267_v7 = vadd.f32 1.0, %v5111_v37  ;;  %v9399_v28 = vld [vmem:[#allocation44_spill] sm:$0xff]  ;;  %v9400_v6 = vld [vmem:[#allocation26_spill] sm:$0xff] }
 0xa44   :  { %5116 = vtanh.f32 %v3204_v11  ;;  %v3214_v15 = vadd.f32 %v9400_v6, %v9399_v28  ;;  %v3299_v11 = vmul.f32 0.5, %v3275_v54 }
 0xa45   :  { %v3089_v16 = vpop.f32.mrf.mxu3  ;;  %5118 = vtanh.f32 %v3205_v47  ;;  %v9401_v47 = vld [vmem:[#allocation45_spill] sm:$0xff]  ;;  %v3291_v26 = vmul.f32 0.5, %v3267_v7 }
 0xa46   :  { %v3191_v29 = vadd.f32 %v8286_v14, %v3089_v16  ;;  %v9394_v14 = vld [vmem:[#allocation29_spill] sm:$0xff] }
 0xa47   :  { %v3161_v2 = vadd.f32 %v9395_v17, %v9394_v14  ;;  %v9405_v17 = vld [vmem:[#allocation37_spill] sm:$0xff] }
 0xa48   :  { %v5113_v48 = vpop.eup %5112  ;;  %v3227_v23 = vadd.f32 %v3191_v29, %v9393_v33 }
 0xa49   :  { %v3322_v30 = vmul.f32 %v5113_v48, %v3290_v60  ;;  %v5115_v36 = vpop.eup %5114  ;;  %v3215_v59 = vadd.f32 %v3161_v2, %v9401_v47  ;;  %v9402_v60 = vld [vmem:[#allocation8_spill] sm:$0xff]  ;;  %v3176_v2 = vadd.f32 %v9405_v17, %v8260_v40  ;;  %v9408_v40 = vld [vmem:[#allocation46_spill] sm:$0xff] }
 0xa4a   :  { %5120 = vtanh.f32 %v3227_v23  ;;  %v5117_v38 = vpop.eup %5116  ;;  %v3276_v29 = vadd.f32 1.0, %v5115_v36 }
 0xa4b   :  { %5122 = vtanh.f32 %v3216_v57  ;;  %v8342_v42 = vadd.f32 %v3322_v30, %v3314_v49  ;;  %v5119_v16 = vpop.eup %5118  ;;  %v9403_v57 = vld [vmem:[#allocation24_spill] sm:$0xff] }
 0xa4c   :  { %5124 = vtanh.f32 %v3218_v0  ;;  %v3315_v48 = vmul.f32 %v3299_v11, %v9403_v57  ;;  %v3268_v0 = vadd.f32 1.0, %v5117_v38  ;;  %v3300_v23 = vmul.f32 0.5, %v3276_v29 }
 0xa4d   :  { %5126 = vtanh.f32 %v3219_v50  ;;  %v3092_v55 = vpop.f32.mrf.mxu3 }
 0xa4e   :  { %5128 = vtanh.f32 %v3217_v4  ;;  %v3194_v22 = vadd.f32 %v8298_v41, %v3092_v55  ;;  %v3292_v6 = vmul.f32 0.5, %v3268_v0 }
 0xa4f   :  { %5130 = vtanh.f32 %v3213_v45 }
 0xa50   :  { %v5121_v37 = vpop.eup %5120  ;;  %5132 = vtanh.f32 %v3214_v15  ;;  %v3228_v51 = vadd.f32 %v3194_v22, %v9402_v60  ;;  %v9406_v15 = vld [vmem:[#allocation31_spill] sm:$0xff] }
 0xa51   :  { %v5123_v61 = vpop.eup %5122  ;;  %5134 = vtanh.f32 %v3215_v59  ;;  %v3323_v35 = vmul.f32 %v5121_v37, %v3291_v26  ;;  %v3316_v38 = vmul.f32 %v3300_v23, %v9406_v15  ;;  %v9407_v26 = vld [vmem:[#allocation35_spill] sm:$0xff] }
 0xa52   :  { %v5125_v49 = vpop.eup %5124  ;;  %5136 = vtanh.f32 %v3228_v51  ;;  %v3280_v11 = vadd.f32 1.0, %v5123_v61  ;;  %v3220_v29 = vadd.f32 %v9408_v40, %v9407_v26  ;;  %v9409_v37 = vld [vmem:[#allocation11_spill] sm:$0xff] }
 0xa53   :  { %v5127_v31 = vpop.eup %5126  ;;  %v8350_v54 = vadd.f32 %v3323_v35, %v3315_v48  ;;  %5138 = vtanh.f32 %v8342_v42  ;;  %v3282_v4 = vadd.f32 1.0, %v5125_v49 }
 0xa54   :  { %v5129_v41 = vpop.eup %5128  ;;  %5140 = vtanh.f32 %v8304_v10  ;;  %v3283_v7 = vadd.f32 1.0, %v5127_v31  ;;  %v3304_v17 = vmul.f32 0.5, %v3280_v11 }
 0xa55   :  { %9404 = vst [vmem:[#allocation18_spill] sm:$0xff] %v8350_v54  ;;  %v5131_v14 = vpop.eup %5130  ;;  %v3094_v50 = vpop.f32.mrf.mxu3  ;;  %5142 = vtanh.f32 %v8350_v54  ;;  %v3281_v59 = vadd.f32 1.0, %v5129_v41  ;;  %v3306_v61 = vmul.f32 0.5, %v3282_v4 }
 0xa56   :  { %v5133_v30 = vpop.eup %5132  ;;  %v3196_v45 = vadd.f32 %v8309_v25, %v3094_v50  ;;  %5144 = vtanh.f32 %v8320_v46  ;;  %v3277_v22 = vadd.f32 1.0, %v5131_v14  ;;  %v9410_v25 = vld [vmem:[#allocation30_spill] sm:$0xff]  ;;  %v3307_v23 = vmul.f32 0.5, %v3283_v7 }
 0xa57   :  { %v5135_v36 = vpop.eup %5134  ;;  %5146 = vtanh.f32 %v8281_v58  ;;  %v3278_v48 = vadd.f32 1.0, %v5133_v30  ;;  %v3221_v35 = vadd.f32 %v3176_v2, %v9410_v25  ;;  %v3269_v14 = vadd.f32 1.0, %v5119_v16 }
 0xa58   :  { %v5137_v55 = vpop.eup %5136  ;;  %v3229_v51 = vadd.f32 %v3196_v45, %v9409_v37  ;;  %5148 = vtanh.f32 %v8294_v18  ;;  %v3279_v0 = vadd.f32 1.0, %v5135_v36  ;;  %v3305_v50 = vmul.f32 0.5, %v3281_v59 }
 0xa59   :  { %v5139_v57 = vpop.eup %5138  ;;  %v3324_v49 = vmul.f32 %v5137_v55, %v3292_v6  ;;  %v3301_v37 = vmul.f32 0.5, %v3277_v22  ;;  %v3302_v25 = vmul.f32 0.5, %v3278_v48 }
 0xa5a   :  { %v5141_v31 = vpop.eup %5140  ;;  %5150 = vtanh.f32 %v3229_v51  ;;  %v3346_v40 = vmul.f32 %v5139_v57, %v3306_v61  ;;  %v3303_v36 = vmul.f32 0.5, %v3279_v0  ;;  %v3293_v51 = vmul.f32 0.5, %v3269_v14 }
 0xa5b   :  { %v5143_v41 = vpop.eup %5142  ;;  %v8366_v15 = vadd.f32 %v3324_v49, %v3316_v38  ;;  %5152 = vtanh.f32 %v3220_v29  ;;  %v3344_v2 = vmul.f32 %v5141_v31, %v3304_v17  ;;  %v9412_v38 = vld [vmem:[#allocation25_spill] sm:$0xff] }
 0xa5c   :  { %v5145_v45 = vpop.eup %5144  ;;  %v3347_v30 = vmul.f32 %v5143_v41, %v3307_v23  ;;  %5154 = vtanh.f32 %v3221_v35  ;;  %v3317_v49 = vmul.f32 %v3301_v37, %v9412_v38  ;;  %v9414_v37 = vld [vmem:[#allocation6_spill] sm:$0xff] }
 0xa5d   :  { %9411 = vst [vmem:[#allocation10_spill] sm:$0xff] %v8366_v15  ;;  %v3345_v6 = vmul.f32 %v5145_v45, %v3305_v50  ;;  %v5147_v55 = vpop.eup %5146  ;;  %5156 = vtanh.f32 %v8366_v15  ;;  %v9416_v50 = vld [vmem:[#allocation7_spill] sm:$0xff]  ;;  %v9417_v45 = vld [vmem:[#allocation14_spill] sm:$0xff] }
 0xa5e   :  { %v3357_v4 = vpack.c.bf16 %v3347_v30, %v3346_v40  ;;  %v5149_v7 = vpop.eup %5148  ;;  %v3342_v11 = vmul.f32 %v5147_v55, %v3302_v25  ;;  %v9418_v40 = vld [vmem:[#allocation39_spill] sm:$0xff]  ;;  %v8400_v55 = vld [vmem:[%s8805_s3 + $0x60] sm:$0xff] }
 0xa5f   :  { %v3356_v26 = vpack.c.bf16 %v3345_v6, %v3344_v2  ;;  %v3343_v59 = vmul.f32 %v5149_v7, %v3303_v36  ;;  %v8393_v30 = vld [vmem:[%s8806_s4 + $0x30] sm:$0xff]  ;;  %v3469_v2 = vpop.f32.mrf.mxu1  ;;  %9421 = vst [vmem:[#allocation27_spill] sm:$0xff] %v8400_v55  ;;  %v8407_v36 = vld [vmem:[%s8806_s4 + $0x38] sm:$0xff] }
 0xa60   :  { %v5151_v16 = vpop.eup %5150  ;;  %9420 = vst [vmem:[#allocation22_spill] sm:$0xff] %v8393_v30 }
 0xa61   :  { %v3325_v18 = vmul.f32 %v5151_v16, %v3293_v51  ;;  %v5153_v29 = vpop.eup %5152  ;;  %v3355_v57 = vpack.c.bf16 %v3343_v59, %v3342_v11  ;;  %9422 = vst [vmem:[#allocation15_spill] sm:$0xff] %v8407_v36  ;;  %v8414_v51 = vld [vmem:[%s8805_s3 + $0x68] sm:$0xff]  ;;  %v8423_v59 = vld [vmem:[%s8806_s4 + $0x40] sm:$0xff] }
 0xa62   :  { %v5155_v61 = vpop.eup %5154  ;;  %v3284_v48 = vadd.f32 1.0, %v5153_v29  ;;  %9423 = vst [vmem:[#allocation47_spill] sm:$0xff] %v8414_v51 }
 0xa63   :  { %v8370_v22 = vadd.f32 %v3325_v18, %v3317_v49  ;;  %v3285_v35 = vadd.f32 1.0, %v5155_v61  ;;  %v5157_v31 = vpop.eup %5156  ;;  %v9415_v18 = vld [vmem:[#allocation20_spill] sm:$0xff]  ;;  %9424 = vst [vmem:[#allocation13_spill] sm:$0xff] %v8423_v59 }
 0xa64   :  { %v3308_v0 = vmul.f32 0.5, %v3284_v48  ;;  %v8432_v61 = vld [vmem:[%s8805_s3 + $0x70] sm:$0xff] }
 0xa65   :  { %9413 = vst [vmem:[#allocation19_spill] sm:$0xff] %v8370_v22  ;;  %5158 = vtanh.f32 %v8370_v22  ;;  %v3309_v23 = vmul.f32 0.5, %v3285_v35 }
 0xa66   :  { %v3348_v25 = vmul.f32 %v5157_v31, %v3308_v0  ;;  %9425 = vst [vmem:[#allocation16_spill] sm:$0xff] %v8432_v61  ;;  %v8441_v31 = vld [vmem:[%s8806_s4 + $0x48] sm:$0xff] }
 0xa67   :  { %v3471_v6 = vpop.f32.mrf.mxu1  ;;  %4569 = vmatmul.msk.bf16.gmra.mxu1 %vm1145_vm2, %v8400_v55  ;;  %9426 = vst [vmem:[#allocation36_spill] sm:$0xff] %v8441_v31 }
 0xa6b   :  { %v5159_v41 = vpop.eup %5158 }
 0xa6c   :  { %v3349_v14 = vmul.f32 %v5159_v41, %v3309_v23 }
 0xa6e   :  { %v3358_v17 = vpack.c.bf16 %v3349_v14, %v3348_v25  ;;  %v8450_v14 = vld [vmem:[%s8805_s3 + $0x78] sm:$0xff] }
 0xa6f   :  { %9427 = vst [vmem:[#allocation9_spill] sm:$0xff] %v8450_v14 }
 0xa70   :  { %3363 = vmatpush.bf16.msrb.mxu0 %v3358_v17 }
 0xa74   :  { %3364 = vmatpush.bf16.msrb.mxu0 %v3357_v4  ;;  %v3474_v4 = vpop.f32.mrf.mxu1 }
 0xa78   :  { %3365 = vmatpush.bf16.msrb.mxu0 %v3356_v26  ;;  %v8386_v26 = vld [vmem:[%s8806_s4 + $0x28] sm:$0xff] }
 0xa79   :  { %9419 = vst [vmem:[#allocation34_spill] sm:$0xff] %v8386_v26 }
 0xa7c   :  { %3366 = vmatpush.bf16.msrb.mxu0 %v3355_v57  ;;  %v3476_v7 = vpop.f32.mrf.mxu1  ;;  %4570 = vmatmul.msk.bf16.gmra.mxu1 %vm1145_vm2, %v8414_v51 }
 0xa7f   :  { %4533 = vmatmul.msk.bf16.vlgmr.msrb.gmra.mxu0 %vm915_vm0, %v9414_v37 }
 0xa84   :  { %v3479_v38 = vpop.f32.mrf.mxu1 }
 0xa8c   :  { %v3481_v57 = vpop.f32.mrf.mxu1  ;;  %4571 = vmatmul.msk.bf16.gmra.mxu1 %vm1145_vm2, %v8432_v61 }
 0xa8f   :  { %4534 = vmatmul.msk.bf16.gmra.mxu0 %vm915_vm0, %v9415_v18  ;;  %v8459_v18 = vld [vmem:[%s8806_s4 + $0x50] sm:$0xff] }
 0xa90   :  { %9428 = vst [vmem:[#allocation12_spill] sm:$0xff] %v8459_v18 }
 0xa94   :  { %v3484_v0 = vpop.f32.mrf.mxu1 }
 0xa9c   :  { %v3486_v25 = vpop.f32.mrf.mxu1  ;;  %4572 = vmatmul.msk.bf16.gmra.mxu1 %vm1145_vm2, %v8450_v14 }
 0xa9f   :  { %4535 = vmatmul.msk.bf16.gmra.mxu0 %vm915_vm0, %v9416_v50 }
 0xaa4   :  { %v3489_v50 = vpop.f32.mrf.mxu1 }
 0xaaf   :  { %4536 = vmatmul.msk.bf16.gmra.mxu0 %vm915_vm0, %v9417_v45 }
 0xabf   :  { %4537 = vmatmul.msk.bf16.gmra.mxu0 %vm915_vm0, %v9418_v40 }
 0xacf   :  { %4538 = vmatmul.msk.bf16.gmra.mxu0 %vm915_vm0, %v8386_v26 }
 0xadf   :  { %4539 = vmatmul.msk.bf16.gmra.mxu0 %vm915_vm0, %v8393_v30 }
 0xaef   :  { %4540 = vmatmul.msk.bf16.gmra.mxu0 %vm915_vm0, %v8407_v36 }
 0xafc   :  { %v3368_v16 = vpop.f32.mrf.mxu0 }
 0xafd   :  { %v8418_v11 = vadd.f32 %v3469_v2, %v3368_v16 }
 0xaff   :  { %4541 = vmatmul.msk.bf16.gmra.mxu0 %vm915_vm0, %v8423_v59 }
 0xb04   :  { %v3370_v49 = vpop.f32.mrf.mxu0 }
 0xb05   :  { %v8427_v29 = vadd.f32 %v3471_v6, %v3370_v49  ;;  %v8465_v6 = vpop.f32.mrf.mxu1 }
 0xb0c   :  { %v3373_v48 = vpop.f32.mrf.mxu0 }
 0xb0d   :  { %v8436_v35 = vadd.f32 %v3474_v4, %v3373_v48 }
 0xb0f   :  { %4542 = vmatmul.msk.bf16.gmra.mxu0 %vm915_vm0, %v8441_v31 }
 0xb14   :  { %v3375_v23 = vpop.f32.mrf.mxu0 }
 0xb15   :  { %v8445_v41 = vadd.f32 %v3476_v7, %v3375_v23  ;;  %v8472_v7 = vld [vmem:[%s8806_s4 + $0x58] sm:$0xff] }
 0xb16   :  { %9429 = vst [vmem:[#allocation21_spill] sm:$0xff] %v8472_v7 }
 0xb1c   :  { %v3378_v17 = vpop.f32.mrf.mxu0 }
 0xb1d   :  { %v8454_v37 = vadd.f32 %v3479_v38, %v3378_v17  ;;  %v3494_v38 = vpop.f32.mrf.mxu1 }
 0xb1f   :  { %4543 = vmatmul.msk.bf16.gmra.mxu0 %vm915_vm0, %v8459_v18 }
 0xb24   :  { %v3380_v45 = vpop.f32.mrf.mxu0 }
 0xb25   :  { %v8463_v40 = vadd.f32 %v3481_v57, %v3380_v45  ;;  %v8478_v57 = vpop.f32.mrf.mxu1 }
 0xb2c   :  { %v3383_v2 = vpop.f32.mrf.mxu0 }
 0xb2d   :  { %v8467_v4 = vadd.f32 %v3484_v0, %v3383_v2  ;;  %v8483_v0 = vld [vmem:[%s8806_s4 + $0x60] sm:$0xff]  ;;  %v3499_v45 = vpop.f32.mrf.mxu1 }
 0xb2e   :  { %9430 = vst [vmem:[#allocation41_spill] sm:$0xff] %v8483_v0 }
 0xb2f   :  { %4544 = vmatmul.msk.bf16.gmra.mxu0 %vm915_vm0, %v8472_v7 }
 0xb34   :  { %v3385_v16 = vpop.f32.mrf.mxu0 }
 0xb35   :  { %v8476_v49 = vadd.f32 %v3486_v25, %v3385_v16  ;;  %v3501_v7 = vpop.f32.mrf.mxu1  ;;  %v8492_v25 = vld [vmem:[%s8806_s4 + $0x68] sm:$0xff] }
 0xb36   :  { %9431 = vst [vmem:[#allocation43_spill] sm:$0xff] %v8492_v25 }
 0xb3c   :  { %v3388_v48 = vpop.f32.mrf.mxu0 }
 0xb3d   :  { %v3490_v23 = vadd.f32 %v3489_v50, %v3388_v48  ;;  %v3504_v16 = vpop.f32.mrf.mxu1 }
 0xb3f   :  { %4545 = vmatmul.msk.bf16.gmra.mxu0 %vm915_vm0, %v8483_v0  ;;  %v8501_v0 = vld [vmem:[%s8806_s4 + $0x70] sm:$0xff] }
 0xb40   :  { %9432 = vst [vmem:[#allocation29_spill] sm:$0xff] %v8501_v0 }
 0xb44   :  { %v8487_v17 = vpop.f32.mrf.mxu0 }
 0xb45   :  { %v3506_v18 = vpop.f32.mrf.mxu1 }
 0xb4c   :  { %v3393_v2 = vpop.f32.mrf.mxu0 }
 0xb4d   :  { %v3495_v14 = vadd.f32 %v3494_v38, %v3393_v2  ;;  %v3509_v2 = vpop.f32.mrf.mxu1 }
 0xb4f   :  { %4546 = vmatmul.msk.bf16.gmra.mxu0 %vm915_vm0, %v8492_v25 }
 0xb54   :  { %v3395_v50 = vpop.f32.mrf.mxu0 }
 0xb55   :  { %v3511_v25 = vpop.f32.mrf.mxu1 }
 0xb5c   :  { %v3398_v48 = vpop.f32.mrf.mxu0 }
 0xb5d   :  { %v8496_v61 = vadd.f32 %v3499_v45, %v3398_v48  ;;  %v8512_v45 = vld [vmem:[%s8806_s4 + $0x78] sm:$0xff]  ;;  %v3514_v55 = vpop.f32.mrf.mxu1 }
 0xb5e   :  { %9433 = vst [vmem:[#allocation48_spill] sm:$0xff] %v8512_v45 }
 0xb5f   :  { %4547 = vmatmul.msk.bf16.gmra.mxu0 %vm915_vm0, %v8501_v0 }
 0xb64   :  { %v3400_v38 = vpop.f32.mrf.mxu0 }
 0xb65   :  { %v8505_v31 = vadd.f32 %v3501_v7, %v3400_v38  ;;  %v3516_v30 = vpop.f32.mrf.mxu1 }
 0xb6c   :  { %v3403_v51 = vpop.f32.mrf.mxu0 }
 0xb6d   :  { %v8507_v59 = vadd.f32 %v3504_v16, %v3403_v51  ;;  %v3519_v51 = vpop.f32.mrf.mxu1 }
 0xb6f   :  { %4548 = vmatmul.msk.bf16.gmra.mxu0 %vm915_vm0, %v8512_v45 }
 0xb74   :  { %v3405_v48 = vpop.f32.mrf.mxu0 }
 0xb75   :  { %v8516_v36 = vadd.f32 %v3506_v18, %v3405_v48  ;;  %v3521_v15 = vpop.f32.mrf.mxu1 }
 0xb77   :  { %9434 = vst [vmem:[#allocation28_spill] sm:$0xff] %v8516_v36 }
 0xb7c   :  { %v3408_v0 = vpop.f32.mrf.mxu0 }
 0xb7d   :  { %v8518_v7 = vadd.f32 %v3509_v2, %v3408_v0  ;;  %v3524_v45 = vpop.f32.mrf.mxu1 }
 0xb7f   :  { %9435 = vst [vmem:[#allocation26_spill] sm:$0xff] %v8518_v7 }
 0xb84   :  { %v3410_v38 = vpop.f32.mrf.mxu0 }
 0xb85   :  { %v8520_v26 = vadd.f32 %v3511_v25, %v3410_v38  ;;  %v3526_v48 = vpop.f32.mrf.mxu1  ;;  %v9438_v38 = vld [vmem:[#allocation33_spill] sm:$0xff] }
 0xb87   :  { %9436 = vst [vmem:[#allocation24_spill] sm:$0xff] %v8520_v26  ;;  %v3557_v26 = vadd.f32 %v3490_v23, %v9438_v38  ;;  %v3559_v38 = vadd.f32 %v3495_v14, %v9143_v24  ;;  %v3552_v14 = vadd.f32 %v8445_v41, %v6666_v52 }
 0xb89   :  { %5160 = vtanh.f32 %v3557_v26  ;;  %v3551_v26 = vadd.f32 %v8436_v35, %v6686_v3 }
 0xb8c   :  { %v3413_v16 = vpop.f32.mrf.mxu0 }
 0xb8d   :  { %v8522_v22 = vadd.f32 %v3514_v55, %v3413_v16  ;;  %v3529_v25 = vpop.f32.mrf.mxu1  ;;  %v3549_v16 = vadd.f32 %v8418_v11, %v9384_v62 }
 0xb8f   :  { %5162 = vtanh.f32 %v3549_v16  ;;  %v3497_v16 = vadd.f32 %v8478_v57, %v3395_v50  ;;  %v3553_v50 = vadd.f32 %v8454_v37, %v6662_v27 }
 0xb94   :  { %v3415_v54 = vpop.f32.mrf.mxu0 }
 0xb95   :  { %v8524_v60 = vadd.f32 %v3516_v30, %v3415_v54  ;;  %v8537_v30 = vpop.f32.mrf.mxu1 }
 0xb9c   :  { %v3418_v47 = vpop.f32.mrf.mxu0 }
 0xb9d   :  { %v8526_v28 = vadd.f32 %v3519_v51, %v3418_v47  ;;  %v5161_v51 = vpop.eup %5160  ;;  %v3534_v23 = vpop.f32.mrf.mxu1 }
 0xba4   :  { %v3420_v18 = vpop.f32.mrf.mxu0 }
 0xba5   :  { %v8528_v36 = vadd.f32 %v3521_v15, %v3420_v18  ;;  %v5163_v18 = vpop.eup %5162 }
 0xbac   :  { %v3423_v0 = vpop.f32.mrf.mxu0 }
 0xbad   :  { %v8530_v2 = vadd.f32 %v3524_v45, %v3423_v0  ;;  %v3621_v0 = vadd.f32 1.0, %v5161_v51 }
 0xbaf   :  { %9437 = vst [vmem:[#allocation37_spill] sm:$0xff] %v8530_v2  ;;  %v3613_v2 = vadd.f32 1.0, %v5163_v18  ;;  %v3645_v7 = vmul.f32 0.5, %v3621_v0 }
 0xbb4   :  { %v3425_v55 = vpop.f32.mrf.mxu0 }
 0xbb5   :  { %v8535_v54 = vadd.f32 %v3526_v48, %v3425_v55  ;;  %v3637_v48 = vmul.f32 0.5, %v3613_v2 }
 0xbbc   :  { %v3428_v47 = vpop.f32.mrf.mxu0 }
 0xbbd   :  { %v3530_v15 = vadd.f32 %v3529_v25, %v3428_v47  ;;  %v3661_v25 = vmul.f32 %v3645_v7, %v8281_v58  ;;  %v3561_v7 = vadd.f32 %v8496_v61, %v6664_v34  ;;  %v9439_v61 = vld [vmem:[#allocation38_spill] sm:$0xff] }
 0xbbf   :  { %v3573_v45 = vadd.f32 %v3530_v15, %v9142_v9  ;;  %v3560_v15 = vadd.f32 %v3497_v16, %v6702_v12 }
 0xbc1   :  { %5164 = vtanh.f32 %v3573_v45  ;;  %v3536_v45 = vpop.f32.mrf.mxu1 }
 0xbc2   :  { %5166 = vtanh.f32 %v3559_v38 }
 0xbc3   :  { %5168 = vtanh.f32 %v3551_v26 }
 0xbc4   :  { %v3430_v11 = vpop.f32.mrf.mxu0  ;;  %5170 = vtanh.f32 %v3560_v15 }
 0xbc5   :  { %5172 = vtanh.f32 %v3552_v14  ;;  %v3492_v14 = vadd.f32 %v8465_v6, %v8487_v17 }
 0xbc7   :  { %v5165_v55 = vpop.eup %5164 }
 0xbc8   :  { %v3669_v47 = vmul.f32 %v5165_v55, %v3637_v48  ;;  %v5167_v0 = vpop.eup %5166 }
 0xbc9   :  { %v5169_v2 = vpop.eup %5168  ;;  %v3623_v57 = vadd.f32 1.0, %v5167_v0 }
 0xbca   :  { %v8545_v51 = vadd.f32 %v3669_v47, %v3661_v25  ;;  %v3615_v58 = vadd.f32 1.0, %v5169_v2  ;;  %v5171_v48 = vpop.eup %5170  ;;  %v3539_v25 = vpop.f32.mrf.mxu1  ;;  %v3554_v2 = vadd.f32 %v8463_v40, %v6644_v39  ;;  %v3532_v40 = vadd.f32 %v8537_v30, %v3430_v11 }
 0xbcb   :  { %v3647_v26 = vmul.f32 0.5, %v3623_v57  ;;  %v5173_v16 = vpop.eup %5172  ;;  %v3562_v57 = vadd.f32 %v8505_v31, %v6676_v19 }
 0xbcc   :  { %v3433_v18 = vpop.f32.mrf.mxu0  ;;  %v3574_v30 = vadd.f32 %v3532_v40, %v6768_v13 }
 0xbcd   :  { %v3535_v35 = vadd.f32 %v3534_v23, %v3433_v18  ;;  %v3639_v23 = vmul.f32 0.5, %v3615_v58  ;;  %v3663_v37 = vmul.f32 %v3647_v26, %v8304_v10  ;;  %v3624_v18 = vadd.f32 1.0, %v5171_v48 }
 0xbce   :  { %v3555_v48 = vadd.f32 %v8467_v4, %v6642_v32 }
 0xbcf   :  { %v3575_v38 = vadd.f32 %v3535_v35, %v6741_v21  ;;  %v3550_v35 = vadd.f32 %v8427_v29, %v9439_v61  ;;  %v3648_v17 = vmul.f32 0.5, %v3624_v18 }
 0xbd1   :  { %5174 = vtanh.f32 %v3575_v38  ;;  %v3664_v31 = vmul.f32 %v3648_v17, %v8320_v46 }
 0xbd2   :  { %5176 = vtanh.f32 %v3553_v50  ;;  %v9440_v50 = vld [vmem:[#allocation40_spill] sm:$0xff] }
 0xbd3   :  { %5178 = vtanh.f32 %v3561_v7  ;;  %v3558_v6 = vadd.f32 %v3492_v14, %v9440_v50  ;;  %v3556_v14 = vadd.f32 %v8476_v49, %v6650_v44  ;;  %v3569_v49 = vadd.f32 %v8526_v28, %v9391_v8  ;;  %v9441_v28 = vld [vmem:[#allocation28_spill] sm:$0xff] }
 0xbd4   :  { %v3435_v41 = vpop.f32.mrf.mxu0  ;;  %v3564_v40 = vadd.f32 %v9441_v28, %v9398_v1 }
 0xbd5   :  { %v3537_v55 = vadd.f32 %v3536_v45, %v3435_v41  ;;  %v3616_v45 = vadd.f32 1.0, %v5173_v16 }
 0xbd7   :  { %v5175_v47 = vpop.eup %5174  ;;  %v3576_v15 = vadd.f32 %v3537_v55, %v6720_v63  ;;  %v3640_v41 = vmul.f32 0.5, %v3616_v45 }
 0xbd8   :  { %v3671_v0 = vmul.f32 %v5175_v47, %v3639_v23  ;;  %v5177_v58 = vpop.eup %5176  ;;  %v3541_v47 = vpop.f32.mrf.mxu1 }
 0xbd9   :  { %5180 = vtanh.f32 %v3576_v15  ;;  %v5179_v7 = vpop.eup %5178  ;;  %v3617_v15 = vadd.f32 1.0, %v5177_v58 }
 0xbda   :  { %v8563_v38 = vadd.f32 %v3671_v0, %v3663_v37  ;;  %5182 = vtanh.f32 %v3550_v35  ;;  %v3625_v16 = vadd.f32 1.0, %v5179_v7 }
 0xbdb   :  { %5184 = vtanh.f32 %v3554_v2  ;;  %v3641_v2 = vmul.f32 0.5, %v3617_v15  ;;  %v9445_v15 = vld [vmem:[#allocation45_spill] sm:$0xff] }
 0xbdc   :  { %v3438_v10 = vpop.f32.mrf.mxu0  ;;  %5186 = vtanh.f32 %v3562_v57  ;;  %v3649_v18 = vmul.f32 0.5, %v3625_v16  ;;  %v9443_v16 = vld [vmem:[#allocation44_spill] sm:$0xff] }
 0xbdd   :  { %v3540_v26 = vadd.f32 %v3539_v25, %v3438_v10  ;;  %5188 = vtanh.f32 %v3558_v6  ;;  %v3563_v25 = vadd.f32 %v8507_v59, %v6632_v5  ;;  %v3567_v59 = vadd.f32 %v8522_v22, %v9203_v56 }
 0xbde   :  { %v3665_v6 = vmul.f32 %v3649_v18, %v8342_v42  ;;  %v3570_v10 = vadd.f32 %v8528_v36, %v9396_v20 }
 0xbdf   :  { %v5181_v29 = vpop.eup %5180  ;;  %v3577_v55 = vadd.f32 %v3540_v26, %v6682_v43 }
 0xbe0   :  { %v3672_v23 = vmul.f32 %v5181_v29, %v3640_v41  ;;  %v5183_v37 = vpop.eup %5182  ;;  %v3568_v29 = vadd.f32 %v8524_v60, %v9397_v53  ;;  %v3544_v42 = vpop.f32.mrf.mxu1 }
 0xbe1   :  { %5190 = vtanh.f32 %v3577_v55  ;;  %v5185_v11 = vpop.eup %5184  ;;  %v3614_v26 = vadd.f32 1.0, %v5183_v37 }
 0xbe2   :  { %v8577_v4 = vadd.f32 %v3672_v23, %v3664_v31  ;;  %5192 = vtanh.f32 %v3555_v48  ;;  %v5187_v0 = vpop.eup %5186  ;;  %v3618_v41 = vadd.f32 1.0, %v5185_v11  ;;  %v9444_v23 = vld [vmem:[#allocation26_spill] sm:$0xff] }
 0xbe3   :  { %5194 = vtanh.f32 %v3563_v25  ;;  %v5189_v45 = vpop.eup %5188  ;;  %v3626_v17 = vadd.f32 1.0, %v5187_v0  ;;  %v3565_v36 = vadd.f32 %v9444_v23, %v9443_v16  ;;  %v3638_v11 = vmul.f32 0.5, %v3614_v26 }
 0xbe4   :  { %v3440_v46 = vpop.f32.mrf.mxu0  ;;  %5196 = vtanh.f32 %v3556_v14  ;;  %v3622_v48 = vadd.f32 1.0, %v5189_v45  ;;  %v9446_v14 = vld [vmem:[#allocation24_spill] sm:$0xff] }
 0xbe5   :  { %v3542_v35 = vadd.f32 %v3541_v47, %v3440_v46  ;;  %5198 = vtanh.f32 %v3574_v30  ;;  %v3650_v25 = vmul.f32 0.5, %v3626_v17  ;;  %v3566_v60 = vadd.f32 %v9446_v14, %v9445_v15 }
 0xbe6   :  { %v3642_v46 = vmul.f32 0.5, %v3618_v41  ;;  %v3646_v0 = vmul.f32 0.5, %v3622_v48 }
 0xbe7   :  { %v5191_v57 = vpop.eup %5190  ;;  %v3578_v58 = vadd.f32 %v3542_v35, %v9393_v33 }
 0xbe8   :  { %v3673_v7 = vmul.f32 %v5191_v57, %v3641_v2  ;;  %v5193_v22 = vpop.eup %5192  ;;  %v9447_v2 = vld [vmem:[#allocation8_spill] sm:$0xff]  ;;  %v3546_v23 = vpop.f32.mrf.mxu1 }
 0xbe9   :  { %5200 = vtanh.f32 %v3578_v58  ;;  %v5195_v31 = vpop.eup %5194 }
 0xbea   :  { %5202 = vtanh.f32 %v3567_v59  ;;  %v8592_v55 = vadd.f32 %v3673_v7, %v3665_v6  ;;  %v5197_v47 = vpop.eup %5196  ;;  %v3627_v35 = vadd.f32 1.0, %v5195_v31  ;;  %v3619_v7 = vadd.f32 1.0, %v5193_v22 }
 0xbeb   :  { %5204 = vtanh.f32 %v3569_v49  ;;  %v5199_v30 = vpop.eup %5198  ;;  %v9448_v49 = vld [vmem:[#allocation18_spill] sm:$0xff] }
 0xbec   :  { %9442 = vst [vmem:[#allocation31_spill] sm:$0xff] %v8592_v55  ;;  %5206 = vtanh.f32 %v3570_v10  ;;  %v3443_v37 = vpop.f32.mrf.mxu0  ;;  %v3666_v58 = vmul.f32 %v3650_v25, %v9448_v49  ;;  %v3670_v6 = vmul.f32 %v5199_v30, %v3638_v11  ;;  %v3651_v41 = vmul.f32 0.5, %v3627_v35  ;;  %v9451_v11 = vld [vmem:[#allocation10_spill] sm:$0xff]  ;;  %v9453_v49 = vld [vmem:[#allocation37_spill] sm:$0xff] }
 0xbed   :  { %5208 = vtanh.f32 %v3568_v29  ;;  %v3545_v18 = vadd.f32 %v3544_v42, %v3443_v37  ;;  %v9449_v29 = vld [vmem:[#allocation17_spill] sm:$0xff]  ;;  %v3643_v30 = vmul.f32 0.5, %v3619_v7 }
 0xbee   :  { %5210 = vtanh.f32 %v3564_v40  ;;  %v3662_v28 = vmul.f32 %v3646_v0, %v9449_v29  ;;  %v9455_v29 = vld [vmem:[#allocation30_spill] sm:$0xff] }
 0xbef   :  { %v5201_v45 = vpop.eup %5200  ;;  %5212 = vtanh.f32 %v3565_v36  ;;  %v3579_v59 = vadd.f32 %v3545_v18, %v9447_v2  ;;  %v3667_v18 = vmul.f32 %v3651_v41, %v9451_v11 }
 0xbf0   :  { %v5203_v57 = vpop.eup %5202  ;;  %5214 = vtanh.f32 %v3566_v60  ;;  %v3674_v17 = vmul.f32 %v5201_v45, %v3642_v46  ;;  %v8605_v31 = vadd.f32 %v3670_v6, %v3662_v28  ;;  %v9454_v6 = vld [vmem:[#allocation11_spill] sm:$0xff]  ;;  %v3572_v28 = vadd.f32 %v8535_v54, %v9455_v29 }
 0xbf1   :  { %v5205_v10 = vpop.eup %5204  ;;  %5216 = vtanh.f32 %v3579_v59  ;;  %v3631_v46 = vadd.f32 1.0, %v5203_v57  ;;  %v9452_v59 = vld [vmem:[#allocation35_spill] sm:$0xff] }
 0xbf2   :  { %v5207_v26 = vpop.eup %5206  ;;  %v8601_v48 = vadd.f32 %v3674_v17, %v3666_v58  ;;  %5218 = vtanh.f32 %v8592_v55  ;;  %v3633_v25 = vadd.f32 1.0, %v5205_v10  ;;  %v3571_v58 = vadd.f32 %v9453_v49, %v9452_v59 }
 0xbf3   :  { %v5209_v40 = vpop.eup %5208  ;;  %5220 = vtanh.f32 %v8563_v38  ;;  %v3634_v14 = vadd.f32 1.0, %v5207_v26  ;;  %v3655_v11 = vmul.f32 0.5, %v3631_v46 }
 0xbf4   :  { %9450 = vst [vmem:[#allocation46_spill] sm:$0xff] %v8601_v48  ;;  %v5211_v42 = vpop.eup %5210  ;;  %v3445_v36 = vpop.f32.mrf.mxu0  ;;  %5222 = vtanh.f32 %v8601_v48  ;;  %v3632_v0 = vadd.f32 1.0, %v5209_v40  ;;  %v3657_v41 = vmul.f32 0.5, %v3633_v25 }
 0xbf5   :  { %v5213_v22 = vpop.eup %5212  ;;  %v3547_v60 = vadd.f32 %v3546_v23, %v3445_v36  ;;  %5224 = vtanh.f32 %v8577_v4  ;;  %v3628_v45 = vadd.f32 1.0, %v5211_v42  ;;  %v3658_v40 = vmul.f32 0.5, %v3634_v14 }
 0xbf6   :  { %v5215_v37 = vpop.eup %5214  ;;  %5226 = vtanh.f32 %v8545_v51  ;;  %v3629_v26 = vadd.f32 1.0, %v5213_v22  ;;  %v3620_v36 = vadd.f32 1.0, %v5197_v47  ;;  %v3656_v49 = vmul.f32 0.5, %v3632_v0 }
 0xbf7   :  { %v5217_v35 = vpop.eup %5216  ;;  %v3580_v17 = vadd.f32 %v3547_v60, %v9454_v6  ;;  %5228 = vtanh.f32 %v8605_v31  ;;  %v3630_v57 = vadd.f32 1.0, %v5215_v37  ;;  %v3652_v59 = vmul.f32 0.5, %v3628_v45 }
 0xbf8   :  { %v5219_v10 = vpop.eup %5218  ;;  %v3675_v23 = vmul.f32 %v5217_v35, %v3643_v30  ;;  %v3653_v29 = vmul.f32 0.5, %v3629_v26 }
 0xbf9   :  { %v5221_v7 = vpop.eup %5220  ;;  %5230 = vtanh.f32 %v3580_v17  ;;  %v3697_v22 = vmul.f32 %v5219_v10, %v3657_v41  ;;  %v3654_v37 = vmul.f32 0.5, %v3630_v57  ;;  %v3644_v17 = vmul.f32 0.5, %v3620_v36  ;;  %v5414_v36 = vld [vmem:[%s8806_s4 + $0x10] sm:$0xff] }
 0xbfa   :  { %v5223_v42 = vpop.eup %5222  ;;  %v8617_v60 = vadd.f32 %v3675_v23, %v3667_v18  ;;  %5232 = vtanh.f32 %v3571_v58  ;;  %v3695_v54 = vmul.f32 %v5221_v7, %v3655_v11  ;;  %v9457_v18 = vld [vmem:[#allocation19_spill] sm:$0xff]  ;;  %v5416_v11 = vld [vmem:[%s8806_s4 + $0x20] sm:$0xff] }
 0xbfb   :  { %v5225_v6 = vpop.eup %5224  ;;  %v3698_v2 = vmul.f32 %v5223_v42, %v3658_v40  ;;  %5234 = vtanh.f32 %v3572_v28  ;;  %v3668_v23 = vmul.f32 %v3652_v59, %v9457_v18  ;;  %v5413_v59 = vld [vmem:[%s8806_s4 + $0x8] sm:$0xff] }
 0xbfc   :  { %9456 = vst [vmem:[#allocation25_spill] sm:$0xff] %v8617_v60  ;;  %v3696_v30 = vmul.f32 %v5225_v6, %v3656_v49  ;;  %v5227_v35 = vpop.eup %5226  ;;  %5236 = vtanh.f32 %v8617_v60  ;;  %v9459_v49 = vld [vmem:[#allocation34_spill] sm:$0xff] }
 0xbfd   :  { %v3708_v25 = vpack.c.bf16 %v3698_v2, %v3697_v22  ;;  %v5229_v14 = vpop.eup %5228  ;;  %v3693_v46 = vmul.f32 %v5227_v35, %v3653_v29  ;;  %v9460_v22 = vld [vmem:[#allocation22_spill] sm:$0xff] }
 0xbfe   :  { %v3707_v48 = vpack.c.bf16 %v3696_v30, %v3695_v54  ;;  %v3694_v0 = vmul.f32 %v5229_v14, %v3654_v37  ;;  %v3820_v54 = vpop.f32.mrf.mxu2  ;;  %v9461_v30 = vld [vmem:[#allocation15_spill] sm:$0xff]  ;;  %v9463_v14 = vld [vmem:[#allocation13_spill] sm:$0xff] }
 0xbff   :  { %v5231_v47 = vpop.eup %5230  ;;  %v9462_v37 = vld [vmem:[#allocation27_spill] sm:$0xff] }
 0xc00   :  { %v3676_v1 = vmul.f32 %v5231_v47, %v3644_v17  ;;  %v5233_v58 = vpop.eup %5232  ;;  %v3706_v10 = vpack.c.bf16 %v3694_v0, %v3693_v46  ;;  %v9464_v47 = vld [vmem:[#allocation47_spill] sm:$0xff] }
 0xc01   :  { %v5235_v41 = vpop.eup %5234  ;;  %v3635_v6 = vadd.f32 1.0, %v5233_v58 }
 0xc02   :  { %v8621_v45 = vadd.f32 %v3676_v1, %v3668_v23  ;;  %v3636_v2 = vadd.f32 1.0, %v5235_v41  ;;  %v5237_v26 = vpop.eup %5236  ;;  %v5412_v1 = vld [vmem:[%s8806_s4] sm:$0xff] }
 0xc03   :  { %v3659_v28 = vmul.f32 0.5, %v3635_v6  ;;  %v9466_v6 = vld [vmem:[#allocation16_spill] sm:$0xff] }
 0xc04   :  { %9458 = vst [vmem:[#allocation6_spill] sm:$0xff] %v8621_v45  ;;  %5238 = vtanh.f32 %v8621_v45  ;;  %v3660_v7 = vmul.f32 0.5, %v3636_v2 }
 0xc05   :  { %v3699_v29 = vmul.f32 %v5237_v26, %v3659_v28 }
 0xc06   :  { %v3822_v35 = vpop.f32.mrf.mxu2  ;;  %4609 = vmatmul.msk.bf16.gmra.mxu2 %vm1145_vm2, %v9462_v37 }
 0xc0a   :  { %v5239_v57 = vpop.eup %5238 }
 0xc0b   :  { %v3700_v40 = vmul.f32 %v5239_v57, %v3660_v7 }
 0xc0d   :  { %v3709_v42 = vpack.c.bf16 %v3700_v40, %v3699_v29  ;;  %v9467_v29 = vld [vmem:[#allocation12_spill] sm:$0xff] }
 0xc0f   :  { %3714 = vmatpush.bf16.msra.mxu3 %v3709_v42  ;;  %v9468_v42 = vld [vmem:[#allocation9_spill] sm:$0xff] }
 0xc13   :  { %3715 = vmatpush.bf16.msra.mxu3 %v3708_v25  ;;  %v3825_v25 = vpop.f32.mrf.mxu2 }
 0xc17   :  { %3716 = vmatpush.bf16.msra.mxu3 %v3707_v48  ;;  %v5415_v48 = vld [vmem:[%s8806_s4 + $0x18] sm:$0xff] }
 0xc1b   :  { %3717 = vmatpush.bf16.msra.mxu3 %v3706_v10  ;;  %v3827_v17 = vpop.f32.mrf.mxu2  ;;  %4610 = vmatmul.msk.bf16.gmra.mxu2 %vm1145_vm2, %v9464_v47  ;;  %v9465_v10 = vld [vmem:[#allocation36_spill] sm:$0xff] }
 0xc1e   :  { %4573 = vmatmul.msk.bf16.vlgmr.msra.gmra.mxu3 %vm915_vm0, %v5412_v1 }
 0xc23   :  { %v3830_v18 = vpop.f32.mrf.mxu2 }
 0xc2b   :  { %v3832_v41 = vpop.f32.mrf.mxu2  ;;  %4611 = vmatmul.msk.bf16.gmra.mxu2 %vm1145_vm2, %v9466_v6 }
 0xc2e   :  { %4574 = vmatmul.msk.bf16.gmra.mxu3 %vm915_vm0, %v5413_v59 }
 0xc33   :  { %v3835_v28 = vpop.f32.mrf.mxu2 }
 0xc3b   :  { %v3837_v40 = vpop.f32.mrf.mxu2  ;;  %4612 = vmatmul.msk.bf16.gmra.mxu2 %vm1145_vm2, %v9468_v42 }
 0xc3e   :  { %4575 = vmatmul.msk.bf16.gmra.mxu3 %vm915_vm0, %v5414_v36 }
 0xc43   :  { %v3840_v36 = vpop.f32.mrf.mxu2 }
 0xc4e   :  { %4576 = vmatmul.msk.bf16.gmra.mxu3 %vm915_vm0, %v5415_v48 }
 0xc5e   :  { %4577 = vmatmul.msk.bf16.gmra.mxu3 %vm915_vm0, %v5416_v11 }
 0xc6e   :  { %4578 = vmatmul.msk.bf16.gmra.mxu3 %vm915_vm0, %v9459_v49  ;;  %v9469_v49 = vld [vmem:[#allocation21_spill] sm:$0xff] }
 0xc7e   :  { %4579 = vmatmul.msk.bf16.gmra.mxu3 %vm915_vm0, %v9460_v22 }
 0xc8e   :  { %4580 = vmatmul.msk.bf16.gmra.mxu3 %vm915_vm0, %v9461_v30 }
 0xc9e   :  { %4581 = vmatmul.msk.bf16.gmra.mxu3 %vm915_vm0, %v9463_v14  ;;  %v9470_v14 = vld [vmem:[#allocation41_spill] sm:$0xff] }
 0xca1   :  { %v3719_v46 = vpop.f32.mrf.mxu3 }
 0xca2   :  { %v8656_v0 = vadd.f32 %v3820_v54, %v3719_v46  ;;  %v3842_v54 = vpop.f32.mrf.mxu2 }
 0xca9   :  { %v3721_v23 = vpop.f32.mrf.mxu3 }
 0xcaa   :  { %v8658_v58 = vadd.f32 %v3822_v35, %v3721_v23  ;;  %v3845_v37 = vpop.f32.mrf.mxu2 }
 0xcae   :  { %4582 = vmatmul.msk.bf16.gmra.mxu3 %vm915_vm0, %v9465_v10 }
 0xcb1   :  { %v3724_v2 = vpop.f32.mrf.mxu3 }
 0xcb2   :  { %v8664_v26 = vadd.f32 %v3825_v25, %v3724_v2  ;;  %v3847_v47 = vpop.f32.mrf.mxu2 }
 0xcb9   :  { %v3726_v7 = vpop.f32.mrf.mxu3 }
 0xcba   :  { %v8666_v57 = vadd.f32 %v3827_v17, %v3726_v7  ;;  %v3850_v23 = vpop.f32.mrf.mxu2 }
 0xcbe   :  { %4583 = vmatmul.msk.bf16.gmra.mxu3 %vm915_vm0, %v9467_v29 }
 0xcc1   :  { %v3729_v1 = vpop.f32.mrf.mxu3 }
 0xcc2   :  { %v8672_v59 = vadd.f32 %v3830_v18, %v3729_v1  ;;  %v3852_v2 = vpop.f32.mrf.mxu2 }
 0xcc9   :  { %v3731_v48 = vpop.f32.mrf.mxu3 }
 0xcca   :  { %v8674_v11 = vadd.f32 %v3832_v41, %v3731_v48  ;;  %v9471_v41 = vld [vmem:[#allocation43_spill] sm:$0xff]  ;;  %v3855_v29 = vpop.f32.mrf.mxu2 }
 0xcce   :  { %4584 = vmatmul.msk.bf16.gmra.mxu3 %vm915_vm0, %v9469_v49 }
 0xcd1   :  { %v3734_v22 = vpop.f32.mrf.mxu3 }
 0xcd2   :  { %v8678_v30 = vadd.f32 %v3835_v28, %v3734_v22  ;;  %v3857_v48 = vpop.f32.mrf.mxu2 }
 0xcd9   :  { %v3736_v35 = vpop.f32.mrf.mxu3 }
 0xcda   :  { %v8680_v25 = vadd.f32 %v3837_v40, %v3736_v35  ;;  %v9472_v40 = vld [vmem:[#allocation29_spill] sm:$0xff]  ;;  %v3860_v22 = vpop.f32.mrf.mxu2  ;;  %v9473_v35 = vld [vmem:[#allocation48_spill] sm:$0xff] }
 0xcde   :  { %4585 = vmatmul.msk.bf16.gmra.mxu3 %vm915_vm0, %v9470_v14 }
 0xce1   :  { %v3739_v17 = vpop.f32.mrf.mxu3 }
 0xce2   :  { %v3841_v46 = vadd.f32 %v3840_v36, %v3739_v17 }
 0xce9   :  { %v3741_v18 = vpop.f32.mrf.mxu3 }
 0xcea   :  { %v3843_v10 = vadd.f32 %v3842_v54, %v3741_v18 }
 0xcee   :  { %4586 = vmatmul.msk.bf16.gmra.mxu3 %vm915_vm0, %v9471_v41 }
 0xcf1   :  { %v3744_v6 = vpop.f32.mrf.mxu3 }
 0xcf2   :  { %v3846_v28 = vadd.f32 %v3845_v37, %v3744_v6  ;;  %v3862_v37 = vpop.f32.mrf.mxu2 }
 0xcf9   :  { %v3746_v7 = vpop.f32.mrf.mxu3 }
 0xcfa   :  { %v8686_v42 = vadd.f32 %v3847_v47, %v3746_v7  ;;  %v3865_v18 = vpop.f32.mrf.mxu2 }
 0xcfe   :  { %4587 = vmatmul.msk.bf16.gmra.mxu3 %vm915_vm0, %v9472_v40 }
 0xd01   :  { %v3749_v1 = vpop.f32.mrf.mxu3 }
 0xd02   :  { %v8690_v49 = vadd.f32 %v3850_v23, %v3749_v1  ;;  %v3867_v7 = vpop.f32.mrf.mxu2 }
 0xd09   :  { %v3751_v36 = vpop.f32.mrf.mxu3 }
 0xd0a   :  { %v8692_v54 = vadd.f32 %v3852_v2, %v3751_v36  ;;  %v3870_v2 = vpop.f32.mrf.mxu2 }
 0xd0e   :  { %4588 = vmatmul.msk.bf16.gmra.mxu3 %vm915_vm0, %v9473_v35 }
 0xd11   :  { %v3754_v14 = vpop.f32.mrf.mxu3 }
 0xd12   :  { %v8696_v17 = vadd.f32 %v3855_v29, %v3754_v14  ;;  %v3872_v35 = vpop.f32.mrf.mxu2 }
 0xd19   :  { %v3756_v47 = vpop.f32.mrf.mxu3 }
 0xd1a   :  { %v8698_v41 = vadd.f32 %v3857_v48, %v3756_v47  ;;  %v3875_v29 = vpop.f32.mrf.mxu2 }
 0xd1c   :  { %9474 = vst [vmem:[#allocation20_spill] sm:$0xff] %v8698_v41 }
 0xd21   :  { %v3759_v6 = vpop.f32.mrf.mxu3 }
 0xd22   :  { %v8700_v40 = vadd.f32 %v3860_v22, %v3759_v6  ;;  %v3877_v47 = vpop.f32.mrf.mxu2 }
 0xd29   :  { %v3761_v23 = vpop.f32.mrf.mxu3 }
 0xd2a   :  { %v8702_v1 = vadd.f32 %v3862_v37, %v3761_v23  ;;  %v3880_v37 = vpop.f32.mrf.mxu2  ;;  %v9475_v23 = vld [vmem:[#allocation33_spill] sm:$0xff] }
 0xd2b   :  { %v3908_v20 = vadd.f32 %v3841_v46, %v9475_v23 }
 0xd2d   :  { %5240 = vtanh.f32 %v3908_v20  ;;  %v3910_v20 = vadd.f32 %v3846_v28, %v9143_v24 }
 0xd31   :  { %v3764_v36 = vpop.f32.mrf.mxu3 }
 0xd32   :  { %v8704_v45 = vadd.f32 %v3865_v18, %v3764_v36  ;;  %v3900_v36 = vadd.f32 %v8656_v0, %v9384_v62 }
 0xd34   :  { %5242 = vtanh.f32 %v3900_v36 }
 0xd39   :  { %v3766_v60 = vpop.f32.mrf.mxu3 }
 0xd3a   :  { %v8706_v55 = vadd.f32 %v3867_v7, %v3766_v60  ;;  %v3882_v7 = vpop.f32.mrf.mxu2 }
 0xd41   :  { %v3769_v14 = vpop.f32.mrf.mxu3 }
 0xd42   :  { %v8708_v33 = vadd.f32 %v3870_v2, %v3769_v14  ;;  %v3909_v2 = vadd.f32 %v3843_v10, %v9440_v50  ;;  %v3885_v0 = vpop.f32.mrf.mxu2  ;;  %v3902_v50 = vadd.f32 %v8664_v26, %v6686_v3  ;;  %v3911_v3 = vadd.f32 %v8686_v42, %v6702_v12 }
 0xd43   :  { %v3903_v26 = vadd.f32 %v8666_v57, %v6666_v52  ;;  %v3904_v52 = vadd.f32 %v8672_v59, %v6662_v27  ;;  %v3912_v42 = vadd.f32 %v8690_v49, %v6664_v34  ;;  %v3905_v27 = vadd.f32 %v8674_v11, %v6644_v39 }
 0xd44   :  { %5244 = vtanh.f32 %v3909_v2  ;;  %v3906_v34 = vadd.f32 %v8678_v30, %v6642_v32  ;;  %v3918_v32 = vadd.f32 %v8704_v45, %v9203_v56 }
 0xd49   :  { %v3771_v48 = vpop.f32.mrf.mxu3 }
 0xd4a   :  { %v8710_v41 = vadd.f32 %v3872_v35, %v3771_v48  ;;  %v3901_v35 = vadd.f32 %v8658_v58, %v9439_v61 }
 0xd4c   :  { %5246 = vtanh.f32 %v3901_v35 }
 0xd51   :  { %v3774_v22 = vpop.f32.mrf.mxu3 }
 0xd52   :  { %v8712_v6 = vadd.f32 %v3875_v29, %v3774_v22  ;;  %v5241_v29 = vpop.eup %5240 }
 0xd53   :  { %v5243_v22 = vpop.eup %5242  ;;  %v3972_v23 = vadd.f32 1.0, %v5241_v29 }
 0xd54   :  { %v3964_v62 = vadd.f32 1.0, %v5243_v22  ;;  %v5245_v61 = vpop.eup %5244 }
 0xd55   :  { %v3996_v10 = vmul.f32 0.5, %v3972_v23  ;;  %v3973_v35 = vadd.f32 1.0, %v5245_v61 }
 0xd57   :  { %v4012_v2 = vmul.f32 %v3996_v10, %v8545_v51 }
 0xd59   :  { %v3776_v18 = vpop.f32.mrf.mxu3 }
 0xd5a   :  { %v8717_v60 = vadd.f32 %v3877_v47, %v3776_v18  ;;  %v5247_v18 = vpop.eup %5246 }
 0xd5b   :  { %v3965_v24 = vadd.f32 1.0, %v5247_v18 }
 0xd5d   :  { %v3989_v23 = vmul.f32 0.5, %v3965_v24  ;;  %v3907_v24 = vadd.f32 %v8680_v25, %v6650_v44 }
 0xd61   :  { %v3779_v14 = vpop.f32.mrf.mxu3 }
 0xd62   :  { %v3881_v48 = vadd.f32 %v3880_v37, %v3779_v14  ;;  %v3988_v37 = vmul.f32 0.5, %v3964_v62 }
 0xd64   :  { %v3924_v46 = vadd.f32 %v3881_v48, %v9142_v9  ;;  %v3887_v48 = vpop.f32.mrf.mxu2 }
 0xd66   :  { %5248 = vtanh.f32 %v3924_v46 }
 0xd67   :  { %5250 = vtanh.f32 %v3910_v20 }
 0xd68   :  { %5252 = vtanh.f32 %v3902_v50 }
 0xd69   :  { %v3781_v47 = vpop.f32.mrf.mxu3 }
 0xd6a   :  { %v3883_v58 = vadd.f32 %v3882_v7, %v3781_v47  ;;  %v3997_v7 = vmul.f32 0.5, %v3973_v35  ;;  %v3913_v35 = vadd.f32 %v8692_v54, %v6676_v19  ;;  %v3919_v19 = vadd.f32 %v8706_v55, %v9397_v53 }
 0xd6c   :  { %v5249_v36 = vpop.eup %5248  ;;  %v3925_v9 = vadd.f32 %v3883_v58, %v6768_v13  ;;  %v4013_v20 = vmul.f32 %v3997_v7, %v8605_v31  ;;  %v3890_v31 = vpop.f32.mrf.mxu2  ;;  %v3920_v7 = vadd.f32 %v8708_v33, %v9391_v8 }
 0xd6d   :  { %v4020_v14 = vmul.f32 %v5249_v36, %v3988_v37  ;;  %v5251_v22 = vpop.eup %5250 }
 0xd6e   :  { %5254 = vtanh.f32 %v3925_v9  ;;  %v5253_v46 = vpop.eup %5252  ;;  %v3974_v50 = vadd.f32 1.0, %v5251_v22  ;;  %v3914_v22 = vadd.f32 %v8696_v17, %v6632_v5 }
 0xd6f   :  { %v8728_v28 = vadd.f32 %v4020_v14, %v4012_v2  ;;  %5256 = vtanh.f32 %v3911_v3  ;;  %v3966_v12 = vadd.f32 1.0, %v5253_v46 }
 0xd70   :  { %5258 = vtanh.f32 %v3903_v26 }
 0xd71   :  { %v3784_v29 = vpop.f32.mrf.mxu3  ;;  %v3990_v18 = vmul.f32 0.5, %v3966_v12 }
 0xd72   :  { %v3886_v13 = vadd.f32 %v3885_v0, %v3784_v29  ;;  %v3998_v0 = vmul.f32 0.5, %v3974_v50 }
 0xd74   :  { %v5255_v51 = vpop.eup %5254  ;;  %v3926_v62 = vadd.f32 %v3886_v13, %v6741_v21  ;;  %v4014_v59 = vmul.f32 %v3998_v0, %v8563_v38  ;;  %v3916_v13 = vadd.f32 %v8700_v40, %v9443_v16  ;;  %v9476_v16 = vld [vmem:[#allocation42_spill] sm:$0xff] }
 0xd75   :  { %v4021_v10 = vmul.f32 %v5255_v51, %v3989_v23  ;;  %v5257_v61 = vpop.eup %5256  ;;  %v3921_v40 = vadd.f32 %v8710_v41, %v9476_v16 }
 0xd76   :  { %5260 = vtanh.f32 %v3926_v62  ;;  %v5259_v21 = vpop.eup %5258  ;;  %v3975_v9 = vadd.f32 1.0, %v5257_v61  ;;  %v9477_v62 = vld [vmem:[#allocation32_spill] sm:$0xff] }
 0xd77   :  { %v8738_v57 = vadd.f32 %v4021_v10, %v4013_v20  ;;  %5262 = vtanh.f32 %v3904_v52  ;;  %v3967_v49 = vadd.f32 1.0, %v5259_v21  ;;  %v9479_v21 = vld [vmem:[#allocation23_spill] sm:$0xff] }
 0xd78   :  { %5264 = vtanh.f32 %v3912_v42  ;;  %v3999_v3 = vmul.f32 0.5, %v3975_v9 }
 0xd79   :  { %v3786_v47 = vpop.f32.mrf.mxu3  ;;  %v3991_v26 = vmul.f32 0.5, %v3967_v49 }
 0xd7a   :  { %v3888_v58 = vadd.f32 %v3887_v48, %v3786_v47  ;;  %v4015_v44 = vmul.f32 %v3999_v3, %v8577_v4  ;;  %v3892_v48 = vpop.f32.mrf.mxu2  ;;  %v3917_v4 = vadd.f32 %v8702_v1, %v9445_v15  ;;  %v9478_v1 = vld [vmem:[#allocation31_spill] sm:$0xff] }
 0xd7c   :  { %v5261_v37 = vpop.eup %5260  ;;  %v3927_v36 = vadd.f32 %v3888_v58, %v6720_v63 }
 0xd7d   :  { %v4022_v2 = vmul.f32 %v5261_v37, %v3990_v18  ;;  %v5263_v63 = vpop.eup %5262  ;;  %v9480_v18 = vld [vmem:[#allocation20_spill] sm:$0xff] }
 0xd7e   :  { %5266 = vtanh.f32 %v3927_v36  ;;  %v5265_v11 = vpop.eup %5264  ;;  %v3968_v45 = vadd.f32 1.0, %v5263_v63  ;;  %v9482_v63 = vld [vmem:[#allocation35_spill] sm:$0xff] }
 0xd7f   :  { %v4030_v14 = vadd.f32 %v4022_v2, %v4014_v59  ;;  %5268 = vtanh.f32 %v3905_v27  ;;  %v3976_v25 = vadd.f32 1.0, %v5265_v11  ;;  %v3922_v3 = vadd.f32 %v8712_v6, %v9482_v63 }
 0xd80   :  { %5270 = vtanh.f32 %v3906_v34  ;;  %v3992_v17 = vmul.f32 0.5, %v3968_v45 }
 0xd81   :  { %v3789_v39 = vpop.f32.mrf.mxu3  ;;  %5272 = vtanh.f32 %v3913_v35  ;;  %v4000_v8 = vmul.f32 0.5, %v3976_v25 }
 0xd82   :  { %v3891_v38 = vadd.f32 %v3890_v31, %v3789_v39  ;;  %5274 = vtanh.f32 %v3907_v24  ;;  %v3895_v47 = vpop.f32.mrf.mxu2  ;;  %v3915_v31 = vadd.f32 %v9480_v18, %v9479_v21  ;;  %v9483_v39 = vld [vmem:[#allocation8_spill] sm:$0xff] }
 0xd83   :  { %v4016_v50 = vmul.f32 %v4000_v8, %v9478_v1 }
 0xd84   :  { %v5267_v30 = vpop.eup %5266  ;;  %v3928_v54 = vadd.f32 %v3891_v38, %v6682_v43 }
 0xd85   :  { %v4023_v29 = vmul.f32 %v5267_v30, %v3991_v26  ;;  %v5269_v56 = vpop.eup %5268 }
 0xd86   :  { %5276 = vtanh.f32 %v3928_v54  ;;  %v5271_v43 = vpop.eup %5270  ;;  %v3969_v42 = vadd.f32 1.0, %v5269_v56 }
 0xd87   :  { %5278 = vtanh.f32 %v3918_v32  ;;  %v4031_v53 = vadd.f32 %v4023_v29, %v4015_v44  ;;  %v5273_v55 = vpop.eup %5272 }
 0xd88   :  { %5280 = vtanh.f32 %v3919_v19  ;;  %v8766_v46 = vpop.eup %5274  ;;  %v3977_v51 = vadd.f32 1.0, %v5273_v55  ;;  %v3993_v49 = vmul.f32 0.5, %v3969_v42 }
 0xd89   :  { %5282 = vtanh.f32 %v3920_v7  ;;  %v3791_v33 = vpop.f32.mrf.mxu3  ;;  %v3970_v7 = vadd.f32 1.0, %v5271_v43  ;;  %v9484_v43 = vld [vmem:[#allocation30_spill] sm:$0xff] }
 0xd8a   :  { %5284 = vtanh.f32 %v3914_v22  ;;  %v3893_v5 = vadd.f32 %v3892_v48, %v3791_v33  ;;  %v4001_v58 = vmul.f32 0.5, %v3977_v51 }
 0xd8b   :  { %5286 = vtanh.f32 %v3916_v13  ;;  %v3994_v51 = vmul.f32 0.5, %v3970_v7 }
 0xd8c   :  { %v5277_v23 = vpop.eup %5276  ;;  %5288 = vtanh.f32 %v3917_v4  ;;  %v3929_v20 = vadd.f32 %v3893_v5, %v9477_v62  ;;  %v3897_v4 = vpop.f32.mrf.mxu2  ;;  %v9485_v62 = vld [vmem:[#allocation11_spill] sm:$0xff] }
 0xd8d   :  { %v5279_v15 = vpop.eup %5278  ;;  %5290 = vtanh.f32 %v4030_v14  ;;  %v4024_v10 = vmul.f32 %v5277_v23, %v3992_v17  ;;  %v9481_v14 = vld [vmem:[#allocation46_spill] sm:$0xff] }
 0xd8e   :  { %v5281_v12 = vpop.eup %5280  ;;  %5292 = vtanh.f32 %v3929_v20  ;;  %v3982_v37 = vadd.f32 1.0, %v5279_v15  ;;  %v4017_v24 = vmul.f32 %v4001_v58, %v9481_v14  ;;  %v3971_v58 = vadd.f32 1.0, %v8766_v46 }
 0xd8f   :  { %v5283_v52 = vpop.eup %5282  ;;  %5294 = vtanh.f32 %v4031_v53  ;;  %v4032_v0 = vadd.f32 %v4024_v10, %v4016_v50  ;;  %v3983_v59 = vadd.f32 1.0, %v5281_v12  ;;  %v9486_v50 = vld [vmem:[#allocation25_spill] sm:$0xff] }
 0xd90   :  { %v5285_v61 = vpop.eup %5284  ;;  %5296 = vtanh.f32 %v3921_v40  ;;  %v3984_v9 = vadd.f32 1.0, %v5283_v52  ;;  %v4006_v54 = vmul.f32 0.5, %v3982_v37  ;;  %v3923_v40 = vadd.f32 %v8717_v60, %v9484_v43 }
 0xd91   :  { %v5287_v41 = vpop.eup %5286  ;;  %5298 = vtanh.f32 %v4032_v0  ;;  %v3794_v36 = vpop.f32.mrf.mxu3  ;;  %v3978_v26 = vadd.f32 1.0, %v5285_v61  ;;  %v4007_v44 = vmul.f32 0.5, %v3983_v59  ;;  %v3995_v37 = vmul.f32 0.5, %v3971_v58 }
 0xd92   :  { %v5289_v27 = vpop.eup %5288  ;;  %5300 = vtanh.f32 %v8728_v28  ;;  %v3896_v2 = vadd.f32 %v3895_v47, %v3794_v36  ;;  %v3980_v32 = vadd.f32 1.0, %v5287_v41  ;;  %v4008_v25 = vmul.f32 0.5, %v3984_v9 }
 0xd93   :  { %v5291_v34 = vpop.eup %5290  ;;  %5302 = vtanh.f32 %v8738_v57  ;;  %v3981_v30 = vadd.f32 1.0, %v5289_v27  ;;  %v4002_v13 = vmul.f32 0.5, %v3978_v26  ;;  %v9487_v27 = vld [vmem:[#allocation6_spill] sm:$0xff] }
 0xd94   :  { %v5293_v35 = vpop.eup %5292  ;;  %5304 = vtanh.f32 %v3915_v31  ;;  %v3930_v11 = vadd.f32 %v3896_v2, %v9483_v39  ;;  %v4046_v56 = vmul.f32 %v5291_v34, %v4006_v54  ;;  %v4004_v53 = vmul.f32 0.5, %v3980_v32 }
 0xd95   :  { %v5295_v38 = vpop.eup %5294  ;;  %v4025_v19 = vmul.f32 %v5293_v35, %v3993_v49  ;;  %v4005_v33 = vmul.f32 0.5, %v3981_v30  ;;  %v4018_v10 = vmul.f32 %v4002_v13, %v9486_v50  ;;  %v4077_v30 = vpop.permute.xlu0 %4076 }
 0xd96   :  { %v5297_v28 = vpop.eup %5296  ;;  %5306 = vtanh.f32 %v3930_v11  ;;  %v4047_v6 = vmul.f32 %v5295_v38, %v4007_v44  ;;  %v4672_v11 = vld [vmem:[%s8808_s6] sm:$0xff]  ;;  %v4673_v38 = vld [vmem:[%s8808_s6 + $0x8] sm:$0xff] }
 0xd97   :  { %v5299_v57 = vpop.eup %5298  ;;  %v4033_v29 = vadd.f32 %v4025_v19, %v4017_v24  ;;  %5308 = vtanh.f32 %v3922_v3  ;;  %v3985_v5 = vadd.f32 1.0, %v5297_v28  ;;  %v4082_v28 = vpop.permute.xlu1 %4081 }
 0xd98   :  { %v5301_v48 = vpop.eup %5300  ;;  %v4048_v22 = vmul.f32 %v5299_v57, %v4008_v25  ;;  %v4057_v23 = vpack.c.bf16 %v4047_v6, %v4046_v56 }
 0xd99   :  { %v5303_v45 = vpop.eup %5302  ;;  %5310 = vtanh.f32 %v4033_v29  ;;  %v3796_v55 = vpop.f32.mrf.mxu3  ;;  %v4044_v15 = vmul.f32 %v5301_v48, %v4004_v53  ;;  %v4009_v0 = vmul.f32 0.5, %v3985_v5 }
 0xd9a   :  { %v5305_v8 = vpop.eup %5304  ;;  %v3898_v17 = vadd.f32 %v3897_v4, %v3796_v55  ;;  %v4045_v1 = vmul.f32 %v5303_v45, %v4005_v33  ;;  %v4067_v29 = vpop.permute.xlu2 %4066  ;;  %v4123_v4 = vld [vmem:[%s8810_s8] sm:$0x3] }
 0xd9b   :  { %v3979_v12 = vadd.f32 1.0, %v5305_v8 }
 0xd9c   :  { %v5307_v16 = vpop.eup %5306  ;;  %v3931_v20 = vadd.f32 %v3898_v17, %v9485_v62  ;;  %v4056_v47 = vpack.c.bf16 %v4045_v1, %v4044_v15 }
 0xd9d   :  { %v4026_v52 = vmul.f32 %v5307_v16, %v3994_v51  ;;  %v5309_v42 = vpop.eup %5308  ;;  %v4003_v31 = vmul.f32 0.5, %v3979_v12  ;;  %v4072_v44 = vpop.permute.xlu0 %4071 }
 0xd9e   :  { %5312 = vtanh.f32 %v3931_v20  ;;  %v3986_v60 = vadd.f32 1.0, %v5309_v42 }
 0xd9f   :  { %v5311_v61 = vpop.eup %5310  ;;  %v4034_v21 = vadd.f32 %v4026_v52, %v4018_v10  ;;  %5314 = vtanh.f32 %v3923_v40  ;;  %v4019_v59 = vmul.f32 %v4003_v31, %v9487_v27  ;;  %v4130_v55 = vpop.permute.xlu1 %4129 }
 0xda0   :  { %v4049_v18 = vmul.f32 %v5311_v61, %v4009_v0  ;;  %v4010_v34 = vmul.f32 0.5, %v3986_v60 }
 0xda1   :  { %5316 = vtanh.f32 %v4034_v21 }
 0xda2   :  { %v4058_v41 = vpack.c.bf16 %v4049_v18, %v4048_v22 }
 0xda4   :  { %v5313_v36 = vpop.eup %5312 }
 0xda5   :  { %v4027_v9 = vmul.f32 %v5313_v36, %v3995_v37  ;;  %v5315_v2 = vpop.eup %5314 }
 0xda6   :  { %v3987_v24 = vadd.f32 1.0, %v5315_v2 }
 0xda7   :  { %v5317_v49 = vpop.eup %5316  ;;  %v4035_v35 = vadd.f32 %v4027_v9, %v4019_v59 }
 0xda8   :  { %v4050_v14 = vmul.f32 %v5317_v49, %v4010_v34  ;;  %v4011_v46 = vmul.f32 0.5, %v3987_v24 }
 0xda9   :  { %5318 = vtanh.f32 %v4035_v35 }
 0xdaf   :  { %v5319_v63 = vpop.eup %5318 }
 0xdb0   :  { %v4051_v3 = vmul.f32 %v5319_v63, %v4011_v46 }
 0xdb2   :  { %v4059_v39 = vpack.c.bf16 %v4051_v3, %v4050_v14 }
 0xdb4   :  { %4104 = vmatpush.bf16.msra.mxu0 %v4059_v39 }
 0xdb8   :  { %4105 = vmatpush.bf16.msra.mxu0 %v4058_v41 }
 0xdbc   :  { %4106 = vmatpush.bf16.msra.mxu0 %v4057_v23 }
 0xdc0   :  { %4107 = vmatpush.bf16.msra.mxu0 %v4056_v47 }
 0xdc3   :  { %4621 = vmatmul.msk.bf16.vlgmr.msra.gmra.mxu0 %vm915_vm0, %v4672_v11 }
 0xdd3   :  { %4622 = vmatmul.msk.bf16.gmra.mxu0 %vm915_vm0, %v4673_v38 }
 0xe40   :  { %v4109_v26 = vpop.f32.mrf.mxu0 }
 0xe41   :  { %v4110_v48 = vadd.f32 %v4109_v26, %v4067_v29 }
 0xe43   :  { %v4119_v13 = vmax.f32 %v4110_v48, 0.0 }
 0xe48   :  { %v4111_v32 = vpop.f32.mrf.mxu0 }
 0xe49   :  { %v4112_v57 = vadd.f32 %v4111_v32, %v4072_v44 }
 0xe4b   :  { %v4120_v6 = vmax.f32 %v4112_v57, 0.0 }
 0xe4d   :  { %v4124_v53 = vpack.c.bf16 %v4120_v6, %v4119_v13 }
 0xe50   :  { %v4114_v19 = vpop.f32.mrf.mxu0 }
 0xe51   :  { %v4115_v54 = vadd.f32 %v4114_v19, %v4077_v30 }
 0xe53   :  { %v4121_v22 = vmax.f32 %v4115_v54, 0.0 }
 0xe58   :  { %v4116_v25 = vpop.f32.mrf.mxu0 }
 0xe59   :  { %v4117_v7 = vadd.f32 %v4116_v25, %v4082_v28 }
 0xe5b   :  { %v4122_v56 = vmax.f32 %v4117_v7, 0.0 }
 0xe5d   :  { %v4125_v45 = vpack.c.bf16 %v4122_v56, %v4121_v22 }
 0xe5f   :  { %4141 = vmatpush.bf16.msra.mxu1 %v4125_v45 }
 0xe63   :  { %4142 = vmatpush.bf16.msra.mxu1 %v4124_v53 }
 0xe66   :  { %4623 = vmatmul.msk.bf16.vlgmr.msra.gmra.mxu1 %vm1145_vm2, %v4123_v4 }
 0xee3   :  { %v4144_v8 = vpop.f32.mrf.mxu1 }
 0xee4   :  { %v4145_v33 = vadd.f32 %v4144_v8, %v4130_v55 }
 0xee6   :  { %4148 = vst.msk [vmem:[#allocation3] sm:$0xf] %vm702_vm1, %v4145_v33 }
 0xee7   :  { %4159 = dma.vmem_to_hbm [thread:$0]  %s4155_s16, 64, %s4157_s18, [#allocation4]  }
 0xeeb   :  { %v4146_v5 = vpop.f32.mrf.mxu1 }
 0xeec   :  { %5441 = dma.done.wait [#allocation4], 64  }
 0xeed   :  { %5442 = vsyncadd [#allocation4], 4294967232 }
 0xeee   :  { %4164 = vsyncpa [#allocation4], 1 }

</bundles_post_ra>
